<compile_context>
chip_gen: v6e
topology: v6e:2x2x1
jax: 0.10.0
libtpu: 0.0.40
codegen_flags: <defaults>
</compile_context>

<pallas_src>
import functools

import jax
import jax.numpy as jnp
from jax import lax
from jax.experimental import pallas as pl
from jax.experimental.pallas import tpu as pltpu

BN_EPS = 1e-5
MM_TM_CAP = 256
MM_TN_CAP = 256
MM_TK_CAP = 512


def _round_up(x, m):
    return ((x + m - 1) // m) * m


def _pick_lane_tile(dim, cap):
    """Lane-dim tile: multiple of 128 that divides round_up(dim, 128)."""
    d = _round_up(dim, 128)
    t = min(cap, d)
    while d % t:
        t -= 128
    return t, d


def _pick_row_tile(dim, cap):
    """Sublane-dim tile: multiple of 8."""
    d = _round_up(dim, 8)
    if d <= cap:
        return d, d
    d = _round_up(dim, cap)
    return cap, d


# ----------------------------------------------------------------------------
# Pallas kernels
# ----------------------------------------------------------------------------
def _mm_affine_kernel(a_ref, b_ref, s_ref, c_ref, o_ref, acc_ref, *, relu):
    """Tiled bf16 matmul, f32 accumulation, fused per-column affine (+ReLU)."""
    @pl.when(pl.program_id(2) == 0)
    def _():
        acc_ref[...] = jnp.zeros_like(acc_ref)

    acc_ref[...] += jnp.dot(a_ref[...], b_ref[...],
                            preferred_element_type=jnp.float32)

    @pl.when(pl.program_id(2) == pl.num_programs(2) - 1)
    def _():
        y = acc_ref[...] * s_ref[...] + c_ref[...]
        if relu:
            y = jnp.maximum(y, 0.0)
        o_ref[...] = y


def _mm_affine_res_kernel(a_ref, b_ref, s_ref, c_ref, r_ref, o_ref, acc_ref,
                          *, relu):
    """Same as above with a fused residual add in the epilogue."""
    @pl.when(pl.program_id(2) == 0)
    def _():
        acc_ref[...] = jnp.zeros_like(acc_ref)

    acc_ref[...] += jnp.dot(a_ref[...], b_ref[...],
                            preferred_element_type=jnp.float32)

    @pl.when(pl.program_id(2) == pl.num_programs(2) - 1)
    def _():
        y = acc_ref[...] * s_ref[...] + c_ref[...]
        if relu:
            y = jnp.maximum(y, 0.0)
        o_ref[...] = y + r_ref[...]


def _affine_relu_kernel(x_ref, s_ref, b_ref, o_ref):
    o_ref[...] = jnp.maximum(x_ref[...] * s_ref[...] + b_ref[...], 0.0)


def _lstm_fused_kernel(a_ref, b_ref, bias_ref, xg_ref, c_ref,
                       h_out_ref, c_out_ref, acc_ref, *, C):
    """h2h matmul with the full ConvLSTM gate math fused into the epilogue.
    Gate order along the 4*C axis: (i, f, o, g)."""
    @pl.when(pl.program_id(1) == 0)
    def _():
        acc_ref[...] = jnp.zeros_like(acc_ref)

    acc_ref[...] += jnp.dot(a_ref[...], b_ref[...],
                            preferred_element_type=jnp.float32)

    @pl.when(pl.program_id(1) == pl.num_programs(1) - 1)
    def _():
        g = acc_ref[...] + bias_ref[...] + xg_ref[...]
        i = jax.nn.sigmoid(g[:, 0 * C:1 * C])
        f = jax.nn.sigmoid(g[:, 1 * C:2 * C])
        o = jax.nn.sigmoid(g[:, 2 * C:3 * C])
        gg = jnp.tanh(g[:, 3 * C:4 * C])
        c_new = f * c_ref[...] + i * gg
        c_out_ref[...] = c_new
        h_out_ref[...] = o * jnp.tanh(c_new)


# ----------------------------------------------------------------------------
# Matmul / conv wrappers
# ----------------------------------------------------------------------------
def matmul_affine(a, b, scale, bias, *, relu, residual=None):
    """y = (a @ b) * scale[None,:] + bias[None,:] (+ residual), optional ReLU.
    a, b are fed to the MXU in bf16; accumulation and epilogue in f32."""
    M, K = a.shape
    K2, N = b.shape
    assert K == K2
    tm, Mp = _pick_row_tile(M, MM_TM_CAP)
    tn, Np = _pick_lane_tile(N, MM_TN_CAP)
    tk, Kp = _pick_lane_tile(K, MM_TK_CAP)

    a_p = jnp.pad(a.astype(jnp.bfloat16), ((0, Mp - M), (0, Kp - K)))
    b_p = jnp.pad(b.astype(jnp.bfloat16), ((0, Kp - K), (0, Np - N)))
    s_p = jnp.pad(scale.astype(jnp.float32), (0, Np - N)).reshape(1, Np)
    c_p = jnp.pad(bias.astype(jnp.float32), (0, Np - N)).reshape(1, Np)

    in_specs = [pl.BlockSpec((tm, tk), lambda i, j, k: (i, k)),
                pl.BlockSpec((tk, tn), lambda i, j, k: (k, j)),
                pl.BlockSpec((1, tn), lambda i, j, k: (0, j)),
                pl.BlockSpec((1, tn), lambda i, j, k: (0, j))]
    operands = [a_p, b_p, s_p, c_p]
    if residual is not None:
        r_p = jnp.pad(residual.astype(jnp.float32),
                      ((0, Mp - M), (0, Np - N)))
        in_specs.append(pl.BlockSpec((tm, tn), lambda i, j, k: (i, j)))
        operands.append(r_p)
        kernel = functools.partial(_mm_affine_res_kernel, relu=relu)
    else:
        kernel = functools.partial(_mm_affine_kernel, relu=relu)

    out = pl.pallas_call(
        kernel,
        out_shape=jax.ShapeDtypeStruct((Mp, Np), jnp.float32),
        grid_spec=pltpu.PrefetchScalarGridSpec(
            num_scalar_prefetch=0,
            grid=(Mp // tm, Np // tn, Kp // tk),
            in_specs=in_specs,
            out_specs=pl.BlockSpec((tm, tn), lambda i, j, k: (i, j)),
            scratch_shapes=[pltpu.VMEM((tm, tn), jnp.float32)]),
        compiler_params=pltpu.CompilerParams(
            dimension_semantics=("parallel", "parallel", "arbitrary")),
    )(*operands)
    if Mp == M and Np == N:
        return out
    return out[:M, :N]


def _im2col(x, k, stride, padding):
    B, H, W, C = x.shape
    Ho = (H + 2 * padding - k) // stride + 1
    Wo = (W + 2 * padding - k) // stride + 1
    if padding:
        x = jnp.pad(x, ((0, 0), (padding, padding), (padding, padding), (0, 0)))
    cols = []
    for kh in range(k):
        for kw in range(k):
            cols.append(x[:, kh: kh + (Ho - 1) * stride + 1: stride,
                           kw: kw + (Wo - 1) * stride + 1: stride, :])
    patches = jnp.stack(cols, axis=3)  # (B, Ho, Wo, k*k, C)
    return patches.reshape(B * Ho * Wo, k * k * C), (B, Ho, Wo)


def conv2d_nhwc(x, w, scale, bias, *, stride, padding, relu, residual=None):
    """x: (B,H,W,Cin) NHWC, w: (Cout,Cin,k,k) torch layout.
    Optional residual (B,Ho,Wo,Cout) is added in the matmul epilogue."""
    Cout, Cin, k, _ = w.shape
    patches, (B, Ho, Wo) = _im2col(x.astype(jnp.bfloat16), k, stride, padding)
    w2 = jnp.transpose(w, (2, 3, 1, 0)).reshape(k * k * Cin, Cout)
    res2 = None if residual is None else residual.reshape(B * Ho * Wo, Cout)
    y = matmul_affine(patches, w2, scale, bias, relu=relu, residual=res2)
    return y.reshape(B, Ho, Wo, Cout)


def conv_layer(x, p, *, stride, padding, relu=True):
    """ConvLayer = Conv2d(bias) + BatchNorm2d(eval) + (ReLU | Identity),
    folded into the matmul epilogue."""
    bn = p['bn']
    s = bn['gamma'] / jnp.sqrt(bn['var'] + BN_EPS)
    bias = (p['b'] - bn['mean']) * s + bn['beta']
    return conv2d_nhwc(x, p['w'], s, bias, stride=stride, padding=padding,
                       relu=relu)


def bn_relu_nhwc(x, bn):
    """Eval-mode BN + ReLU over NHWC in a lane-dense flat layout (small C is
    tiled across the 128 lanes instead of being padded to 128)."""
    shape = x.shape
    C = shape[-1]
    scale = bn['gamma'] / jnp.sqrt(bn['var'] + BN_EPS)
    bias = bn['beta'] - bn['mean'] * scale
    total = 1
    for d in shape:
        total *= d

    if 128 % C == 0 and total % 128 == 0:
        lane, trailing_pad = 128, 0
        rep = 128 // C
        x2 = x.reshape(total // 128, 128)
        s_row = jnp.tile(scale, rep).reshape(1, lane)
        b_row = jnp.tile(bias, rep).reshape(1, lane)
    elif C % 128 == 0:
        lane, trailing_pad = C, 0
        x2 = x.reshape(total // C, C)
        s_row = scale.reshape(1, lane)
        b_row = bias.reshape(1, lane)
    else:
        lane = _round_up(C, 128)
        trailing_pad = lane - C
        x2 = jnp.pad(x.reshape(total // C, C), ((0, 0), (0, trailing_pad)))
        s_row = jnp.pad(scale, (0, trailing_pad)).reshape(1, lane)
        b_row = jnp.pad(bias, (0, trailing_pad)).reshape(1, lane)

    R = x2.shape[0]
    tr, Rp = _pick_row_tile(R, 512)
    if Rp != R:
        x2 = jnp.pad(x2, ((0, Rp - R), (0, 0)))

    out = pl.pallas_call(
        _affine_relu_kernel,
        out_shape=jax.ShapeDtypeStruct((Rp, lane), jnp.float32),
        grid=(Rp // tr,),
        in_specs=[pl.BlockSpec((tr, lane), lambda i: (i, 0)),
                  pl.BlockSpec((1, lane), lambda i: (0, 0)),
                  pl.BlockSpec((1, lane), lambda i: (0, 0))],
        out_specs=pl.BlockSpec((tr, lane), lambda i: (i, 0)),
        compiler_params=pltpu.CompilerParams(
            dimension_semantics=("parallel",)),
    )(x2, s_row, b_row)
    out = out[:R]
    if trailing_pad:
        out = out[:, :C]
    return out.reshape(shape)


def preact_block(x, p, *, stride):
    """PreActBlock:
       a   = relu(bn1(x))
       sc  = downsample(a) if needed else x
       t   = relu(bn2(conv1(a)))      # bn2+relu fused into conv1's epilogue
       out = conv2(t) + sc            # residual fused into conv2's epilogue
    """
    cin = x.shape[-1]
    cout = p['w1'].shape[0]
    ones = jnp.ones((cout,), jnp.float32)
    zeros = jnp.zeros((cout,), jnp.float32)

    a = bn_relu_nhwc(x, p['bn1'])
    if stride != 1 or cin != cout:
        sc = conv2d_nhwc(a, p['w_sc'], ones, zeros, stride=stride, padding=0,
                         relu=False)
    else:
        sc = x

    bn2 = p['bn2']
    s2 = bn2['gamma'] / jnp.sqrt(bn2['var'] + BN_EPS)
    b2 = bn2['beta'] - bn2['mean'] * s2
    t = conv2d_nhwc(a, p['w1'], s2, b2, stride=stride, padding=1, relu=True)
    out = conv2d_nhwc(t, p['w2'], ones, zeros, stride=1, padding=1,
                      relu=False, residual=sc)
    return out


# ----------------------------------------------------------------------------
# ConvRNN (ConvLSTM) with fused gate math
# ----------------------------------------------------------------------------
def lstm_step(h_patches, w2d, bias, xg_t, c_prev, cout):
    """One ConvLSTM step: (im2col(h_prev) @ w_h2h + b + xg) -> gates -> h, c.
    h_patches, w2d are bf16; gate math and state are f32."""
    M, K = h_patches.shape
    G = 4 * cout
    assert cout % 128 == 0, "cout must be a multiple of 128 for the gate fusion"
    tm, Mp = _pick_row_tile(M, MM_TM_CAP)
    tk, Kp = _pick_lane_tile(K, MM_TK_CAP)

    a_p = jnp.pad(h_patches, ((0, Mp - M), (0, Kp - K)))
    b_p = jnp.pad(w2d, ((0, Kp - K), (0, 0)))
    xg_p = jnp.pad(xg_t, ((0, Mp - M), (0, 0)))
    c_p = jnp.pad(c_prev, ((0, Mp - M), (0, 0)))
    bias_row = bias.astype(jnp.float32).reshape(1, G)

    h_out, c_out = pl.pallas_call(
        functools.partial(_lstm_fused_kernel, C=cout),
        out_shape=(jax.ShapeDtypeStruct((Mp, cout), jnp.float32),
                   jax.ShapeDtypeStruct((Mp, cout), jnp.float32)),
        grid_spec=pltpu.PrefetchScalarGridSpec(
            num_scalar_prefetch=0,
            grid=(Mp // tm, Kp // tk),
            in_specs=[pl.BlockSpec((tm, tk), lambda i, k: (i, k)),
                      pl.BlockSpec((tk, G), lambda i, k: (k, 0)),
                      pl.BlockSpec((1, G), lambda i, k: (0, 0)),
                      pl.BlockSpec((tm, G), lambda i, k: (i, 0)),
                      pl.BlockSpec((tm, cout), lambda i, k: (i, 0))],
            out_specs=(pl.BlockSpec((tm, cout), lambda i, k: (i, 0)),
                       pl.BlockSpec((tm, cout), lambda i, k: (i, 0))),
            scratch_shapes=[pltpu.VMEM((tm, G), jnp.float32)]),
        compiler_params=pltpu.CompilerParams(
            dimension_semantics=("parallel", "arbitrary")),
    )(a_p, b_p, bias_row, xg_p, c_p)
    if Mp != M:
        h_out, c_out = h_out[:M], c_out[:M]
    return h_out, c_out


def conv_rnn(x, p, *, stride, cout):
    """ConvRNN = SequenceWise(ConvLayer in->4*cout, Identity act) + ConvLSTM
    cell with a 3x3 hidden-to-hidden conv.  Zero initial state (fresh reset)."""
    T, N, H, W, Cin = x.shape
    xb = x.reshape(T * N, H, W, Cin)
    xg = conv_layer(xb, p['x2h'], stride=stride, padding=1, relu=False)
    _, Ho, Wo, _ = xg.shape
    M = N * Ho * Wo
    xg = xg.reshape(T, M, 4 * cout)

    w2d = jnp.transpose(p['w_h2h'], (2, 3, 1, 0)).reshape(
        9 * cout, 4 * cout).astype(jnp.bfloat16)
    h0 = jnp.zeros((N, Ho, Wo, cout), jnp.float32)
    c0 = jnp.zeros((M, cout), jnp.float32)

    def step(carry, xg_t):
        h, c = carry
        hp, _ = _im2col(h.astype(jnp.bfloat16), 3, 1, 1)
        h2d, c_new = lstm_step(hp, w2d, p['b_h2h'], xg_t, c, cout)
        h_new = h2d.reshape(N, Ho, Wo, cout)
        return (h_new, c_new), h_new

    (_, _), hs = lax.scan(step, (h0, c0), xg)
    return hs  # (T, N, Ho, Wo, cout)


def _time_to_batch_nchw(x):
    # (T, N, H, W, C) -> (T*N, C, H, W), matching time_to_batch(x)[0].
    T, N, H, W, C = x.shape
    return jnp.transpose(x, (0, 1, 4, 2, 3)).reshape(T * N, C, H, W)


# ----------------------------------------------------------------------------
# Parameter init (deterministic, PyTorch-like fan-in scaling)
# ----------------------------------------------------------------------------
class _KeyGen:
    def __init__(self, key):
        self._key = key

    def __call__(self):
        self._key, sub = jax.random.split(self._key)
        return sub


def _conv_w(kg, cout, cin, k):
    fan_in = cin * k * k
    return (jax.random.normal(kg(), (cout, cin, k, k), jnp.float32)
            / jnp.sqrt(float(fan_in)))


def _bn(kg, c):
    return dict(gamma=1.0 + 0.1 * jax.random.normal(kg(), (c,), jnp.float32),
                beta=0.1 * jax.random.normal(kg(), (c,), jnp.float32),
                mean=0.1 * jax.random.normal(kg(), (c,), jnp.float32),
                var=jnp.ones((c,), jnp.float32))


def _conv_layer_p(kg, cin, cout, k):
    return dict(w=_conv_w(kg, cout, cin, k),
                b=0.1 * jax.random.normal(kg(), (cout,), jnp.float32),
                bn=_bn(kg, cout))


def _preact_p(kg, cin, cout):
    return dict(bn1=_bn(kg, cin),
                w1=_conv_w(kg, cout, cin, 3),
                bn2=_bn(kg, cout),
                w2=_conv_w(kg, cout, cout, 3),
                w_sc=_conv_w(kg, cout, cin, 1))


def _conv_rnn_p(kg, cin, cout):
    return dict(x2h=_conv_layer_p(kg, cin, 4 * cout, 3),
                w_h2h=_conv_w(kg, 4 * cout, cout, 3),
                b_h2h=0.1 * jax.random.normal(kg(), (4 * cout,), jnp.float32))


def init_vanilla_params(key, cin=1, cout=256, base=4):
    kg = _KeyGen(key)
    return dict(
        stem_conv=_conv_layer_p(kg, cin, base * 2, 7),      # ConvLayer k7 s2
        stem_pa1=_preact_p(kg, base * 2, base * 4),          # PreActBlock s2
        stem_pa2=_preact_p(kg, base * 4, base * 8),          # PreActBlock s2
        rnn0=_conv_rnn_p(kg, base * 8, cout),                # ConvRNN s2
        rnn1=_conv_rnn_p(kg, cout, cout),                    # ConvRNN s1
        pa3=_preact_p(kg, cout, cout))                       # PreActBlock s2


# ----------------------------------------------------------------------------
# Vanilla forward
# ----------------------------------------------------------------------------
def vanilla_forward(params, x, *, cout):
    """x: (T, N, Cin, H, W) float32 — same convention as the PyTorch module."""
    T, N, Cin, H, W = x.shape
    xb = jnp.transpose(x, (0, 1, 3, 4, 2)).reshape(T * N, H, W, Cin)
    # conv1 = SequenceWise(ConvLayer -> PreActBlock -> PreActBlock)
    xb = conv_layer(xb, params['stem_conv'], stride=2, padding=3, relu=True)
    xb = preact_block(xb, params['stem_pa1'], stride=2)
    xb = preact_block(xb, params['stem_pa2'], stride=2)
    _, Hs, Ws, Cs = xb.shape
    xt = xb.reshape(T, N, Hs, Ws, Cs)

    outs = []
    # conv2[0]: ConvRNN(base*8 -> cout, stride=2)
    xt = conv_rnn(xt, params['rnn0'], stride=2, cout=cout)
    outs.append(_time_to_batch_nchw(xt))
    # conv2[1]: ConvRNN(cout -> cout, stride=1) + SequenceWise(PreActBlock s2)
    xt = conv_rnn(xt, params['rnn1'], stride=1, cout=cout)
    T2, N2, H2, W2, C2 = xt.shape
    xb = preact_block(xt.reshape(T2 * N2, H2, W2, C2), params['pa3'], stride=2)
    xt = xb.reshape(T2, N2, xb.shape[1], xb.shape[2], C2)
    outs.append(_time_to_batch_nchw(xt))
    return outs


if __name__ == "__main__":
    key = jax.random.PRNGKey(0)
    kp, kx = jax.random.split(key)

    cin, cout = 1, 128           # cout is a constructor arg of Vanilla
    T, N, H, W = 2, 2, 64, 64    # small sequence of NCHW frames

    params = init_vanilla_params(kp, cin=cin, cout=cout)
    x = jax.random.normal(kx, (T, N, cin, H, W), jnp.float32)

    fwd = jax.jit(functools.partial(vanilla_forward, cout=cout))
    outs = fwd(params, x)
    outs = jax.block_until_ready(outs)

    assert outs[0].shape == (T * N, cout, 4, 4), outs[0].shape
    assert outs[1].shape == (T * N, cout, 2, 2), outs[1].shape
    assert all(bool(jnp.isfinite(o).all()) for o in outs)
    print("KERNEL_OK")
</pallas_src>

<mosaic_0001>
module attributes {stable_mosaic.version = 11 : i64} {
  func.func @_mm_affine_kernel(%arg0: i32, %arg1: i32, %arg2: i32, %arg3: memref<256x128xbf16, #tpu.memory_space<vmem>>, %arg4: memref<128x128xbf16, #tpu.memory_space<vmem>>, %arg5: memref<1x128xf32, #tpu.memory_space<vmem>>, %arg6: memref<1x128xf32, #tpu.memory_space<vmem>>, %arg7: memref<256x128xf32, #tpu.memory_space<vmem>>, %arg8: memref<256x128xf32, #tpu.memory_space<vmem>>) attributes {dimension_semantics = [#tpu.dimension_semantics<parallel>, #tpu.dimension_semantics<parallel>, #tpu.dimension_semantics<arbitrary>], iteration_bounds = array<i64: 16, 1, 1>, scalar_prefetch = 0 : i64, scratch_operands = 1 : i64, tpu.core_type = #tpu.core_type<tc>, window_params = [{transform_indices = @transform_0, window_bounds = array<i64: 256, 128>}, {transform_indices = @transform_1, window_bounds = array<i64: 128, 128>}, {transform_indices = @transform_2, window_bounds = array<i64: 1, 128>}, {transform_indices = @transform_3, window_bounds = array<i64: 1, 128>}, {transform_indices = @transform_4, window_bounds = array<i64: 256, 128>}]} {
    %c0_i32 = arith.constant 0 : i32
    %0 = arith.cmpi eq, %arg2, %c0_i32 : i32
    %1 = arith.extui %0 : i1 to i32
    %c0_i32_0 = arith.constant 0 : i32
    %2 = arith.cmpi ne, %1, %c0_i32_0 : i32
    scf.if %2 {
      %cst_10 = arith.constant 0.000000e+00 : f32
      %12 = vector.broadcast %cst_10 : f32 to vector<256x128xf32>
      %c0_11 = arith.constant 0 : index
      %c0_12 = arith.constant 0 : index
      %13 = vector.load %arg8[%c0_11, %c0_12] : memref<256x128xf32, #tpu.memory_space<vmem>>, vector<256x128xf32>
      tpu.vector_store %arg8[%c0_11, %c0_12], %12 {strides = array<i32>} : memref<256x128xf32, #tpu.memory_space<vmem>>, vector<256x128xf32>,
    } else {
    }
    %c0 = arith.constant 0 : index
    %c0_1 = arith.constant 0 : index
    %3 = vector.load %arg8[%c0, %c0_1] : memref<256x128xf32, #tpu.memory_space<vmem>>, vector<256x128xf32>
    %c0_2 = arith.constant 0 : index
    %c0_3 = arith.constant 0 : index
    %4 = vector.load %arg3[%c0_2, %c0_3] : memref<256x128xbf16, #tpu.memory_space<vmem>>, vector<256x128xbf16>
    %c0_4 = arith.constant 0 : index
    %c0_5 = arith.constant 0 : index
    %5 = vector.load %arg4[%c0_4, %c0_5] : memref<128x128xbf16, #tpu.memory_space<vmem>>, vector<128x128xbf16>
    %cst = arith.constant dense<0.000000e+00> : vector<256x128xf32>
    %6 = tpu.matmul %4, %5, %cst {dimension_numbers = #tpu.dot_dimension_numbers<[1], [0], [0], [1], [0, 0, 1, 1], [], []>} : vector<256x128xbf16>, vector<128x128xbf16>, vector<256x128xf32> -> vector<256x128xf32>
    %7 = arith.addf %3, %6 : vector<256x128xf32>
    %c0_6 = arith.constant 0 : index
    %c0_7 = arith.constant 0 : index
    %8 = vector.load %arg8[%c0_6, %c0_7] : memref<256x128xf32, #tpu.memory_space<vmem>>, vector<256x128xf32>
    tpu.vector_store %arg8[%c0_6, %c0_7], %7 {strides = array<i32>} : memref<256x128xf32, #tpu.memory_space<vmem>>, vector<256x128xf32>,
    %c0_i32_8 = arith.constant 0 : i32
    %9 = arith.cmpi eq, %arg2, %c0_i32_8 : i32
    %10 = arith.extui %9 : i1 to i32
    %c0_i32_9 = arith.constant 0 : i32
    %11 = arith.cmpi ne, %10, %c0_i32_9 : i32
    scf.if %11 {
      %c0_10 = arith.constant 0 : index
      %c0_11 = arith.constant 0 : index
      %12 = vector.load %arg8[%c0_10, %c0_11] : memref<256x128xf32, #tpu.memory_space<vmem>>, vector<256x128xf32>
      %c0_12 = arith.constant 0 : index
      %c0_13 = arith.constant 0 : index
      %13 = vector.load %arg5[%c0_12, %c0_13] : memref<1x128xf32, #tpu.memory_space<vmem>>, vector<1x128xf32>
      %14 = vector.broadcast %13 : vector<1x128xf32> to vector<256x128xf32>
      %15 = arith.mulf %12, %14 : vector<256x128xf32>
      %c0_14 = arith.constant 0 : index
      %c0_15 = arith.constant 0 : index
      %16 = vector.load %arg6[%c0_14, %c0_15] : memref<1x128xf32, #tpu.memory_space<vmem>>, vector<1x128xf32>
      %17 = vector.broadcast %16 : vector<1x128xf32> to vector<256x128xf32>
      %18 = arith.addf %15, %17 : vector<256x128xf32>
      %cst_16 = arith.constant 0.000000e+00 : f32
      %19 = vector.broadcast %cst_16 : f32 to vector<256x128xf32>
      %20 = arith.maximumf %18, %19 : vector<256x128xf32>
      %c0_17 = arith.constant 0 : index
      %c0_18 = arith.constant 0 : index
      %21 = vector.load %arg7[%c0_17, %c0_18] : memref<256x128xf32, #tpu.memory_space<vmem>>, vector<256x128xf32>
      tpu.vector_store %arg7[%c0_17, %c0_18], %20 {strides = array<i32>} : memref<256x128xf32, #tpu.memory_space<vmem>>, vector<256x128xf32>,
    } else {
    }
    return
  }
  func.func @transform_0(%arg0: i32, %arg1: i32, %arg2: i32) -> (i32, i32) {
    %c0_i32 = arith.constant 0 : i32
    return %arg0, %arg2 : i32, i32
  }
  func.func @transform_1(%arg0: i32, %arg1: i32, %arg2: i32) -> (i32, i32) {
    %c0_i32 = arith.constant 0 : i32
    return %arg2, %arg1 : i32, i32
  }
  func.func @transform_2(%arg0: i32, %arg1: i32, %arg2: i32) -> (i32, i32) {
    %c0_i32 = arith.constant 0 : i32
    %c0_i32_0 = arith.constant 0 : i32
    return %c0_i32, %arg1 : i32, i32
  }
  func.func @transform_3(%arg0: i32, %arg1: i32, %arg2: i32) -> (i32, i32) {
    %c0_i32 = arith.constant 0 : i32
    %c0_i32_0 = arith.constant 0 : i32
    return %c0_i32, %arg1 : i32, i32
  }
  func.func @transform_4(%arg0: i32, %arg1: i32, %arg2: i32) -> (i32, i32) {
    %c0_i32 = arith.constant 0 : i32
    return %arg0, %arg1 : i32, i32
  }
}

module attributes {stable_mosaic.version = 11 : i64} {
  func.func @_affine_relu_kernel(%arg0: i32, %arg1: memref<256x128xf32, #tpu.memory_space<vmem>>, %arg2: memref<1x128xf32, #tpu.memory_space<vmem>>, %arg3: memref<1x128xf32, #tpu.memory_space<vmem>>, %arg4: memref<256x128xf32, #tpu.memory_space<vmem>>) attributes {dimension_semantics = [#tpu.dimension_semantics<parallel>], iteration_bounds = array<i64: 1>, scalar_prefetch = 0 : i64, scratch_operands = 0 : i64, tpu.core_type = #tpu.core_type<tc>, window_params = [{transform_indices = @transform_0, window_bounds = array<i64: 256, 128>}, {pipeline_mode = #tpu.pipeline_mode<synchronous>, transform_indices = @transform_1, window_bounds = array<i64: 1, 128>}, {pipeline_mode = #tpu.pipeline_mode<synchronous>, transform_indices = @transform_2, window_bounds = array<i64: 1, 128>}, {transform_indices = @transform_3, window_bounds = array<i64: 256, 128>}]} {
    %c0 = arith.constant 0 : index
    %c0_0 = arith.constant 0 : index
    %0 = vector.load %arg1[%c0, %c0_0] : memref<256x128xf32, #tpu.memory_space<vmem>>, vector<256x128xf32>
    %c0_1 = arith.constant 0 : index
    %c0_2 = arith.constant 0 : index
    %1 = vector.load %arg2[%c0_1, %c0_2] : memref<1x128xf32, #tpu.memory_space<vmem>>, vector<1x128xf32>
    %2 = vector.broadcast %1 : vector<1x128xf32> to vector<256x128xf32>
    %3 = arith.mulf %0, %2 : vector<256x128xf32>
    %c0_3 = arith.constant 0 : index
    %c0_4 = arith.constant 0 : index
    %4 = vector.load %arg3[%c0_3, %c0_4] : memref<1x128xf32, #tpu.memory_space<vmem>>, vector<1x128xf32>
    %5 = vector.broadcast %4 : vector<1x128xf32> to vector<256x128xf32>
    %6 = arith.addf %3, %5 : vector<256x128xf32>
    %cst = arith.constant 0.000000e+00 : f32
    %7 = vector.broadcast %cst : f32 to vector<256x128xf32>
    %8 = arith.maximumf %6, %7 : vector<256x128xf32>
    %c0_5 = arith.constant 0 : index
    %c0_6 = arith.constant 0 : index
    %9 = vector.load %arg4[%c0_5, %c0_6] : memref<256x128xf32, #tpu.memory_space<vmem>>, vector<256x128xf32>
    tpu.vector_store %arg4[%c0_5, %c0_6], %8 {strides = array<i32>} : memref<256x128xf32, #tpu.memory_space<vmem>>, vector<256x128xf32>,
    return
  }
  func.func @transform_0(%arg0: i32) -> (i32, i32) {
    %c0_i32 = arith.constant 0 : i32
    %c0_i32_0 = arith.constant 0 : i32
    return %arg0, %c0_i32 : i32, i32
  }
  func.func @transform_1(%arg0: i32) -> (i32, i32) {
    %c0_i32 = arith.constant 0 : i32
    %c0_i32_0 = arith.constant 0 : i32
    %c0_i32_1 = arith.constant 0 : i32
    return %c0_i32, %c0_i32_0 : i32, i32
  }
  func.func @transform_2(%arg0: i32) -> (i32, i32) {
    %c0_i32 = arith.constant 0 : i32
    %c0_i32_0 = arith.constant 0 : i32
    %c0_i32_1 = arith.constant 0 : i32
    return %c0_i32, %c0_i32_0 : i32, i32
  }
  func.func @transform_3(%arg0: i32) -> (i32, i32) {
    %c0_i32 = arith.constant 0 : i32
    %c0_i32_0 = arith.constant 0 : i32
    return %arg0, %c0_i32 : i32, i32
  }
}

module attributes {stable_mosaic.version = 11 : i64} {
  func.func @_mm_affine_kernel(%arg0: i32, %arg1: i32, %arg2: i32, %arg3: memref<256x128xbf16, #tpu.memory_space<vmem>>, %arg4: memref<128x128xbf16, #tpu.memory_space<vmem>>, %arg5: memref<1x128xf32, #tpu.memory_space<vmem>>, %arg6: memref<1x128xf32, #tpu.memory_space<vmem>>, %arg7: memref<256x128xf32, #tpu.memory_space<vmem>>, %arg8: memref<256x128xf32, #tpu.memory_space<vmem>>) attributes {dimension_semantics = [#tpu.dimension_semantics<parallel>, #tpu.dimension_semantics<parallel>, #tpu.dimension_semantics<arbitrary>], iteration_bounds = array<i64: 4, 1, 1>, scalar_prefetch = 0 : i64, scratch_operands = 1 : i64, tpu.core_type = #tpu.core_type<tc>, window_params = [{transform_indices = @transform_0, window_bounds = array<i64: 256, 128>}, {transform_indices = @transform_1, window_bounds = array<i64: 128, 128>}, {transform_indices = @transform_2, window_bounds = array<i64: 1, 128>}, {transform_indices = @transform_3, window_bounds = array<i64: 1, 128>}, {transform_indices = @transform_4, window_bounds = array<i64: 256, 128>}]} {
    %c0_i32 = arith.constant 0 : i32
    %0 = arith.cmpi eq, %arg2, %c0_i32 : i32
    %1 = arith.extui %0 : i1 to i32
    %c0_i32_0 = arith.constant 0 : i32
    %2 = arith.cmpi ne, %1, %c0_i32_0 : i32
    scf.if %2 {
      %cst_10 = arith.constant 0.000000e+00 : f32
      %12 = vector.broadcast %cst_10 : f32 to vector<256x128xf32>
      %c0_11 = arith.constant 0 : index
      %c0_12 = arith.constant 0 : index
      %13 = vector.load %arg8[%c0_11, %c0_12] : memref<256x128xf32, #tpu.memory_space<vmem>>, vector<256x128xf32>
      tpu.vector_store %arg8[%c0_11, %c0_12], %12 {strides = array<i32>} : memref<256x128xf32, #tpu.memory_space<vmem>>, vector<256x128xf32>,
    } else {
    }
    %c0 = arith.constant 0 : index
    %c0_1 = arith.constant 0 : index
    %3 = vector.load %arg8[%c0, %c0_1] : memref<256x128xf32, #tpu.memory_space<vmem>>, vector<256x128xf32>
    %c0_2 = arith.constant 0 : index
    %c0_3 = arith.constant 0 : index
    %4 = vector.load %arg3[%c0_2, %c0_3] : memref<256x128xbf16, #tpu.memory_space<vmem>>, vector<256x128xbf16>
    %c0_4 = arith.constant 0 : index
    %c0_5 = arith.constant 0 : index
    %5 = vector.load %arg4[%c0_4, %c0_5] : memref<128x128xbf16, #tpu.memory_space<vmem>>, vector<128x128xbf16>
    %cst = arith.constant dense<0.000000e+00> : vector<256x128xf32>
    %6 = tpu.matmul %4, %5, %cst {dimension_numbers = #tpu.dot_dimension_numbers<[1], [0], [0], [1], [0, 0, 1, 1], [], []>} : vector<256x128xbf16>, vector<128x128xbf16>, vector<256x128xf32> -> vector<256x128xf32>
    %7 = arith.addf %3, %6 : vector<256x128xf32>
    %c0_6 = arith.constant 0 : index
    %c0_7 = arith.constant 0 : index
    %8 = vector.load %arg8[%c0_6, %c0_7] : memref<256x128xf32, #tpu.memory_space<vmem>>, vector<256x128xf32>
    tpu.vector_store %arg8[%c0_6, %c0_7], %7 {strides = array<i32>} : memref<256x128xf32, #tpu.memory_space<vmem>>, vector<256x128xf32>,
    %c0_i32_8 = arith.constant 0 : i32
    %9 = arith.cmpi eq, %arg2, %c0_i32_8 : i32
    %10 = arith.extui %9 : i1 to i32
    %c0_i32_9 = arith.constant 0 : i32
    %11 = arith.cmpi ne, %10, %c0_i32_9 : i32
    scf.if %11 {
      %c0_10 = arith.constant 0 : index
      %c0_11 = arith.constant 0 : index
      %12 = vector.load %arg8[%c0_10, %c0_11] : memref<256x128xf32, #tpu.memory_space<vmem>>, vector<256x128xf32>
      %c0_12 = arith.constant 0 : index
      %c0_13 = arith.constant 0 : index
      %13 = vector.load %arg5[%c0_12, %c0_13] : memref<1x128xf32, #tpu.memory_space<vmem>>, vector<1x128xf32>
      %14 = vector.broadcast %13 : vector<1x128xf32> to vector<256x128xf32>
      %15 = arith.mulf %12, %14 : vector<256x128xf32>
      %c0_14 = arith.constant 0 : index
      %c0_15 = arith.constant 0 : index
      %16 = vector.load %arg6[%c0_14, %c0_15] : memref<1x128xf32, #tpu.memory_space<vmem>>, vector<1x128xf32>
      %17 = vector.broadcast %16 : vector<1x128xf32> to vector<256x128xf32>
      %18 = arith.addf %15, %17 : vector<256x128xf32>
      %cst_16 = arith.constant 0.000000e+00 : f32
      %19 = vector.broadcast %cst_16 : f32 to vector<256x128xf32>
      %20 = arith.maximumf %18, %19 : vector<256x128xf32>
      %c0_17 = arith.constant 0 : index
      %c0_18 = arith.constant 0 : index
      %21 = vector.load %arg7[%c0_17, %c0_18] : memref<256x128xf32, #tpu.memory_space<vmem>>, vector<256x128xf32>
      tpu.vector_store %arg7[%c0_17, %c0_18], %20 {strides = array<i32>} : memref<256x128xf32, #tpu.memory_space<vmem>>, vector<256x128xf32>,
    } else {
    }
    return
  }
  func.func @transform_0(%arg0: i32, %arg1: i32, %arg2: i32) -> (i32, i32) {
    %c0_i32 = arith.constant 0 : i32
    return %arg0, %arg2 : i32, i32
  }
  func.func @transform_1(%arg0: i32, %arg1: i32, %arg2: i32) -> (i32, i32) {
    %c0_i32 = arith.constant 0 : i32
    return %arg2, %arg1 : i32, i32
  }
  func.func @transform_2(%arg0: i32, %arg1: i32, %arg2: i32) -> (i32, i32) {
    %c0_i32 = arith.constant 0 : i32
    %c0_i32_0 = arith.constant 0 : i32
    return %c0_i32, %arg1 : i32, i32
  }
  func.func @transform_3(%arg0: i32, %arg1: i32, %arg2: i32) -> (i32, i32) {
    %c0_i32 = arith.constant 0 : i32
    %c0_i32_0 = arith.constant 0 : i32
    return %c0_i32, %arg1 : i32, i32
  }
  func.func @transform_4(%arg0: i32, %arg1: i32, %arg2: i32) -> (i32, i32) {
    %c0_i32 = arith.constant 0 : i32
    return %arg0, %arg1 : i32, i32
  }
}

module attributes {stable_mosaic.version = 11 : i64} {
  func.func @_mm_affine_kernel(%arg0: i32, %arg1: i32, %arg2: i32, %arg3: memref<256x128xbf16, #tpu.memory_space<vmem>>, %arg4: memref<128x128xbf16, #tpu.memory_space<vmem>>, %arg5: memref<1x128xf32, #tpu.memory_space<vmem>>, %arg6: memref<1x128xf32, #tpu.memory_space<vmem>>, %arg7: memref<256x128xf32, #tpu.memory_space<vmem>>, %arg8: memref<256x128xf32, #tpu.memory_space<vmem>>) attributes {dimension_semantics = [#tpu.dimension_semantics<parallel>, #tpu.dimension_semantics<parallel>, #tpu.dimension_semantics<arbitrary>], iteration_bounds = array<i64: 4, 1, 1>, scalar_prefetch = 0 : i64, scratch_operands = 1 : i64, tpu.core_type = #tpu.core_type<tc>, window_params = [{transform_indices = @transform_0, window_bounds = array<i64: 256, 128>}, {transform_indices = @transform_1, window_bounds = array<i64: 128, 128>}, {transform_indices = @transform_2, window_bounds = array<i64: 1, 128>}, {transform_indices = @transform_3, window_bounds = array<i64: 1, 128>}, {transform_indices = @transform_4, window_bounds = array<i64: 256, 128>}]} {
    %c0_i32 = arith.constant 0 : i32
    %0 = arith.cmpi eq, %arg2, %c0_i32 : i32
    %1 = arith.extui %0 : i1 to i32
    %c0_i32_0 = arith.constant 0 : i32
    %2 = arith.cmpi ne, %1, %c0_i32_0 : i32
    scf.if %2 {
      %cst_10 = arith.constant 0.000000e+00 : f32
      %12 = vector.broadcast %cst_10 : f32 to vector<256x128xf32>
      %c0_11 = arith.constant 0 : index
      %c0_12 = arith.constant 0 : index
      %13 = vector.load %arg8[%c0_11, %c0_12] : memref<256x128xf32, #tpu.memory_space<vmem>>, vector<256x128xf32>
      tpu.vector_store %arg8[%c0_11, %c0_12], %12 {strides = array<i32>} : memref<256x128xf32, #tpu.memory_space<vmem>>, vector<256x128xf32>,
    } else {
    }
    %c0 = arith.constant 0 : index
    %c0_1 = arith.constant 0 : index
    %3 = vector.load %arg8[%c0, %c0_1] : memref<256x128xf32, #tpu.memory_space<vmem>>, vector<256x128xf32>
    %c0_2 = arith.constant 0 : index
    %c0_3 = arith.constant 0 : index
    %4 = vector.load %arg3[%c0_2, %c0_3] : memref<256x128xbf16, #tpu.memory_space<vmem>>, vector<256x128xbf16>
    %c0_4 = arith.constant 0 : index
    %c0_5 = arith.constant 0 : index
    %5 = vector.load %arg4[%c0_4, %c0_5] : memref<128x128xbf16, #tpu.memory_space<vmem>>, vector<128x128xbf16>
    %cst = arith.constant dense<0.000000e+00> : vector<256x128xf32>
    %6 = tpu.matmul %4, %5, %cst {dimension_numbers = #tpu.dot_dimension_numbers<[1], [0], [0], [1], [0, 0, 1, 1], [], []>} : vector<256x128xbf16>, vector<128x128xbf16>, vector<256x128xf32> -> vector<256x128xf32>
    %7 = arith.addf %3, %6 : vector<256x128xf32>
    %c0_6 = arith.constant 0 : index
    %c0_7 = arith.constant 0 : index
    %8 = vector.load %arg8[%c0_6, %c0_7] : memref<256x128xf32, #tpu.memory_space<vmem>>, vector<256x128xf32>
    tpu.vector_store %arg8[%c0_6, %c0_7], %7 {strides = array<i32>} : memref<256x128xf32, #tpu.memory_space<vmem>>, vector<256x128xf32>,
    %c0_i32_8 = arith.constant 0 : i32
    %9 = arith.cmpi eq, %arg2, %c0_i32_8 : i32
    %10 = arith.extui %9 : i1 to i32
    %c0_i32_9 = arith.constant 0 : i32
    %11 = arith.cmpi ne, %10, %c0_i32_9 : i32
    scf.if %11 {
      %c0_10 = arith.constant 0 : index
      %c0_11 = arith.constant 0 : index
      %12 = vector.load %arg8[%c0_10, %c0_11] : memref<256x128xf32, #tpu.memory_space<vmem>>, vector<256x128xf32>
      %c0_12 = arith.constant 0 : index
      %c0_13 = arith.constant 0 : index
      %13 = vector.load %arg5[%c0_12, %c0_13] : memref<1x128xf32, #tpu.memory_space<vmem>>, vector<1x128xf32>
      %14 = vector.broadcast %13 : vector<1x128xf32> to vector<256x128xf32>
      %15 = arith.mulf %12, %14 : vector<256x128xf32>
      %c0_14 = arith.constant 0 : index
      %c0_15 = arith.constant 0 : index
      %16 = vector.load %arg6[%c0_14, %c0_15] : memref<1x128xf32, #tpu.memory_space<vmem>>, vector<1x128xf32>
      %17 = vector.broadcast %16 : vector<1x128xf32> to vector<256x128xf32>
      %18 = arith.addf %15, %17 : vector<256x128xf32>
      %c0_16 = arith.constant 0 : index
      %c0_17 = arith.constant 0 : index
      %19 = vector.load %arg7[%c0_16, %c0_17] : memref<256x128xf32, #tpu.memory_space<vmem>>, vector<256x128xf32>
      tpu.vector_store %arg7[%c0_16, %c0_17], %18 {strides = array<i32>} : memref<256x128xf32, #tpu.memory_space<vmem>>, vector<256x128xf32>,
    } else {
    }
    return
  }
  func.func @transform_0(%arg0: i32, %arg1: i32, %arg2: i32) -> (i32, i32) {
    %c0_i32 = arith.constant 0 : i32
    return %arg0, %arg2 : i32, i32
  }
  func.func @transform_1(%arg0: i32, %arg1: i32, %arg2: i32) -> (i32, i32) {
    %c0_i32 = arith.constant 0 : i32
    return %arg2, %arg1 : i32, i32
  }
  func.func @transform_2(%arg0: i32, %arg1: i32, %arg2: i32) -> (i32, i32) {
    %c0_i32 = arith.constant 0 : i32
    %c0_i32_0 = arith.constant 0 : i32
    return %c0_i32, %arg1 : i32, i32
  }
  func.func @transform_3(%arg0: i32, %arg1: i32, %arg2: i32) -> (i32, i32) {
    %c0_i32 = arith.constant 0 : i32
    %c0_i32_0 = arith.constant 0 : i32
    return %c0_i32, %arg1 : i32, i32
  }
  func.func @transform_4(%arg0: i32, %arg1: i32, %arg2: i32) -> (i32, i32) {
    %c0_i32 = arith.constant 0 : i32
    return %arg0, %arg1 : i32, i32
  }
}

module attributes {stable_mosaic.version = 11 : i64} {
  func.func @_mm_affine_res_kernel(%arg0: i32, %arg1: i32, %arg2: i32, %arg3: memref<256x256xbf16, #tpu.memory_space<vmem>>, %arg4: memref<256x128xbf16, #tpu.memory_space<vmem>>, %arg5: memref<1x128xf32, #tpu.memory_space<vmem>>, %arg6: memref<1x128xf32, #tpu.memory_space<vmem>>, %arg7: memref<256x128xf32, #tpu.memory_space<vmem>>, %arg8: memref<256x128xf32, #tpu.memory_space<vmem>>, %arg9: memref<256x128xf32, #tpu.memory_space<vmem>>) attributes {dimension_semantics = [#tpu.dimension_semantics<parallel>, #tpu.dimension_semantics<parallel>, #tpu.dimension_semantics<arbitrary>], iteration_bounds = array<i64: 4, 1, 1>, scalar_prefetch = 0 : i64, scratch_operands = 1 : i64, tpu.core_type = #tpu.core_type<tc>, window_params = [{transform_indices = @transform_0, window_bounds = array<i64: 256, 256>}, {transform_indices = @transform_1, window_bounds = array<i64: 256, 128>}, {transform_indices = @transform_2, window_bounds = array<i64: 1, 128>}, {transform_indices = @transform_3, window_bounds = array<i64: 1, 128>}, {transform_indices = @transform_4, window_bounds = array<i64: 256, 128>}, {transform_indices = @transform_5, window_bounds = array<i64: 256, 128>}]} {
    %c0_i32 = arith.constant 0 : i32
    %0 = arith.cmpi eq, %arg2, %c0_i32 : i32
    %1 = arith.extui %0 : i1 to i32
    %c0_i32_0 = arith.constant 0 : i32
    %2 = arith.cmpi ne, %1, %c0_i32_0 : i32
    scf.if %2 {
      %cst_10 = arith.constant 0.000000e+00 : f32
      %12 = vector.broadcast %cst_10 : f32 to vector<256x128xf32>
      %c0_11 = arith.constant 0 : index
      %c0_12 = arith.constant 0 : index
      %13 = vector.load %arg9[%c0_11, %c0_12] : memref<256x128xf32, #tpu.memory_space<vmem>>, vector<256x128xf32>
      tpu.vector_store %arg9[%c0_11, %c0_12], %12 {strides = array<i32>} : memref<256x128xf32, #tpu.memory_space<vmem>>, vector<256x128xf32>,
    } else {
    }
    %c0 = arith.constant 0 : index
    %c0_1 = arith.constant 0 : index
    %3 = vector.load %arg9[%c0, %c0_1] : memref<256x128xf32, #tpu.memory_space<vmem>>, vector<256x128xf32>
    %c0_2 = arith.constant 0 : index
    %c0_3 = arith.constant 0 : index
    %4 = vector.load %arg3[%c0_2, %c0_3] : memref<256x256xbf16, #tpu.memory_space<vmem>>, vector<256x256xbf16>
    %c0_4 = arith.constant 0 : index
    %c0_5 = arith.constant 0 : index
    %5 = vector.load %arg4[%c0_4, %c0_5] : memref<256x128xbf16, #tpu.memory_space<vmem>>, vector<256x128xbf16>
    %cst = arith.constant dense<0.000000e+00> : vector<256x128xf32>
    %6 = tpu.matmul %4, %5, %cst {dimension_numbers = #tpu.dot_dimension_numbers<[1], [0], [0], [1], [0, 0, 1, 1], [], []>} : vector<256x256xbf16>, vector<256x128xbf16>, vector<256x128xf32> -> vector<256x128xf32>
    %7 = arith.addf %3, %6 : vector<256x128xf32>
    %c0_6 = arith.constant 0 : index
    %c0_7 = arith.constant 0 : index
    %8 = vector.load %arg9[%c0_6, %c0_7] : memref<256x128xf32, #tpu.memory_space<vmem>>, vector<256x128xf32>
    tpu.vector_store %arg9[%c0_6, %c0_7], %7 {strides = array<i32>} : memref<256x128xf32, #tpu.memory_space<vmem>>, vector<256x128xf32>,
    %c0_i32_8 = arith.constant 0 : i32
    %9 = arith.cmpi eq, %arg2, %c0_i32_8 : i32
    %10 = arith.extui %9 : i1 to i32
    %c0_i32_9 = arith.constant 0 : i32
    %11 = arith.cmpi ne, %10, %c0_i32_9 : i32
    scf.if %11 {
      %c0_10 = arith.constant 0 : index
      %c0_11 = arith.constant 0 : index
      %12 = vector.load %arg9[%c0_10, %c0_11] : memref<256x128xf32, #tpu.memory_space<vmem>>, vector<256x128xf32>
      %c0_12 = arith.constant 0 : index
      %c0_13 = arith.constant 0 : index
      %13 = vector.load %arg5[%c0_12, %c0_13] : memref<1x128xf32, #tpu.memory_space<vmem>>, vector<1x128xf32>
      %14 = vector.broadcast %13 : vector<1x128xf32> to vector<256x128xf32>
      %15 = arith.mulf %12, %14 : vector<256x128xf32>
      %c0_14 = arith.constant 0 : index
      %c0_15 = arith.constant 0 : index
      %16 = vector.load %arg6[%c0_14, %c0_15] : memref<1x128xf32, #tpu.memory_space<vmem>>, vector<1x128xf32>
      %17 = vector.broadcast %16 : vector<1x128xf32> to vector<256x128xf32>
      %18 = arith.addf %15, %17 : vector<256x128xf32>
      %c0_16 = arith.constant 0 : index
      %c0_17 = arith.constant 0 : index
      %19 = vector.load %arg7[%c0_16, %c0_17] : memref<256x128xf32, #tpu.memory_space<vmem>>, vector<256x128xf32>
      %20 = arith.addf %18, %19 : vector<256x128xf32>
      %c0_18 = arith.constant 0 : index
      %c0_19 = arith.constant 0 : index
      %21 = vector.load %arg8[%c0_18, %c0_19] : memref<256x128xf32, #tpu.memory_space<vmem>>, vector<256x128xf32>
      tpu.vector_store %arg8[%c0_18, %c0_19], %20 {strides = array<i32>} : memref<256x128xf32, #tpu.memory_space<vmem>>, vector<256x128xf32>,
    } else {
    }
    return
  }
  func.func @transform_0(%arg0: i32, %arg1: i32, %arg2: i32) -> (i32, i32) {
    %c0_i32 = arith.constant 0 : i32
    return %arg0, %arg2 : i32, i32
  }
  func.func @transform_1(%arg0: i32, %arg1: i32, %arg2: i32) -> (i32, i32) {
    %c0_i32 = arith.constant 0 : i32
    return %arg2, %arg1 : i32, i32
  }
  func.func @transform_2(%arg0: i32, %arg1: i32, %arg2: i32) -> (i32, i32) {
    %c0_i32 = arith.constant 0 : i32
    %c0_i32_0 = arith.constant 0 : i32
    return %c0_i32, %arg1 : i32, i32
  }
  func.func @transform_3(%arg0: i32, %arg1: i32, %arg2: i32) -> (i32, i32) {
    %c0_i32 = arith.constant 0 : i32
    %c0_i32_0 = arith.constant 0 : i32
    return %c0_i32, %arg1 : i32, i32
  }
  func.func @transform_4(%arg0: i32, %arg1: i32, %arg2: i32) -> (i32, i32) {
    %c0_i32 = arith.constant 0 : i32
    return %arg0, %arg1 : i32, i32
  }
  func.func @transform_5(%arg0: i32, %arg1: i32, %arg2: i32) -> (i32, i32) {
    %c0_i32 = arith.constant 0 : i32
    return %arg0, %arg1 : i32, i32
  }
}

module attributes {stable_mosaic.version = 11 : i64} {
  func.func @_affine_relu_kernel(%arg0: i32, %arg1: memref<128x128xf32, #tpu.memory_space<vmem>>, %arg2: memref<1x128xf32, #tpu.memory_space<vmem>>, %arg3: memref<1x128xf32, #tpu.memory_space<vmem>>, %arg4: memref<128x128xf32, #tpu.memory_space<vmem>>) attributes {dimension_semantics = [#tpu.dimension_semantics<parallel>], iteration_bounds = array<i64: 1>, scalar_prefetch = 0 : i64, scratch_operands = 0 : i64, tpu.core_type = #tpu.core_type<tc>, window_params = [{transform_indices = @transform_0, window_bounds = array<i64: 128, 128>}, {pipeline_mode = #tpu.pipeline_mode<synchronous>, transform_indices = @transform_1, window_bounds = array<i64: 1, 128>}, {pipeline_mode = #tpu.pipeline_mode<synchronous>, transform_indices = @transform_2, window_bounds = array<i64: 1, 128>}, {transform_indices = @transform_3, window_bounds = array<i64: 128, 128>}]} {
    %c0 = arith.constant 0 : index
    %c0_0 = arith.constant 0 : index
    %0 = vector.load %arg1[%c0, %c0_0] : memref<128x128xf32, #tpu.memory_space<vmem>>, vector<128x128xf32>
    %c0_1 = arith.constant 0 : index
    %c0_2 = arith.constant 0 : index
    %1 = vector.load %arg2[%c0_1, %c0_2] : memref<1x128xf32, #tpu.memory_space<vmem>>, vector<1x128xf32>
    %2 = vector.broadcast %1 : vector<1x128xf32> to vector<128x128xf32>
    %3 = arith.mulf %0, %2 : vector<128x128xf32>
    %c0_3 = arith.constant 0 : index
    %c0_4 = arith.constant 0 : index
    %4 = vector.load %arg3[%c0_3, %c0_4] : memref<1x128xf32, #tpu.memory_space<vmem>>, vector<1x128xf32>
    %5 = vector.broadcast %4 : vector<1x128xf32> to vector<128x128xf32>
    %6 = arith.addf %3, %5 : vector<128x128xf32>
    %cst = arith.constant 0.000000e+00 : f32
    %7 = vector.broadcast %cst : f32 to vector<128x128xf32>
    %8 = arith.maximumf %6, %7 : vector<128x128xf32>
    %c0_5 = arith.constant 0 : index
    %c0_6 = arith.constant 0 : index
    %9 = vector.load %arg4[%c0_5, %c0_6] : memref<128x128xf32, #tpu.memory_space<vmem>>, vector<128x128xf32>
    tpu.vector_store %arg4[%c0_5, %c0_6], %8 {strides = array<i32>} : memref<128x128xf32, #tpu.memory_space<vmem>>, vector<128x128xf32>,
    return
  }
  func.func @transform_0(%arg0: i32) -> (i32, i32) {
    %c0_i32 = arith.constant 0 : i32
    %c0_i32_0 = arith.constant 0 : i32
    return %arg0, %c0_i32 : i32, i32
  }
  func.func @transform_1(%arg0: i32) -> (i32, i32) {
    %c0_i32 = arith.constant 0 : i32
    %c0_i32_0 = arith.constant 0 : i32
    %c0_i32_1 = arith.constant 0 : i32
    return %c0_i32, %c0_i32_0 : i32, i32
  }
  func.func @transform_2(%arg0: i32) -> (i32, i32) {
    %c0_i32 = arith.constant 0 : i32
    %c0_i32_0 = arith.constant 0 : i32
    %c0_i32_1 = arith.constant 0 : i32
    return %c0_i32, %c0_i32_0 : i32, i32
  }
  func.func @transform_3(%arg0: i32) -> (i32, i32) {
    %c0_i32 = arith.constant 0 : i32
    %c0_i32_0 = arith.constant 0 : i32
    return %arg0, %c0_i32 : i32, i32
  }
}

module attributes {stable_mosaic.version = 11 : i64} {
  func.func @_mm_affine_kernel(%arg0: i32, %arg1: i32, %arg2: i32, %arg3: memref<256x256xbf16, #tpu.memory_space<vmem>>, %arg4: memref<256x128xbf16, #tpu.memory_space<vmem>>, %arg5: memref<1x128xf32, #tpu.memory_space<vmem>>, %arg6: memref<1x128xf32, #tpu.memory_space<vmem>>, %arg7: memref<256x128xf32, #tpu.memory_space<vmem>>, %arg8: memref<256x128xf32, #tpu.memory_space<vmem>>) attributes {dimension_semantics = [#tpu.dimension_semantics<parallel>, #tpu.dimension_semantics<parallel>, #tpu.dimension_semantics<arbitrary>], iteration_bounds = array<i64: 1, 1, 1>, scalar_prefetch = 0 : i64, scratch_operands = 1 : i64, tpu.core_type = #tpu.core_type<tc>, window_params = [{transform_indices = @transform_0, window_bounds = array<i64: 256, 256>}, {transform_indices = @transform_1, window_bounds = array<i64: 256, 128>}, {transform_indices = @transform_2, window_bounds = array<i64: 1, 128>}, {transform_indices = @transform_3, window_bounds = array<i64: 1, 128>}, {transform_indices = @transform_4, window_bounds = array<i64: 256, 128>}]} {
    %c0_i32 = arith.constant 0 : i32
    %0 = arith.cmpi eq, %arg2, %c0_i32 : i32
    %1 = arith.extui %0 : i1 to i32
    %c0_i32_0 = arith.constant 0 : i32
    %2 = arith.cmpi ne, %1, %c0_i32_0 : i32
    scf.if %2 {
      %cst_10 = arith.constant 0.000000e+00 : f32
      %12 = vector.broadcast %cst_10 : f32 to vector<256x128xf32>
      %c0_11 = arith.constant 0 : index
      %c0_12 = arith.constant 0 : index
      %13 = vector.load %arg8[%c0_11, %c0_12] : memref<256x128xf32, #tpu.memory_space<vmem>>, vector<256x128xf32>
      tpu.vector_store %arg8[%c0_11, %c0_12], %12 {strides = array<i32>} : memref<256x128xf32, #tpu.memory_space<vmem>>, vector<256x128xf32>,
    } else {
    }
    %c0 = arith.constant 0 : index
    %c0_1 = arith.constant 0 : index
    %3 = vector.load %arg8[%c0, %c0_1] : memref<256x128xf32, #tpu.memory_space<vmem>>, vector<256x128xf32>
    %c0_2 = arith.constant 0 : index
    %c0_3 = arith.constant 0 : index
    %4 = vector.load %arg3[%c0_2, %c0_3] : memref<256x256xbf16, #tpu.memory_space<vmem>>, vector<256x256xbf16>
    %c0_4 = arith.constant 0 : index
    %c0_5 = arith.constant 0 : index
    %5 = vector.load %arg4[%c0_4, %c0_5] : memref<256x128xbf16, #tpu.memory_space<vmem>>, vector<256x128xbf16>
    %cst = arith.constant dense<0.000000e+00> : vector<256x128xf32>
    %6 = tpu.matmul %4, %5, %cst {dimension_numbers = #tpu.dot_dimension_numbers<[1], [0], [0], [1], [0, 0, 1, 1], [], []>} : vector<256x256xbf16>, vector<256x128xbf16>, vector<256x128xf32> -> vector<256x128xf32>
    %7 = arith.addf %3, %6 : vector<256x128xf32>
    %c0_6 = arith.constant 0 : index
    %c0_7 = arith.constant 0 : index
    %8 = vector.load %arg8[%c0_6, %c0_7] : memref<256x128xf32, #tpu.memory_space<vmem>>, vector<256x128xf32>
    tpu.vector_store %arg8[%c0_6, %c0_7], %7 {strides = array<i32>} : memref<256x128xf32, #tpu.memory_space<vmem>>, vector<256x128xf32>,
    %c0_i32_8 = arith.constant 0 : i32
    %9 = arith.cmpi eq, %arg2, %c0_i32_8 : i32
    %10 = arith.extui %9 : i1 to i32
    %c0_i32_9 = arith.constant 0 : i32
    %11 = arith.cmpi ne, %10, %c0_i32_9 : i32
    scf.if %11 {
      %c0_10 = arith.constant 0 : index
      %c0_11 = arith.constant 0 : index
      %12 = vector.load %arg8[%c0_10, %c0_11] : memref<256x128xf32, #tpu.memory_space<vmem>>, vector<256x128xf32>
      %c0_12 = arith.constant 0 : index
      %c0_13 = arith.constant 0 : index
      %13 = vector.load %arg5[%c0_12, %c0_13] : memref<1x128xf32, #tpu.memory_space<vmem>>, vector<1x128xf32>
      %14 = vector.broadcast %13 : vector<1x128xf32> to vector<256x128xf32>
      %15 = arith.mulf %12, %14 : vector<256x128xf32>
      %c0_14 = arith.constant 0 : index
      %c0_15 = arith.constant 0 : index
      %16 = vector.load %arg6[%c0_14, %c0_15] : memref<1x128xf32, #tpu.memory_space<vmem>>, vector<1x128xf32>
      %17 = vector.broadcast %16 : vector<1x128xf32> to vector<256x128xf32>
      %18 = arith.addf %15, %17 : vector<256x128xf32>
      %cst_16 = arith.constant 0.000000e+00 : f32
      %19 = vector.broadcast %cst_16 : f32 to vector<256x128xf32>
      %20 = arith.maximumf %18, %19 : vector<256x128xf32>
      %c0_17 = arith.constant 0 : index
      %c0_18 = arith.constant 0 : index
      %21 = vector.load %arg7[%c0_17, %c0_18] : memref<256x128xf32, #tpu.memory_space<vmem>>, vector<256x128xf32>
      tpu.vector_store %arg7[%c0_17, %c0_18], %20 {strides = array<i32>} : memref<256x128xf32, #tpu.memory_space<vmem>>, vector<256x128xf32>,
    } else {
    }
    return
  }
  func.func @transform_0(%arg0: i32, %arg1: i32, %arg2: i32) -> (i32, i32) {
    %c0_i32 = arith.constant 0 : i32
    return %arg0, %arg2 : i32, i32
  }
  func.func @transform_1(%arg0: i32, %arg1: i32, %arg2: i32) -> (i32, i32) {
    %c0_i32 = arith.constant 0 : i32
    return %arg2, %arg1 : i32, i32
  }
  func.func @transform_2(%arg0: i32, %arg1: i32, %arg2: i32) -> (i32, i32) {
    %c0_i32 = arith.constant 0 : i32
    %c0_i32_0 = arith.constant 0 : i32
    return %c0_i32, %arg1 : i32, i32
  }
  func.func @transform_3(%arg0: i32, %arg1: i32, %arg2: i32) -> (i32, i32) {
    %c0_i32 = arith.constant 0 : i32
    %c0_i32_0 = arith.constant 0 : i32
    return %c0_i32, %arg1 : i32, i32
  }
  func.func @transform_4(%arg0: i32, %arg1: i32, %arg2: i32) -> (i32, i32) {
    %c0_i32 = arith.constant 0 : i32
    return %arg0, %arg1 : i32, i32
  }
}

module attributes {stable_mosaic.version = 11 : i64} {
  func.func @_mm_affine_kernel(%arg0: i32, %arg1: i32, %arg2: i32, %arg3: memref<256x128xbf16, #tpu.memory_space<vmem>>, %arg4: memref<128x128xbf16, #tpu.memory_space<vmem>>, %arg5: memref<1x128xf32, #tpu.memory_space<vmem>>, %arg6: memref<1x128xf32, #tpu.memory_space<vmem>>, %arg7: memref<256x128xf32, #tpu.memory_space<vmem>>, %arg8: memref<256x128xf32, #tpu.memory_space<vmem>>) attributes {dimension_semantics = [#tpu.dimension_semantics<parallel>, #tpu.dimension_semantics<parallel>, #tpu.dimension_semantics<arbitrary>], iteration_bounds = array<i64: 1, 1, 1>, scalar_prefetch = 0 : i64, scratch_operands = 1 : i64, tpu.core_type = #tpu.core_type<tc>, window_params = [{transform_indices = @transform_0, window_bounds = array<i64: 256, 128>}, {transform_indices = @transform_1, window_bounds = array<i64: 128, 128>}, {transform_indices = @transform_2, window_bounds = array<i64: 1, 128>}, {transform_indices = @transform_3, window_bounds = array<i64: 1, 128>}, {transform_indices = @transform_4, window_bounds = array<i64: 256, 128>}]} {
    %c0_i32 = arith.constant 0 : i32
    %0 = arith.cmpi eq, %arg2, %c0_i32 : i32
    %1 = arith.extui %0 : i1 to i32
    %c0_i32_0 = arith.constant 0 : i32
    %2 = arith.cmpi ne, %1, %c0_i32_0 : i32
    scf.if %2 {
      %cst_10 = arith.constant 0.000000e+00 : f32
      %12 = vector.broadcast %cst_10 : f32 to vector<256x128xf32>
      %c0_11 = arith.constant 0 : index
      %c0_12 = arith.constant 0 : index
      %13 = vector.load %arg8[%c0_11, %c0_12] : memref<256x128xf32, #tpu.memory_space<vmem>>, vector<256x128xf32>
      tpu.vector_store %arg8[%c0_11, %c0_12], %12 {strides = array<i32>} : memref<256x128xf32, #tpu.memory_space<vmem>>, vector<256x128xf32>,
    } else {
    }
    %c0 = arith.constant 0 : index
    %c0_1 = arith.constant 0 : index
    %3 = vector.load %arg8[%c0, %c0_1] : memref<256x128xf32, #tpu.memory_space<vmem>>, vector<256x128xf32>
    %c0_2 = arith.constant 0 : index
    %c0_3 = arith.constant 0 : index
    %4 = vector.load %arg3[%c0_2, %c0_3] : memref<256x128xbf16, #tpu.memory_space<vmem>>, vector<256x128xbf16>
    %c0_4 = arith.constant 0 : index
    %c0_5 = arith.constant 0 : index
    %5 = vector.load %arg4[%c0_4, %c0_5] : memref<128x128xbf16, #tpu.memory_space<vmem>>, vector<128x128xbf16>
    %cst = arith.constant dense<0.000000e+00> : vector<256x128xf32>
    %6 = tpu.matmul %4, %5, %cst {dimension_numbers = #tpu.dot_dimension_numbers<[1], [0], [0], [1], [0, 0, 1, 1], [], []>} : vector<256x128xbf16>, vector<128x128xbf16>, vector<256x128xf32> -> vector<256x128xf32>
    %7 = arith.addf %3, %6 : vector<256x128xf32>
    %c0_6 = arith.constant 0 : index
    %c0_7 = arith.constant 0 : index
    %8 = vector.load %arg8[%c0_6, %c0_7] : memref<256x128xf32, #tpu.memory_space<vmem>>, vector<256x128xf32>
    tpu.vector_store %arg8[%c0_6, %c0_7], %7 {strides = array<i32>} : memref<256x128xf32, #tpu.memory_space<vmem>>, vector<256x128xf32>,
    %c0_i32_8 = arith.constant 0 : i32
    %9 = arith.cmpi eq, %arg2, %c0_i32_8 : i32
    %10 = arith.extui %9 : i1 to i32
    %c0_i32_9 = arith.constant 0 : i32
    %11 = arith.cmpi ne, %10, %c0_i32_9 : i32
    scf.if %11 {
      %c0_10 = arith.constant 0 : index
      %c0_11 = arith.constant 0 : index
      %12 = vector.load %arg8[%c0_10, %c0_11] : memref<256x128xf32, #tpu.memory_space<vmem>>, vector<256x128xf32>
      %c0_12 = arith.constant 0 : index
      %c0_13 = arith.constant 0 : index
      %13 = vector.load %arg5[%c0_12, %c0_13] : memref<1x128xf32, #tpu.memory_space<vmem>>, vector<1x128xf32>
      %14 = vector.broadcast %13 : vector<1x128xf32> to vector<256x128xf32>
      %15 = arith.mulf %12, %14 : vector<256x128xf32>
      %c0_14 = arith.constant 0 : index
      %c0_15 = arith.constant 0 : index
      %16 = vector.load %arg6[%c0_14, %c0_15] : memref<1x128xf32, #tpu.memory_space<vmem>>, vector<1x128xf32>
      %17 = vector.broadcast %16 : vector<1x128xf32> to vector<256x128xf32>
      %18 = arith.addf %15, %17 : vector<256x128xf32>
      %c0_16 = arith.constant 0 : index
      %c0_17 = arith.constant 0 : index
      %19 = vector.load %arg7[%c0_16, %c0_17] : memref<256x128xf32, #tpu.memory_space<vmem>>, vector<256x128xf32>
      tpu.vector_store %arg7[%c0_16, %c0_17], %18 {strides = array<i32>} : memref<256x128xf32, #tpu.memory_space<vmem>>, vector<256x128xf32>,
    } else {
    }
    return
  }
  func.func @transform_0(%arg0: i32, %arg1: i32, %arg2: i32) -> (i32, i32) {
    %c0_i32 = arith.constant 0 : i32
    return %arg0, %arg2 : i32, i32
  }
  func.func @transform_1(%arg0: i32, %arg1: i32, %arg2: i32) -> (i32, i32) {
    %c0_i32 = arith.constant 0 : i32
    return %arg2, %arg1 : i32, i32
  }
  func.func @transform_2(%arg0: i32, %arg1: i32, %arg2: i32) -> (i32, i32) {
    %c0_i32 = arith.constant 0 : i32
    %c0_i32_0 = arith.constant 0 : i32
    return %c0_i32, %arg1 : i32, i32
  }
  func.func @transform_3(%arg0: i32, %arg1: i32, %arg2: i32) -> (i32, i32) {
    %c0_i32 = arith.constant 0 : i32
    %c0_i32_0 = arith.constant 0 : i32
    return %c0_i32, %arg1 : i32, i32
  }
  func.func @transform_4(%arg0: i32, %arg1: i32, %arg2: i32) -> (i32, i32) {
    %c0_i32 = arith.constant 0 : i32
    return %arg0, %arg1 : i32, i32
  }
}

module attributes {stable_mosaic.version = 11 : i64} {
  func.func @_mm_affine_res_kernel(%arg0: i32, %arg1: i32, %arg2: i32, %arg3: memref<256x384xbf16, #tpu.memory_space<vmem>>, %arg4: memref<384x128xbf16, #tpu.memory_space<vmem>>, %arg5: memref<1x128xf32, #tpu.memory_space<vmem>>, %arg6: memref<1x128xf32, #tpu.memory_space<vmem>>, %arg7: memref<256x128xf32, #tpu.memory_space<vmem>>, %arg8: memref<256x128xf32, #tpu.memory_space<vmem>>, %arg9: memref<256x128xf32, #tpu.memory_space<vmem>>) attributes {dimension_semantics = [#tpu.dimension_semantics<parallel>, #tpu.dimension_semantics<parallel>, #tpu.dimension_semantics<arbitrary>], iteration_bounds = array<i64: 1, 1, 1>, scalar_prefetch = 0 : i64, scratch_operands = 1 : i64, tpu.core_type = #tpu.core_type<tc>, window_params = [{transform_indices = @transform_0, window_bounds = array<i64: 256, 384>}, {transform_indices = @transform_1, window_bounds = array<i64: 384, 128>}, {transform_indices = @transform_2, window_bounds = array<i64: 1, 128>}, {transform_indices = @transform_3, window_bounds = array<i64: 1, 128>}, {transform_indices = @transform_4, window_bounds = array<i64: 256, 128>}, {transform_indices = @transform_5, window_bounds = array<i64: 256, 128>}]} {
    %c0_i32 = arith.constant 0 : i32
    %0 = arith.cmpi eq, %arg2, %c0_i32 : i32
    %1 = arith.extui %0 : i1 to i32
    %c0_i32_0 = arith.constant 0 : i32
    %2 = arith.cmpi ne, %1, %c0_i32_0 : i32
    scf.if %2 {
      %cst_10 = arith.constant 0.000000e+00 : f32
      %12 = vector.broadcast %cst_10 : f32 to vector<256x128xf32>
      %c0_11 = arith.constant 0 : index
      %c0_12 = arith.constant 0 : index
      %13 = vector.load %arg9[%c0_11, %c0_12] : memref<256x128xf32, #tpu.memory_space<vmem>>, vector<256x128xf32>
      tpu.vector_store %arg9[%c0_11, %c0_12], %12 {strides = array<i32>} : memref<256x128xf32, #tpu.memory_space<vmem>>, vector<256x128xf32>,
    } else {
    }
    %c0 = arith.constant 0 : index
    %c0_1 = arith.constant 0 : index
    %3 = vector.load %arg9[%c0, %c0_1] : memref<256x128xf32, #tpu.memory_space<vmem>>, vector<256x128xf32>
    %c0_2 = arith.constant 0 : index
    %c0_3 = arith.constant 0 : index
    %4 = vector.load %arg3[%c0_2, %c0_3] : memref<256x384xbf16, #tpu.memory_space<vmem>>, vector<256x384xbf16>
    %c0_4 = arith.constant 0 : index
    %c0_5 = arith.constant 0 : index
    %5 = vector.load %arg4[%c0_4, %c0_5] : memref<384x128xbf16, #tpu.memory_space<vmem>>, vector<384x128xbf16>
    %cst = arith.constant dense<0.000000e+00> : vector<256x128xf32>
    %6 = tpu.matmul %4, %5, %cst {dimension_numbers = #tpu.dot_dimension_numbers<[1], [0], [0], [1], [0, 0, 1, 1], [], []>} : vector<256x384xbf16>, vector<384x128xbf16>, vector<256x128xf32> -> vector<256x128xf32>
    %7 = arith.addf %3, %6 : vector<256x128xf32>
    %c0_6 = arith.constant 0 : index
    %c0_7 = arith.constant 0 : index
    %8 = vector.load %arg9[%c0_6, %c0_7] : memref<256x128xf32, #tpu.memory_space<vmem>>, vector<256x128xf32>
    tpu.vector_store %arg9[%c0_6, %c0_7], %7 {strides = array<i32>} : memref<256x128xf32, #tpu.memory_space<vmem>>, vector<256x128xf32>,
    %c0_i32_8 = arith.constant 0 : i32
    %9 = arith.cmpi eq, %arg2, %c0_i32_8 : i32
    %10 = arith.extui %9 : i1 to i32
    %c0_i32_9 = arith.constant 0 : i32
    %11 = arith.cmpi ne, %10, %c0_i32_9 : i32
    scf.if %11 {
      %c0_10 = arith.constant 0 : index
      %c0_11 = arith.constant 0 : index
      %12 = vector.load %arg9[%c0_10, %c0_11] : memref<256x128xf32, #tpu.memory_space<vmem>>, vector<256x128xf32>
      %c0_12 = arith.constant 0 : index
      %c0_13 = arith.constant 0 : index
      %13 = vector.load %arg5[%c0_12, %c0_13] : memref<1x128xf32, #tpu.memory_space<vmem>>, vector<1x128xf32>
      %14 = vector.broadcast %13 : vector<1x128xf32> to vector<256x128xf32>
      %15 = arith.mulf %12, %14 : vector<256x128xf32>
      %c0_14 = arith.constant 0 : index
      %c0_15 = arith.constant 0 : index
      %16 = vector.load %arg6[%c0_14, %c0_15] : memref<1x128xf32, #tpu.memory_space<vmem>>, vector<1x128xf32>
      %17 = vector.broadcast %16 : vector<1x128xf32> to vector<256x128xf32>
      %18 = arith.addf %15, %17 : vector<256x128xf32>
      %c0_16 = arith.constant 0 : index
      %c0_17 = arith.constant 0 : index
      %19 = vector.load %arg7[%c0_16, %c0_17] : memref<256x128xf32, #tpu.memory_space<vmem>>, vector<256x128xf32>
      %20 = arith.addf %18, %19 : vector<256x128xf32>
      %c0_18 = arith.constant 0 : index
      %c0_19 = arith.constant 0 : index
      %21 = vector.load %arg8[%c0_18, %c0_19] : memref<256x128xf32, #tpu.memory_space<vmem>>, vector<256x128xf32>
      tpu.vector_store %arg8[%c0_18, %c0_19], %20 {strides = array<i32>} : memref<256x128xf32, #tpu.memory_space<vmem>>, vector<256x128xf32>,
    } else {
    }
    return
  }
  func.func @transform_0(%arg0: i32, %arg1: i32, %arg2: i32) -> (i32, i32) {
    %c0_i32 = arith.constant 0 : i32
    return %arg0, %arg2 : i32, i32
  }
  func.func @transform_1(%arg0: i32, %arg1: i32, %arg2: i32) -> (i32, i32) {
    %c0_i32 = arith.constant 0 : i32
    return %arg2, %arg1 : i32, i32
  }
  func.func @transform_2(%arg0: i32, %arg1: i32, %arg2: i32) -> (i32, i32) {
    %c0_i32 = arith.constant 0 : i32
    %c0_i32_0 = arith.constant 0 : i32
    return %c0_i32, %arg1 : i32, i32
  }
  func.func @transform_3(%arg0: i32, %arg1: i32, %arg2: i32) -> (i32, i32) {
    %c0_i32 = arith.constant 0 : i32
    %c0_i32_0 = arith.constant 0 : i32
    return %c0_i32, %arg1 : i32, i32
  }
  func.func @transform_4(%arg0: i32, %arg1: i32, %arg2: i32) -> (i32, i32) {
    %c0_i32 = arith.constant 0 : i32
    return %arg0, %arg1 : i32, i32
  }
  func.func @transform_5(%arg0: i32, %arg1: i32, %arg2: i32) -> (i32, i32) {
    %c0_i32 = arith.constant 0 : i32
    return %arg0, %arg1 : i32, i32
  }
}

module attributes {stable_mosaic.version = 11 : i64} {
  func.func @_mm_affine_kernel(%arg0: i32, %arg1: i32, %arg2: i32, %arg3: memref<64x384xbf16, #tpu.memory_space<vmem>>, %arg4: memref<384x256xbf16, #tpu.memory_space<vmem>>, %arg5: memref<1x256xf32, #tpu.memory_space<vmem>>, %arg6: memref<1x256xf32, #tpu.memory_space<vmem>>, %arg7: memref<64x256xf32, #tpu.memory_space<vmem>>, %arg8: memref<64x256xf32, #tpu.memory_space<vmem>>) attributes {dimension_semantics = [#tpu.dimension_semantics<parallel>, #tpu.dimension_semantics<parallel>, #tpu.dimension_semantics<arbitrary>], iteration_bounds = array<i64: 1, 2, 1>, scalar_prefetch = 0 : i64, scratch_operands = 1 : i64, tpu.core_type = #tpu.core_type<tc>, window_params = [{transform_indices = @transform_0, window_bounds = array<i64: 64, 384>}, {transform_indices = @transform_1, window_bounds = array<i64: 384, 256>}, {transform_indices = @transform_2, window_bounds = array<i64: 1, 256>}, {transform_indices = @transform_3, window_bounds = array<i64: 1, 256>}, {transform_indices = @transform_4, window_bounds = array<i64: 64, 256>}]} {
    %c0_i32 = arith.constant 0 : i32
    %0 = arith.cmpi eq, %arg2, %c0_i32 : i32
    %1 = arith.extui %0 : i1 to i32
    %c0_i32_0 = arith.constant 0 : i32
    %2 = arith.cmpi ne, %1, %c0_i32_0 : i32
    scf.if %2 {
      %cst_10 = arith.constant 0.000000e+00 : f32
      %12 = vector.broadcast %cst_10 : f32 to vector<64x256xf32>
      %c0_11 = arith.constant 0 : index
      %c0_12 = arith.constant 0 : index
      %13 = vector.load %arg8[%c0_11, %c0_12] : memref<64x256xf32, #tpu.memory_space<vmem>>, vector<64x256xf32>
      tpu.vector_store %arg8[%c0_11, %c0_12], %12 {strides = array<i32>} : memref<64x256xf32, #tpu.memory_space<vmem>>, vector<64x256xf32>,
    } else {
    }
    %c0 = arith.constant 0 : index
    %c0_1 = arith.constant 0 : index
    %3 = vector.load %arg8[%c0, %c0_1] : memref<64x256xf32, #tpu.memory_space<vmem>>, vector<64x256xf32>
    %c0_2 = arith.constant 0 : index
    %c0_3 = arith.constant 0 : index
    %4 = vector.load %arg3[%c0_2, %c0_3] : memref<64x384xbf16, #tpu.memory_space<vmem>>, vector<64x384xbf16>
    %c0_4 = arith.constant 0 : index
    %c0_5 = arith.constant 0 : index
    %5 = vector.load %arg4[%c0_4, %c0_5] : memref<384x256xbf16, #tpu.memory_space<vmem>>, vector<384x256xbf16>
    %cst = arith.constant dense<0.000000e+00> : vector<64x256xf32>
    %6 = tpu.matmul %4, %5, %cst {dimension_numbers = #tpu.dot_dimension_numbers<[1], [0], [0], [1], [0, 0, 1, 1], [], []>} : vector<64x384xbf16>, vector<384x256xbf16>, vector<64x256xf32> -> vector<64x256xf32>
    %7 = arith.addf %3, %6 : vector<64x256xf32>
    %c0_6 = arith.constant 0 : index
    %c0_7 = arith.constant 0 : index
    %8 = vector.load %arg8[%c0_6, %c0_7] : memref<64x256xf32, #tpu.memory_space<vmem>>, vector<64x256xf32>
    tpu.vector_store %arg8[%c0_6, %c0_7], %7 {strides = array<i32>} : memref<64x256xf32, #tpu.memory_space<vmem>>, vector<64x256xf32>,
    %c0_i32_8 = arith.constant 0 : i32
    %9 = arith.cmpi eq, %arg2, %c0_i32_8 : i32
    %10 = arith.extui %9 : i1 to i32
    %c0_i32_9 = arith.constant 0 : i32
    %11 = arith.cmpi ne, %10, %c0_i32_9 : i32
    scf.if %11 {
      %c0_10 = arith.constant 0 : index
      %c0_11 = arith.constant 0 : index
      %12 = vector.load %arg8[%c0_10, %c0_11] : memref<64x256xf32, #tpu.memory_space<vmem>>, vector<64x256xf32>
      %c0_12 = arith.constant 0 : index
      %c0_13 = arith.constant 0 : index
      %13 = vector.load %arg5[%c0_12, %c0_13] : memref<1x256xf32, #tpu.memory_space<vmem>>, vector<1x256xf32>
      %14 = vector.broadcast %13 : vector<1x256xf32> to vector<64x256xf32>
      %15 = arith.mulf %12, %14 : vector<64x256xf32>
      %c0_14 = arith.constant 0 : index
      %c0_15 = arith.constant 0 : index
      %16 = vector.load %arg6[%c0_14, %c0_15] : memref<1x256xf32, #tpu.memory_space<vmem>>, vector<1x256xf32>
      %17 = vector.broadcast %16 : vector<1x256xf32> to vector<64x256xf32>
      %18 = arith.addf %15, %17 : vector<64x256xf32>
      %c0_16 = arith.constant 0 : index
      %c0_17 = arith.constant 0 : index
      %19 = vector.load %arg7[%c0_16, %c0_17] : memref<64x256xf32, #tpu.memory_space<vmem>>, vector<64x256xf32>
      tpu.vector_store %arg7[%c0_16, %c0_17], %18 {strides = array<i32>} : memref<64x256xf32, #tpu.memory_space<vmem>>, vector<64x256xf32>,
    } else {
    }
    return
  }
  func.func @transform_0(%arg0: i32, %arg1: i32, %arg2: i32) -> (i32, i32) {
    %c0_i32 = arith.constant 0 : i32
    return %arg0, %arg2 : i32, i32
  }
  func.func @transform_1(%arg0: i32, %arg1: i32, %arg2: i32) -> (i32, i32) {
    %c0_i32 = arith.constant 0 : i32
    return %arg2, %arg1 : i32, i32
  }
  func.func @transform_2(%arg0: i32, %arg1: i32, %arg2: i32) -> (i32, i32) {
    %c0_i32 = arith.constant 0 : i32
    %c0_i32_0 = arith.constant 0 : i32
    return %c0_i32, %arg1 : i32, i32
  }
  func.func @transform_3(%arg0: i32, %arg1: i32, %arg2: i32) -> (i32, i32) {
    %c0_i32 = arith.constant 0 : i32
    %c0_i32_0 = arith.constant 0 : i32
    return %c0_i32, %arg1 : i32, i32
  }
  func.func @transform_4(%arg0: i32, %arg1: i32, %arg2: i32) -> (i32, i32) {
    %c0_i32 = arith.constant 0 : i32
    return %arg0, %arg1 : i32, i32
  }
}

module attributes {stable_mosaic.version = 11 : i64} {
  func.func @_lstm_fused_kernel(%arg0: i32, %arg1: i32, %arg2: memref<32x384xbf16, #tpu.memory_space<vmem>>, %arg3: memref<384x512xbf16, #tpu.memory_space<vmem>>, %arg4: memref<1x512xf32, #tpu.memory_space<vmem>>, %arg5: memref<32x512xf32, #tpu.memory_space<vmem>>, %arg6: memref<32x128xf32, #tpu.memory_space<vmem>>, %arg7: memref<32x128xf32, #tpu.memory_space<vmem>>, %arg8: memref<32x128xf32, #tpu.memory_space<vmem>>, %arg9: memref<32x512xf32, #tpu.memory_space<vmem>>) attributes {dimension_semantics = [#tpu.dimension_semantics<parallel>, #tpu.dimension_semantics<arbitrary>], iteration_bounds = array<i64: 1, 3>, scalar_prefetch = 0 : i64, scratch_operands = 1 : i64, tpu.core_type = #tpu.core_type<tc>, window_params = [{transform_indices = @transform_0, window_bounds = array<i64: 32, 384>}, {transform_indices = @transform_1, window_bounds = array<i64: 384, 512>}, {pipeline_mode = #tpu.pipeline_mode<synchronous>, transform_indices = @transform_2, window_bounds = array<i64: 1, 512>}, {transform_indices = @transform_3, window_bounds = array<i64: 32, 512>}, {transform_indices = @transform_4, window_bounds = array<i64: 32, 128>}, {transform_indices = @transform_5, window_bounds = array<i64: 32, 128>}, {transform_indices = @transform_6, window_bounds = array<i64: 32, 128>}]} {
    %c0_i32 = arith.constant 0 : i32
    %0 = arith.cmpi eq, %arg1, %c0_i32 : i32
    %1 = arith.extui %0 : i1 to i32
    %c0_i32_0 = arith.constant 0 : i32
    %2 = arith.cmpi ne, %1, %c0_i32_0 : i32
    scf.if %2 {
      %cst_9 = arith.constant 0.000000e+00 : f32
      %12 = vector.broadcast %cst_9 : f32 to vector<32x512xf32>
      %c0_10 = arith.constant 0 : index
      %c0_11 = arith.constant 0 : index
      %13 = vector.load %arg9[%c0_10, %c0_11] : memref<32x512xf32, #tpu.memory_space<vmem>>, vector<32x512xf32>
      tpu.vector_store %arg9[%c0_10, %c0_11], %12 {strides = array<i32>} : memref<32x512xf32, #tpu.memory_space<vmem>>, vector<32x512xf32>,
    } else {
    }
    %c0 = arith.constant 0 : index
    %c0_1 = arith.constant 0 : index
    %3 = vector.load %arg9[%c0, %c0_1] : memref<32x512xf32, #tpu.memory_space<vmem>>, vector<32x512xf32>
    %c0_2 = arith.constant 0 : index
    %c0_3 = arith.constant 0 : index
    %4 = vector.load %arg2[%c0_2, %c0_3] : memref<32x384xbf16, #tpu.memory_space<vmem>>, vector<32x384xbf16>
    %c0_4 = arith.constant 0 : index
    %c0_5 = arith.constant 0 : index
    %5 = vector.load %arg3[%c0_4, %c0_5] : memref<384x512xbf16, #tpu.memory_space<vmem>>, vector<384x512xbf16>
    %cst = arith.constant dense<0.000000e+00> : vector<32x512xf32>
    %6 = tpu.matmul %4, %5, %cst {dimension_numbers = #tpu.dot_dimension_numbers<[1], [0], [0], [1], [0, 0, 1, 1], [], []>} : vector<32x384xbf16>, vector<384x512xbf16>, vector<32x512xf32> -> vector<32x512xf32>
    %7 = arith.addf %3, %6 : vector<32x512xf32>
    %c0_6 = arith.constant 0 : index
    %c0_7 = arith.constant 0 : index
    %8 = vector.load %arg9[%c0_6, %c0_7] : memref<32x512xf32, #tpu.memory_space<vmem>>, vector<32x512xf32>
    tpu.vector_store %arg9[%c0_6, %c0_7], %7 {strides = array<i32>} : memref<32x512xf32, #tpu.memory_space<vmem>>, vector<32x512xf32>,
    %c2_i32 = arith.constant 2 : i32
    %9 = arith.cmpi eq, %arg1, %c2_i32 : i32
    %10 = arith.extui %9 : i1 to i32
    %c0_i32_8 = arith.constant 0 : i32
    %11 = arith.cmpi ne, %10, %c0_i32_8 : i32
    scf.if %11 {
      %c0_9 = arith.constant 0 : index
      %c0_10 = arith.constant 0 : index
      %12 = vector.load %arg9[%c0_9, %c0_10] : memref<32x512xf32, #tpu.memory_space<vmem>>, vector<32x512xf32>
      %c0_11 = arith.constant 0 : index
      %c0_12 = arith.constant 0 : index
      %13 = vector.load %arg4[%c0_11, %c0_12] : memref<1x512xf32, #tpu.memory_space<vmem>>, vector<1x512xf32>
      %14 = vector.broadcast %13 : vector<1x512xf32> to vector<32x512xf32>
      %15 = arith.addf %12, %14 : vector<32x512xf32>
      %c0_13 = arith.constant 0 : index
      %c0_14 = arith.constant 0 : index
      %16 = vector.load %arg5[%c0_13, %c0_14] : memref<32x512xf32, #tpu.memory_space<vmem>>, vector<32x512xf32>
      %17 = arith.addf %15, %16 : vector<32x512xf32>
      %18 = vector.extract_strided_slice %17 {offsets = [0, 0], sizes = [32, 128], strides = [1, 1]} : vector<32x512xf32> to vector<32x128xf32>
      %19 = arith.negf %18 : vector<32x128xf32>
      %20 = math.exp %19 : vector<32x128xf32>
      %cst_15 = arith.constant 1.000000e+00 : f32
      %21 = vector.broadcast %cst_15 : f32 to vector<32x128xf32>
      %22 = arith.addf %21, %20 : vector<32x128xf32>
      %23 = arith.divf %21, %22 : vector<32x128xf32>
      %24 = vector.extract_strided_slice %17 {offsets = [0, 128], sizes = [32, 128], strides = [1, 1]} : vector<32x512xf32> to vector<32x128xf32>
      %25 = arith.negf %24 : vector<32x128xf32>
      %26 = math.exp %25 : vector<32x128xf32>
      %cst_16 = arith.constant 1.000000e+00 : f32
      %27 = vector.broadcast %cst_16 : f32 to vector<32x128xf32>
      %28 = arith.addf %27, %26 : vector<32x128xf32>
      %29 = arith.divf %27, %28 : vector<32x128xf32>
      %30 = vector.extract_strided_slice %17 {offsets = [0, 256], sizes = [32, 128], strides = [1, 1]} : vector<32x512xf32> to vector<32x128xf32>
      %31 = arith.negf %30 : vector<32x128xf32>
      %32 = math.exp %31 : vector<32x128xf32>
      %cst_17 = arith.constant 1.000000e+00 : f32
      %33 = vector.broadcast %cst_17 : f32 to vector<32x128xf32>
      %34 = arith.addf %33, %32 : vector<32x128xf32>
      %35 = arith.divf %33, %34 : vector<32x128xf32>
      %36 = vector.extract_strided_slice %17 {offsets = [0, 384], sizes = [32, 128], strides = [1, 1]} : vector<32x512xf32> to vector<32x128xf32>
      %37 = math.tanh %36 : vector<32x128xf32>
      %c0_18 = arith.constant 0 : index
      %c0_19 = arith.constant 0 : index
      %38 = vector.load %arg6[%c0_18, %c0_19] : memref<32x128xf32, #tpu.memory_space<vmem>>, vector<32x128xf32>
      %39 = arith.mulf %29, %38 : vector<32x128xf32>
      %40 = arith.mulf %23, %37 : vector<32x128xf32>
      %41 = arith.addf %39, %40 : vector<32x128xf32>
      %c0_20 = arith.constant 0 : index
      %c0_21 = arith.constant 0 : index
      %42 = vector.load %arg8[%c0_20, %c0_21] : memref<32x128xf32, #tpu.memory_space<vmem>>, vector<32x128xf32>
      tpu.vector_store %arg8[%c0_20, %c0_21], %41 {strides = array<i32>} : memref<32x128xf32, #tpu.memory_space<vmem>>, vector<32x128xf32>,
      %43 = math.tanh %41 : vector<32x128xf32>
      %44 = arith.mulf %35, %43 : vector<32x128xf32>
      %c0_22 = arith.constant 0 : index
      %c0_23 = arith.constant 0 : index
      %45 = vector.load %arg7[%c0_22, %c0_23] : memref<32x128xf32, #tpu.memory_space<vmem>>, vector<32x128xf32>
      tpu.vector_store %arg7[%c0_22, %c0_23], %44 {strides = array<i32>} : memref<32x128xf32, #tpu.memory_space<vmem>>, vector<32x128xf32>,
    } else {
    }
    return
  }
  func.func @transform_0(%arg0: i32, %arg1: i32) -> (i32, i32) {
    %c0_i32 = arith.constant 0 : i32
    return %arg0, %arg1 : i32, i32
  }
  func.func @transform_1(%arg0: i32, %arg1: i32) -> (i32, i32) {
    %c0_i32 = arith.constant 0 : i32
    %c0_i32_0 = arith.constant 0 : i32
    return %arg1, %c0_i32 : i32, i32
  }
  func.func @transform_2(%arg0: i32, %arg1: i32) -> (i32, i32) {
    %c0_i32 = arith.constant 0 : i32
    %c0_i32_0 = arith.constant 0 : i32
    %c0_i32_1 = arith.constant 0 : i32
    return %c0_i32, %c0_i32_0 : i32, i32
  }
  func.func @transform_3(%arg0: i32, %arg1: i32) -> (i32, i32) {
    %c0_i32 = arith.constant 0 : i32
    %c0_i32_0 = arith.constant 0 : i32
    return %arg0, %c0_i32 : i32, i32
  }
  func.func @transform_4(%arg0: i32, %arg1: i32) -> (i32, i32) {
    %c0_i32 = arith.constant 0 : i32
    %c0_i32_0 = arith.constant 0 : i32
    return %arg0, %c0_i32 : i32, i32
  }
  func.func @transform_5(%arg0: i32, %arg1: i32) -> (i32, i32) {
    %c0_i32 = arith.constant 0 : i32
    %c0_i32_0 = arith.constant 0 : i32
    return %arg0, %c0_i32 : i32, i32
  }
  func.func @transform_6(%arg0: i32, %arg1: i32) -> (i32, i32) {
    %c0_i32 = arith.constant 0 : i32
    %c0_i32_0 = arith.constant 0 : i32
    return %arg0, %c0_i32 : i32, i32
  }
}

module attributes {stable_mosaic.version = 11 : i64} {
  func.func @_mm_affine_kernel(%arg0: i32, %arg1: i32, %arg2: i32, %arg3: memref<64x384xbf16, #tpu.memory_space<vmem>>, %arg4: memref<384x256xbf16, #tpu.memory_space<vmem>>, %arg5: memref<1x256xf32, #tpu.memory_space<vmem>>, %arg6: memref<1x256xf32, #tpu.memory_space<vmem>>, %arg7: memref<64x256xf32, #tpu.memory_space<vmem>>, %arg8: memref<64x256xf32, #tpu.memory_space<vmem>>) attributes {dimension_semantics = [#tpu.dimension_semantics<parallel>, #tpu.dimension_semantics<parallel>, #tpu.dimension_semantics<arbitrary>], iteration_bounds = array<i64: 1, 2, 3>, scalar_prefetch = 0 : i64, scratch_operands = 1 : i64, tpu.core_type = #tpu.core_type<tc>, window_params = [{transform_indices = @transform_0, window_bounds = array<i64: 64, 384>}, {transform_indices = @transform_1, window_bounds = array<i64: 384, 256>}, {transform_indices = @transform_2, window_bounds = array<i64: 1, 256>}, {transform_indices = @transform_3, window_bounds = array<i64: 1, 256>}, {transform_indices = @transform_4, window_bounds = array<i64: 64, 256>}]} {
    %c0_i32 = arith.constant 0 : i32
    %0 = arith.cmpi eq, %arg2, %c0_i32 : i32
    %1 = arith.extui %0 : i1 to i32
    %c0_i32_0 = arith.constant 0 : i32
    %2 = arith.cmpi ne, %1, %c0_i32_0 : i32
    scf.if %2 {
      %cst_9 = arith.constant 0.000000e+00 : f32
      %12 = vector.broadcast %cst_9 : f32 to vector<64x256xf32>
      %c0_10 = arith.constant 0 : index
      %c0_11 = arith.constant 0 : index
      %13 = vector.load %arg8[%c0_10, %c0_11] : memref<64x256xf32, #tpu.memory_space<vmem>>, vector<64x256xf32>
      tpu.vector_store %arg8[%c0_10, %c0_11], %12 {strides = array<i32>} : memref<64x256xf32, #tpu.memory_space<vmem>>, vector<64x256xf32>,
    } else {
    }
    %c0 = arith.constant 0 : index
    %c0_1 = arith.constant 0 : index
    %3 = vector.load %arg8[%c0, %c0_1] : memref<64x256xf32, #tpu.memory_space<vmem>>, vector<64x256xf32>
    %c0_2 = arith.constant 0 : index
    %c0_3 = arith.constant 0 : index
    %4 = vector.load %arg3[%c0_2, %c0_3] : memref<64x384xbf16, #tpu.memory_space<vmem>>, vector<64x384xbf16>
    %c0_4 = arith.constant 0 : index
    %c0_5 = arith.constant 0 : index
    %5 = vector.load %arg4[%c0_4, %c0_5] : memref<384x256xbf16, #tpu.memory_space<vmem>>, vector<384x256xbf16>
    %cst = arith.constant dense<0.000000e+00> : vector<64x256xf32>
    %6 = tpu.matmul %4, %5, %cst {dimension_numbers = #tpu.dot_dimension_numbers<[1], [0], [0], [1], [0, 0, 1, 1], [], []>} : vector<64x384xbf16>, vector<384x256xbf16>, vector<64x256xf32> -> vector<64x256xf32>
    %7 = arith.addf %3, %6 : vector<64x256xf32>
    %c0_6 = arith.constant 0 : index
    %c0_7 = arith.constant 0 : index
    %8 = vector.load %arg8[%c0_6, %c0_7] : memref<64x256xf32, #tpu.memory_space<vmem>>, vector<64x256xf32>
    tpu.vector_store %arg8[%c0_6, %c0_7], %7 {strides = array<i32>} : memref<64x256xf32, #tpu.memory_space<vmem>>, vector<64x256xf32>,
    %c2_i32 = arith.constant 2 : i32
    %9 = arith.cmpi eq, %arg2, %c2_i32 : i32
    %10 = arith.extui %9 : i1 to i32
    %c0_i32_8 = arith.constant 0 : i32
    %11 = arith.cmpi ne, %10, %c0_i32_8 : i32
    scf.if %11 {
      %c0_9 = arith.constant 0 : index
      %c0_10 = arith.constant 0 : index
      %12 = vector.load %arg8[%c0_9, %c0_10] : memref<64x256xf32, #tpu.memory_space<vmem>>, vector<64x256xf32>
      %c0_11 = arith.constant 0 : index
      %c0_12 = arith.constant 0 : index
      %13 = vector.load %arg5[%c0_11, %c0_12] : memref<1x256xf32, #tpu.memory_space<vmem>>, vector<1x256xf32>
      %14 = vector.broadcast %13 : vector<1x256xf32> to vector<64x256xf32>
      %15 = arith.mulf %12, %14 : vector<64x256xf32>
      %c0_13 = arith.constant 0 : index
      %c0_14 = arith.constant 0 : index
      %16 = vector.load %arg6[%c0_13, %c0_14] : memref<1x256xf32, #tpu.memory_space<vmem>>, vector<1x256xf32>
      %17 = vector.broadcast %16 : vector<1x256xf32> to vector<64x256xf32>
      %18 = arith.addf %15, %17 : vector<64x256xf32>
      %c0_15 = arith.constant 0 : index
      %c0_16 = arith.constant 0 : index
      %19 = vector.load %arg7[%c0_15, %c0_16] : memref<64x256xf32, #tpu.memory_space<vmem>>, vector<64x256xf32>
      tpu.vector_store %arg7[%c0_15, %c0_16], %18 {strides = array<i32>} : memref<64x256xf32, #tpu.memory_space<vmem>>, vector<64x256xf32>,
    } else {
    }
    return
  }
  func.func @transform_0(%arg0: i32, %arg1: i32, %arg2: i32) -> (i32, i32) {
    %c0_i32 = arith.constant 0 : i32
    return %arg0, %arg2 : i32, i32
  }
  func.func @transform_1(%arg0: i32, %arg1: i32, %arg2: i32) -> (i32, i32) {
    %c0_i32 = arith.constant 0 : i32
    return %arg2, %arg1 : i32, i32
  }
  func.func @transform_2(%arg0: i32, %arg1: i32, %arg2: i32) -> (i32, i32) {
    %c0_i32 = arith.constant 0 : i32
    %c0_i32_0 = arith.constant 0 : i32
    return %c0_i32, %arg1 : i32, i32
  }
  func.func @transform_3(%arg0: i32, %arg1: i32, %arg2: i32) -> (i32, i32) {
    %c0_i32 = arith.constant 0 : i32
    %c0_i32_0 = arith.constant 0 : i32
    return %c0_i32, %arg1 : i32, i32
  }
  func.func @transform_4(%arg0: i32, %arg1: i32, %arg2: i32) -> (i32, i32) {
    %c0_i32 = arith.constant 0 : i32
    return %arg0, %arg1 : i32, i32
  }
}

module attributes {stable_mosaic.version = 11 : i64} {
  func.func @_affine_relu_kernel(%arg0: i32, %arg1: memref<64x128xf32, #tpu.memory_space<vmem>>, %arg2: memref<1x128xf32, #tpu.memory_space<vmem>>, %arg3: memref<1x128xf32, #tpu.memory_space<vmem>>, %arg4: memref<64x128xf32, #tpu.memory_space<vmem>>) attributes {dimension_semantics = [#tpu.dimension_semantics<parallel>], iteration_bounds = array<i64: 1>, scalar_prefetch = 0 : i64, scratch_operands = 0 : i64, tpu.core_type = #tpu.core_type<tc>, window_params = [{transform_indices = @transform_0, window_bounds = array<i64: 64, 128>}, {pipeline_mode = #tpu.pipeline_mode<synchronous>, transform_indices = @transform_1, window_bounds = array<i64: 1, 128>}, {pipeline_mode = #tpu.pipeline_mode<synchronous>, transform_indices = @transform_2, window_bounds = array<i64: 1, 128>}, {transform_indices = @transform_3, window_bounds = array<i64: 64, 128>}]} {
    %c0 = arith.constant 0 : index
    %c0_0 = arith.constant 0 : index
    %0 = vector.load %arg1[%c0, %c0_0] : memref<64x128xf32, #tpu.memory_space<vmem>>, vector<64x128xf32>
    %c0_1 = arith.constant 0 : index
    %c0_2 = arith.constant 0 : index
    %1 = vector.load %arg2[%c0_1, %c0_2] : memref<1x128xf32, #tpu.memory_space<vmem>>, vector<1x128xf32>
    %2 = vector.broadcast %1 : vector<1x128xf32> to vector<64x128xf32>
    %3 = arith.mulf %0, %2 : vector<64x128xf32>
    %c0_3 = arith.constant 0 : index
    %c0_4 = arith.constant 0 : index
    %4 = vector.load %arg3[%c0_3, %c0_4] : memref<1x128xf32, #tpu.memory_space<vmem>>, vector<1x128xf32>
    %5 = vector.broadcast %4 : vector<1x128xf32> to vector<64x128xf32>
    %6 = arith.addf %3, %5 : vector<64x128xf32>
    %cst = arith.constant 0.000000e+00 : f32
    %7 = vector.broadcast %cst : f32 to vector<64x128xf32>
    %8 = arith.maximumf %6, %7 : vector<64x128xf32>
    %c0_5 = arith.constant 0 : index
    %c0_6 = arith.constant 0 : index
    %9 = vector.load %arg4[%c0_5, %c0_6] : memref<64x128xf32, #tpu.memory_space<vmem>>, vector<64x128xf32>
    tpu.vector_store %arg4[%c0_5, %c0_6], %8 {strides = array<i32>} : memref<64x128xf32, #tpu.memory_space<vmem>>, vector<64x128xf32>,
    return
  }
  func.func @transform_0(%arg0: i32) -> (i32, i32) {
    %c0_i32 = arith.constant 0 : i32
    %c0_i32_0 = arith.constant 0 : i32
    return %arg0, %c0_i32 : i32, i32
  }
  func.func @transform_1(%arg0: i32) -> (i32, i32) {
    %c0_i32 = arith.constant 0 : i32
    %c0_i32_0 = arith.constant 0 : i32
    %c0_i32_1 = arith.constant 0 : i32
    return %c0_i32, %c0_i32_0 : i32, i32
  }
  func.func @transform_2(%arg0: i32) -> (i32, i32) {
    %c0_i32 = arith.constant 0 : i32
    %c0_i32_0 = arith.constant 0 : i32
    %c0_i32_1 = arith.constant 0 : i32
    return %c0_i32, %c0_i32_0 : i32, i32
  }
  func.func @transform_3(%arg0: i32) -> (i32, i32) {
    %c0_i32 = arith.constant 0 : i32
    %c0_i32_0 = arith.constant 0 : i32
    return %arg0, %c0_i32 : i32, i32
  }
}

module attributes {stable_mosaic.version = 11 : i64} {
  func.func @_mm_affine_kernel(%arg0: i32, %arg1: i32, %arg2: i32, %arg3: memref<16x384xbf16, #tpu.memory_space<vmem>>, %arg4: memref<384x128xbf16, #tpu.memory_space<vmem>>, %arg5: memref<1x128xf32, #tpu.memory_space<vmem>>, %arg6: memref<1x128xf32, #tpu.memory_space<vmem>>, %arg7: memref<16x128xf32, #tpu.memory_space<vmem>>, %arg8: memref<16x128xf32, #tpu.memory_space<vmem>>) attributes {dimension_semantics = [#tpu.dimension_semantics<parallel>, #tpu.dimension_semantics<parallel>, #tpu.dimension_semantics<arbitrary>], iteration_bounds = array<i64: 1, 1, 3>, scalar_prefetch = 0 : i64, scratch_operands = 1 : i64, tpu.core_type = #tpu.core_type<tc>, window_params = [{transform_indices = @transform_0, window_bounds = array<i64: 16, 384>}, {transform_indices = @transform_1, window_bounds = array<i64: 384, 128>}, {transform_indices = @transform_2, window_bounds = array<i64: 1, 128>}, {transform_indices = @transform_3, window_bounds = array<i64: 1, 128>}, {transform_indices = @transform_4, window_bounds = array<i64: 16, 128>}]} {
    %c0_i32 = arith.constant 0 : i32
    %0 = arith.cmpi eq, %arg2, %c0_i32 : i32
    %1 = arith.extui %0 : i1 to i32
    %c0_i32_0 = arith.constant 0 : i32
    %2 = arith.cmpi ne, %1, %c0_i32_0 : i32
    scf.if %2 {
      %cst_9 = arith.constant 0.000000e+00 : f32
      %12 = vector.broadcast %cst_9 : f32 to vector<16x128xf32>
      %c0_10 = arith.constant 0 : index
      %c0_11 = arith.constant 0 : index
      %13 = vector.load %arg8[%c0_10, %c0_11] : memref<16x128xf32, #tpu.memory_space<vmem>>, vector<16x128xf32>
      tpu.vector_store %arg8[%c0_10, %c0_11], %12 {strides = array<i32>} : memref<16x128xf32, #tpu.memory_space<vmem>>, vector<16x128xf32>,
    } else {
    }
    %c0 = arith.constant 0 : index
    %c0_1 = arith.constant 0 : index
    %3 = vector.load %arg8[%c0, %c0_1] : memref<16x128xf32, #tpu.memory_space<vmem>>, vector<16x128xf32>
    %c0_2 = arith.constant 0 : index
    %c0_3 = arith.constant 0 : index
    %4 = vector.load %arg3[%c0_2, %c0_3] : memref<16x384xbf16, #tpu.memory_space<vmem>>, vector<16x384xbf16>
    %c0_4 = arith.constant 0 : index
    %c0_5 = arith.constant 0 : index
    %5 = vector.load %arg4[%c0_4, %c0_5] : memref<384x128xbf16, #tpu.memory_space<vmem>>, vector<384x128xbf16>
    %cst = arith.constant dense<0.000000e+00> : vector<16x128xf32>
    %6 = tpu.matmul %4, %5, %cst {dimension_numbers = #tpu.dot_dimension_numbers<[1], [0], [0], [1], [0, 0, 1, 1], [], []>} : vector<16x384xbf16>, vector<384x128xbf16>, vector<16x128xf32> -> vector<16x128xf32>
    %7 = arith.addf %3, %6 : vector<16x128xf32>
    %c0_6 = arith.constant 0 : index
    %c0_7 = arith.constant 0 : index
    %8 = vector.load %arg8[%c0_6, %c0_7] : memref<16x128xf32, #tpu.memory_space<vmem>>, vector<16x128xf32>
    tpu.vector_store %arg8[%c0_6, %c0_7], %7 {strides = array<i32>} : memref<16x128xf32, #tpu.memory_space<vmem>>, vector<16x128xf32>,
    %c2_i32 = arith.constant 2 : i32
    %9 = arith.cmpi eq, %arg2, %c2_i32 : i32
    %10 = arith.extui %9 : i1 to i32
    %c0_i32_8 = arith.constant 0 : i32
    %11 = arith.cmpi ne, %10, %c0_i32_8 : i32
    scf.if %11 {
      %c0_9 = arith.constant 0 : index
      %c0_10 = arith.constant 0 : index
      %12 = vector.load %arg8[%c0_9, %c0_10] : memref<16x128xf32, #tpu.memory_space<vmem>>, vector<16x128xf32>
      %c0_11 = arith.constant 0 : index
      %c0_12 = arith.constant 0 : index
      %13 = vector.load %arg5[%c0_11, %c0_12] : memref<1x128xf32, #tpu.memory_space<vmem>>, vector<1x128xf32>
      %14 = vector.broadcast %13 : vector<1x128xf32> to vector<16x128xf32>
      %15 = arith.mulf %12, %14 : vector<16x128xf32>
      %c0_13 = arith.constant 0 : index
      %c0_14 = arith.constant 0 : index
      %16 = vector.load %arg6[%c0_13, %c0_14] : memref<1x128xf32, #tpu.memory_space<vmem>>, vector<1x128xf32>
      %17 = vector.broadcast %16 : vector<1x128xf32> to vector<16x128xf32>
      %18 = arith.addf %15, %17 : vector<16x128xf32>
      %cst_15 = arith.constant 0.000000e+00 : f32
      %19 = vector.broadcast %cst_15 : f32 to vector<16x128xf32>
      %20 = arith.maximumf %18, %19 : vector<16x128xf32>
      %c0_16 = arith.constant 0 : index
      %c0_17 = arith.constant 0 : index
      %21 = vector.load %arg7[%c0_16, %c0_17] : memref<16x128xf32, #tpu.memory_space<vmem>>, vector<16x128xf32>
      tpu.vector_store %arg7[%c0_16, %c0_17], %20 {strides = array<i32>} : memref<16x128xf32, #tpu.memory_space<vmem>>, vector<16x128xf32>,
    } else {
    }
    return
  }
  func.func @transform_0(%arg0: i32, %arg1: i32, %arg2: i32) -> (i32, i32) {
    %c0_i32 = arith.constant 0 : i32
    return %arg0, %arg2 : i32, i32
  }
  func.func @transform_1(%arg0: i32, %arg1: i32, %arg2: i32) -> (i32, i32) {
    %c0_i32 = arith.constant 0 : i32
    return %arg2, %arg1 : i32, i32
  }
  func.func @transform_2(%arg0: i32, %arg1: i32, %arg2: i32) -> (i32, i32) {
    %c0_i32 = arith.constant 0 : i32
    %c0_i32_0 = arith.constant 0 : i32
    return %c0_i32, %arg1 : i32, i32
  }
  func.func @transform_3(%arg0: i32, %arg1: i32, %arg2: i32) -> (i32, i32) {
    %c0_i32 = arith.constant 0 : i32
    %c0_i32_0 = arith.constant 0 : i32
    return %c0_i32, %arg1 : i32, i32
  }
  func.func @transform_4(%arg0: i32, %arg1: i32, %arg2: i32) -> (i32, i32) {
    %c0_i32 = arith.constant 0 : i32
    return %arg0, %arg1 : i32, i32
  }
}

module attributes {stable_mosaic.version = 11 : i64} {
  func.func @_mm_affine_kernel(%arg0: i32, %arg1: i32, %arg2: i32, %arg3: memref<16x128xbf16, #tpu.memory_space<vmem>>, %arg4: memref<128x128xbf16, #tpu.memory_space<vmem>>, %arg5: memref<1x128xf32, #tpu.memory_space<vmem>>, %arg6: memref<1x128xf32, #tpu.memory_space<vmem>>, %arg7: memref<16x128xf32, #tpu.memory_space<vmem>>, %arg8: memref<16x128xf32, #tpu.memory_space<vmem>>) attributes {dimension_semantics = [#tpu.dimension_semantics<parallel>, #tpu.dimension_semantics<parallel>, #tpu.dimension_semantics<arbitrary>], iteration_bounds = array<i64: 1, 1, 1>, scalar_prefetch = 0 : i64, scratch_operands = 1 : i64, tpu.core_type = #tpu.core_type<tc>, window_params = [{transform_indices = @transform_0, window_bounds = array<i64: 16, 128>}, {transform_indices = @transform_1, window_bounds = array<i64: 128, 128>}, {transform_indices = @transform_2, window_bounds = array<i64: 1, 128>}, {transform_indices = @transform_3, window_bounds = array<i64: 1, 128>}, {transform_indices = @transform_4, window_bounds = array<i64: 16, 128>}]} {
    %c0_i32 = arith.constant 0 : i32
    %0 = arith.cmpi eq, %arg2, %c0_i32 : i32
    %1 = arith.extui %0 : i1 to i32
    %c0_i32_0 = arith.constant 0 : i32
    %2 = arith.cmpi ne, %1, %c0_i32_0 : i32
    scf.if %2 {
      %cst_10 = arith.constant 0.000000e+00 : f32
      %12 = vector.broadcast %cst_10 : f32 to vector<16x128xf32>
      %c0_11 = arith.constant 0 : index
      %c0_12 = arith.constant 0 : index
      %13 = vector.load %arg8[%c0_11, %c0_12] : memref<16x128xf32, #tpu.memory_space<vmem>>, vector<16x128xf32>
      tpu.vector_store %arg8[%c0_11, %c0_12], %12 {strides = array<i32>} : memref<16x128xf32, #tpu.memory_space<vmem>>, vector<16x128xf32>,
    } else {
    }
    %c0 = arith.constant 0 : index
    %c0_1 = arith.constant 0 : index
    %3 = vector.load %arg8[%c0, %c0_1] : memref<16x128xf32, #tpu.memory_space<vmem>>, vector<16x128xf32>
    %c0_2 = arith.constant 0 : index
    %c0_3 = arith.constant 0 : index
    %4 = vector.load %arg3[%c0_2, %c0_3] : memref<16x128xbf16, #tpu.memory_space<vmem>>, vector<16x128xbf16>
    %c0_4 = arith.constant 0 : index
    %c0_5 = arith.constant 0 : index
    %5 = vector.load %arg4[%c0_4, %c0_5] : memref<128x128xbf16, #tpu.memory_space<vmem>>, vector<128x128xbf16>
    %cst = arith.constant dense<0.000000e+00> : vector<16x128xf32>
    %6 = tpu.matmul %4, %5, %cst {dimension_numbers = #tpu.dot_dimension_numbers<[1], [0], [0], [1], [0, 0, 1, 1], [], []>} : vector<16x128xbf16>, vector<128x128xbf16>, vector<16x128xf32> -> vector<16x128xf32>
    %7 = arith.addf %3, %6 : vector<16x128xf32>
    %c0_6 = arith.constant 0 : index
    %c0_7 = arith.constant 0 : index
    %8 = vector.load %arg8[%c0_6, %c0_7] : memref<16x128xf32, #tpu.memory_space<vmem>>, vector<16x128xf32>
    tpu.vector_store %arg8[%c0_6, %c0_7], %7 {strides = array<i32>} : memref<16x128xf32, #tpu.memory_space<vmem>>, vector<16x128xf32>,
    %c0_i32_8 = arith.constant 0 : i32
    %9 = arith.cmpi eq, %arg2, %c0_i32_8 : i32
    %10 = arith.extui %9 : i1 to i32
    %c0_i32_9 = arith.constant 0 : i32
    %11 = arith.cmpi ne, %10, %c0_i32_9 : i32
    scf.if %11 {
      %c0_10 = arith.constant 0 : index
      %c0_11 = arith.constant 0 : index
      %12 = vector.load %arg8[%c0_10, %c0_11] : memref<16x128xf32, #tpu.memory_space<vmem>>, vector<16x128xf32>
      %c0_12 = arith.constant 0 : index
      %c0_13 = arith.constant 0 : index
      %13 = vector.load %arg5[%c0_12, %c0_13] : memref<1x128xf32, #tpu.memory_space<vmem>>, vector<1x128xf32>
      %14 = vector.broadcast %13 : vector<1x128xf32> to vector<16x128xf32>
      %15 = arith.mulf %12, %14 : vector<16x128xf32>
      %c0_14 = arith.constant 0 : index
      %c0_15 = arith.constant 0 : index
      %16 = vector.load %arg6[%c0_14, %c0_15] : memref<1x128xf32, #tpu.memory_space<vmem>>, vector<1x128xf32>
      %17 = vector.broadcast %16 : vector<1x128xf32> to vector<16x128xf32>
      %18 = arith.addf %15, %17 : vector<16x128xf32>
      %c0_16 = arith.constant 0 : index
      %c0_17 = arith.constant 0 : index
      %19 = vector.load %arg7[%c0_16, %c0_17] : memref<16x128xf32, #tpu.memory_space<vmem>>, vector<16x128xf32>
      tpu.vector_store %arg7[%c0_16, %c0_17], %18 {strides = array<i32>} : memref<16x128xf32, #tpu.memory_space<vmem>>, vector<16x128xf32>,
    } else {
    }
    return
  }
  func.func @transform_0(%arg0: i32, %arg1: i32, %arg2: i32) -> (i32, i32) {
    %c0_i32 = arith.constant 0 : i32
    return %arg0, %arg2 : i32, i32
  }
  func.func @transform_1(%arg0: i32, %arg1: i32, %arg2: i32) -> (i32, i32) {
    %c0_i32 = arith.constant 0 : i32
    return %arg2, %arg1 : i32, i32
  }
  func.func @transform_2(%arg0: i32, %arg1: i32, %arg2: i32) -> (i32, i32) {
    %c0_i32 = arith.constant 0 : i32
    %c0_i32_0 = arith.constant 0 : i32
    return %c0_i32, %arg1 : i32, i32
  }
  func.func @transform_3(%arg0: i32, %arg1: i32, %arg2: i32) -> (i32, i32) {
    %c0_i32 = arith.constant 0 : i32
    %c0_i32_0 = arith.constant 0 : i32
    return %c0_i32, %arg1 : i32, i32
  }
  func.func @transform_4(%arg0: i32, %arg1: i32, %arg2: i32) -> (i32, i32) {
    %c0_i32 = arith.constant 0 : i32
    return %arg0, %arg1 : i32, i32
  }
}

module attributes {stable_mosaic.version = 11 : i64} {
  func.func @_mm_affine_res_kernel(%arg0: i32, %arg1: i32, %arg2: i32, %arg3: memref<16x384xbf16, #tpu.memory_space<vmem>>, %arg4: memref<384x128xbf16, #tpu.memory_space<vmem>>, %arg5: memref<1x128xf32, #tpu.memory_space<vmem>>, %arg6: memref<1x128xf32, #tpu.memory_space<vmem>>, %arg7: memref<16x128xf32, #tpu.memory_space<vmem>>, %arg8: memref<16x128xf32, #tpu.memory_space<vmem>>, %arg9: memref<16x128xf32, #tpu.memory_space<vmem>>) attributes {dimension_semantics = [#tpu.dimension_semantics<parallel>, #tpu.dimension_semantics<parallel>, #tpu.dimension_semantics<arbitrary>], iteration_bounds = array<i64: 1, 1, 3>, scalar_prefetch = 0 : i64, scratch_operands = 1 : i64, tpu.core_type = #tpu.core_type<tc>, window_params = [{transform_indices = @transform_0, window_bounds = array<i64: 16, 384>}, {transform_indices = @transform_1, window_bounds = array<i64: 384, 128>}, {transform_indices = @transform_2, window_bounds = array<i64: 1, 128>}, {transform_indices = @transform_3, window_bounds = array<i64: 1, 128>}, {transform_indices = @transform_4, window_bounds = array<i64: 16, 128>}, {transform_indices = @transform_5, window_bounds = array<i64: 16, 128>}]} {
    %c0_i32 = arith.constant 0 : i32
    %0 = arith.cmpi eq, %arg2, %c0_i32 : i32
    %1 = arith.extui %0 : i1 to i32
    %c0_i32_0 = arith.constant 0 : i32
    %2 = arith.cmpi ne, %1, %c0_i32_0 : i32
    scf.if %2 {
      %cst_9 = arith.constant 0.000000e+00 : f32
      %12 = vector.broadcast %cst_9 : f32 to vector<16x128xf32>
      %c0_10 = arith.constant 0 : index
      %c0_11 = arith.constant 0 : index
      %13 = vector.load %arg9[%c0_10, %c0_11] : memref<16x128xf32, #tpu.memory_space<vmem>>, vector<16x128xf32>
      tpu.vector_store %arg9[%c0_10, %c0_11], %12 {strides = array<i32>} : memref<16x128xf32, #tpu.memory_space<vmem>>, vector<16x128xf32>,
    } else {
    }
    %c0 = arith.constant 0 : index
    %c0_1 = arith.constant 0 : index
    %3 = vector.load %arg9[%c0, %c0_1] : memref<16x128xf32, #tpu.memory_space<vmem>>, vector<16x128xf32>
    %c0_2 = arith.constant 0 : index
    %c0_3 = arith.constant 0 : index
    %4 = vector.load %arg3[%c0_2, %c0_3] : memref<16x384xbf16, #tpu.memory_space<vmem>>, vector<16x384xbf16>
    %c0_4 = arith.constant 0 : index
    %c0_5 = arith.constant 0 : index
    %5 = vector.load %arg4[%c0_4, %c0_5] : memref<384x128xbf16, #tpu.memory_space<vmem>>, vector<384x128xbf16>
    %cst = arith.constant dense<0.000000e+00> : vector<16x128xf32>
    %6 = tpu.matmul %4, %5, %cst {dimension_numbers = #tpu.dot_dimension_numbers<[1], [0], [0], [1], [0, 0, 1, 1], [], []>} : vector<16x384xbf16>, vector<384x128xbf16>, vector<16x128xf32> -> vector<16x128xf32>
    %7 = arith.addf %3, %6 : vector<16x128xf32>
    %c0_6 = arith.constant 0 : index
    %c0_7 = arith.constant 0 : index
    %8 = vector.load %arg9[%c0_6, %c0_7] : memref<16x128xf32, #tpu.memory_space<vmem>>, vector<16x128xf32>
    tpu.vector_store %arg9[%c0_6, %c0_7], %7 {strides = array<i32>} : memref<16x128xf32, #tpu.memory_space<vmem>>, vector<16x128xf32>,
    %c2_i32 = arith.constant 2 : i32
    %9 = arith.cmpi eq, %arg2, %c2_i32 : i32
    %10 = arith.extui %9 : i1 to i32
    %c0_i32_8 = arith.constant 0 : i32
    %11 = arith.cmpi ne, %10, %c0_i32_8 : i32
    scf.if %11 {
      %c0_9 = arith.constant 0 : index
      %c0_10 = arith.constant 0 : index
      %12 = vector.load %arg9[%c0_9, %c0_10] : memref<16x128xf32, #tpu.memory_space<vmem>>, vector<16x128xf32>
      %c0_11 = arith.constant 0 : index
      %c0_12 = arith.constant 0 : index
      %13 = vector.load %arg5[%c0_11, %c0_12] : memref<1x128xf32, #tpu.memory_space<vmem>>, vector<1x128xf32>
      %14 = vector.broadcast %13 : vector<1x128xf32> to vector<16x128xf32>
      %15 = arith.mulf %12, %14 : vector<16x128xf32>
      %c0_13 = arith.constant 0 : index
      %c0_14 = arith.constant 0 : index
      %16 = vector.load %arg6[%c0_13, %c0_14] : memref<1x128xf32, #tpu.memory_space<vmem>>, vector<1x128xf32>
      %17 = vector.broadcast %16 : vector<1x128xf32> to vector<16x128xf32>
      %18 = arith.addf %15, %17 : vector<16x128xf32>
      %c0_15 = arith.constant 0 : index
      %c0_16 = arith.constant 0 : index
      %19 = vector.load %arg7[%c0_15, %c0_16] : memref<16x128xf32, #tpu.memory_space<vmem>>, vector<16x128xf32>
      %20 = arith.addf %18, %19 : vector<16x128xf32>
      %c0_17 = arith.constant 0 : index
      %c0_18 = arith.constant 0 : index
      %21 = vector.load %arg8[%c0_17, %c0_18] : memref<16x128xf32, #tpu.memory_space<vmem>>, vector<16x128xf32>
      tpu.vector_store %arg8[%c0_17, %c0_18], %20 {strides = array<i32>} : memref<16x128xf32, #tpu.memory_space<vmem>>, vector<16x128xf32>,
    } else {
    }
    return
  }
  func.func @transform_0(%arg0: i32, %arg1: i32, %arg2: i32) -> (i32, i32) {
    %c0_i32 = arith.constant 0 : i32
    return %arg0, %arg2 : i32, i32
  }
  func.func @transform_1(%arg0: i32, %arg1: i32, %arg2: i32) -> (i32, i32) {
    %c0_i32 = arith.constant 0 : i32
    return %arg2, %arg1 : i32, i32
  }
  func.func @transform_2(%arg0: i32, %arg1: i32, %arg2: i32) -> (i32, i32) {
    %c0_i32 = arith.constant 0 : i32
    %c0_i32_0 = arith.constant 0 : i32
    return %c0_i32, %arg1 : i32, i32
  }
  func.func @transform_3(%arg0: i32, %arg1: i32, %arg2: i32) -> (i32, i32) {
    %c0_i32 = arith.constant 0 : i32
    %c0_i32_0 = arith.constant 0 : i32
    return %c0_i32, %arg1 : i32, i32
  }
  func.func @transform_4(%arg0: i32, %arg1: i32, %arg2: i32) -> (i32, i32) {
    %c0_i32 = arith.constant 0 : i32
    return %arg0, %arg1 : i32, i32
  }
  func.func @transform_5(%arg0: i32, %arg1: i32, %arg2: i32) -> (i32, i32) {
    %c0_i32 = arith.constant 0 : i32
    return %arg0, %arg1 : i32, i32
  }
}

</mosaic_0001>

<bundles_post_ra>
// kernel: tile.25
= control target key start
LH: loop header
LB: loop body
LE: loop exit
PB: predicated region body
PF: predicated region fallthrough
CT: control target
= control target key end

     0   :  { %s28_s0 = inlined_call_operand.vmem [shape: f32[8], index: 0, kind: input, shape index: {}]   ;;  %s29_s1 = inlined_call_operand.vmem [shape: f32[16,8], index: 1, kind: output, shape index: {}]  }
   0x1   :  { %v4_v0 = vld [vmem:[%s28_s0] ss:$0 sm:$0xff] }
   0x2   :  { %5 = vst [vmem:[%s29_s1] sm:$0xff] %v4_v0  ;;  %8 = vst [vmem:[%s29_s1 + $0x8] sm:$0xff] %v4_v0 }

// kernel: tile.26
= control target key start
LH: loop header
LB: loop body
LE: loop exit
PB: predicated region body
PF: predicated region fallthrough
CT: control target
= control target key end

     0   :  { %s133_s10 = smov 120   ;;  %s134_s11 = smov 104   ;;  %vm3_vm0 = vcmask 64512   ;;  %vm9_vm1 = vcmask 1048512   ;;  %vm15_vm2 = vcmask 982912   ;;  %vm21_vm3 = vcmask 917312   ;;  %s209_s0 = inlined_call_operand.vmem [shape: f32[16,8], index: 0, kind: input, shape index: {}]   ;;  %s210_s1 = inlined_call_operand.vmem [shape: f32[1,128], index: 1, kind: output, shape index: {}]  }
   0x1   :  { %v103_v0 = vld [vmem:[%s209_s0 + $0xf] sm:$0x1]   ;;  %v105_v1 = vld [vmem:[%s209_s0 + $0xd] sm:$0x1]   ;;  %v104_v2 = vld [vmem:[%s209_s0 + $0xe] sm:$0x1]  }
   0x2   :  { %7 = vrot.lane.b32.xlu0 %v103_v0, %s133_s10  ;;  %19 = vrot.lane.b32.xlu1 %v105_v1, %s134_s11  ;;  %v106_v3 = vld [vmem:[%s209_s0 + $0xc] sm:$0x1]   ;;  %s135_s16 = smov 112   ;;  %s136_s17 = smov 96   ;;  %v107_v4 = vld [vmem:[%s209_s0 + $0xb] sm:$0x1]  }
   0x3   :  { %v108_v5 = vld [vmem:[%s209_s0 + $0xa] sm:$0x1]   ;;  %v2_v6 = vld [vmem:[%s209_s0] sm:$0x1]   ;;  %s137_s24 = smov 88   ;;  %s138_s25 = smov 80  }
   0x4   :  { %4 = vst.msk [vmem:[#allocation0] sm:$0x1] %vm3_vm0, %v2_v6   ;;  %v109_v7 = vld [vmem:[%s209_s0 + $0x9] sm:$0x1]   ;;  %v110_v8 = vld [vmem:[%s209_s0 + $0x8] sm:$0x1]  }
   0x5   :  { %s139_s30 = smov 72   ;;  %s140_s2 = smov 64   ;;  %v111_v9 = vld [vmem:[%s209_s0 + $0x7] sm:$0x1]   ;;  %v112_v10 = vld [vmem:[%s209_s0 + $0x6] sm:$0x1]  }
   0x6   :  { %13 = vrot.lane.b32.xlu0 %v104_v2, %s135_s16  ;;  %25 = vrot.lane.b32.xlu1 %v106_v3, %s136_s17  ;;  %s141_s7 = smov 56   ;;  %s142_s8 = smov 48   ;;  %v113_v11 = vld [vmem:[%s209_s0 + $0x5] sm:$0x1]   ;;  %v114_v12 = vld [vmem:[%s209_s0 + $0x4] sm:$0x1]  }
   0x7   :  { %s143_s13 = smov 40   ;;  %s144_s14 = smov 32   ;;  %v115_v13 = vld [vmem:[%s209_s0 + $0x3] sm:$0x1]   ;;  %v116_v14 = vld [vmem:[%s209_s0 + $0x2] sm:$0x1]  }
   0x8   :  { %s145_s19 = smov 24   ;;  %s146_s20 = smov 16   ;;  %v117_v15 = vld [vmem:[%s209_s0 + $0x1] sm:$0x1]   ;;  %vm27_vm4 = vcmask 851712   ;;  %vm33_vm5 = vcmask 786112  }
   0x9   :  { %s147_s0 = smov 8   ;;  %vm39_vm6 = vcmask 720512   ;;  %vm45_vm7 = vcmask 654912   ;;  %vm51_vm8 = vcmask 589312   ;;  %vm57_vm9 = vcmask 523712  }
   0xa   :  { %31 = vrot.lane.b32.xlu0 %v107_v4, %s137_s24  ;;  %37 = vrot.lane.b32.xlu1 %v108_v5, %s138_s25  ;;  %vm63_vm10 = vcmask 458112   ;;  %vm69_vm11 = vcmask 392512   ;;  %vm75_vm12 = vcmask 326912   ;;  %vm81_vm13 = vcmask 261312  }
   0xb   :  { %vm87_vm14 = vcmask 195712   ;;  %vm93_vm15 = vcmask 130112  }
   0xe   :  { %43 = vrot.lane.b32.xlu0 %v109_v7, %s139_s30  ;;  %49 = vrot.lane.b32.xlu1 %v110_v8, %s140_s2 }
  0x12   :  { %55 = vrot.lane.b32.xlu0 %v111_v9, %s141_s7  ;;  %61 = vrot.lane.b32.xlu1 %v112_v10, %s142_s8 }
  0x16   :  { %67 = vrot.lane.b32.xlu0 %v113_v11, %s143_s13  ;;  %73 = vrot.lane.b32.xlu1 %v114_v12, %s144_s14 }
  0x1a   :  { %79 = vrot.lane.b32.xlu0 %v115_v13, %s145_s19  ;;  %85 = vrot.lane.b32.xlu1 %v116_v14, %s146_s20 }
  0x1e   :  { %91 = vrot.lane.b32.xlu0 %v117_v15, %s147_s0 }
  0x74   :  { %v8_v16 = vpop.permute.xlu0 %7   ;;  %v20_v17 = vpop.permute.xlu1 %19  }
  0x75   :  { %10 = vst.msk [vmem:[#allocation0] sm:$0x1] %vm9_vm1, %v8_v16  }
  0x78   :  { %v14_v18 = vpop.permute.xlu0 %13   ;;  %v26_v19 = vpop.permute.xlu1 %25  }
  0x79   :  { %16 = vst.msk [vmem:[#allocation0] sm:$0x1] %vm15_vm2, %v14_v18  }
  0x7a   :  { %22 = vst.msk [vmem:[#allocation0] sm:$0x1] %vm21_vm3, %v20_v17  }
  0x7b   :  { %28 = vst.msk [vmem:[#allocation0] sm:$0x1] %vm27_vm4, %v26_v19  }
  0x7c   :  { %v32_v20 = vpop.permute.xlu0 %31   ;;  %v38_v21 = vpop.permute.xlu1 %37  }
  0x7d   :  { %34 = vst.msk [vmem:[#allocation0] sm:$0x1] %vm33_vm5, %v32_v20  }
  0x7e   :  { %40 = vst.msk [vmem:[#allocation0] sm:$0x1] %vm39_vm6, %v38_v21  }
  0x80   :  { %v44_v22 = vpop.permute.xlu0 %43   ;;  %v50_v23 = vpop.permute.xlu1 %49  }
  0x81   :  { %46 = vst.msk [vmem:[#allocation0] sm:$0x1] %vm45_vm7, %v44_v22  }
  0x82   :  { %52 = vst.msk [vmem:[#allocation0] sm:$0x1] %vm51_vm8, %v50_v23  }
  0x84   :  { %v56_v24 = vpop.permute.xlu0 %55   ;;  %v62_v25 = vpop.permute.xlu1 %61  }
  0x85   :  { %58 = vst.msk [vmem:[#allocation0] sm:$0x1] %vm57_vm9, %v56_v24  }
  0x86   :  { %64 = vst.msk [vmem:[#allocation0] sm:$0x1] %vm63_vm10, %v62_v25  }
  0x88   :  { %v68_v26 = vpop.permute.xlu0 %67   ;;  %v74_v27 = vpop.permute.xlu1 %73  }
  0x89   :  { %70 = vst.msk [vmem:[#allocation0] sm:$0x1] %vm69_vm11, %v68_v26  }
  0x8a   :  { %76 = vst.msk [vmem:[#allocation0] sm:$0x1] %vm75_vm12, %v74_v27  }
  0x8c   :  { %v80_v28 = vpop.permute.xlu0 %79   ;;  %v86_v29 = vpop.permute.xlu1 %85  }
  0x8d   :  { %82 = vst.msk [vmem:[#allocation0] sm:$0x1] %vm81_vm13, %v80_v28  }
  0x8e   :  { %88 = vst.msk [vmem:[#allocation0] sm:$0x1] %vm87_vm14, %v86_v29  }
  0x90   :  { %v92_v30 = vpop.permute.xlu0 %91  }
  0x91   :  { %94 = vst.msk [vmem:[#allocation0] sm:$0x1] %vm93_vm15, %v92_v30  }
  0x98   :  { %v99_v31 = vld [vmem:[#allocation0] sm:$0x1] }
  0x99   :  { %102 = vst [vmem:[%s210_s1] sm:$0x1] %v99_v31 }

// kernel: vanilla_forward.16
= control target key start
LH: loop header
LB: loop body
LE: loop exit
PB: predicated region body
PF: predicated region fallthrough
CT: control target
= control target key end

     0   :  { %s480_s0 = inlined_call_operand.vmem [shape: f32[256,128], index: 0, kind: input, shape index: {}]   ;;  %s481_s1 = inlined_call_operand.vmem [shape: f32[1,128], index: 1, kind: input, shape index: {}]   ;;  %s482_s2 = inlined_call_operand.vmem [shape: f32[1,128], index: 2, kind: input, shape index: {}]   ;;  %s483_s3 = inlined_call_operand.vmem [shape: f32[256,128], index: 3, kind: output, shape index: {}]  }
   0x1   :  { %v14_v0 = vld [vmem:[%s480_s0] sm:$0xff]  ;;  %v15_v4 = vld [vmem:[%s480_s0 + $0x8] sm:$0xff]  ;;  %v16_v5 = vld [vmem:[%s480_s0 + $0x10] sm:$0xff] }
   0x2   :  { %v220_v1 = vld [vmem:[%s481_s1] ss:$0 sm:$0xff]  ;;  %v17_v6 = vld [vmem:[%s480_s0 + $0x18] sm:$0xff]  ;;  %v19_v11 = vld [vmem:[%s480_s0 + $0x28] sm:$0xff] }
   0x3   :  { %v225_v2 = vld [vmem:[%s482_s2] ss:$0 sm:$0xff]  ;;  %v53_v3 = vmul.f32 %v220_v1, %v14_v0  ;;  %v54_v7 = vmul.f32 %v220_v1, %v15_v4  ;;  %v55_v8 = vmul.f32 %v220_v1, %v16_v5  ;;  %v56_v9 = vmul.f32 %v220_v1, %v17_v6  ;;  %v20_v12 = vld [vmem:[%s480_s0 + $0x30] sm:$0xff]  ;;  %v21_v17 = vld [vmem:[%s480_s0 + $0x38] sm:$0xff] }
   0x4   :  { %v18_v10 = vld [vmem:[%s480_s0 + $0x20] sm:$0xff]  ;;  %v58_v15 = vmul.f32 %v220_v1, %v19_v11  ;;  %v59_v16 = vmul.f32 %v220_v1, %v20_v12  ;;  %v60_v21 = vmul.f32 %v220_v1, %v21_v17  ;;  %v23_v27 = vld [vmem:[%s480_s0 + $0x48] sm:$0xff]  ;;  %v24_v28 = vld [vmem:[%s480_s0 + $0x50] sm:$0xff] }
   0x5   :  { %v92_v13 = vadd.f32 %v225_v2, %v53_v3  ;;  %v57_v14 = vmul.f32 %v220_v1, %v18_v10  ;;  %v93_v18 = vadd.f32 %v225_v2, %v54_v7  ;;  %v94_v19 = vadd.f32 %v225_v2, %v55_v8  ;;  %v22_v22 = vld [vmem:[%s480_s0 + $0x40] sm:$0xff]  ;;  %v25_v29 = vld [vmem:[%s480_s0 + $0x58] sm:$0xff]  ;;  %v27_v35 = vld [vmem:[%s480_s0 + $0x68] sm:$0xff] }
   0x6   :  { %v95_v20 = vadd.f32 %v225_v2, %v56_v9  ;;  %v97_v25 = vadd.f32 %v225_v2, %v58_v15  ;;  %v98_v26 = vadd.f32 %v225_v2, %v59_v16  ;;  %v99_v33 = vadd.f32 %v225_v2, %v60_v21  ;;  %v26_v34 = vld [vmem:[%s480_s0 + $0x60] sm:$0xff]  ;;  %v28_v36 = vld [vmem:[%s480_s0 + $0x70] sm:$0xff]  ;;  %v29_v41 = vld [vmem:[%s480_s0 + $0x78] sm:$0xff] }
   0x7   :  { %v124_v23 = vmax.f32 %v92_v13, 0.0  ;;  %v96_v24 = vadd.f32 %v225_v2, %v57_v14  ;;  %v125_v30 = vmax.f32 %v93_v18, 0.0  ;;  %v126_v31 = vmax.f32 %v94_v19, 0.0  ;;  %v30_v54 = vld [vmem:[%s480_s0 + $0x80] sm:$0xff]  ;;  %v31_v59 = vld [vmem:[%s480_s0 + $0x88] sm:$0xff]  ;;  %v32_v60 = vld [vmem:[%s480_s0 + $0x90] sm:$0xff] }
   0x8   :  { %v127_v32 = vmax.f32 %v95_v20, 0.0  ;;  %v129_v38 = vmax.f32 %v97_v25, 0.0  ;;  %v130_v39 = vmax.f32 %v98_v26, 0.0  ;;  %v61_v40 = vmul.f32 %v220_v1, %v22_v22  ;;  %v33_v61 = vld [vmem:[%s480_s0 + $0x98] sm:$0xff]  ;;  %v34_v4 = vld [vmem:[%s480_s0 + $0xa0] sm:$0xff]  ;;  %v35_v5 = vld [vmem:[%s480_s0 + $0xa8] sm:$0xff] }
   0x9   :  { %156 = vst [vmem:[%s483_s3] sm:$0xff] %v124_v23  ;;  %v128_v37 = vmax.f32 %v96_v24, 0.0  ;;  %157 = vst [vmem:[%s483_s3 + $0x8] sm:$0xff] %v125_v30  ;;  %v131_v42 = vmax.f32 %v99_v33, 0.0  ;;  %v62_v43 = vmul.f32 %v220_v1, %v23_v27  ;;  %v63_v44 = vmul.f32 %v220_v1, %v24_v28  ;;  %v36_v6 = vld [vmem:[%s480_s0 + $0xb0] sm:$0xff]  ;;  %v37_v11 = vld [vmem:[%s480_s0 + $0xb8] sm:$0xff] }
   0xa   :  { %158 = vst [vmem:[%s483_s3 + $0x10] sm:$0xff] %v126_v31  ;;  %159 = vst [vmem:[%s483_s3 + $0x18] sm:$0xff] %v127_v32  ;;  %v64_v45 = vmul.f32 %v220_v1, %v25_v29  ;;  %v100_v46 = vadd.f32 %v225_v2, %v61_v40  ;;  %v65_v47 = vmul.f32 %v220_v1, %v26_v34  ;;  %v38_v24 = vld [vmem:[%s480_s0 + $0xc0] sm:$0xff]  ;;  %v39_v29 = vld [vmem:[%s480_s0 + $0xc8] sm:$0xff] }
   0xb   :  { %160 = vst [vmem:[%s483_s3 + $0x20] sm:$0xff] %v128_v37  ;;  %161 = vst [vmem:[%s483_s3 + $0x28] sm:$0xff] %v129_v38  ;;  %v66_v48 = vmul.f32 %v220_v1, %v27_v35  ;;  %v67_v49 = vmul.f32 %v220_v1, %v28_v36  ;;  %v101_v50 = vadd.f32 %v225_v2, %v62_v43  ;;  %v40_v30 = vld [vmem:[%s480_s0 + $0xd0] sm:$0xff]  ;;  %v41_v31 = vld [vmem:[%s480_s0 + $0xd8] sm:$0xff] }
   0xc   :  { %162 = vst [vmem:[%s483_s3 + $0x30] sm:$0xff] %v130_v39  ;;  %163 = vst [vmem:[%s483_s3 + $0x38] sm:$0xff] %v131_v42  ;;  %v102_v51 = vadd.f32 %v225_v2, %v63_v44  ;;  %v103_v52 = vadd.f32 %v225_v2, %v64_v45  ;;  %v68_v53 = vmul.f32 %v220_v1, %v29_v41  ;;  %v132_v55 = vmax.f32 %v100_v46, 0.0  ;;  %v42_v36 = vld [vmem:[%s480_s0 + $0xe0] sm:$0xff]  ;;  %v43_v37 = vld [vmem:[%s480_s0 + $0xe8] sm:$0xff] }
   0xd   :  { %v104_v56 = vadd.f32 %v225_v2, %v65_v47  ;;  %v105_v57 = vadd.f32 %v225_v2, %v66_v48  ;;  %v106_v58 = vadd.f32 %v225_v2, %v67_v49  ;;  %v133_v62 = vmax.f32 %v101_v50, 0.0  ;;  %v44_v38 = vld [vmem:[%s480_s0 + $0xf0] sm:$0xff]  ;;  %v45_v43 = vld [vmem:[%s480_s0 + $0xf8] sm:$0xff] }
   0xe   :  { %v134_v63 = vmax.f32 %v102_v51, 0.0  ;;  %v135_v0 = vmax.f32 %v103_v52, 0.0  ;;  %v107_v3 = vadd.f32 %v225_v2, %v68_v53  ;;  %164 = vst [vmem:[%s483_s3 + $0x40] sm:$0xff] %v132_v55  ;;  %v69_v10 = vmul.f32 %v220_v1, %v30_v54 }
   0xf   :  { %v136_v7 = vmax.f32 %v104_v56, 0.0  ;;  %v137_v8 = vmax.f32 %v105_v57, 0.0  ;;  %v138_v9 = vmax.f32 %v106_v58, 0.0  ;;  %165 = vst [vmem:[%s483_s3 + $0x48] sm:$0xff] %v133_v62  ;;  %v70_v13 = vmul.f32 %v220_v1, %v31_v59 }
  0x10   :  { %166 = vst [vmem:[%s483_s3 + $0x50] sm:$0xff] %v134_v63  ;;  %167 = vst [vmem:[%s483_s3 + $0x58] sm:$0xff] %v135_v0  ;;  %v139_v12 = vmax.f32 %v107_v3, 0.0  ;;  %v71_v14 = vmul.f32 %v220_v1, %v32_v60  ;;  %v72_v15 = vmul.f32 %v220_v1, %v33_v61  ;;  %v108_v16 = vadd.f32 %v225_v2, %v69_v10 }
  0x11   :  { %168 = vst [vmem:[%s483_s3 + $0x60] sm:$0xff] %v136_v7  ;;  %169 = vst [vmem:[%s483_s3 + $0x68] sm:$0xff] %v137_v8  ;;  %v73_v17 = vmul.f32 %v220_v1, %v34_v4  ;;  %v74_v18 = vmul.f32 %v220_v1, %v35_v5  ;;  %v75_v19 = vmul.f32 %v220_v1, %v36_v6 }
  0x12   :  { %170 = vst [vmem:[%s483_s3 + $0x70] sm:$0xff] %v138_v9  ;;  %171 = vst [vmem:[%s483_s3 + $0x78] sm:$0xff] %v139_v12  ;;  %v109_v20 = vadd.f32 %v225_v2, %v70_v13  ;;  %v110_v21 = vadd.f32 %v225_v2, %v71_v14  ;;  %v111_v22 = vadd.f32 %v225_v2, %v72_v15  ;;  %v140_v25 = vmax.f32 %v108_v16, 0.0 }
  0x13   :  { %v76_v23 = vmul.f32 %v220_v1, %v37_v11  ;;  %v112_v26 = vadd.f32 %v225_v2, %v73_v17  ;;  %v113_v27 = vadd.f32 %v225_v2, %v74_v18  ;;  %v114_v28 = vadd.f32 %v225_v2, %v75_v19 }
  0x14   :  { %v141_v32 = vmax.f32 %v109_v20, 0.0  ;;  %v142_v33 = vmax.f32 %v110_v21, 0.0  ;;  %v143_v34 = vmax.f32 %v111_v22, 0.0  ;;  %172 = vst [vmem:[%s483_s3 + $0x80] sm:$0xff] %v140_v25  ;;  %v77_v42 = vmul.f32 %v220_v1, %v38_v24 }
  0x15   :  { %v115_v35 = vadd.f32 %v225_v2, %v76_v23  ;;  %v144_v39 = vmax.f32 %v112_v26, 0.0  ;;  %v145_v40 = vmax.f32 %v113_v27, 0.0  ;;  %v146_v41 = vmax.f32 %v114_v28, 0.0 }
  0x16   :  { %173 = vst [vmem:[%s483_s3 + $0x88] sm:$0xff] %v141_v32  ;;  %174 = vst [vmem:[%s483_s3 + $0x90] sm:$0xff] %v142_v33  ;;  %v78_v45 = vmul.f32 %v220_v1, %v39_v29  ;;  %v79_v46 = vmul.f32 %v220_v1, %v40_v30  ;;  %v80_v47 = vmul.f32 %v220_v1, %v41_v31 }
  0x17   :  { %175 = vst [vmem:[%s483_s3 + $0x98] sm:$0xff] %v143_v34  ;;  %v147_v44 = vmax.f32 %v115_v35, 0.0  ;;  %176 = vst [vmem:[%s483_s3 + $0xa0] sm:$0xff] %v144_v39  ;;  %v116_v48 = vadd.f32 %v225_v2, %v77_v42  ;;  %v81_v49 = vmul.f32 %v220_v1, %v42_v36  ;;  %v82_v50 = vmul.f32 %v220_v1, %v43_v37 }
  0x18   :  { %177 = vst [vmem:[%s483_s3 + $0xa8] sm:$0xff] %v145_v40  ;;  %178 = vst [vmem:[%s483_s3 + $0xb0] sm:$0xff] %v146_v41  ;;  %v83_v51 = vmul.f32 %v220_v1, %v44_v38  ;;  %v117_v52 = vadd.f32 %v225_v2, %v78_v45  ;;  %v118_v53 = vadd.f32 %v225_v2, %v79_v46 }
  0x19   :  { %179 = vst [vmem:[%s483_s3 + $0xb8] sm:$0xff] %v147_v44  ;;  %v119_v54 = vadd.f32 %v225_v2, %v80_v47  ;;  %v84_v55 = vmul.f32 %v220_v1, %v45_v43  ;;  %v148_v56 = vmax.f32 %v116_v48, 0.0  ;;  %v120_v57 = vadd.f32 %v225_v2, %v81_v49 }
  0x1a   :  { %v121_v58 = vadd.f32 %v225_v2, %v82_v50  ;;  %v122_v59 = vadd.f32 %v225_v2, %v83_v51  ;;  %v149_v60 = vmax.f32 %v117_v52, 0.0  ;;  %v150_v61 = vmax.f32 %v118_v53, 0.0 }
  0x1b   :  { %v151_v62 = vmax.f32 %v119_v54, 0.0  ;;  %v123_v63 = vadd.f32 %v225_v2, %v84_v55  ;;  %180 = vst [vmem:[%s483_s3 + $0xc0] sm:$0xff] %v148_v56  ;;  %v152_v0 = vmax.f32 %v120_v57, 0.0 }
  0x1c   :  { %v153_v3 = vmax.f32 %v121_v58, 0.0  ;;  %v154_v4 = vmax.f32 %v122_v59, 0.0  ;;  %181 = vst [vmem:[%s483_s3 + $0xc8] sm:$0xff] %v149_v60  ;;  %182 = vst [vmem:[%s483_s3 + $0xd0] sm:$0xff] %v150_v61 }
  0x1d   :  { %183 = vst [vmem:[%s483_s3 + $0xd8] sm:$0xff] %v151_v62  ;;  %v155_v1 = vmax.f32 %v123_v63, 0.0  ;;  %184 = vst [vmem:[%s483_s3 + $0xe0] sm:$0xff] %v152_v0 }
  0x1e   :  { %185 = vst [vmem:[%s483_s3 + $0xe8] sm:$0xff] %v153_v3  ;;  %186 = vst [vmem:[%s483_s3 + $0xf0] sm:$0xff] %v154_v4 }
  0x1f   :  { %187 = vst [vmem:[%s483_s3 + $0xf8] sm:$0xff] %v155_v1 }

// kernel: vanilla_forward.15
= control target key start
LH: loop header
LB: loop body
LE: loop exit
PB: predicated region body
PF: predicated region fallthrough
CT: control target
= control target key end

     0   :  { %s1311_s15 = smov 0   ;;  %s1313_s16 = smov 0   ;;  %s1498_s0 = inlined_call_operand.vmem [shape: bf16[4096,128], index: 0, kind: input, shape index: {}]   ;;  %s1499_s1 = inlined_call_operand.vmem [shape: bf16[128,128], index: 1, kind: input, shape index: {}]   ;;  %s1500_s2 = inlined_call_operand.vmem [shape: f32[1,128], index: 2, kind: input, shape index: {}]   ;;  %s1501_s3 = inlined_call_operand.vmem [shape: f32[1,128], index: 3, kind: input, shape index: {}]   ;;  %s1502_s4 = inlined_call_operand.vmem [shape: f32[4096,128], index: 4, kind: output, shape index: {}]  }
   0x1   :  { %s1315_s17 = smov 0  }
   0x2 LB: > { %s33_s18 = sadd.s32 1, %s1280_s16  ;;  %p1093_p0 = scmp.ge.s32.totalorder %s1284_s17, 1  ;;  %s1284_s17 = sphi %s1315_s17, %s14_s17   ;;  %s1280_s16 = sphi %s1313_s16, %s1504_s16   ;;  %s1276_s15 = sphi %s1311_s15, %s1503_s15  }
   0x3   : > { %p35_p1 = scmp.ge.s32.totalorder %s33_s18, 16  ;;  %p221_p2 = scmp.lt.s32.totalorder %s1284_s17, 17 }
   0x5   : > { %s1506_s18 = smov (%p35_p1, %s33_s18), 0  ;;  %p222_p3 = pnand %p1093_p0, %p221_p2 }
   0x6   : > { %s1094_s21 = sshll.u32 (!%p222_p3), %s1276_s15, 5 }
   0x7   : > { %225 = sbr.rel (%p222_p3) target bundleno = 275 (0x113), region = 36  ;;  %p268_p4 = scmp.lt.s32.totalorder (!%p222_p3), %s1094_s21, 511 }
   0xc   : > { %v1238_v0 = vld [vmem:[%s1499_s1 + $0x38] sm:$0xff]   ;;  %v1239_v1 = vld [vmem:[%s1499_s1 + $0x30] sm:$0xff]   ;;  %s1508_s21 = smov (!%p268_p4, %s1094_s21), 511  ;;  %v1240_v2 = vld [vmem:[%s1499_s1 + $0x28] sm:$0xff]  }
   0xd   : > { %1150 = vmatprep.subr.bf16.mxu0 %v1238_v0  ;;  %1198 = vmatprep.subr.bf16.mxu1 %v1238_v0  ;;  %s1095_s26 = sshll.u32 %s1508_s21, 2  ;;  %v1241_v3 = vld [vmem:[%s1499_s1 + $0x20] sm:$0xff]   ;;  %v1242_v6 = vld [vmem:[%s1499_s1 + $0x18] sm:$0xff]   ;;  %v1243_v7 = vld [vmem:[%s1499_s1 + $0x10] sm:$0xff]   ;;  %s1097_s22 = sshll.u32 %s1508_s21, 3 }
   0xe   : > { %1151 = vmatpush3.bf16.msra.mxu0 %v1238_v0  ;;  %1206 = vmatpush3.bf16.msra.mxu1 %v1238_v0  ;;  %s1344_s29 = scalar_lea.vmem %s1498_s0, %s1095_s26  ;;  %v1244_v8 = vld [vmem:[%s1499_s1 + $0x8] sm:$0xff]   ;;  %v1245_v9 = vld [vmem:[%s1499_s1] sm:$0xff]   ;;  %s1397_s25 = scalar_lea.vmem %s1502_s4, %s1097_s22 }
   0xf   : > { %1152 = vmatprep.subr.bf16.mxu0 %v1239_v1  ;;  %1199 = vmatprep.subr.bf16.mxu1 %v1239_v1  ;;  %v1246_v4 = vld [vmem:[%s1344_s29] sm:$0xff]   ;;  %v1248_v10 = vld [vmem:[%s1344_s29 + $0x8] sm:$0xff]   ;;  %v1250_v12 = vld [vmem:[%s1344_s29 + $0x10] sm:$0xff]  }
  0x10   : > { %v1247_v5 = vld [vmem:[%s1344_s29 + $0x40] sm:$0xff]   ;;  %1166 = vmatprep.mubr.bf16.mxu0 %v1246_v4  ;;  %v1249_v11 = vld [vmem:[%s1344_s29 + $0x48] sm:$0xff]   ;;  %v1251_v13 = vld [vmem:[%s1344_s29 + $0x50] sm:$0xff]  }
  0x11   : > { %1182 = vmatprep.mubr.bf16.mxu1 %v1247_v5  ;;  %v1252_v14 = vld [vmem:[%s1344_s29 + $0x18] sm:$0xff]   ;;  %v1254_v16 = vld [vmem:[%s1344_s29 + $0x20] sm:$0xff]   ;;  %v1256_v18 = vld [vmem:[%s1344_s29 + $0x28] sm:$0xff]  }
  0x12   : > { %1153 = vmatpush3.bf16.msra.mxu0 %v1239_v1  ;;  %1207 = vmatpush3.bf16.msra.mxu1 %v1239_v1  ;;  %v1253_v15 = vld [vmem:[%s1344_s29 + $0x58] sm:$0xff]   ;;  %v1255_v17 = vld [vmem:[%s1344_s29 + $0x60] sm:$0xff]   ;;  %v1257_v19 = vld [vmem:[%s1344_s29 + $0x68] sm:$0xff]  }
  0x13   : > { %1154 = vmatprep.subr.bf16.mxu0 %v1240_v2  ;;  %1200 = vmatprep.subr.bf16.mxu1 %v1240_v2  ;;  %v1258_v20 = vld [vmem:[%s1344_s29 + $0x30] sm:$0xff]   ;;  %v1260_v22 = vld [vmem:[%s1344_s29 + $0x38] sm:$0xff]   ;;  %v1380_v24 = vld [vmem:[%s1500_s2] ss:$0 sm:$0xff] }
  0x14   : > { %v1259_v21 = vld [vmem:[%s1344_s29 + $0x70] sm:$0xff]   ;;  %v1261_v23 = vld [vmem:[%s1344_s29 + $0x78] sm:$0xff]   ;;  %v1385_v26 = vld [vmem:[%s1501_s3] ss:$0 sm:$0xff] }
  0x16   : > { %1155 = vmatpush3.bf16.msra.mxu0 %v1240_v2  ;;  %1208 = vmatpush3.bf16.msra.mxu1 %v1240_v2 }
  0x17   : > { %1156 = vmatprep.subr.bf16.mxu0 %v1241_v3  ;;  %1201 = vmatprep.subr.bf16.mxu1 %v1241_v3 }
  0x1a   : > { %1157 = vmatpush3.bf16.msra.mxu0 %v1241_v3  ;;  %1209 = vmatpush3.bf16.msra.mxu1 %v1241_v3 }
  0x1b   : > { %1158 = vmatprep.subr.bf16.mxu0 %v1242_v6  ;;  %1202 = vmatprep.subr.bf16.mxu1 %v1242_v6 }
  0x1e   : > { %1159 = vmatpush3.bf16.msra.mxu0 %v1242_v6  ;;  %1210 = vmatpush3.bf16.msra.mxu1 %v1242_v6 }
  0x1f   : > { %1160 = vmatprep.subr.bf16.mxu0 %v1243_v7  ;;  %1203 = vmatprep.subr.bf16.mxu1 %v1243_v7 }
  0x22   : > { %1161 = vmatpush3.bf16.msra.mxu0 %v1243_v7  ;;  %1211 = vmatpush3.bf16.msra.mxu1 %v1243_v7 }
  0x23   : > { %1162 = vmatprep.subr.bf16.mxu0 %v1244_v8  ;;  %1204 = vmatprep.subr.bf16.mxu1 %v1244_v8 }
  0x26   : > { %1163 = vmatpush3.bf16.msra.mxu0 %v1244_v8  ;;  %1212 = vmatpush3.bf16.msra.mxu1 %v1244_v8 }
  0x27   : > { %1164 = vmatprep.subr.bf16.mxu0 %v1245_v9  ;;  %1205 = vmatprep.subr.bf16.mxu1 %v1245_v9 }
  0x2a   : > { %1165 = vmatpush3.bf16.msra.mxu0 %v1245_v9  ;;  %1213 = vmatpush3.bf16.msra.mxu1 %v1245_v9 }
  0x2d   : > { %1167 = vmatmul.mubr.bf16.vlgmr.msra.gmra.mxu0 %v1248_v10  ;;  %1183 = vmatmul.mubr.bf16.vlgmr.msra.gmra.mxu1 %v1249_v11 }
  0x2e   : > { %1170 = vmatprep.mubr.bf16.mxu0 %v1250_v12  ;;  %1186 = vmatprep.mubr.bf16.mxu1 %v1251_v13 }
  0x35   : > { %1171 = vmatmul.mubr.bf16.gmra.mxu0 %v1252_v14  ;;  %1187 = vmatmul.mubr.bf16.gmra.mxu1 %v1253_v15 }
  0x36   : > { %1174 = vmatprep.mubr.bf16.mxu0 %v1254_v16  ;;  %1190 = vmatprep.mubr.bf16.mxu1 %v1255_v17 }
  0x3d   : > { %1175 = vmatmul.mubr.bf16.gmra.mxu0 %v1256_v18  ;;  %1191 = vmatmul.mubr.bf16.gmra.mxu1 %v1257_v19 }
  0x3e   : > { %1178 = vmatprep.mubr.bf16.mxu0 %v1258_v20  ;;  %1194 = vmatprep.mubr.bf16.mxu1 %v1259_v21 }
  0x45   : > { %1179 = vmatmul.mubr.bf16.gmra.mxu0 %v1260_v22  ;;  %1195 = vmatmul.mubr.bf16.gmra.mxu1 %v1261_v23 }
  0xed   : > { %v1168_v25 = vpop.f32.mrf.mxu0  ;;  %v1184_v27 = vpop.f32.mrf.mxu1 }
  0xee   : > { %v830_v28 = vmul.f32 %v1168_v25, %v1380_v24  ;;  %v846_v29 = vmul.f32 %v1184_v27, %v1380_v24 }
  0xef   : > { %v595_v30 = vpop.f32.mrf.mxu0  ;;  %v659_v31 = vpop.f32.mrf.mxu1 }
  0xf0   : > { %v869_v32 = vadd.f32 %v1385_v26, %v830_v28  ;;  %v885_v33 = vadd.f32 %v1385_v26, %v846_v29  ;;  %v828_v34 = vmul.f32 %v1380_v24, %v595_v30  ;;  %v844_v35 = vmul.f32 %v1380_v24, %v659_v31 }
  0xf1   : > { %v1169_v36 = vpop.f32.mrf.mxu0  ;;  %v1185_v37 = vpop.f32.mrf.mxu1 }
  0xf2   : > { %v901_v38 = vmax.f32 %v869_v32, 0.0  ;;  %v917_v39 = vmax.f32 %v885_v33, 0.0  ;;  %v867_v40 = vadd.f32 %v1385_v26, %v828_v34  ;;  %v883_v41 = vadd.f32 %v1385_v26, %v844_v35 }
  0xf3   : > { %v831_v42 = vmul.f32 %v1169_v36, %v1380_v24  ;;  %v847_v43 = vmul.f32 %v1185_v37, %v1380_v24  ;;  %v598_v44 = vpop.f32.mrf.mxu0  ;;  %v662_v45 = vpop.f32.mrf.mxu1 }
  0xf4   : > { %933 = vst [vmem:[%s1397_s25 + $0x10] sm:$0xff] %v901_v38  ;;  %949 = vst [vmem:[%s1397_s25 + $0x90] sm:$0xff] %v917_v39  ;;  %v899_v46 = vmax.f32 %v867_v40, 0.0  ;;  %v915_v47 = vmax.f32 %v883_v41, 0.0  ;;  %v829_v48 = vmul.f32 %v1380_v24, %v598_v44  ;;  %v845_v49 = vmul.f32 %v1380_v24, %v662_v45 }
  0xf5   : > { %v870_v50 = vadd.f32 %v1385_v26, %v831_v42  ;;  %v886_v51 = vadd.f32 %v1385_v26, %v847_v43  ;;  %v1172_v52 = vpop.f32.mrf.mxu0  ;;  %v1188_v53 = vpop.f32.mrf.mxu1 }
  0xf6   : > { %931 = vst [vmem:[%s1397_s25] sm:$0xff] %v899_v46  ;;  %947 = vst [vmem:[%s1397_s25 + $0x80] sm:$0xff] %v915_v47  ;;  %v868_v54 = vadd.f32 %v1385_v26, %v829_v48  ;;  %v884_v55 = vadd.f32 %v1385_v26, %v845_v49  ;;  %v834_v56 = vmul.f32 %v1172_v52, %v1380_v24 }
  0xf7   : > { %v850_v57 = vmul.f32 %v1188_v53, %v1380_v24  ;;  %v902_v58 = vmax.f32 %v870_v50, 0.0  ;;  %v918_v59 = vmax.f32 %v886_v51, 0.0  ;;  %v611_v60 = vpop.f32.mrf.mxu0  ;;  %v675_v61 = vpop.f32.mrf.mxu1 }
  0xf8   : > { %v900_v62 = vmax.f32 %v868_v54, 0.0  ;;  %v916_v63 = vmax.f32 %v884_v55, 0.0  ;;  %v873_v0 = vadd.f32 %v1385_v26, %v834_v56  ;;  %v832_v2 = vmul.f32 %v1380_v24, %v611_v60 }
  0xf9   : > { %v889_v1 = vadd.f32 %v1385_v26, %v850_v57  ;;  %934 = vst [vmem:[%s1397_s25 + $0x18] sm:$0xff] %v902_v58  ;;  %950 = vst [vmem:[%s1397_s25 + $0x98] sm:$0xff] %v918_v59  ;;  %v848_v3 = vmul.f32 %v1380_v24, %v675_v61  ;;  %v1173_v4 = vpop.f32.mrf.mxu0  ;;  %v1189_v5 = vpop.f32.mrf.mxu1 }
  0xfa   : > { %932 = vst [vmem:[%s1397_s25 + $0x8] sm:$0xff] %v900_v62  ;;  %948 = vst [vmem:[%s1397_s25 + $0x88] sm:$0xff] %v916_v63  ;;  %v905_v6 = vmax.f32 %v873_v0, 0.0  ;;  %v835_v8 = vmul.f32 %v1173_v4, %v1380_v24  ;;  %v851_v9 = vmul.f32 %v1189_v5, %v1380_v24  ;;  %v871_v10 = vadd.f32 %v1385_v26, %v832_v2 }
  0xfb   : > { %v921_v7 = vmax.f32 %v889_v1, 0.0  ;;  %v887_v11 = vadd.f32 %v1385_v26, %v848_v3  ;;  %v614_v12 = vpop.f32.mrf.mxu0  ;;  %v678_v13 = vpop.f32.mrf.mxu1 }
  0xfc   : > { %937 = vst [vmem:[%s1397_s25 + $0x30] sm:$0xff] %v905_v6  ;;  %v874_v14 = vadd.f32 %v1385_v26, %v835_v8  ;;  %v890_v15 = vadd.f32 %v1385_v26, %v851_v9  ;;  %v833_v16 = vmul.f32 %v1380_v24, %v614_v12  ;;  %v849_v17 = vmul.f32 %v1380_v24, %v678_v13 }
  0xfd   : > { %953 = vst [vmem:[%s1397_s25 + $0xb0] sm:$0xff] %v921_v7  ;;  %v903_v18 = vmax.f32 %v871_v10, 0.0  ;;  %v919_v19 = vmax.f32 %v887_v11, 0.0  ;;  %v1176_v20 = vpop.f32.mrf.mxu0  ;;  %v1192_v21 = vpop.f32.mrf.mxu1 }
  0xfe   : > { %v906_v22 = vmax.f32 %v874_v14, 0.0  ;;  %v922_v23 = vmax.f32 %v890_v15, 0.0  ;;  %v872_v25 = vadd.f32 %v1385_v26, %v833_v16  ;;  %v888_v27 = vadd.f32 %v1385_v26, %v849_v17 }
  0xff   : > { %935 = vst [vmem:[%s1397_s25 + $0x20] sm:$0xff] %v903_v18  ;;  %951 = vst [vmem:[%s1397_s25 + $0xa0] sm:$0xff] %v919_v19  ;;  %v838_v28 = vmul.f32 %v1176_v20, %v1380_v24  ;;  %v854_v29 = vmul.f32 %v1192_v21, %v1380_v24  ;;  %v627_v30 = vpop.f32.mrf.mxu0  ;;  %v691_v31 = vpop.f32.mrf.mxu1 }
 0x100   : > { %938 = vst [vmem:[%s1397_s25 + $0x38] sm:$0xff] %v906_v22  ;;  %954 = vst [vmem:[%s1397_s25 + $0xb8] sm:$0xff] %v922_v23  ;;  %v904_v32 = vmax.f32 %v872_v25, 0.0  ;;  %v920_v33 = vmax.f32 %v888_v27, 0.0  ;;  %v836_v34 = vmul.f32 %v1380_v24, %v627_v30  ;;  %v852_v35 = vmul.f32 %v1380_v24, %v691_v31 }
 0x101   : > { %v877_v36 = vadd.f32 %v1385_v26, %v838_v28  ;;  %v893_v37 = vadd.f32 %v1385_v26, %v854_v29  ;;  %v1177_v38 = vpop.f32.mrf.mxu0  ;;  %v1193_v39 = vpop.f32.mrf.mxu1 }
 0x102   : > { %936 = vst [vmem:[%s1397_s25 + $0x28] sm:$0xff] %v904_v32  ;;  %952 = vst [vmem:[%s1397_s25 + $0xa8] sm:$0xff] %v920_v33  ;;  %v875_v40 = vadd.f32 %v1385_v26, %v836_v34  ;;  %v891_v41 = vadd.f32 %v1385_v26, %v852_v35  ;;  %v839_v42 = vmul.f32 %v1177_v38, %v1380_v24 }
 0x103   : > { %v855_v43 = vmul.f32 %v1193_v39, %v1380_v24  ;;  %v909_v44 = vmax.f32 %v877_v36, 0.0  ;;  %v925_v45 = vmax.f32 %v893_v37, 0.0  ;;  %v630_v46 = vpop.f32.mrf.mxu0  ;;  %v694_v47 = vpop.f32.mrf.mxu1 }
 0x104   : > { %v907_v48 = vmax.f32 %v875_v40, 0.0  ;;  %v923_v49 = vmax.f32 %v891_v41, 0.0  ;;  %v878_v50 = vadd.f32 %v1385_v26, %v839_v42  ;;  %v837_v52 = vmul.f32 %v1380_v24, %v630_v46 }
 0x105   : > { %v894_v51 = vadd.f32 %v1385_v26, %v855_v43  ;;  %941 = vst [vmem:[%s1397_s25 + $0x50] sm:$0xff] %v909_v44  ;;  %957 = vst [vmem:[%s1397_s25 + $0xd0] sm:$0xff] %v925_v45  ;;  %v853_v53 = vmul.f32 %v1380_v24, %v694_v47  ;;  %v1180_v54 = vpop.f32.mrf.mxu0  ;;  %v1196_v55 = vpop.f32.mrf.mxu1 }
 0x106   : > { %939 = vst [vmem:[%s1397_s25 + $0x40] sm:$0xff] %v907_v48  ;;  %955 = vst [vmem:[%s1397_s25 + $0xc0] sm:$0xff] %v923_v49  ;;  %v910_v56 = vmax.f32 %v878_v50, 0.0  ;;  %v842_v58 = vmul.f32 %v1180_v54, %v1380_v24  ;;  %v858_v59 = vmul.f32 %v1196_v55, %v1380_v24  ;;  %v876_v60 = vadd.f32 %v1385_v26, %v837_v52 }
 0x107   : > { %v926_v57 = vmax.f32 %v894_v51, 0.0  ;;  %v892_v61 = vadd.f32 %v1385_v26, %v853_v53  ;;  %v643_v62 = vpop.f32.mrf.mxu0  ;;  %v707_v63 = vpop.f32.mrf.mxu1 }
 0x108   : > { %942 = vst [vmem:[%s1397_s25 + $0x58] sm:$0xff] %v910_v56  ;;  %v881_v0 = vadd.f32 %v1385_v26, %v842_v58  ;;  %v897_v1 = vadd.f32 %v1385_v26, %v858_v59  ;;  %v840_v2 = vmul.f32 %v1380_v24, %v643_v62  ;;  %v856_v3 = vmul.f32 %v1380_v24, %v707_v63 }
 0x109   : > { %958 = vst [vmem:[%s1397_s25 + $0xd8] sm:$0xff] %v926_v57  ;;  %v908_v4 = vmax.f32 %v876_v60, 0.0  ;;  %v924_v5 = vmax.f32 %v892_v61, 0.0  ;;  %v1181_v6 = vpop.f32.mrf.mxu0  ;;  %v1197_v7 = vpop.f32.mrf.mxu1 }
 0x10a   : > { %v913_v8 = vmax.f32 %v881_v0, 0.0  ;;  %v929_v9 = vmax.f32 %v897_v1, 0.0  ;;  %v879_v10 = vadd.f32 %v1385_v26, %v840_v2  ;;  %v895_v11 = vadd.f32 %v1385_v26, %v856_v3 }
 0x10b   : > { %940 = vst [vmem:[%s1397_s25 + $0x48] sm:$0xff] %v908_v4  ;;  %956 = vst [vmem:[%s1397_s25 + $0xc8] sm:$0xff] %v924_v5  ;;  %v843_v12 = vmul.f32 %v1181_v6, %v1380_v24  ;;  %v859_v13 = vmul.f32 %v1197_v7, %v1380_v24  ;;  %v646_v14 = vpop.f32.mrf.mxu0  ;;  %v710_v15 = vpop.f32.mrf.mxu1 }
 0x10c   : > { %945 = vst [vmem:[%s1397_s25 + $0x70] sm:$0xff] %v913_v8  ;;  %961 = vst [vmem:[%s1397_s25 + $0xf0] sm:$0xff] %v929_v9  ;;  %v911_v16 = vmax.f32 %v879_v10, 0.0  ;;  %v927_v17 = vmax.f32 %v895_v11, 0.0  ;;  %v841_v18 = vmul.f32 %v1380_v24, %v646_v14  ;;  %v857_v19 = vmul.f32 %v1380_v24, %v710_v15 }
 0x10d   : > { %v882_v20 = vadd.f32 %v1385_v26, %v843_v12  ;;  %v898_v21 = vadd.f32 %v1385_v26, %v859_v13 }
 0x10e   : > { %943 = vst [vmem:[%s1397_s25 + $0x60] sm:$0xff] %v911_v16  ;;  %959 = vst [vmem:[%s1397_s25 + $0xe0] sm:$0xff] %v927_v17  ;;  %v880_v22 = vadd.f32 %v1385_v26, %v841_v18  ;;  %v896_v23 = vadd.f32 %v1385_v26, %v857_v19 }
 0x10f   : > { %v914_v25 = vmax.f32 %v882_v20, 0.0  ;;  %v930_v27 = vmax.f32 %v898_v21, 0.0 }
 0x110   : > { %v912_v28 = vmax.f32 %v880_v22, 0.0  ;;  %v928_v29 = vmax.f32 %v896_v23, 0.0 }
 0x111   : > { %946 = vst [vmem:[%s1397_s25 + $0x78] sm:$0xff] %v914_v25  ;;  %962 = vst [vmem:[%s1397_s25 + $0xf8] sm:$0xff] %v930_v27 }
 0x112   : > { %944 = vst [vmem:[%s1397_s25 + $0x68] sm:$0xff] %v912_v28  ;;  %960 = vst [vmem:[%s1397_s25 + $0xe8] sm:$0xff] %v928_v29 }
 0x113 PF: > { %s14_s17 = sadd.s32 1, %s1284_s17   ;;  %s1503_s15 = smov %s1280_s16 }
 0x114   : > { %p11_p5 = scmp.ge.s32.totalorder %s14_s17, 18   ;;  %s1504_s16 = smov %s1506_s18 }
 0x116   :  { %13 = sbr.rel (!%p11_p5) target bundleno = 2 (0x2), region = 83 }

// kernel: vanilla_forward.18
= control target key start
LH: loop header
LB: loop body
LE: loop exit
PB: predicated region body
PF: predicated region fallthrough
CT: control target
= control target key end

     0   :  { %s1311_s15 = smov 0   ;;  %s1313_s16 = smov 0   ;;  %s1498_s0 = inlined_call_operand.vmem [shape: bf16[1024,128], index: 0, kind: input, shape index: {}]   ;;  %s1499_s1 = inlined_call_operand.vmem [shape: bf16[128,128], index: 1, kind: input, shape index: {}]   ;;  %s1500_s2 = inlined_call_operand.vmem [shape: f32[1,128], index: 2, kind: input, shape index: {}]   ;;  %s1501_s3 = inlined_call_operand.vmem [shape: f32[1,128], index: 3, kind: input, shape index: {}]   ;;  %s1502_s4 = inlined_call_operand.vmem [shape: f32[1024,128], index: 4, kind: output, shape index: {}]  }
   0x1   :  { %s1315_s17 = smov 0  }
   0x2 LB: > { %s33_s18 = sadd.s32 1, %s1280_s16  ;;  %p1093_p0 = scmp.ge.s32.totalorder %s1284_s17, 1  ;;  %s1284_s17 = sphi %s1315_s17, %s14_s17   ;;  %s1280_s16 = sphi %s1313_s16, %s1504_s16   ;;  %s1276_s15 = sphi %s1311_s15, %s1503_s15  }
   0x3   : > { %p35_p1 = scmp.ge.s32.totalorder %s33_s18, 4  ;;  %p221_p2 = scmp.lt.s32.totalorder %s1284_s17, 5 }
   0x5   : > { %s1506_s18 = smov (%p35_p1, %s33_s18), 0  ;;  %p222_p3 = pnand %p1093_p0, %p221_p2 }
   0x6   : > { %s1094_s21 = sshll.u32 (!%p222_p3), %s1276_s15, 5 }
   0x7   : > { %225 = sbr.rel (%p222_p3) target bundleno = 275 (0x113), region = 36  ;;  %p268_p4 = scmp.lt.s32.totalorder (!%p222_p3), %s1094_s21, 127 }
   0xc   : > { %v1238_v0 = vld [vmem:[%s1499_s1 + $0x38] sm:$0xff]   ;;  %v1239_v1 = vld [vmem:[%s1499_s1 + $0x30] sm:$0xff]   ;;  %s1508_s21 = smov (!%p268_p4, %s1094_s21), 127  ;;  %v1240_v2 = vld [vmem:[%s1499_s1 + $0x28] sm:$0xff]  }
   0xd   : > { %1150 = vmatprep.subr.bf16.mxu0 %v1238_v0  ;;  %1198 = vmatprep.subr.bf16.mxu1 %v1238_v0  ;;  %s1095_s26 = sshll.u32 %s1508_s21, 2  ;;  %v1241_v3 = vld [vmem:[%s1499_s1 + $0x20] sm:$0xff]   ;;  %v1242_v6 = vld [vmem:[%s1499_s1 + $0x18] sm:$0xff]   ;;  %v1243_v7 = vld [vmem:[%s1499_s1 + $0x10] sm:$0xff]   ;;  %s1097_s22 = sshll.u32 %s1508_s21, 3 }
   0xe   : > { %1151 = vmatpush3.bf16.msra.mxu0 %v1238_v0  ;;  %1206 = vmatpush3.bf16.msra.mxu1 %v1238_v0  ;;  %s1344_s29 = scalar_lea.vmem %s1498_s0, %s1095_s26  ;;  %v1244_v8 = vld [vmem:[%s1499_s1 + $0x8] sm:$0xff]   ;;  %v1245_v9 = vld [vmem:[%s1499_s1] sm:$0xff]   ;;  %s1397_s25 = scalar_lea.vmem %s1502_s4, %s1097_s22 }
   0xf   : > { %1152 = vmatprep.subr.bf16.mxu0 %v1239_v1  ;;  %1199 = vmatprep.subr.bf16.mxu1 %v1239_v1  ;;  %v1246_v4 = vld [vmem:[%s1344_s29] sm:$0xff]   ;;  %v1248_v10 = vld [vmem:[%s1344_s29 + $0x8] sm:$0xff]   ;;  %v1250_v12 = vld [vmem:[%s1344_s29 + $0x10] sm:$0xff]  }
  0x10   : > { %v1247_v5 = vld [vmem:[%s1344_s29 + $0x40] sm:$0xff]   ;;  %1166 = vmatprep.mubr.bf16.mxu0 %v1246_v4  ;;  %v1249_v11 = vld [vmem:[%s1344_s29 + $0x48] sm:$0xff]   ;;  %v1251_v13 = vld [vmem:[%s1344_s29 + $0x50] sm:$0xff]  }
  0x11   : > { %1182 = vmatprep.mubr.bf16.mxu1 %v1247_v5  ;;  %v1252_v14 = vld [vmem:[%s1344_s29 + $0x18] sm:$0xff]   ;;  %v1254_v16 = vld [vmem:[%s1344_s29 + $0x20] sm:$0xff]   ;;  %v1256_v18 = vld [vmem:[%s1344_s29 + $0x28] sm:$0xff]  }
  0x12   : > { %1153 = vmatpush3.bf16.msra.mxu0 %v1239_v1  ;;  %1207 = vmatpush3.bf16.msra.mxu1 %v1239_v1  ;;  %v1253_v15 = vld [vmem:[%s1344_s29 + $0x58] sm:$0xff]   ;;  %v1255_v17 = vld [vmem:[%s1344_s29 + $0x60] sm:$0xff]   ;;  %v1257_v19 = vld [vmem:[%s1344_s29 + $0x68] sm:$0xff]  }
  0x13   : > { %1154 = vmatprep.subr.bf16.mxu0 %v1240_v2  ;;  %1200 = vmatprep.subr.bf16.mxu1 %v1240_v2  ;;  %v1258_v20 = vld [vmem:[%s1344_s29 + $0x30] sm:$0xff]   ;;  %v1260_v22 = vld [vmem:[%s1344_s29 + $0x38] sm:$0xff]   ;;  %v1380_v24 = vld [vmem:[%s1500_s2] ss:$0 sm:$0xff] }
  0x14   : > { %v1259_v21 = vld [vmem:[%s1344_s29 + $0x70] sm:$0xff]   ;;  %v1261_v23 = vld [vmem:[%s1344_s29 + $0x78] sm:$0xff]   ;;  %v1385_v26 = vld [vmem:[%s1501_s3] ss:$0 sm:$0xff] }
  0x16   : > { %1155 = vmatpush3.bf16.msra.mxu0 %v1240_v2  ;;  %1208 = vmatpush3.bf16.msra.mxu1 %v1240_v2 }
  0x17   : > { %1156 = vmatprep.subr.bf16.mxu0 %v1241_v3  ;;  %1201 = vmatprep.subr.bf16.mxu1 %v1241_v3 }
  0x1a   : > { %1157 = vmatpush3.bf16.msra.mxu0 %v1241_v3  ;;  %1209 = vmatpush3.bf16.msra.mxu1 %v1241_v3 }
  0x1b   : > { %1158 = vmatprep.subr.bf16.mxu0 %v1242_v6  ;;  %1202 = vmatprep.subr.bf16.mxu1 %v1242_v6 }
  0x1e   : > { %1159 = vmatpush3.bf16.msra.mxu0 %v1242_v6  ;;  %1210 = vmatpush3.bf16.msra.mxu1 %v1242_v6 }
  0x1f   : > { %1160 = vmatprep.subr.bf16.mxu0 %v1243_v7  ;;  %1203 = vmatprep.subr.bf16.mxu1 %v1243_v7 }
  0x22   : > { %1161 = vmatpush3.bf16.msra.mxu0 %v1243_v7  ;;  %1211 = vmatpush3.bf16.msra.mxu1 %v1243_v7 }
  0x23   : > { %1162 = vmatprep.subr.bf16.mxu0 %v1244_v8  ;;  %1204 = vmatprep.subr.bf16.mxu1 %v1244_v8 }
  0x26   : > { %1163 = vmatpush3.bf16.msra.mxu0 %v1244_v8  ;;  %1212 = vmatpush3.bf16.msra.mxu1 %v1244_v8 }
  0x27   : > { %1164 = vmatprep.subr.bf16.mxu0 %v1245_v9  ;;  %1205 = vmatprep.subr.bf16.mxu1 %v1245_v9 }
  0x2a   : > { %1165 = vmatpush3.bf16.msra.mxu0 %v1245_v9  ;;  %1213 = vmatpush3.bf16.msra.mxu1 %v1245_v9 }
  0x2d   : > { %1167 = vmatmul.mubr.bf16.vlgmr.msra.gmra.mxu0 %v1248_v10  ;;  %1183 = vmatmul.mubr.bf16.vlgmr.msra.gmra.mxu1 %v1249_v11 }
  0x2e   : > { %1170 = vmatprep.mubr.bf16.mxu0 %v1250_v12  ;;  %1186 = vmatprep.mubr.bf16.mxu1 %v1251_v13 }
  0x35   : > { %1171 = vmatmul.mubr.bf16.gmra.mxu0 %v1252_v14  ;;  %1187 = vmatmul.mubr.bf16.gmra.mxu1 %v1253_v15 }
  0x36   : > { %1174 = vmatprep.mubr.bf16.mxu0 %v1254_v16  ;;  %1190 = vmatprep.mubr.bf16.mxu1 %v1255_v17 }
  0x3d   : > { %1175 = vmatmul.mubr.bf16.gmra.mxu0 %v1256_v18  ;;  %1191 = vmatmul.mubr.bf16.gmra.mxu1 %v1257_v19 }
  0x3e   : > { %1178 = vmatprep.mubr.bf16.mxu0 %v1258_v20  ;;  %1194 = vmatprep.mubr.bf16.mxu1 %v1259_v21 }
  0x45   : > { %1179 = vmatmul.mubr.bf16.gmra.mxu0 %v1260_v22  ;;  %1195 = vmatmul.mubr.bf16.gmra.mxu1 %v1261_v23 }
  0xed   : > { %v1168_v25 = vpop.f32.mrf.mxu0  ;;  %v1184_v27 = vpop.f32.mrf.mxu1 }
  0xee   : > { %v830_v28 = vmul.f32 %v1168_v25, %v1380_v24  ;;  %v846_v29 = vmul.f32 %v1184_v27, %v1380_v24 }
  0xef   : > { %v595_v30 = vpop.f32.mrf.mxu0  ;;  %v659_v31 = vpop.f32.mrf.mxu1 }
  0xf0   : > { %v869_v32 = vadd.f32 %v1385_v26, %v830_v28  ;;  %v885_v33 = vadd.f32 %v1385_v26, %v846_v29  ;;  %v828_v34 = vmul.f32 %v1380_v24, %v595_v30  ;;  %v844_v35 = vmul.f32 %v1380_v24, %v659_v31 }
  0xf1   : > { %v1169_v36 = vpop.f32.mrf.mxu0  ;;  %v1185_v37 = vpop.f32.mrf.mxu1 }
  0xf2   : > { %v901_v38 = vmax.f32 %v869_v32, 0.0  ;;  %v917_v39 = vmax.f32 %v885_v33, 0.0  ;;  %v867_v40 = vadd.f32 %v1385_v26, %v828_v34  ;;  %v883_v41 = vadd.f32 %v1385_v26, %v844_v35 }
  0xf3   : > { %v831_v42 = vmul.f32 %v1169_v36, %v1380_v24  ;;  %v847_v43 = vmul.f32 %v1185_v37, %v1380_v24  ;;  %v598_v44 = vpop.f32.mrf.mxu0  ;;  %v662_v45 = vpop.f32.mrf.mxu1 }
  0xf4   : > { %933 = vst [vmem:[%s1397_s25 + $0x10] sm:$0xff] %v901_v38  ;;  %949 = vst [vmem:[%s1397_s25 + $0x90] sm:$0xff] %v917_v39  ;;  %v899_v46 = vmax.f32 %v867_v40, 0.0  ;;  %v915_v47 = vmax.f32 %v883_v41, 0.0  ;;  %v829_v48 = vmul.f32 %v1380_v24, %v598_v44  ;;  %v845_v49 = vmul.f32 %v1380_v24, %v662_v45 }
  0xf5   : > { %v870_v50 = vadd.f32 %v1385_v26, %v831_v42  ;;  %v886_v51 = vadd.f32 %v1385_v26, %v847_v43  ;;  %v1172_v52 = vpop.f32.mrf.mxu0  ;;  %v1188_v53 = vpop.f32.mrf.mxu1 }
  0xf6   : > { %931 = vst [vmem:[%s1397_s25] sm:$0xff] %v899_v46  ;;  %947 = vst [vmem:[%s1397_s25 + $0x80] sm:$0xff] %v915_v47  ;;  %v868_v54 = vadd.f32 %v1385_v26, %v829_v48  ;;  %v884_v55 = vadd.f32 %v1385_v26, %v845_v49  ;;  %v834_v56 = vmul.f32 %v1172_v52, %v1380_v24 }
  0xf7   : > { %v850_v57 = vmul.f32 %v1188_v53, %v1380_v24  ;;  %v902_v58 = vmax.f32 %v870_v50, 0.0  ;;  %v918_v59 = vmax.f32 %v886_v51, 0.0  ;;  %v611_v60 = vpop.f32.mrf.mxu0  ;;  %v675_v61 = vpop.f32.mrf.mxu1 }
  0xf8   : > { %v900_v62 = vmax.f32 %v868_v54, 0.0  ;;  %v916_v63 = vmax.f32 %v884_v55, 0.0  ;;  %v873_v0 = vadd.f32 %v1385_v26, %v834_v56  ;;  %v832_v2 = vmul.f32 %v1380_v24, %v611_v60 }
  0xf9   : > { %v889_v1 = vadd.f32 %v1385_v26, %v850_v57  ;;  %934 = vst [vmem:[%s1397_s25 + $0x18] sm:$0xff] %v902_v58  ;;  %950 = vst [vmem:[%s1397_s25 + $0x98] sm:$0xff] %v918_v59  ;;  %v848_v3 = vmul.f32 %v1380_v24, %v675_v61  ;;  %v1173_v4 = vpop.f32.mrf.mxu0  ;;  %v1189_v5 = vpop.f32.mrf.mxu1 }
  0xfa   : > { %932 = vst [vmem:[%s1397_s25 + $0x8] sm:$0xff] %v900_v62  ;;  %948 = vst [vmem:[%s1397_s25 + $0x88] sm:$0xff] %v916_v63  ;;  %v905_v6 = vmax.f32 %v873_v0, 0.0  ;;  %v835_v8 = vmul.f32 %v1173_v4, %v1380_v24  ;;  %v851_v9 = vmul.f32 %v1189_v5, %v1380_v24  ;;  %v871_v10 = vadd.f32 %v1385_v26, %v832_v2 }
  0xfb   : > { %v921_v7 = vmax.f32 %v889_v1, 0.0  ;;  %v887_v11 = vadd.f32 %v1385_v26, %v848_v3  ;;  %v614_v12 = vpop.f32.mrf.mxu0  ;;  %v678_v13 = vpop.f32.mrf.mxu1 }
  0xfc   : > { %937 = vst [vmem:[%s1397_s25 + $0x30] sm:$0xff] %v905_v6  ;;  %v874_v14 = vadd.f32 %v1385_v26, %v835_v8  ;;  %v890_v15 = vadd.f32 %v1385_v26, %v851_v9  ;;  %v833_v16 = vmul.f32 %v1380_v24, %v614_v12  ;;  %v849_v17 = vmul.f32 %v1380_v24, %v678_v13 }
  0xfd   : > { %953 = vst [vmem:[%s1397_s25 + $0xb0] sm:$0xff] %v921_v7  ;;  %v903_v18 = vmax.f32 %v871_v10, 0.0  ;;  %v919_v19 = vmax.f32 %v887_v11, 0.0  ;;  %v1176_v20 = vpop.f32.mrf.mxu0  ;;  %v1192_v21 = vpop.f32.mrf.mxu1 }
  0xfe   : > { %v906_v22 = vmax.f32 %v874_v14, 0.0  ;;  %v922_v23 = vmax.f32 %v890_v15, 0.0  ;;  %v872_v25 = vadd.f32 %v1385_v26, %v833_v16  ;;  %v888_v27 = vadd.f32 %v1385_v26, %v849_v17 }
  0xff   : > { %935 = vst [vmem:[%s1397_s25 + $0x20] sm:$0xff] %v903_v18  ;;  %951 = vst [vmem:[%s1397_s25 + $0xa0] sm:$0xff] %v919_v19  ;;  %v838_v28 = vmul.f32 %v1176_v20, %v1380_v24  ;;  %v854_v29 = vmul.f32 %v1192_v21, %v1380_v24  ;;  %v627_v30 = vpop.f32.mrf.mxu0  ;;  %v691_v31 = vpop.f32.mrf.mxu1 }
 0x100   : > { %938 = vst [vmem:[%s1397_s25 + $0x38] sm:$0xff] %v906_v22  ;;  %954 = vst [vmem:[%s1397_s25 + $0xb8] sm:$0xff] %v922_v23  ;;  %v904_v32 = vmax.f32 %v872_v25, 0.0  ;;  %v920_v33 = vmax.f32 %v888_v27, 0.0  ;;  %v836_v34 = vmul.f32 %v1380_v24, %v627_v30  ;;  %v852_v35 = vmul.f32 %v1380_v24, %v691_v31 }
 0x101   : > { %v877_v36 = vadd.f32 %v1385_v26, %v838_v28  ;;  %v893_v37 = vadd.f32 %v1385_v26, %v854_v29  ;;  %v1177_v38 = vpop.f32.mrf.mxu0  ;;  %v1193_v39 = vpop.f32.mrf.mxu1 }
 0x102   : > { %936 = vst [vmem:[%s1397_s25 + $0x28] sm:$0xff] %v904_v32  ;;  %952 = vst [vmem:[%s1397_s25 + $0xa8] sm:$0xff] %v920_v33  ;;  %v875_v40 = vadd.f32 %v1385_v26, %v836_v34  ;;  %v891_v41 = vadd.f32 %v1385_v26, %v852_v35  ;;  %v839_v42 = vmul.f32 %v1177_v38, %v1380_v24 }
 0x103   : > { %v855_v43 = vmul.f32 %v1193_v39, %v1380_v24  ;;  %v909_v44 = vmax.f32 %v877_v36, 0.0  ;;  %v925_v45 = vmax.f32 %v893_v37, 0.0  ;;  %v630_v46 = vpop.f32.mrf.mxu0  ;;  %v694_v47 = vpop.f32.mrf.mxu1 }
 0x104   : > { %v907_v48 = vmax.f32 %v875_v40, 0.0  ;;  %v923_v49 = vmax.f32 %v891_v41, 0.0  ;;  %v878_v50 = vadd.f32 %v1385_v26, %v839_v42  ;;  %v837_v52 = vmul.f32 %v1380_v24, %v630_v46 }
 0x105   : > { %v894_v51 = vadd.f32 %v1385_v26, %v855_v43  ;;  %941 = vst [vmem:[%s1397_s25 + $0x50] sm:$0xff] %v909_v44  ;;  %957 = vst [vmem:[%s1397_s25 + $0xd0] sm:$0xff] %v925_v45  ;;  %v853_v53 = vmul.f32 %v1380_v24, %v694_v47  ;;  %v1180_v54 = vpop.f32.mrf.mxu0  ;;  %v1196_v55 = vpop.f32.mrf.mxu1 }
 0x106   : > { %939 = vst [vmem:[%s1397_s25 + $0x40] sm:$0xff] %v907_v48  ;;  %955 = vst [vmem:[%s1397_s25 + $0xc0] sm:$0xff] %v923_v49  ;;  %v910_v56 = vmax.f32 %v878_v50, 0.0  ;;  %v842_v58 = vmul.f32 %v1180_v54, %v1380_v24  ;;  %v858_v59 = vmul.f32 %v1196_v55, %v1380_v24  ;;  %v876_v60 = vadd.f32 %v1385_v26, %v837_v52 }
 0x107   : > { %v926_v57 = vmax.f32 %v894_v51, 0.0  ;;  %v892_v61 = vadd.f32 %v1385_v26, %v853_v53  ;;  %v643_v62 = vpop.f32.mrf.mxu0  ;;  %v707_v63 = vpop.f32.mrf.mxu1 }
 0x108   : > { %942 = vst [vmem:[%s1397_s25 + $0x58] sm:$0xff] %v910_v56  ;;  %v881_v0 = vadd.f32 %v1385_v26, %v842_v58  ;;  %v897_v1 = vadd.f32 %v1385_v26, %v858_v59  ;;  %v840_v2 = vmul.f32 %v1380_v24, %v643_v62  ;;  %v856_v3 = vmul.f32 %v1380_v24, %v707_v63 }
 0x109   : > { %958 = vst [vmem:[%s1397_s25 + $0xd8] sm:$0xff] %v926_v57  ;;  %v908_v4 = vmax.f32 %v876_v60, 0.0  ;;  %v924_v5 = vmax.f32 %v892_v61, 0.0  ;;  %v1181_v6 = vpop.f32.mrf.mxu0  ;;  %v1197_v7 = vpop.f32.mrf.mxu1 }
 0x10a   : > { %v913_v8 = vmax.f32 %v881_v0, 0.0  ;;  %v929_v9 = vmax.f32 %v897_v1, 0.0  ;;  %v879_v10 = vadd.f32 %v1385_v26, %v840_v2  ;;  %v895_v11 = vadd.f32 %v1385_v26, %v856_v3 }
 0x10b   : > { %940 = vst [vmem:[%s1397_s25 + $0x48] sm:$0xff] %v908_v4  ;;  %956 = vst [vmem:[%s1397_s25 + $0xc8] sm:$0xff] %v924_v5  ;;  %v843_v12 = vmul.f32 %v1181_v6, %v1380_v24  ;;  %v859_v13 = vmul.f32 %v1197_v7, %v1380_v24  ;;  %v646_v14 = vpop.f32.mrf.mxu0  ;;  %v710_v15 = vpop.f32.mrf.mxu1 }
 0x10c   : > { %945 = vst [vmem:[%s1397_s25 + $0x70] sm:$0xff] %v913_v8  ;;  %961 = vst [vmem:[%s1397_s25 + $0xf0] sm:$0xff] %v929_v9  ;;  %v911_v16 = vmax.f32 %v879_v10, 0.0  ;;  %v927_v17 = vmax.f32 %v895_v11, 0.0  ;;  %v841_v18 = vmul.f32 %v1380_v24, %v646_v14  ;;  %v857_v19 = vmul.f32 %v1380_v24, %v710_v15 }
 0x10d   : > { %v882_v20 = vadd.f32 %v1385_v26, %v843_v12  ;;  %v898_v21 = vadd.f32 %v1385_v26, %v859_v13 }
 0x10e   : > { %943 = vst [vmem:[%s1397_s25 + $0x60] sm:$0xff] %v911_v16  ;;  %959 = vst [vmem:[%s1397_s25 + $0xe0] sm:$0xff] %v927_v17  ;;  %v880_v22 = vadd.f32 %v1385_v26, %v841_v18  ;;  %v896_v23 = vadd.f32 %v1385_v26, %v857_v19 }
 0x10f   : > { %v914_v25 = vmax.f32 %v882_v20, 0.0  ;;  %v930_v27 = vmax.f32 %v898_v21, 0.0 }
 0x110   : > { %v912_v28 = vmax.f32 %v880_v22, 0.0  ;;  %v928_v29 = vmax.f32 %v896_v23, 0.0 }
 0x111   : > { %946 = vst [vmem:[%s1397_s25 + $0x78] sm:$0xff] %v914_v25  ;;  %962 = vst [vmem:[%s1397_s25 + $0xf8] sm:$0xff] %v930_v27 }
 0x112   : > { %944 = vst [vmem:[%s1397_s25 + $0x68] sm:$0xff] %v912_v28  ;;  %960 = vst [vmem:[%s1397_s25 + $0xe8] sm:$0xff] %v928_v29 }
 0x113 PF: > { %s14_s17 = sadd.s32 1, %s1284_s17   ;;  %s1503_s15 = smov %s1280_s16 }
 0x114   : > { %p11_p5 = scmp.ge.s32.totalorder %s14_s17, 6   ;;  %s1504_s16 = smov %s1506_s18 }
 0x116   :  { %13 = sbr.rel (!%p11_p5) target bundleno = 2 (0x2), region = 83 }

// kernel: vanilla_forward.17
= control target key start
LH: loop header
LB: loop body
LE: loop exit
PB: predicated region body
PF: predicated region fallthrough
CT: control target
= control target key end

     0   :  { %s1279_s15 = smov 0   ;;  %s1281_s16 = smov 0   ;;  %s1466_s0 = inlined_call_operand.vmem [shape: bf16[1024,128], index: 0, kind: input, shape index: {}]   ;;  %s1467_s1 = inlined_call_operand.vmem [shape: bf16[128,128], index: 1, kind: input, shape index: {}]   ;;  %s1468_s2 = inlined_call_operand.vmem [shape: f32[1,128], index: 2, kind: input, shape index: {}]   ;;  %s1469_s3 = inlined_call_operand.vmem [shape: f32[1,128], index: 3, kind: input, shape index: {}]   ;;  %s1470_s4 = inlined_call_operand.vmem [shape: f32[1024,128], index: 4, kind: output, shape index: {}]  }
   0x1   :  { %s1283_s17 = smov 0  }
   0x2 LB: > { %s33_s18 = sadd.s32 1, %s1248_s16  ;;  %p1061_p0 = scmp.ge.s32.totalorder %s1252_s17, 1  ;;  %s1252_s17 = sphi %s1283_s17, %s14_s17   ;;  %s1248_s16 = sphi %s1281_s16, %s1472_s16   ;;  %s1244_s15 = sphi %s1279_s15, %s1471_s15  }
   0x3   : > { %p35_p1 = scmp.ge.s32.totalorder %s33_s18, 4  ;;  %p221_p2 = scmp.lt.s32.totalorder %s1252_s17, 5 }
   0x5   : > { %s1474_s18 = smov (%p35_p1, %s33_s18), 0  ;;  %p222_p3 = pnand %p1061_p0, %p221_p2 }
   0x6   : > { %s1062_s21 = sshll.u32 (!%p222_p3), %s1244_s15, 5 }
   0x7   : > { %225 = sbr.rel (%p222_p3) target bundleno = 273 (0x111), region = 36  ;;  %p268_p4 = scmp.lt.s32.totalorder (!%p222_p3), %s1062_s21, 127 }
   0xc   : > { %v1206_v0 = vld [vmem:[%s1467_s1 + $0x38] sm:$0xff]   ;;  %v1207_v1 = vld [vmem:[%s1467_s1 + $0x30] sm:$0xff]   ;;  %s1476_s21 = smov (!%p268_p4, %s1062_s21), 127  ;;  %v1208_v2 = vld [vmem:[%s1467_s1 + $0x28] sm:$0xff]  }
   0xd   : > { %1118 = vmatprep.subr.bf16.mxu0 %v1206_v0  ;;  %1166 = vmatprep.subr.bf16.mxu1 %v1206_v0  ;;  %s1063_s26 = sshll.u32 %s1476_s21, 2  ;;  %v1209_v3 = vld [vmem:[%s1467_s1 + $0x20] sm:$0xff]   ;;  %v1210_v6 = vld [vmem:[%s1467_s1 + $0x18] sm:$0xff]   ;;  %v1211_v7 = vld [vmem:[%s1467_s1 + $0x10] sm:$0xff]   ;;  %s1065_s19 = sshll.u32 %s1476_s21, 3 }
   0xe   : > { %1119 = vmatpush3.bf16.msra.mxu0 %v1206_v0  ;;  %1174 = vmatpush3.bf16.msra.mxu1 %v1206_v0  ;;  %s1312_s29 = scalar_lea.vmem %s1466_s0, %s1063_s26  ;;  %v1212_v8 = vld [vmem:[%s1467_s1 + $0x8] sm:$0xff]   ;;  %v1213_v9 = vld [vmem:[%s1467_s1] sm:$0xff]   ;;  %s1361_s25 = scalar_lea.vmem %s1470_s4, %s1065_s19 }
   0xf   : > { %1120 = vmatprep.subr.bf16.mxu0 %v1207_v1  ;;  %1167 = vmatprep.subr.bf16.mxu1 %v1207_v1  ;;  %v1214_v4 = vld [vmem:[%s1312_s29] sm:$0xff]   ;;  %v1216_v10 = vld [vmem:[%s1312_s29 + $0x8] sm:$0xff]   ;;  %v1218_v12 = vld [vmem:[%s1312_s29 + $0x10] sm:$0xff]  }
  0x10   : > { %v1215_v5 = vld [vmem:[%s1312_s29 + $0x40] sm:$0xff]   ;;  %1134 = vmatprep.mubr.bf16.mxu0 %v1214_v4  ;;  %v1217_v11 = vld [vmem:[%s1312_s29 + $0x48] sm:$0xff]   ;;  %v1219_v13 = vld [vmem:[%s1312_s29 + $0x50] sm:$0xff]  }
  0x11   : > { %1150 = vmatprep.mubr.bf16.mxu1 %v1215_v5  ;;  %v1220_v14 = vld [vmem:[%s1312_s29 + $0x18] sm:$0xff]   ;;  %v1222_v16 = vld [vmem:[%s1312_s29 + $0x20] sm:$0xff]   ;;  %v1224_v18 = vld [vmem:[%s1312_s29 + $0x28] sm:$0xff]  }
  0x12   : > { %1121 = vmatpush3.bf16.msra.mxu0 %v1207_v1  ;;  %1175 = vmatpush3.bf16.msra.mxu1 %v1207_v1  ;;  %v1221_v15 = vld [vmem:[%s1312_s29 + $0x58] sm:$0xff]   ;;  %v1223_v17 = vld [vmem:[%s1312_s29 + $0x60] sm:$0xff]   ;;  %v1225_v19 = vld [vmem:[%s1312_s29 + $0x68] sm:$0xff]  }
  0x13   : > { %1122 = vmatprep.subr.bf16.mxu0 %v1208_v2  ;;  %1168 = vmatprep.subr.bf16.mxu1 %v1208_v2  ;;  %v1226_v20 = vld [vmem:[%s1312_s29 + $0x30] sm:$0xff]   ;;  %v1228_v22 = vld [vmem:[%s1312_s29 + $0x38] sm:$0xff]   ;;  %v1348_v24 = vld [vmem:[%s1468_s2] ss:$0 sm:$0xff] }
  0x14   : > { %v1227_v21 = vld [vmem:[%s1312_s29 + $0x70] sm:$0xff]   ;;  %v1229_v23 = vld [vmem:[%s1312_s29 + $0x78] sm:$0xff]   ;;  %v1354_v26 = vld [vmem:[%s1469_s3] ss:$0 sm:$0xff] }
  0x16   : > { %1123 = vmatpush3.bf16.msra.mxu0 %v1208_v2  ;;  %1176 = vmatpush3.bf16.msra.mxu1 %v1208_v2 }
  0x17   : > { %1124 = vmatprep.subr.bf16.mxu0 %v1209_v3  ;;  %1169 = vmatprep.subr.bf16.mxu1 %v1209_v3 }
  0x1a   : > { %1125 = vmatpush3.bf16.msra.mxu0 %v1209_v3  ;;  %1177 = vmatpush3.bf16.msra.mxu1 %v1209_v3 }
  0x1b   : > { %1126 = vmatprep.subr.bf16.mxu0 %v1210_v6  ;;  %1170 = vmatprep.subr.bf16.mxu1 %v1210_v6 }
  0x1e   : > { %1127 = vmatpush3.bf16.msra.mxu0 %v1210_v6  ;;  %1178 = vmatpush3.bf16.msra.mxu1 %v1210_v6 }
  0x1f   : > { %1128 = vmatprep.subr.bf16.mxu0 %v1211_v7  ;;  %1171 = vmatprep.subr.bf16.mxu1 %v1211_v7 }
  0x22   : > { %1129 = vmatpush3.bf16.msra.mxu0 %v1211_v7  ;;  %1179 = vmatpush3.bf16.msra.mxu1 %v1211_v7 }
  0x23   : > { %1130 = vmatprep.subr.bf16.mxu0 %v1212_v8  ;;  %1172 = vmatprep.subr.bf16.mxu1 %v1212_v8 }
  0x26   : > { %1131 = vmatpush3.bf16.msra.mxu0 %v1212_v8  ;;  %1180 = vmatpush3.bf16.msra.mxu1 %v1212_v8 }
  0x27   : > { %1132 = vmatprep.subr.bf16.mxu0 %v1213_v9  ;;  %1173 = vmatprep.subr.bf16.mxu1 %v1213_v9 }
  0x2a   : > { %1133 = vmatpush3.bf16.msra.mxu0 %v1213_v9  ;;  %1181 = vmatpush3.bf16.msra.mxu1 %v1213_v9 }
  0x2d   : > { %1135 = vmatmul.mubr.bf16.vlgmr.msra.gmra.mxu0 %v1216_v10  ;;  %1151 = vmatmul.mubr.bf16.vlgmr.msra.gmra.mxu1 %v1217_v11 }
  0x2e   : > { %1138 = vmatprep.mubr.bf16.mxu0 %v1218_v12  ;;  %1154 = vmatprep.mubr.bf16.mxu1 %v1219_v13 }
  0x35   : > { %1139 = vmatmul.mubr.bf16.gmra.mxu0 %v1220_v14  ;;  %1155 = vmatmul.mubr.bf16.gmra.mxu1 %v1221_v15 }
  0x36   : > { %1142 = vmatprep.mubr.bf16.mxu0 %v1222_v16  ;;  %1158 = vmatprep.mubr.bf16.mxu1 %v1223_v17 }
  0x3d   : > { %1143 = vmatmul.mubr.bf16.gmra.mxu0 %v1224_v18  ;;  %1159 = vmatmul.mubr.bf16.gmra.mxu1 %v1225_v19 }
  0x3e   : > { %1146 = vmatprep.mubr.bf16.mxu0 %v1226_v20  ;;  %1162 = vmatprep.mubr.bf16.mxu1 %v1227_v21 }
  0x45   : > { %1147 = vmatmul.mubr.bf16.gmra.mxu0 %v1228_v22  ;;  %1163 = vmatmul.mubr.bf16.gmra.mxu1 %v1229_v23 }
  0xed   : > { %v1136_v25 = vpop.f32.mrf.mxu0  ;;  %v1152_v27 = vpop.f32.mrf.mxu1 }
  0xee   : > { %v830_v28 = vmul.f32 %v1136_v25, %v1348_v24  ;;  %v846_v29 = vmul.f32 %v1152_v27, %v1348_v24 }
  0xef   : > { %v595_v30 = vpop.f32.mrf.mxu0  ;;  %v659_v31 = vpop.f32.mrf.mxu1 }
  0xf0   : > { %v869_v32 = vadd.f32 %v1354_v26, %v830_v28  ;;  %v885_v33 = vadd.f32 %v1354_v26, %v846_v29  ;;  %v828_v34 = vmul.f32 %v1348_v24, %v595_v30  ;;  %v844_v35 = vmul.f32 %v1348_v24, %v659_v31 }
  0xf1   : > { %v1137_v36 = vpop.f32.mrf.mxu0  ;;  %v1153_v37 = vpop.f32.mrf.mxu1 }
  0xf2   : > { %901 = vst [vmem:[%s1361_s25 + $0x10] sm:$0xff] %v869_v32  ;;  %917 = vst [vmem:[%s1361_s25 + $0x90] sm:$0xff] %v885_v33  ;;  %v867_v38 = vadd.f32 %v1354_v26, %v828_v34  ;;  %v883_v39 = vadd.f32 %v1354_v26, %v844_v35  ;;  %v831_v40 = vmul.f32 %v1137_v36, %v1348_v24 }
  0xf3   : > { %v847_v41 = vmul.f32 %v1153_v37, %v1348_v24  ;;  %v598_v42 = vpop.f32.mrf.mxu0  ;;  %v662_v43 = vpop.f32.mrf.mxu1 }
  0xf4   : > { %899 = vst [vmem:[%s1361_s25] sm:$0xff] %v867_v38  ;;  %915 = vst [vmem:[%s1361_s25 + $0x80] sm:$0xff] %v883_v39  ;;  %v870_v44 = vadd.f32 %v1354_v26, %v831_v40  ;;  %v829_v46 = vmul.f32 %v1348_v24, %v598_v42  ;;  %v845_v47 = vmul.f32 %v1348_v24, %v662_v43 }
  0xf5   : > { %v886_v45 = vadd.f32 %v1354_v26, %v847_v41  ;;  %v1140_v48 = vpop.f32.mrf.mxu0  ;;  %v1156_v49 = vpop.f32.mrf.mxu1 }
  0xf6   : > { %902 = vst [vmem:[%s1361_s25 + $0x18] sm:$0xff] %v870_v44  ;;  %v868_v50 = vadd.f32 %v1354_v26, %v829_v46  ;;  %v884_v51 = vadd.f32 %v1354_v26, %v845_v47  ;;  %v834_v52 = vmul.f32 %v1140_v48, %v1348_v24  ;;  %v850_v53 = vmul.f32 %v1156_v49, %v1348_v24 }
  0xf7   : > { %918 = vst [vmem:[%s1361_s25 + $0x98] sm:$0xff] %v886_v45  ;;  %v611_v54 = vpop.f32.mrf.mxu0  ;;  %v675_v55 = vpop.f32.mrf.mxu1 }
  0xf8   : > { %900 = vst [vmem:[%s1361_s25 + $0x8] sm:$0xff] %v868_v50  ;;  %916 = vst [vmem:[%s1361_s25 + $0x88] sm:$0xff] %v884_v51  ;;  %v873_v56 = vadd.f32 %v1354_v26, %v834_v52  ;;  %v889_v57 = vadd.f32 %v1354_v26, %v850_v53  ;;  %v832_v58 = vmul.f32 %v1348_v24, %v611_v54 }
  0xf9   : > { %v848_v59 = vmul.f32 %v1348_v24, %v675_v55  ;;  %v1141_v60 = vpop.f32.mrf.mxu0  ;;  %v1157_v61 = vpop.f32.mrf.mxu1 }
  0xfa   : > { %905 = vst [vmem:[%s1361_s25 + $0x30] sm:$0xff] %v873_v56  ;;  %921 = vst [vmem:[%s1361_s25 + $0xb0] sm:$0xff] %v889_v57  ;;  %v871_v62 = vadd.f32 %v1354_v26, %v832_v58  ;;  %v835_v0 = vmul.f32 %v1141_v60, %v1348_v24  ;;  %v851_v1 = vmul.f32 %v1157_v61, %v1348_v24 }
  0xfb   : > { %v887_v63 = vadd.f32 %v1354_v26, %v848_v59  ;;  %v614_v2 = vpop.f32.mrf.mxu0  ;;  %v678_v3 = vpop.f32.mrf.mxu1 }
  0xfc   : > { %903 = vst [vmem:[%s1361_s25 + $0x20] sm:$0xff] %v871_v62  ;;  %v874_v4 = vadd.f32 %v1354_v26, %v835_v0  ;;  %v890_v5 = vadd.f32 %v1354_v26, %v851_v1  ;;  %v833_v6 = vmul.f32 %v1348_v24, %v614_v2  ;;  %v849_v7 = vmul.f32 %v1348_v24, %v678_v3 }
  0xfd   : > { %919 = vst [vmem:[%s1361_s25 + $0xa0] sm:$0xff] %v887_v63  ;;  %v1144_v8 = vpop.f32.mrf.mxu0  ;;  %v1160_v9 = vpop.f32.mrf.mxu1 }
  0xfe   : > { %906 = vst [vmem:[%s1361_s25 + $0x38] sm:$0xff] %v874_v4  ;;  %922 = vst [vmem:[%s1361_s25 + $0xb8] sm:$0xff] %v890_v5  ;;  %v872_v10 = vadd.f32 %v1354_v26, %v833_v6  ;;  %v888_v11 = vadd.f32 %v1354_v26, %v849_v7  ;;  %v838_v12 = vmul.f32 %v1144_v8, %v1348_v24 }
  0xff   : > { %v854_v13 = vmul.f32 %v1160_v9, %v1348_v24  ;;  %v627_v14 = vpop.f32.mrf.mxu0  ;;  %v691_v15 = vpop.f32.mrf.mxu1 }
 0x100   : > { %904 = vst [vmem:[%s1361_s25 + $0x28] sm:$0xff] %v872_v10  ;;  %920 = vst [vmem:[%s1361_s25 + $0xa8] sm:$0xff] %v888_v11  ;;  %v877_v16 = vadd.f32 %v1354_v26, %v838_v12  ;;  %v836_v18 = vmul.f32 %v1348_v24, %v627_v14  ;;  %v852_v19 = vmul.f32 %v1348_v24, %v691_v15 }
 0x101   : > { %v893_v17 = vadd.f32 %v1354_v26, %v854_v13  ;;  %v1145_v20 = vpop.f32.mrf.mxu0  ;;  %v1161_v21 = vpop.f32.mrf.mxu1 }
 0x102   : > { %909 = vst [vmem:[%s1361_s25 + $0x50] sm:$0xff] %v877_v16  ;;  %v875_v22 = vadd.f32 %v1354_v26, %v836_v18  ;;  %v891_v23 = vadd.f32 %v1354_v26, %v852_v19  ;;  %v839_v25 = vmul.f32 %v1145_v20, %v1348_v24  ;;  %v855_v27 = vmul.f32 %v1161_v21, %v1348_v24 }
 0x103   : > { %925 = vst [vmem:[%s1361_s25 + $0xd0] sm:$0xff] %v893_v17  ;;  %v630_v28 = vpop.f32.mrf.mxu0  ;;  %v694_v29 = vpop.f32.mrf.mxu1 }
 0x104   : > { %907 = vst [vmem:[%s1361_s25 + $0x40] sm:$0xff] %v875_v22  ;;  %923 = vst [vmem:[%s1361_s25 + $0xc0] sm:$0xff] %v891_v23  ;;  %v878_v30 = vadd.f32 %v1354_v26, %v839_v25  ;;  %v894_v31 = vadd.f32 %v1354_v26, %v855_v27  ;;  %v837_v32 = vmul.f32 %v1348_v24, %v630_v28 }
 0x105   : > { %v853_v33 = vmul.f32 %v1348_v24, %v694_v29  ;;  %v1148_v34 = vpop.f32.mrf.mxu0  ;;  %v1164_v35 = vpop.f32.mrf.mxu1 }
 0x106   : > { %910 = vst [vmem:[%s1361_s25 + $0x58] sm:$0xff] %v878_v30  ;;  %926 = vst [vmem:[%s1361_s25 + $0xd8] sm:$0xff] %v894_v31  ;;  %v876_v36 = vadd.f32 %v1354_v26, %v837_v32  ;;  %v842_v38 = vmul.f32 %v1148_v34, %v1348_v24  ;;  %v858_v39 = vmul.f32 %v1164_v35, %v1348_v24 }
 0x107   : > { %v892_v37 = vadd.f32 %v1354_v26, %v853_v33  ;;  %v643_v40 = vpop.f32.mrf.mxu0  ;;  %v707_v41 = vpop.f32.mrf.mxu1 }
 0x108   : > { %908 = vst [vmem:[%s1361_s25 + $0x48] sm:$0xff] %v876_v36  ;;  %v881_v42 = vadd.f32 %v1354_v26, %v842_v38  ;;  %v897_v43 = vadd.f32 %v1354_v26, %v858_v39  ;;  %v840_v44 = vmul.f32 %v1348_v24, %v643_v40  ;;  %v856_v45 = vmul.f32 %v1348_v24, %v707_v41 }
 0x109   : > { %924 = vst [vmem:[%s1361_s25 + $0xc8] sm:$0xff] %v892_v37  ;;  %v1149_v46 = vpop.f32.mrf.mxu0  ;;  %v1165_v47 = vpop.f32.mrf.mxu1 }
 0x10a   : > { %913 = vst [vmem:[%s1361_s25 + $0x70] sm:$0xff] %v881_v42  ;;  %929 = vst [vmem:[%s1361_s25 + $0xf0] sm:$0xff] %v897_v43  ;;  %v879_v48 = vadd.f32 %v1354_v26, %v840_v44  ;;  %v895_v49 = vadd.f32 %v1354_v26, %v856_v45  ;;  %v843_v50 = vmul.f32 %v1149_v46, %v1348_v24 }
 0x10b   : > { %v859_v51 = vmul.f32 %v1165_v47, %v1348_v24  ;;  %v646_v52 = vpop.f32.mrf.mxu0  ;;  %v710_v53 = vpop.f32.mrf.mxu1 }
 0x10c   : > { %911 = vst [vmem:[%s1361_s25 + $0x60] sm:$0xff] %v879_v48  ;;  %927 = vst [vmem:[%s1361_s25 + $0xe0] sm:$0xff] %v895_v49  ;;  %v882_v54 = vadd.f32 %v1354_v26, %v843_v50  ;;  %v841_v56 = vmul.f32 %v1348_v24, %v646_v52  ;;  %v857_v57 = vmul.f32 %v1348_v24, %v710_v53 }
 0x10d   : > { %v898_v55 = vadd.f32 %v1354_v26, %v859_v51 }
 0x10e   : > { %914 = vst [vmem:[%s1361_s25 + $0x78] sm:$0xff] %v882_v54  ;;  %v880_v58 = vadd.f32 %v1354_v26, %v841_v56  ;;  %v896_v59 = vadd.f32 %v1354_v26, %v857_v57 }
 0x10f   : > { %930 = vst [vmem:[%s1361_s25 + $0xf8] sm:$0xff] %v898_v55 }
 0x110   : > { %912 = vst [vmem:[%s1361_s25 + $0x68] sm:$0xff] %v880_v58  ;;  %928 = vst [vmem:[%s1361_s25 + $0xe8] sm:$0xff] %v896_v59 }
 0x111 PF: > { %s14_s17 = sadd.s32 1, %s1252_s17   ;;  %s1471_s15 = smov %s1248_s16 }
 0x112   : > { %p11_p5 = scmp.ge.s32.totalorder %s14_s17, 6   ;;  %s1472_s16 = smov %s1474_s18 }
 0x114   :  { %13 = sbr.rel (!%p11_p5) target bundleno = 2 (0x2), region = 83 }

// kernel: vanilla_forward.19
= control target key start
LH: loop header
LB: loop body
LE: loop exit
PB: predicated region body
PF: predicated region fallthrough
CT: control target
= control target key end

     0   :  { %s1670_s18 = smov 0   ;;  %s1672_s19 = smov 0   ;;  %s1935_s0 = inlined_call_operand.vmem [shape: bf16[1024,256], index: 0, kind: input, shape index: {}]   ;;  %s1936_s1 = inlined_call_operand.vmem [shape: bf16[256,128], index: 1, kind: input, shape index: {}]   ;;  %s1937_s2 = inlined_call_operand.vmem [shape: f32[1,128], index: 2, kind: input, shape index: {}]   ;;  %s1938_s3 = inlined_call_operand.vmem [shape: f32[1,128], index: 3, kind: input, shape index: {}]   ;;  %s1939_s4 = inlined_call_operand.vmem [shape: f32[1024,128], index: 4, kind: input, shape index: {}]   ;;  %s1940_s5 = inlined_call_operand.vmem [shape: f32[1024,128], index: 5, kind: output, shape index: {}]  }
   0x1   :  { %s1674_s20 = smov 0  }
   0x2 LB: > { %s34_s21 = sadd.s32 1, %s1634_s19  ;;  %p1339_p0 = scmp.ge.s32.totalorder %s1638_s20, 1  ;;  %s1638_s20 = sphi %s1674_s20, %s15_s20   ;;  %s1634_s19 = sphi %s1672_s19, %s1942_s19   ;;  %s1630_s18 = sphi %s1670_s18, %s1941_s18  }
   0x3   : > { %p36_p1 = scmp.ge.s32.totalorder %s34_s21, 4  ;;  %p265_p2 = scmp.lt.s32.totalorder %s1638_s20, 5 }
   0x5   : > { %s1944_s21 = smov (%p36_p1, %s34_s21), 0  ;;  %p266_p3 = pnand %p1339_p0, %p265_p2 }
   0x6   : > { %s1340_s24 = sshll.u32 (!%p266_p3), %s1630_s18, 5 }
   0x7   : > { %269 = sbr.rel (%p266_p3) target bundleno = 309 (0x135), region = 40  ;;  %p325_p4 = scmp.lt.s32.totalorder (!%p266_p3), %s1340_s24, 127 }
   0xc   : > { %v1552_v0 = vld [vmem:[%s1936_s1 + $0x78] sm:$0xff]   ;;  %v1554_v2 = vld [vmem:[%s1936_s1 + $0x70] sm:$0xff]   ;;  %v1556_v4 = vld [vmem:[%s1936_s1 + $0x68] sm:$0xff]   ;;  %s1946_s24 = smov (!%p325_p4, %s1340_s24), 127 }
   0xd   : > { %v1553_v1 = vld [vmem:[%s1936_s1 + $0x38] sm:$0xff]   ;;  %1400 = vmatprep.subr.bf16.mxu0 %v1552_v0  ;;  %1512 = vmatprep.subr.bf16.mxu1 %v1552_v0  ;;  %v1555_v3 = vld [vmem:[%s1936_s1 + $0x30] sm:$0xff]   ;;  %v1557_v5 = vld [vmem:[%s1936_s1 + $0x28] sm:$0xff]   ;;  %s1712_s14 = sshll.u32 %s1946_s24, 3 }
   0xe   : > { %1401 = vmatpush3.bf16.msra.mxu0 %v1553_v1  ;;  %1520 = vmatpush3.bf16.msra.mxu1 %v1553_v1  ;;  %v1558_v6 = vld [vmem:[%s1936_s1 + $0x60] sm:$0xff]   ;;  %v1560_v8 = vld [vmem:[%s1936_s1 + $0x58] sm:$0xff]   ;;  %s1721_s22 = scalar_lea.vmem %s1935_s0, %s1712_s14  ;;  %v1562_v10 = vld [vmem:[%s1936_s1 + $0x50] sm:$0xff]   ;;  %s1785_s17 = scalar_lea.vmem %s1939_s4, %s1712_s14 }
   0xf   : > { %1402 = vmatprep.subr.bf16.mxu0 %v1554_v2  ;;  %1513 = vmatprep.subr.bf16.mxu1 %v1554_v2  ;;  %v1559_v7 = vld [vmem:[%s1936_s1 + $0x20] sm:$0xff]   ;;  %v1561_v9 = vld [vmem:[%s1936_s1 + $0x18] sm:$0xff]   ;;  %v1563_v13 = vld [vmem:[%s1936_s1 + $0x10] sm:$0xff]   ;;  %s1802_s24 = scalar_lea.vmem %s1940_s5, %s1712_s14 }
  0x10   : > { %v1570_v11 = vld [vmem:[%s1721_s22 + $0x4] ss:$8 sps:$4 sm:$0xff]   ;;  %v1568_v18 = vld [vmem:[%s1721_s22] ss:$8 sps:$4 sm:$0xff]   ;;  %v1574_v20 = vld [vmem:[%s1721_s22 + $0x14] ss:$8 sps:$4 sm:$0xff]  }
  0x11   : > { %v1573_v12 = vld [vmem:[%s1721_s22 + $0x84] ss:$8 sps:$4 sm:$0xff]   ;;  %789 = vmatprep.mubr.bf16.mxu0 %v1570_v11  ;;  %v1571_v19 = vld [vmem:[%s1721_s22 + $0x80] ss:$8 sps:$4 sm:$0xff]   ;;  %v1576_v21 = vld [vmem:[%s1721_s22 + $0x94] ss:$8 sps:$4 sm:$0xff]  }
  0x12   : > { %1403 = vmatpush3.bf16.msra.mxu0 %v1555_v3  ;;  %1521 = vmatpush3.bf16.msra.mxu1 %v1555_v3  ;;  %v1564_v14 = vld [vmem:[%s1936_s1 + $0x48] sm:$0xff]   ;;  %v1566_v16 = vld [vmem:[%s1936_s1 + $0x40] sm:$0xff]   ;;  %v1578_v22 = vld [vmem:[%s1721_s22 + $0x10] ss:$8 sps:$4 sm:$0xff]  }
  0x13   : > { %1404 = vmatprep.subr.bf16.mxu0 %v1556_v4  ;;  %1514 = vmatprep.subr.bf16.mxu1 %v1556_v4  ;;  %v1565_v15 = vld [vmem:[%s1936_s1 + $0x8] sm:$0xff]   ;;  %v1567_v17 = vld [vmem:[%s1936_s1] sm:$0xff]   ;;  %v1579_v23 = vld [vmem:[%s1721_s22 + $0x90] ss:$8 sps:$4 sm:$0xff]  }
  0x14   : > { %853 = vmatprep.mubr.bf16.mxu1 %v1573_v12  ;;  %v1580_v24 = vld [vmem:[%s1721_s22 + $0x24] ss:$8 sps:$4 sm:$0xff]   ;;  %v1584_v26 = vld [vmem:[%s1721_s22 + $0x20] ss:$8 sps:$4 sm:$0xff]   ;;  %v1586_v28 = vld [vmem:[%s1721_s22 + $0x34] ss:$8 sps:$4 sm:$0xff]  }
  0x15   : > { %v1582_v25 = vld [vmem:[%s1721_s22 + $0xa4] ss:$8 sps:$4 sm:$0xff]   ;;  %v1585_v27 = vld [vmem:[%s1721_s22 + $0xa0] ss:$8 sps:$4 sm:$0xff]   ;;  %v1588_v29 = vld [vmem:[%s1721_s22 + $0xb4] ss:$8 sps:$4 sm:$0xff]  }
  0x16   : > { %1405 = vmatpush3.bf16.msra.mxu0 %v1557_v5  ;;  %1522 = vmatpush3.bf16.msra.mxu1 %v1557_v5  ;;  %v1590_v30 = vld [vmem:[%s1721_s22 + $0x30] ss:$8 sps:$4 sm:$0xff]   ;;  %v1592_v32 = vld [vmem:[%s1721_s22 + $0x44] ss:$8 sps:$4 sm:$0xff]   ;;  %v1596_v34 = vld [vmem:[%s1721_s22 + $0x40] ss:$8 sps:$4 sm:$0xff]  }
  0x17   : > { %1406 = vmatprep.subr.bf16.mxu0 %v1558_v6  ;;  %1515 = vmatprep.subr.bf16.mxu1 %v1558_v6  ;;  %v1591_v31 = vld [vmem:[%s1721_s22 + $0xb0] ss:$8 sps:$4 sm:$0xff]   ;;  %v1594_v33 = vld [vmem:[%s1721_s22 + $0xc4] ss:$8 sps:$4 sm:$0xff]   ;;  %v1597_v35 = vld [vmem:[%s1721_s22 + $0xc0] ss:$8 sps:$4 sm:$0xff]  }
  0x18   : > { %v1598_v36 = vld [vmem:[%s1721_s22 + $0x54] ss:$8 sps:$4 sm:$0xff]   ;;  %v1602_v38 = vld [vmem:[%s1721_s22 + $0x50] ss:$8 sps:$4 sm:$0xff]   ;;  %v1604_v40 = vld [vmem:[%s1721_s22 + $0x64] ss:$8 sps:$4 sm:$0xff]  }
  0x19   : > { %v1600_v37 = vld [vmem:[%s1721_s22 + $0xd4] ss:$8 sps:$4 sm:$0xff]   ;;  %v1603_v39 = vld [vmem:[%s1721_s22 + $0xd0] ss:$8 sps:$4 sm:$0xff]   ;;  %v1606_v41 = vld [vmem:[%s1721_s22 + $0xe4] ss:$8 sps:$4 sm:$0xff]  }
  0x1a   : > { %1407 = vmatpush3.bf16.msra.mxu0 %v1559_v7  ;;  %1523 = vmatpush3.bf16.msra.mxu1 %v1559_v7  ;;  %v1608_v42 = vld [vmem:[%s1721_s22 + $0x60] ss:$8 sps:$4 sm:$0xff]   ;;  %v1610_v44 = vld [vmem:[%s1721_s22 + $0x74] ss:$8 sps:$4 sm:$0xff]   ;;  %v1614_v46 = vld [vmem:[%s1721_s22 + $0x70] ss:$8 sps:$4 sm:$0xff]  }
  0x1b   : > { %1408 = vmatprep.subr.bf16.mxu0 %v1560_v8  ;;  %1516 = vmatprep.subr.bf16.mxu1 %v1560_v8  ;;  %v1609_v43 = vld [vmem:[%s1721_s22 + $0xe0] ss:$8 sps:$4 sm:$0xff]   ;;  %v1612_v45 = vld [vmem:[%s1721_s22 + $0xf4] ss:$8 sps:$4 sm:$0xff]   ;;  %v1615_v47 = vld [vmem:[%s1721_s22 + $0xf0] ss:$8 sps:$4 sm:$0xff]  }
  0x1c   : > { %v1779_v51 = vld [vmem:[%s1937_s2] ss:$0 sm:$0xff]  ;;  %v1112_v11 = vld [vmem:[%s1785_s17 + $0x88] sm:$0xff] }
  0x1d   : > { %v1790_v55 = vld [vmem:[%s1938_s3] ss:$0 sm:$0xff] }
  0x1e   : > { %1409 = vmatpush3.bf16.msra.mxu0 %v1561_v9  ;;  %1524 = vmatpush3.bf16.msra.mxu1 %v1561_v9  ;;  %v1095_v60 = vld [vmem:[%s1785_s17] sm:$0xff] }
  0x1f   : > { %1410 = vmatprep.subr.bf16.mxu0 %v1562_v10  ;;  %1517 = vmatprep.subr.bf16.mxu1 %v1562_v10  ;;  %v1111_v61 = vld [vmem:[%s1785_s17 + $0x80] sm:$0xff]  ;;  %v1096_v10 = vld [vmem:[%s1785_s17 + $0x8] sm:$0xff] }
  0x22   : > { %1411 = vmatpush3.bf16.msra.mxu0 %v1563_v13  ;;  %1525 = vmatpush3.bf16.msra.mxu1 %v1563_v13 }
  0x23   : > { %1412 = vmatprep.subr.bf16.mxu0 %v1564_v14  ;;  %1518 = vmatprep.subr.bf16.mxu1 %v1564_v14 }
  0x26   : > { %1413 = vmatpush3.bf16.msra.mxu0 %v1565_v15  ;;  %1526 = vmatpush3.bf16.msra.mxu1 %v1565_v15 }
  0x27   : > { %1414 = vmatprep.subr.bf16.mxu0 %v1566_v16  ;;  %1519 = vmatprep.subr.bf16.mxu1 %v1566_v16 }
  0x2a   : > { %1415 = vmatpush3.bf16.msra.mxu0 %v1567_v17  ;;  %1527 = vmatpush3.bf16.msra.mxu1 %v1567_v17 }
  0x2d   : > { %790 = vmatmul.mubr.bf16.vlgmr.msra.gmra.mxu0 %v1568_v18  ;;  %854 = vmatmul.mubr.bf16.vlgmr.msra.gmra.mxu1 %v1571_v19 }
  0x2e   : > { %797 = vmatprep.mubr.bf16.mxu0 %v1574_v20  ;;  %861 = vmatprep.mubr.bf16.mxu1 %v1576_v21 }
  0x35   : > { %798 = vmatmul.mubr.bf16.gmra.mxu0 %v1578_v22  ;;  %862 = vmatmul.mubr.bf16.gmra.mxu1 %v1579_v23 }
  0x36   : > { %805 = vmatprep.mubr.bf16.mxu0 %v1580_v24  ;;  %869 = vmatprep.mubr.bf16.mxu1 %v1582_v25  ;;  %v1097_v24 = vld [vmem:[%s1785_s17 + $0x10] sm:$0xff] }
  0x37   : > { %v1113_v25 = vld [vmem:[%s1785_s17 + $0x90] sm:$0xff] }
  0x3d   : > { %806 = vmatmul.mubr.bf16.gmra.mxu0 %v1584_v26  ;;  %870 = vmatmul.mubr.bf16.gmra.mxu1 %v1585_v27 }
  0x3e   : > { %813 = vmatprep.mubr.bf16.mxu0 %v1586_v28  ;;  %877 = vmatprep.mubr.bf16.mxu1 %v1588_v29 }
  0x45   : > { %814 = vmatmul.mubr.bf16.gmra.mxu0 %v1590_v30  ;;  %878 = vmatmul.mubr.bf16.gmra.mxu1 %v1591_v31 }
  0x46   : > { %821 = vmatprep.mubr.bf16.mxu0 %v1592_v32  ;;  %885 = vmatprep.mubr.bf16.mxu1 %v1594_v33 }
  0x4d   : > { %822 = vmatmul.mubr.bf16.gmra.mxu0 %v1596_v34  ;;  %886 = vmatmul.mubr.bf16.gmra.mxu1 %v1597_v35 }
  0x4e   : > { %829 = vmatprep.mubr.bf16.mxu0 %v1598_v36  ;;  %893 = vmatprep.mubr.bf16.mxu1 %v1600_v37 }
  0x55   : > { %830 = vmatmul.mubr.bf16.gmra.mxu0 %v1602_v38  ;;  %894 = vmatmul.mubr.bf16.gmra.mxu1 %v1603_v39  ;;  %v1098_v38 = vld [vmem:[%s1785_s17 + $0x18] sm:$0xff] }
  0x56   : > { %837 = vmatprep.mubr.bf16.mxu0 %v1604_v40  ;;  %901 = vmatprep.mubr.bf16.mxu1 %v1606_v41  ;;  %v1114_v39 = vld [vmem:[%s1785_s17 + $0x98] sm:$0xff] }
  0x5d   : > { %838 = vmatmul.mubr.bf16.gmra.mxu0 %v1608_v42  ;;  %902 = vmatmul.mubr.bf16.gmra.mxu1 %v1609_v43 }
  0x5e   : > { %845 = vmatprep.mubr.bf16.mxu0 %v1610_v44  ;;  %909 = vmatprep.mubr.bf16.mxu1 %v1612_v45 }
  0x65   : > { %846 = vmatmul.mubr.bf16.gmra.mxu0 %v1614_v46  ;;  %910 = vmatmul.mubr.bf16.gmra.mxu1 %v1615_v47 }
  0xed   : > { %v1416_v48 = vpop.f32.mrf.mxu0  ;;  %v1464_v49 = vpop.f32.mrf.mxu1 }
  0xef   : > { %v1417_v50 = vpop.f32.mrf.mxu0  ;;  %v1465_v52 = vpop.f32.mrf.mxu1 }
  0xf0   : > { %v1418_v53 = vadd.f32 %v1417_v50, %v1416_v48  ;;  %v1466_v54 = vadd.f32 %v1465_v52, %v1464_v49 }
  0xf1   : > { %v1419_v56 = vpop.f32.mrf.mxu0  ;;  %v1467_v57 = vpop.f32.mrf.mxu1 }
  0xf2   : > { %v1024_v58 = vmul.f32 %v1418_v53, %v1779_v51  ;;  %v1040_v59 = vmul.f32 %v1466_v54, %v1779_v51  ;;  %v1099_v53 = vld [vmem:[%s1785_s17 + $0x20] sm:$0xff] }
  0xf3   : > { %v1420_v62 = vpop.f32.mrf.mxu0  ;;  %v1468_v63 = vpop.f32.mrf.mxu1  ;;  %v1115_v54 = vld [vmem:[%s1785_s17 + $0xa0] sm:$0xff] }
  0xf4   : > { %v1063_v0 = vadd.f32 %v1790_v55, %v1024_v58  ;;  %v1079_v1 = vadd.f32 %v1790_v55, %v1040_v59  ;;  %v1421_v2 = vadd.f32 %v1420_v62, %v1419_v56  ;;  %v1469_v3 = vadd.f32 %v1468_v63, %v1467_v57 }
  0xf5   : > { %v1422_v4 = vpop.f32.mrf.mxu0  ;;  %v1470_v5 = vpop.f32.mrf.mxu1 }
  0xf6   : > { %v1127_v6 = vadd.f32 %v1095_v60, %v1063_v0  ;;  %v1143_v7 = vadd.f32 %v1111_v61, %v1079_v1  ;;  %v1025_v8 = vmul.f32 %v1421_v2, %v1779_v51  ;;  %v1041_v9 = vmul.f32 %v1469_v3, %v1779_v51 }
  0xf7   : > { %v1423_v12 = vpop.f32.mrf.mxu0  ;;  %v1471_v13 = vpop.f32.mrf.mxu1 }
  0xf8   : > { %1159 = vst [vmem:[%s1802_s24] sm:$0xff] %v1127_v6  ;;  %1175 = vst [vmem:[%s1802_s24 + $0x80] sm:$0xff] %v1143_v7  ;;  %v1064_v14 = vadd.f32 %v1790_v55, %v1025_v8  ;;  %v1080_v15 = vadd.f32 %v1790_v55, %v1041_v9  ;;  %v1424_v16 = vadd.f32 %v1423_v12, %v1422_v4  ;;  %v1100_v4 = vld [vmem:[%s1785_s17 + $0x28] sm:$0xff] }
  0xf9   : > { %v1472_v17 = vadd.f32 %v1471_v13, %v1470_v5  ;;  %v1425_v18 = vpop.f32.mrf.mxu0  ;;  %v1473_v19 = vpop.f32.mrf.mxu1  ;;  %v1116_v5 = vld [vmem:[%s1785_s17 + $0xa8] sm:$0xff] }
  0xfa   : > { %v1128_v20 = vadd.f32 %v1096_v10, %v1064_v14  ;;  %v1144_v21 = vadd.f32 %v1112_v11, %v1080_v15  ;;  %v1026_v22 = vmul.f32 %v1424_v16, %v1779_v51 }
  0xfb   : > { %v1042_v23 = vmul.f32 %v1472_v17, %v1779_v51  ;;  %v1426_v26 = vpop.f32.mrf.mxu0  ;;  %v1474_v27 = vpop.f32.mrf.mxu1 }
  0xfc   : > { %1160 = vst [vmem:[%s1802_s24 + $0x8] sm:$0xff] %v1128_v20  ;;  %1176 = vst [vmem:[%s1802_s24 + $0x88] sm:$0xff] %v1144_v21  ;;  %v1065_v28 = vadd.f32 %v1790_v55, %v1026_v22  ;;  %v1427_v30 = vadd.f32 %v1426_v26, %v1425_v18  ;;  %v1475_v31 = vadd.f32 %v1474_v27, %v1473_v19  ;;  %v1101_v18 = vld [vmem:[%s1785_s17 + $0x30] sm:$0xff] }
  0xfd   : > { %v1081_v29 = vadd.f32 %v1790_v55, %v1042_v23  ;;  %v1428_v32 = vpop.f32.mrf.mxu0  ;;  %v1476_v33 = vpop.f32.mrf.mxu1  ;;  %v1117_v19 = vld [vmem:[%s1785_s17 + $0xb0] sm:$0xff] }
  0xfe   : > { %v1129_v34 = vadd.f32 %v1097_v24, %v1065_v28  ;;  %v1027_v36 = vmul.f32 %v1427_v30, %v1779_v51  ;;  %v1043_v37 = vmul.f32 %v1475_v31, %v1779_v51 }
  0xff   : > { %v1145_v35 = vadd.f32 %v1113_v25, %v1081_v29  ;;  %v1429_v40 = vpop.f32.mrf.mxu0  ;;  %v1477_v41 = vpop.f32.mrf.mxu1 }
 0x100   : > { %1161 = vst [vmem:[%s1802_s24 + $0x10] sm:$0xff] %v1129_v34  ;;  %v1066_v42 = vadd.f32 %v1790_v55, %v1027_v36  ;;  %v1082_v43 = vadd.f32 %v1790_v55, %v1043_v37  ;;  %v1430_v44 = vadd.f32 %v1429_v40, %v1428_v32  ;;  %v1478_v45 = vadd.f32 %v1477_v41, %v1476_v33  ;;  %v1102_v32 = vld [vmem:[%s1785_s17 + $0x38] sm:$0xff] }
 0x101   : > { %1177 = vst [vmem:[%s1802_s24 + $0x90] sm:$0xff] %v1145_v35  ;;  %v1431_v46 = vpop.f32.mrf.mxu0  ;;  %v1479_v47 = vpop.f32.mrf.mxu1  ;;  %v1118_v33 = vld [vmem:[%s1785_s17 + $0xb8] sm:$0xff] }
 0x102   : > { %v1130_v48 = vadd.f32 %v1098_v38, %v1066_v42  ;;  %v1146_v49 = vadd.f32 %v1114_v39, %v1082_v43  ;;  %v1028_v50 = vmul.f32 %v1430_v44, %v1779_v51  ;;  %v1044_v52 = vmul.f32 %v1478_v45, %v1779_v51 }
 0x103   : > { %v1432_v56 = vpop.f32.mrf.mxu0  ;;  %v1480_v57 = vpop.f32.mrf.mxu1 }
 0x104   : > { %1162 = vst [vmem:[%s1802_s24 + $0x18] sm:$0xff] %v1130_v48  ;;  %1178 = vst [vmem:[%s1802_s24 + $0x98] sm:$0xff] %v1146_v49  ;;  %v1067_v58 = vadd.f32 %v1790_v55, %v1028_v50  ;;  %v1083_v59 = vadd.f32 %v1790_v55, %v1044_v52  ;;  %v1433_v60 = vadd.f32 %v1432_v56, %v1431_v46  ;;  %v1103_v46 = vld [vmem:[%s1785_s17 + $0x40] sm:$0xff] }
 0x105   : > { %v1481_v61 = vadd.f32 %v1480_v57, %v1479_v47  ;;  %v1434_v62 = vpop.f32.mrf.mxu0  ;;  %v1482_v63 = vpop.f32.mrf.mxu1  ;;  %v1119_v47 = vld [vmem:[%s1785_s17 + $0xc0] sm:$0xff] }
 0x106   : > { %v1131_v0 = vadd.f32 %v1099_v53, %v1067_v58  ;;  %v1147_v1 = vadd.f32 %v1115_v54, %v1083_v59  ;;  %v1029_v2 = vmul.f32 %v1433_v60, %v1779_v51 }
 0x107   : > { %v1045_v3 = vmul.f32 %v1481_v61, %v1779_v51  ;;  %v1435_v6 = vpop.f32.mrf.mxu0  ;;  %v1483_v7 = vpop.f32.mrf.mxu1 }
 0x108   : > { %1163 = vst [vmem:[%s1802_s24 + $0x20] sm:$0xff] %v1131_v0  ;;  %1179 = vst [vmem:[%s1802_s24 + $0xa0] sm:$0xff] %v1147_v1  ;;  %v1068_v8 = vadd.f32 %v1790_v55, %v1029_v2  ;;  %v1436_v10 = vadd.f32 %v1435_v6, %v1434_v62  ;;  %v1484_v11 = vadd.f32 %v1483_v7, %v1482_v63  ;;  %v1104_v62 = vld [vmem:[%s1785_s17 + $0x48] sm:$0xff] }
 0x109   : > { %v1084_v9 = vadd.f32 %v1790_v55, %v1045_v3  ;;  %v1437_v12 = vpop.f32.mrf.mxu0  ;;  %v1485_v13 = vpop.f32.mrf.mxu1  ;;  %v1120_v63 = vld [vmem:[%s1785_s17 + $0xc8] sm:$0xff] }
 0x10a   : > { %v1132_v14 = vadd.f32 %v1100_v4, %v1068_v8  ;;  %v1030_v16 = vmul.f32 %v1436_v10, %v1779_v51  ;;  %v1046_v17 = vmul.f32 %v1484_v11, %v1779_v51 }
 0x10b   : > { %v1148_v15 = vadd.f32 %v1116_v5, %v1084_v9  ;;  %v1438_v20 = vpop.f32.mrf.mxu0  ;;  %v1486_v21 = vpop.f32.mrf.mxu1 }
 0x10c   : > { %1164 = vst [vmem:[%s1802_s24 + $0x28] sm:$0xff] %v1132_v14  ;;  %v1069_v22 = vadd.f32 %v1790_v55, %v1030_v16  ;;  %v1085_v23 = vadd.f32 %v1790_v55, %v1046_v17  ;;  %v1439_v24 = vadd.f32 %v1438_v20, %v1437_v12  ;;  %v1487_v25 = vadd.f32 %v1486_v21, %v1485_v13  ;;  %v1105_v12 = vld [vmem:[%s1785_s17 + $0x50] sm:$0xff] }
 0x10d   : > { %1180 = vst [vmem:[%s1802_s24 + $0xa8] sm:$0xff] %v1148_v15  ;;  %v1440_v26 = vpop.f32.mrf.mxu0  ;;  %v1488_v27 = vpop.f32.mrf.mxu1  ;;  %v1121_v13 = vld [vmem:[%s1785_s17 + $0xd0] sm:$0xff] }
 0x10e   : > { %v1133_v28 = vadd.f32 %v1101_v18, %v1069_v22  ;;  %v1149_v29 = vadd.f32 %v1117_v19, %v1085_v23  ;;  %v1031_v30 = vmul.f32 %v1439_v24, %v1779_v51  ;;  %v1047_v31 = vmul.f32 %v1487_v25, %v1779_v51 }
 0x10f   : > { %v1441_v34 = vpop.f32.mrf.mxu0  ;;  %v1489_v35 = vpop.f32.mrf.mxu1 }
 0x110   : > { %1165 = vst [vmem:[%s1802_s24 + $0x30] sm:$0xff] %v1133_v28  ;;  %1181 = vst [vmem:[%s1802_s24 + $0xb0] sm:$0xff] %v1149_v29  ;;  %v1070_v36 = vadd.f32 %v1790_v55, %v1031_v30  ;;  %v1086_v37 = vadd.f32 %v1790_v55, %v1047_v31  ;;  %v1442_v38 = vadd.f32 %v1441_v34, %v1440_v26  ;;  %v1106_v26 = vld [vmem:[%s1785_s17 + $0x58] sm:$0xff] }
 0x111   : > { %v1490_v39 = vadd.f32 %v1489_v35, %v1488_v27  ;;  %v1443_v40 = vpop.f32.mrf.mxu0  ;;  %v1491_v41 = vpop.f32.mrf.mxu1  ;;  %v1122_v27 = vld [vmem:[%s1785_s17 + $0xd8] sm:$0xff] }
 0x112   : > { %v1134_v42 = vadd.f32 %v1102_v32, %v1070_v36  ;;  %v1150_v43 = vadd.f32 %v1118_v33, %v1086_v37  ;;  %v1032_v44 = vmul.f32 %v1442_v38, %v1779_v51 }
 0x113   : > { %v1048_v45 = vmul.f32 %v1490_v39, %v1779_v51  ;;  %v1444_v48 = vpop.f32.mrf.mxu0  ;;  %v1492_v49 = vpop.f32.mrf.mxu1 }
 0x114   : > { %1166 = vst [vmem:[%s1802_s24 + $0x38] sm:$0xff] %v1134_v42  ;;  %1182 = vst [vmem:[%s1802_s24 + $0xb8] sm:$0xff] %v1150_v43  ;;  %v1071_v50 = vadd.f32 %v1790_v55, %v1032_v44  ;;  %v1445_v53 = vadd.f32 %v1444_v48, %v1443_v40  ;;  %v1493_v54 = vadd.f32 %v1492_v49, %v1491_v41  ;;  %v1107_v40 = vld [vmem:[%s1785_s17 + $0x60] sm:$0xff] }
 0x115   : > { %v1087_v52 = vadd.f32 %v1790_v55, %v1048_v45  ;;  %v1446_v56 = vpop.f32.mrf.mxu0  ;;  %v1494_v57 = vpop.f32.mrf.mxu1  ;;  %v1123_v41 = vld [vmem:[%s1785_s17 + $0xe0] sm:$0xff] }
 0x116   : > { %v1135_v58 = vadd.f32 %v1103_v46, %v1071_v50  ;;  %v1033_v60 = vmul.f32 %v1445_v53, %v1779_v51  ;;  %v1049_v61 = vmul.f32 %v1493_v54, %v1779_v51 }
 0x117   : > { %v1151_v59 = vadd.f32 %v1119_v47, %v1087_v52  ;;  %v1447_v0 = vpop.f32.mrf.mxu0  ;;  %v1495_v1 = vpop.f32.mrf.mxu1 }
 0x118   : > { %1167 = vst [vmem:[%s1802_s24 + $0x40] sm:$0xff] %v1135_v58  ;;  %v1072_v2 = vadd.f32 %v1790_v55, %v1033_v60  ;;  %v1088_v3 = vadd.f32 %v1790_v55, %v1049_v61  ;;  %v1448_v4 = vadd.f32 %v1447_v0, %v1446_v56  ;;  %v1496_v5 = vadd.f32 %v1495_v1, %v1494_v57  ;;  %v1108_v56 = vld [vmem:[%s1785_s17 + $0x68] sm:$0xff] }
 0x119   : > { %1183 = vst [vmem:[%s1802_s24 + $0xc0] sm:$0xff] %v1151_v59  ;;  %v1449_v6 = vpop.f32.mrf.mxu0  ;;  %v1497_v7 = vpop.f32.mrf.mxu1  ;;  %v1124_v57 = vld [vmem:[%s1785_s17 + $0xe8] sm:$0xff] }
 0x11a   : > { %v1136_v8 = vadd.f32 %v1104_v62, %v1072_v2  ;;  %v1152_v9 = vadd.f32 %v1120_v63, %v1088_v3  ;;  %v1034_v10 = vmul.f32 %v1448_v4, %v1779_v51  ;;  %v1050_v11 = vmul.f32 %v1496_v5, %v1779_v51 }
 0x11b   : > { %v1450_v14 = vpop.f32.mrf.mxu0  ;;  %v1498_v15 = vpop.f32.mrf.mxu1 }
 0x11c   : > { %1168 = vst [vmem:[%s1802_s24 + $0x48] sm:$0xff] %v1136_v8  ;;  %1184 = vst [vmem:[%s1802_s24 + $0xc8] sm:$0xff] %v1152_v9  ;;  %v1073_v16 = vadd.f32 %v1790_v55, %v1034_v10  ;;  %v1089_v17 = vadd.f32 %v1790_v55, %v1050_v11  ;;  %v1451_v18 = vadd.f32 %v1450_v14, %v1449_v6  ;;  %v1109_v6 = vld [vmem:[%s1785_s17 + $0x70] sm:$0xff] }
 0x11d   : > { %v1499_v19 = vadd.f32 %v1498_v15, %v1497_v7  ;;  %v1452_v20 = vpop.f32.mrf.mxu0  ;;  %v1500_v21 = vpop.f32.mrf.mxu1  ;;  %v1125_v7 = vld [vmem:[%s1785_s17 + $0xf0] sm:$0xff] }
 0x11e   : > { %v1137_v22 = vadd.f32 %v1105_v12, %v1073_v16  ;;  %v1153_v23 = vadd.f32 %v1121_v13, %v1089_v17  ;;  %v1035_v24 = vmul.f32 %v1451_v18, %v1779_v51  ;;  %v1110_v18 = vld [vmem:[%s1785_s17 + $0x78] sm:$0xff] }
 0x11f   : > { %v1051_v25 = vmul.f32 %v1499_v19, %v1779_v51  ;;  %v1453_v28 = vpop.f32.mrf.mxu0  ;;  %v1501_v29 = vpop.f32.mrf.mxu1  ;;  %v1126_v19 = vld [vmem:[%s1785_s17 + $0xf8] sm:$0xff] }
 0x120   : > { %1169 = vst [vmem:[%s1802_s24 + $0x50] sm:$0xff] %v1137_v22  ;;  %1185 = vst [vmem:[%s1802_s24 + $0xd0] sm:$0xff] %v1153_v23  ;;  %v1074_v30 = vadd.f32 %v1790_v55, %v1035_v24  ;;  %v1454_v32 = vadd.f32 %v1453_v28, %v1452_v20  ;;  %v1502_v33 = vadd.f32 %v1501_v29, %v1500_v21 }
 0x121   : > { %v1090_v31 = vadd.f32 %v1790_v55, %v1051_v25  ;;  %v1455_v34 = vpop.f32.mrf.mxu0  ;;  %v1503_v35 = vpop.f32.mrf.mxu1 }
 0x122   : > { %v1138_v36 = vadd.f32 %v1106_v26, %v1074_v30  ;;  %v1036_v38 = vmul.f32 %v1454_v32, %v1779_v51  ;;  %v1052_v39 = vmul.f32 %v1502_v33, %v1779_v51 }
 0x123   : > { %v1154_v37 = vadd.f32 %v1122_v27, %v1090_v31  ;;  %v1456_v42 = vpop.f32.mrf.mxu0  ;;  %v1504_v43 = vpop.f32.mrf.mxu1 }
 0x124   : > { %1170 = vst [vmem:[%s1802_s24 + $0x58] sm:$0xff] %v1138_v36  ;;  %v1075_v44 = vadd.f32 %v1790_v55, %v1036_v38  ;;  %v1091_v45 = vadd.f32 %v1790_v55, %v1052_v39  ;;  %v1457_v46 = vadd.f32 %v1456_v42, %v1455_v34  ;;  %v1505_v47 = vadd.f32 %v1504_v43, %v1503_v35 }
 0x125   : > { %1186 = vst [vmem:[%s1802_s24 + $0xd8] sm:$0xff] %v1154_v37  ;;  %v1458_v48 = vpop.f32.mrf.mxu0  ;;  %v1506_v49 = vpop.f32.mrf.mxu1 }
 0x126   : > { %v1139_v50 = vadd.f32 %v1107_v40, %v1075_v44  ;;  %v1155_v52 = vadd.f32 %v1123_v41, %v1091_v45  ;;  %v1037_v53 = vmul.f32 %v1457_v46, %v1779_v51  ;;  %v1053_v54 = vmul.f32 %v1505_v47, %v1779_v51 }
 0x127   : > { %v1459_v58 = vpop.f32.mrf.mxu0  ;;  %v1507_v59 = vpop.f32.mrf.mxu1 }
 0x128   : > { %1171 = vst [vmem:[%s1802_s24 + $0x60] sm:$0xff] %v1139_v50  ;;  %1187 = vst [vmem:[%s1802_s24 + $0xe0] sm:$0xff] %v1155_v52  ;;  %v1076_v60 = vadd.f32 %v1790_v55, %v1037_v53  ;;  %v1092_v61 = vadd.f32 %v1790_v55, %v1053_v54  ;;  %v1460_v62 = vadd.f32 %v1459_v58, %v1458_v48 }
 0x129   : > { %v1508_v63 = vadd.f32 %v1507_v59, %v1506_v49  ;;  %v1461_v0 = vpop.f32.mrf.mxu0  ;;  %v1509_v1 = vpop.f32.mrf.mxu1 }
 0x12a   : > { %v1140_v2 = vadd.f32 %v1108_v56, %v1076_v60  ;;  %v1156_v3 = vadd.f32 %v1124_v57, %v1092_v61  ;;  %v1038_v4 = vmul.f32 %v1460_v62, %v1779_v51 }
 0x12b   : > { %v1054_v5 = vmul.f32 %v1508_v63, %v1779_v51  ;;  %v1462_v8 = vpop.f32.mrf.mxu0  ;;  %v1510_v9 = vpop.f32.mrf.mxu1 }
 0x12c   : > { %1172 = vst [vmem:[%s1802_s24 + $0x68] sm:$0xff] %v1140_v2  ;;  %1188 = vst [vmem:[%s1802_s24 + $0xe8] sm:$0xff] %v1156_v3  ;;  %v1077_v10 = vadd.f32 %v1790_v55, %v1038_v4  ;;  %v1463_v12 = vadd.f32 %v1462_v8, %v1461_v0  ;;  %v1511_v13 = vadd.f32 %v1510_v9, %v1509_v1 }
 0x12d   : > { %v1093_v11 = vadd.f32 %v1790_v55, %v1054_v5 }
 0x12e   : > { %v1141_v14 = vadd.f32 %v1109_v6, %v1077_v10  ;;  %v1039_v16 = vmul.f32 %v1463_v12, %v1779_v51  ;;  %v1055_v17 = vmul.f32 %v1511_v13, %v1779_v51 }
 0x12f   : > { %v1157_v15 = vadd.f32 %v1125_v7, %v1093_v11 }
 0x130   : > { %1173 = vst [vmem:[%s1802_s24 + $0x70] sm:$0xff] %v1141_v14  ;;  %v1078_v20 = vadd.f32 %v1790_v55, %v1039_v16  ;;  %v1094_v21 = vadd.f32 %v1790_v55, %v1055_v17 }
 0x131   : > { %1189 = vst [vmem:[%s1802_s24 + $0xf0] sm:$0xff] %v1157_v15 }
 0x132   : > { %v1142_v22 = vadd.f32 %v1110_v18, %v1078_v20  ;;  %v1158_v23 = vadd.f32 %v1126_v19, %v1094_v21 }
 0x134   : > { %1174 = vst [vmem:[%s1802_s24 + $0x78] sm:$0xff] %v1142_v22  ;;  %1190 = vst [vmem:[%s1802_s24 + $0xf8] sm:$0xff] %v1158_v23 }
 0x135 PF: > { %s15_s20 = sadd.s32 1, %s1638_s20   ;;  %s1941_s18 = smov %s1634_s19 }
 0x136   : > { %p12_p5 = scmp.ge.s32.totalorder %s15_s20, 6   ;;  %s1942_s19 = smov %s1944_s21 }
 0x138   :  { %14 = sbr.rel (!%p12_p5) target bundleno = 2 (0x2), region = 90 }

// kernel: tile.35
= control target key start
LH: loop header
LB: loop body
LE: loop exit
PB: predicated region body
PF: predicated region fallthrough
CT: control target
= control target key end

     0   :  { %s22_s0 = inlined_call_operand.vmem [shape: f32[16], index: 0, kind: input, shape index: {}]   ;;  %s23_s1 = inlined_call_operand.vmem [shape: f32[8,16], index: 1, kind: output, shape index: {}]  }
   0x1   :  { %v4_v0 = vld [vmem:[%s22_s0] ss:$0 sm:$0xff] }
   0x2   :  { %5 = vst [vmem:[%s23_s1] sm:$0xff] %v4_v0 }

// kernel: tile.36
= control target key start
LH: loop header
LB: loop body
LE: loop exit
PB: predicated region body
PF: predicated region fallthrough
CT: control target
= control target key end

     0   :  { %s69_s10 = smov 112   ;;  %s70_s11 = smov 80   ;;  %vm3_vm0 = vcmask 130048   ;;  %vm9_vm1 = vcmask 1048448   ;;  %vm15_vm2 = vcmask 917248   ;;  %vm21_vm3 = vcmask 786048   ;;  %s113_s0 = inlined_call_operand.vmem [shape: f32[8,16], index: 0, kind: input, shape index: {}]   ;;  %s114_s1 = inlined_call_operand.vmem [shape: f32[1,128], index: 1, kind: output, shape index: {}]  }
   0x1   :  { %v55_v0 = vld [vmem:[%s113_s0 + $0x7] sm:$0x1]   ;;  %v57_v1 = vld [vmem:[%s113_s0 + $0x5] sm:$0x1]   ;;  %v56_v2 = vld [vmem:[%s113_s0 + $0x6] sm:$0x1]  }
   0x2   :  { %7 = vrot.lane.b32.xlu0 %v55_v0, %s69_s10  ;;  %19 = vrot.lane.b32.xlu1 %v57_v1, %s70_s11  ;;  %v58_v3 = vld [vmem:[%s113_s0 + $0x4] sm:$0x1]   ;;  %v2_v4 = vld [vmem:[%s113_s0] sm:$0x1]   ;;  %s71_s18 = smov 96   ;;  %s72_s19 = smov 64  }
   0x3   :  { %4 = vst.msk [vmem:[#allocation0] sm:$0x1] %vm3_vm0, %v2_v4   ;;  %v59_v5 = vld [vmem:[%s113_s0 + $0x3] sm:$0x1]   ;;  %v60_v6 = vld [vmem:[%s113_s0 + $0x2] sm:$0x1]  }
   0x4   :  { %s73_s24 = smov 48   ;;  %s74_s25 = smov 32   ;;  %v61_v7 = vld [vmem:[%s113_s0 + $0x1] sm:$0x1]   ;;  %vm27_vm4 = vcmask 654848   ;;  %vm33_vm5 = vcmask 523648  }
   0x5   :  { %s75_s0 = smov 16   ;;  %vm39_vm6 = vcmask 392448   ;;  %vm45_vm7 = vcmask 261248  }
   0x6   :  { %13 = vrot.lane.b32.xlu0 %v56_v2, %s71_s18  ;;  %25 = vrot.lane.b32.xlu1 %v58_v3, %s72_s19 }
   0xa   :  { %31 = vrot.lane.b32.xlu0 %v59_v5, %s73_s24  ;;  %37 = vrot.lane.b32.xlu1 %v60_v6, %s74_s25 }
   0xe   :  { %43 = vrot.lane.b32.xlu0 %v61_v7, %s75_s0 }
  0x74   :  { %v8_v8 = vpop.permute.xlu0 %7   ;;  %v20_v9 = vpop.permute.xlu1 %19  }
  0x75   :  { %10 = vst.msk [vmem:[#allocation0] sm:$0x1] %vm9_vm1, %v8_v8  }
  0x78   :  { %v14_v10 = vpop.permute.xlu0 %13   ;;  %v26_v11 = vpop.permute.xlu1 %25  }
  0x79   :  { %16 = vst.msk [vmem:[#allocation0] sm:$0x1] %vm15_vm2, %v14_v10  }
  0x7a   :  { %22 = vst.msk [vmem:[#allocation0] sm:$0x1] %vm21_vm3, %v20_v9  }
  0x7b   :  { %28 = vst.msk [vmem:[#allocation0] sm:$0x1] %vm27_vm4, %v26_v11  }
  0x7c   :  { %v32_v12 = vpop.permute.xlu0 %31   ;;  %v38_v13 = vpop.permute.xlu1 %37  }
  0x7d   :  { %34 = vst.msk [vmem:[#allocation0] sm:$0x1] %vm33_vm5, %v32_v12  }
  0x7e   :  { %40 = vst.msk [vmem:[#allocation0] sm:$0x1] %vm39_vm6, %v38_v13  }
  0x80   :  { %v44_v14 = vpop.permute.xlu0 %43  }
  0x81   :  { %46 = vst.msk [vmem:[#allocation0] sm:$0x1] %vm45_vm7, %v44_v14  }
  0x88   :  { %v51_v15 = vld [vmem:[#allocation0] sm:$0x1] }
  0x89   :  { %54 = vst [vmem:[%s114_s1] sm:$0x1] %v51_v15 }

// kernel: vanilla_forward.20
= control target key start
LH: loop header
LB: loop body
LE: loop exit
PB: predicated region body
PF: predicated region fallthrough
CT: control target
= control target key end

     0   :  { %s254_s0 = inlined_call_operand.vmem [shape: f32[128,128], index: 0, kind: input, shape index: {}]   ;;  %s255_s1 = inlined_call_operand.vmem [shape: f32[1,128], index: 1, kind: input, shape index: {}]   ;;  %s256_s2 = inlined_call_operand.vmem [shape: f32[1,128], index: 2, kind: input, shape index: {}]   ;;  %s257_s3 = inlined_call_operand.vmem [shape: f32[128,128], index: 3, kind: output, shape index: {}]  }
   0x1   :  { %v14_v0 = vld [vmem:[%s254_s0] sm:$0xff]  ;;  %v15_v4 = vld [vmem:[%s254_s0 + $0x8] sm:$0xff]  ;;  %v16_v5 = vld [vmem:[%s254_s0 + $0x10] sm:$0xff] }
   0x2   :  { %v112_v1 = vld [vmem:[%s255_s1] ss:$0 sm:$0xff]  ;;  %v17_v6 = vld [vmem:[%s254_s0 + $0x18] sm:$0xff]  ;;  %v19_v11 = vld [vmem:[%s254_s0 + $0x28] sm:$0xff] }
   0x3   :  { %v143_v2 = vld [vmem:[%s256_s2] ss:$0 sm:$0xff]  ;;  %v37_v3 = vmul.f32 %v112_v1, %v14_v0  ;;  %v38_v7 = vmul.f32 %v112_v1, %v15_v4  ;;  %v39_v8 = vmul.f32 %v112_v1, %v16_v5  ;;  %v40_v9 = vmul.f32 %v112_v1, %v17_v6  ;;  %v20_v12 = vld [vmem:[%s254_s0 + $0x30] sm:$0xff]  ;;  %v21_v17 = vld [vmem:[%s254_s0 + $0x38] sm:$0xff] }
   0x4   :  { %v18_v10 = vld [vmem:[%s254_s0 + $0x20] sm:$0xff]  ;;  %v42_v15 = vmul.f32 %v112_v1, %v19_v11  ;;  %v43_v16 = vmul.f32 %v112_v1, %v20_v12  ;;  %v44_v21 = vmul.f32 %v112_v1, %v21_v17  ;;  %v23_v27 = vld [vmem:[%s254_s0 + $0x48] sm:$0xff]  ;;  %v24_v28 = vld [vmem:[%s254_s0 + $0x50] sm:$0xff] }
   0x5   :  { %v60_v13 = vadd.f32 %v143_v2, %v37_v3  ;;  %v41_v14 = vmul.f32 %v112_v1, %v18_v10  ;;  %v61_v18 = vadd.f32 %v143_v2, %v38_v7  ;;  %v62_v19 = vadd.f32 %v143_v2, %v39_v8  ;;  %v22_v22 = vld [vmem:[%s254_s0 + $0x40] sm:$0xff]  ;;  %v25_v29 = vld [vmem:[%s254_s0 + $0x58] sm:$0xff]  ;;  %v27_v35 = vld [vmem:[%s254_s0 + $0x68] sm:$0xff] }
   0x6   :  { %v63_v20 = vadd.f32 %v143_v2, %v40_v9  ;;  %v65_v25 = vadd.f32 %v143_v2, %v42_v15  ;;  %v66_v26 = vadd.f32 %v143_v2, %v43_v16  ;;  %v67_v33 = vadd.f32 %v143_v2, %v44_v21  ;;  %v26_v34 = vld [vmem:[%s254_s0 + $0x60] sm:$0xff]  ;;  %v28_v36 = vld [vmem:[%s254_s0 + $0x70] sm:$0xff]  ;;  %v29_v41 = vld [vmem:[%s254_s0 + $0x78] sm:$0xff] }
   0x7   :  { %v76_v23 = vmax.f32 %v60_v13, 0.0  ;;  %v64_v24 = vadd.f32 %v143_v2, %v41_v14  ;;  %v77_v30 = vmax.f32 %v61_v18, 0.0  ;;  %v78_v31 = vmax.f32 %v62_v19, 0.0 }
   0x8   :  { %v79_v32 = vmax.f32 %v63_v20, 0.0  ;;  %v81_v38 = vmax.f32 %v65_v25, 0.0  ;;  %v82_v39 = vmax.f32 %v66_v26, 0.0  ;;  %v45_v40 = vmul.f32 %v112_v1, %v22_v22 }
   0x9   :  { %92 = vst [vmem:[%s257_s3] sm:$0xff] %v76_v23  ;;  %v80_v37 = vmax.f32 %v64_v24, 0.0  ;;  %93 = vst [vmem:[%s257_s3 + $0x8] sm:$0xff] %v77_v30  ;;  %v83_v42 = vmax.f32 %v67_v33, 0.0  ;;  %v46_v43 = vmul.f32 %v112_v1, %v23_v27  ;;  %v47_v44 = vmul.f32 %v112_v1, %v24_v28 }
   0xa   :  { %94 = vst [vmem:[%s257_s3 + $0x10] sm:$0xff] %v78_v31  ;;  %95 = vst [vmem:[%s257_s3 + $0x18] sm:$0xff] %v79_v32  ;;  %v48_v45 = vmul.f32 %v112_v1, %v25_v29  ;;  %v68_v46 = vadd.f32 %v143_v2, %v45_v40  ;;  %v49_v47 = vmul.f32 %v112_v1, %v26_v34 }
   0xb   :  { %96 = vst [vmem:[%s257_s3 + $0x20] sm:$0xff] %v80_v37  ;;  %97 = vst [vmem:[%s257_s3 + $0x28] sm:$0xff] %v81_v38  ;;  %v50_v48 = vmul.f32 %v112_v1, %v27_v35  ;;  %v51_v49 = vmul.f32 %v112_v1, %v28_v36  ;;  %v69_v50 = vadd.f32 %v143_v2, %v46_v43 }
   0xc   :  { %98 = vst [vmem:[%s257_s3 + $0x30] sm:$0xff] %v82_v39  ;;  %99 = vst [vmem:[%s257_s3 + $0x38] sm:$0xff] %v83_v42  ;;  %v70_v51 = vadd.f32 %v143_v2, %v47_v44  ;;  %v71_v52 = vadd.f32 %v143_v2, %v48_v45  ;;  %v52_v53 = vmul.f32 %v112_v1, %v29_v41  ;;  %v84_v54 = vmax.f32 %v68_v46, 0.0 }
   0xd   :  { %v72_v55 = vadd.f32 %v143_v2, %v49_v47  ;;  %v73_v56 = vadd.f32 %v143_v2, %v50_v48  ;;  %v74_v57 = vadd.f32 %v143_v2, %v51_v49  ;;  %v85_v58 = vmax.f32 %v69_v50, 0.0 }
   0xe   :  { %v86_v59 = vmax.f32 %v70_v51, 0.0  ;;  %v87_v60 = vmax.f32 %v71_v52, 0.0  ;;  %v75_v61 = vadd.f32 %v143_v2, %v52_v53  ;;  %100 = vst [vmem:[%s257_s3 + $0x40] sm:$0xff] %v84_v54 }
   0xf   :  { %v88_v62 = vmax.f32 %v72_v55, 0.0  ;;  %v89_v63 = vmax.f32 %v73_v56, 0.0  ;;  %v90_v0 = vmax.f32 %v74_v57, 0.0  ;;  %101 = vst [vmem:[%s257_s3 + $0x48] sm:$0xff] %v85_v58 }
  0x10   :  { %102 = vst [vmem:[%s257_s3 + $0x50] sm:$0xff] %v86_v59  ;;  %103 = vst [vmem:[%s257_s3 + $0x58] sm:$0xff] %v87_v60  ;;  %v91_v1 = vmax.f32 %v75_v61, 0.0 }
  0x11   :  { %104 = vst [vmem:[%s257_s3 + $0x60] sm:$0xff] %v88_v62  ;;  %105 = vst [vmem:[%s257_s3 + $0x68] sm:$0xff] %v89_v63 }
  0x12   :  { %106 = vst [vmem:[%s257_s3 + $0x70] sm:$0xff] %v90_v0  ;;  %107 = vst [vmem:[%s257_s3 + $0x78] sm:$0xff] %v91_v1 }

// kernel: vanilla_forward.22
= control target key start
LH: loop header
LB: loop body
LE: loop exit
PB: predicated region body
PF: predicated region fallthrough
CT: control target
= control target key end

     0   :  { %s1393_s1 = inlined_call_operand.vmem [shape: bf16[256,128], index: 1, kind: input, shape index: {}]   ;;  %s1394_s0 = inlined_call_operand.vmem [shape: bf16[256,256], index: 0, kind: input, shape index: {}]   ;;  %s1395_s2 = inlined_call_operand.vmem [shape: f32[1,128], index: 2, kind: input, shape index: {}]   ;;  %s1396_s3 = inlined_call_operand.vmem [shape: f32[1,128], index: 3, kind: input, shape index: {}]   ;;  %s1397_s4 = inlined_call_operand.vmem [shape: f32[256,128], index: 4, kind: output, shape index: {}]  }
   0x1   :  { %v990_v0 = vld [vmem:[%s1393_s1 + $0x78] sm:$0xff]   ;;  %v992_v2 = vld [vmem:[%s1393_s1 + $0x70] sm:$0xff]   ;;  %v994_v4 = vld [vmem:[%s1393_s1 + $0x68] sm:$0xff]  }
   0x2   :  { %v991_v1 = vld [vmem:[%s1393_s1 + $0x38] sm:$0xff]   ;;  %862 = vmatprep.subr.bf16.mxu0 %v990_v0  ;;  %974 = vmatprep.subr.bf16.mxu1 %v990_v0  ;;  %v993_v3 = vld [vmem:[%s1393_s1 + $0x30] sm:$0xff]   ;;  %v995_v5 = vld [vmem:[%s1393_s1 + $0x28] sm:$0xff]  }
   0x3   :  { %863 = vmatpush3.bf16.msra.mxu0 %v991_v1  ;;  %982 = vmatpush3.bf16.msra.mxu1 %v991_v1  ;;  %v996_v6 = vld [vmem:[%s1393_s1 + $0x60] sm:$0xff]   ;;  %v998_v8 = vld [vmem:[%s1393_s1 + $0x58] sm:$0xff]   ;;  %v1000_v10 = vld [vmem:[%s1393_s1 + $0x50] sm:$0xff]  }
   0x4   :  { %864 = vmatprep.subr.bf16.mxu0 %v992_v2  ;;  %975 = vmatprep.subr.bf16.mxu1 %v992_v2  ;;  %v997_v7 = vld [vmem:[%s1393_s1 + $0x20] sm:$0xff]   ;;  %v999_v9 = vld [vmem:[%s1393_s1 + $0x18] sm:$0xff]   ;;  %v1001_v13 = vld [vmem:[%s1393_s1 + $0x10] sm:$0xff]  }
   0x5   :  { %v1008_v11 = vld [vmem:[%s1394_s0 + $0x4] ss:$8 sps:$4 sm:$0xff]   ;;  %v1006_v18 = vld [vmem:[%s1394_s0] ss:$8 sps:$4 sm:$0xff]   ;;  %v1012_v20 = vld [vmem:[%s1394_s0 + $0x14] ss:$8 sps:$4 sm:$0xff]  }
   0x6   :  { %v1011_v12 = vld [vmem:[%s1394_s0 + $0x84] ss:$8 sps:$4 sm:$0xff]   ;;  %438 = vmatprep.mubr.bf16.mxu0 %v1008_v11  ;;  %v1009_v19 = vld [vmem:[%s1394_s0 + $0x80] ss:$8 sps:$4 sm:$0xff]   ;;  %v1014_v21 = vld [vmem:[%s1394_s0 + $0x94] ss:$8 sps:$4 sm:$0xff]  }
   0x7   :  { %865 = vmatpush3.bf16.msra.mxu0 %v993_v3  ;;  %983 = vmatpush3.bf16.msra.mxu1 %v993_v3  ;;  %v1002_v14 = vld [vmem:[%s1393_s1 + $0x48] sm:$0xff]   ;;  %v1004_v16 = vld [vmem:[%s1393_s1 + $0x40] sm:$0xff]   ;;  %v1016_v22 = vld [vmem:[%s1394_s0 + $0x10] ss:$8 sps:$4 sm:$0xff]  }
   0x8   :  { %866 = vmatprep.subr.bf16.mxu0 %v994_v4  ;;  %976 = vmatprep.subr.bf16.mxu1 %v994_v4  ;;  %v1003_v15 = vld [vmem:[%s1393_s1 + $0x8] sm:$0xff]   ;;  %v1005_v17 = vld [vmem:[%s1393_s1] sm:$0xff]   ;;  %v1017_v23 = vld [vmem:[%s1394_s0 + $0x90] ss:$8 sps:$4 sm:$0xff]  }
   0x9   :  { %502 = vmatprep.mubr.bf16.mxu1 %v1011_v12  ;;  %v1018_v24 = vld [vmem:[%s1394_s0 + $0x24] ss:$8 sps:$4 sm:$0xff]   ;;  %v1022_v26 = vld [vmem:[%s1394_s0 + $0x20] ss:$8 sps:$4 sm:$0xff]   ;;  %v1024_v28 = vld [vmem:[%s1394_s0 + $0x34] ss:$8 sps:$4 sm:$0xff]  }
   0xa   :  { %v1020_v25 = vld [vmem:[%s1394_s0 + $0xa4] ss:$8 sps:$4 sm:$0xff]   ;;  %v1023_v27 = vld [vmem:[%s1394_s0 + $0xa0] ss:$8 sps:$4 sm:$0xff]   ;;  %v1026_v29 = vld [vmem:[%s1394_s0 + $0xb4] ss:$8 sps:$4 sm:$0xff]  }
   0xb   :  { %867 = vmatpush3.bf16.msra.mxu0 %v995_v5  ;;  %984 = vmatpush3.bf16.msra.mxu1 %v995_v5  ;;  %v1028_v30 = vld [vmem:[%s1394_s0 + $0x30] ss:$8 sps:$4 sm:$0xff]   ;;  %v1030_v32 = vld [vmem:[%s1394_s0 + $0x44] ss:$8 sps:$4 sm:$0xff]   ;;  %v1034_v34 = vld [vmem:[%s1394_s0 + $0x40] ss:$8 sps:$4 sm:$0xff]  }
   0xc   :  { %868 = vmatprep.subr.bf16.mxu0 %v996_v6  ;;  %977 = vmatprep.subr.bf16.mxu1 %v996_v6  ;;  %v1029_v31 = vld [vmem:[%s1394_s0 + $0xb0] ss:$8 sps:$4 sm:$0xff]   ;;  %v1032_v33 = vld [vmem:[%s1394_s0 + $0xc4] ss:$8 sps:$4 sm:$0xff]   ;;  %v1035_v35 = vld [vmem:[%s1394_s0 + $0xc0] ss:$8 sps:$4 sm:$0xff]  }
   0xd   :  { %v1036_v36 = vld [vmem:[%s1394_s0 + $0x54] ss:$8 sps:$4 sm:$0xff]   ;;  %v1040_v38 = vld [vmem:[%s1394_s0 + $0x50] ss:$8 sps:$4 sm:$0xff]   ;;  %v1042_v40 = vld [vmem:[%s1394_s0 + $0x64] ss:$8 sps:$4 sm:$0xff]  }
   0xe   :  { %v1038_v37 = vld [vmem:[%s1394_s0 + $0xd4] ss:$8 sps:$4 sm:$0xff]   ;;  %v1041_v39 = vld [vmem:[%s1394_s0 + $0xd0] ss:$8 sps:$4 sm:$0xff]   ;;  %v1044_v41 = vld [vmem:[%s1394_s0 + $0xe4] ss:$8 sps:$4 sm:$0xff]  }
   0xf   :  { %869 = vmatpush3.bf16.msra.mxu0 %v997_v7  ;;  %985 = vmatpush3.bf16.msra.mxu1 %v997_v7  ;;  %v1046_v42 = vld [vmem:[%s1394_s0 + $0x60] ss:$8 sps:$4 sm:$0xff]   ;;  %v1048_v44 = vld [vmem:[%s1394_s0 + $0x74] ss:$8 sps:$4 sm:$0xff]   ;;  %v1052_v46 = vld [vmem:[%s1394_s0 + $0x70] ss:$8 sps:$4 sm:$0xff]  }
  0x10   :  { %870 = vmatprep.subr.bf16.mxu0 %v998_v8  ;;  %978 = vmatprep.subr.bf16.mxu1 %v998_v8  ;;  %v1047_v43 = vld [vmem:[%s1394_s0 + $0xe0] ss:$8 sps:$4 sm:$0xff]   ;;  %v1050_v45 = vld [vmem:[%s1394_s0 + $0xf4] ss:$8 sps:$4 sm:$0xff]   ;;  %v1053_v47 = vld [vmem:[%s1394_s0 + $0xf0] ss:$8 sps:$4 sm:$0xff]  }
  0x11   :  { %v1226_v51 = vld [vmem:[%s1395_s2] ss:$0 sm:$0xff] }
  0x12   :  { %v1231_v55 = vld [vmem:[%s1396_s3] ss:$0 sm:$0xff] }
  0x13   :  { %871 = vmatpush3.bf16.msra.mxu0 %v999_v9  ;;  %986 = vmatpush3.bf16.msra.mxu1 %v999_v9 }
  0x14   :  { %872 = vmatprep.subr.bf16.mxu0 %v1000_v10  ;;  %979 = vmatprep.subr.bf16.mxu1 %v1000_v10 }
  0x17   :  { %873 = vmatpush3.bf16.msra.mxu0 %v1001_v13  ;;  %987 = vmatpush3.bf16.msra.mxu1 %v1001_v13 }
  0x18   :  { %874 = vmatprep.subr.bf16.mxu0 %v1002_v14  ;;  %980 = vmatprep.subr.bf16.mxu1 %v1002_v14 }
  0x1b   :  { %875 = vmatpush3.bf16.msra.mxu0 %v1003_v15  ;;  %988 = vmatpush3.bf16.msra.mxu1 %v1003_v15 }
  0x1c   :  { %876 = vmatprep.subr.bf16.mxu0 %v1004_v16  ;;  %981 = vmatprep.subr.bf16.mxu1 %v1004_v16 }
  0x1f   :  { %877 = vmatpush3.bf16.msra.mxu0 %v1005_v17  ;;  %989 = vmatpush3.bf16.msra.mxu1 %v1005_v17 }
  0x22   :  { %439 = vmatmul.mubr.bf16.vlgmr.msra.gmra.mxu0 %v1006_v18  ;;  %503 = vmatmul.mubr.bf16.vlgmr.msra.gmra.mxu1 %v1009_v19 }
  0x23   :  { %446 = vmatprep.mubr.bf16.mxu0 %v1012_v20  ;;  %510 = vmatprep.mubr.bf16.mxu1 %v1014_v21 }
  0x2a   :  { %447 = vmatmul.mubr.bf16.gmra.mxu0 %v1016_v22  ;;  %511 = vmatmul.mubr.bf16.gmra.mxu1 %v1017_v23 }
  0x2b   :  { %454 = vmatprep.mubr.bf16.mxu0 %v1018_v24  ;;  %518 = vmatprep.mubr.bf16.mxu1 %v1020_v25 }
  0x32   :  { %455 = vmatmul.mubr.bf16.gmra.mxu0 %v1022_v26  ;;  %519 = vmatmul.mubr.bf16.gmra.mxu1 %v1023_v27 }
  0x33   :  { %462 = vmatprep.mubr.bf16.mxu0 %v1024_v28  ;;  %526 = vmatprep.mubr.bf16.mxu1 %v1026_v29 }
  0x3a   :  { %463 = vmatmul.mubr.bf16.gmra.mxu0 %v1028_v30  ;;  %527 = vmatmul.mubr.bf16.gmra.mxu1 %v1029_v31 }
  0x3b   :  { %470 = vmatprep.mubr.bf16.mxu0 %v1030_v32  ;;  %534 = vmatprep.mubr.bf16.mxu1 %v1032_v33 }
  0x42   :  { %471 = vmatmul.mubr.bf16.gmra.mxu0 %v1034_v34  ;;  %535 = vmatmul.mubr.bf16.gmra.mxu1 %v1035_v35 }
  0x43   :  { %478 = vmatprep.mubr.bf16.mxu0 %v1036_v36  ;;  %542 = vmatprep.mubr.bf16.mxu1 %v1038_v37 }
  0x4a   :  { %479 = vmatmul.mubr.bf16.gmra.mxu0 %v1040_v38  ;;  %543 = vmatmul.mubr.bf16.gmra.mxu1 %v1041_v39 }
  0x4b   :  { %486 = vmatprep.mubr.bf16.mxu0 %v1042_v40  ;;  %550 = vmatprep.mubr.bf16.mxu1 %v1044_v41 }
  0x52   :  { %487 = vmatmul.mubr.bf16.gmra.mxu0 %v1046_v42  ;;  %551 = vmatmul.mubr.bf16.gmra.mxu1 %v1047_v43 }
  0x53   :  { %494 = vmatprep.mubr.bf16.mxu0 %v1048_v44  ;;  %558 = vmatprep.mubr.bf16.mxu1 %v1050_v45 }
  0x5a   :  { %495 = vmatmul.mubr.bf16.gmra.mxu0 %v1052_v46  ;;  %559 = vmatmul.mubr.bf16.gmra.mxu1 %v1053_v47 }
  0xe2   :  { %v878_v48 = vpop.f32.mrf.mxu0  ;;  %v926_v49 = vpop.f32.mrf.mxu1 }
  0xe4   :  { %v879_v50 = vpop.f32.mrf.mxu0  ;;  %v927_v52 = vpop.f32.mrf.mxu1 }
  0xe5   :  { %v880_v53 = vadd.f32 %v879_v50, %v878_v48  ;;  %v928_v54 = vadd.f32 %v927_v52, %v926_v49 }
  0xe6   :  { %v881_v56 = vpop.f32.mrf.mxu0  ;;  %v929_v57 = vpop.f32.mrf.mxu1 }
  0xe7   :  { %v673_v58 = vmul.f32 %v880_v53, %v1226_v51  ;;  %v689_v59 = vmul.f32 %v928_v54, %v1226_v51 }
  0xe8   :  { %v882_v60 = vpop.f32.mrf.mxu0  ;;  %v930_v61 = vpop.f32.mrf.mxu1 }
  0xe9   :  { %v712_v62 = vadd.f32 %v1231_v55, %v673_v58  ;;  %v728_v63 = vadd.f32 %v1231_v55, %v689_v59  ;;  %v883_v0 = vadd.f32 %v882_v60, %v881_v56  ;;  %v931_v1 = vadd.f32 %v930_v61, %v929_v57 }
  0xea   :  { %v884_v2 = vpop.f32.mrf.mxu0  ;;  %v932_v3 = vpop.f32.mrf.mxu1 }
  0xeb   :  { %v744_v4 = vmax.f32 %v712_v62, 0.0  ;;  %v760_v5 = vmax.f32 %v728_v63, 0.0  ;;  %v674_v6 = vmul.f32 %v883_v0, %v1226_v51  ;;  %v690_v7 = vmul.f32 %v931_v1, %v1226_v51 }
  0xec   :  { %v885_v8 = vpop.f32.mrf.mxu0  ;;  %v933_v9 = vpop.f32.mrf.mxu1 }
  0xed   :  { %776 = vst [vmem:[%s1397_s4] sm:$0xff] %v744_v4  ;;  %792 = vst [vmem:[%s1397_s4 + $0x80] sm:$0xff] %v760_v5  ;;  %v713_v10 = vadd.f32 %v1231_v55, %v674_v6  ;;  %v729_v11 = vadd.f32 %v1231_v55, %v690_v7  ;;  %v886_v12 = vadd.f32 %v885_v8, %v884_v2 }
  0xee   :  { %v934_v13 = vadd.f32 %v933_v9, %v932_v3  ;;  %v887_v14 = vpop.f32.mrf.mxu0  ;;  %v935_v15 = vpop.f32.mrf.mxu1 }
  0xef   :  { %v745_v16 = vmax.f32 %v713_v10, 0.0  ;;  %v761_v17 = vmax.f32 %v729_v11, 0.0  ;;  %v675_v18 = vmul.f32 %v886_v12, %v1226_v51 }
  0xf0   :  { %v691_v19 = vmul.f32 %v934_v13, %v1226_v51  ;;  %v888_v20 = vpop.f32.mrf.mxu0  ;;  %v936_v21 = vpop.f32.mrf.mxu1 }
  0xf1   :  { %777 = vst [vmem:[%s1397_s4 + $0x8] sm:$0xff] %v745_v16  ;;  %793 = vst [vmem:[%s1397_s4 + $0x88] sm:$0xff] %v761_v17  ;;  %v714_v22 = vadd.f32 %v1231_v55, %v675_v18  ;;  %v889_v24 = vadd.f32 %v888_v20, %v887_v14  ;;  %v937_v25 = vadd.f32 %v936_v21, %v935_v15 }
  0xf2   :  { %v730_v23 = vadd.f32 %v1231_v55, %v691_v19  ;;  %v890_v26 = vpop.f32.mrf.mxu0  ;;  %v938_v27 = vpop.f32.mrf.mxu1 }
  0xf3   :  { %v746_v28 = vmax.f32 %v714_v22, 0.0  ;;  %v676_v30 = vmul.f32 %v889_v24, %v1226_v51  ;;  %v692_v31 = vmul.f32 %v937_v25, %v1226_v51 }
  0xf4   :  { %v762_v29 = vmax.f32 %v730_v23, 0.0  ;;  %v891_v32 = vpop.f32.mrf.mxu0  ;;  %v939_v33 = vpop.f32.mrf.mxu1 }
  0xf5   :  { %778 = vst [vmem:[%s1397_s4 + $0x10] sm:$0xff] %v746_v28  ;;  %v715_v34 = vadd.f32 %v1231_v55, %v676_v30  ;;  %v731_v35 = vadd.f32 %v1231_v55, %v692_v31  ;;  %v892_v36 = vadd.f32 %v891_v32, %v890_v26  ;;  %v940_v37 = vadd.f32 %v939_v33, %v938_v27 }
  0xf6   :  { %794 = vst [vmem:[%s1397_s4 + $0x90] sm:$0xff] %v762_v29  ;;  %v893_v38 = vpop.f32.mrf.mxu0  ;;  %v941_v39 = vpop.f32.mrf.mxu1 }
  0xf7   :  { %v747_v40 = vmax.f32 %v715_v34, 0.0  ;;  %v763_v41 = vmax.f32 %v731_v35, 0.0  ;;  %v677_v42 = vmul.f32 %v892_v36, %v1226_v51  ;;  %v693_v43 = vmul.f32 %v940_v37, %v1226_v51 }
  0xf8   :  { %v894_v44 = vpop.f32.mrf.mxu0  ;;  %v942_v45 = vpop.f32.mrf.mxu1 }
  0xf9   :  { %779 = vst [vmem:[%s1397_s4 + $0x18] sm:$0xff] %v747_v40  ;;  %795 = vst [vmem:[%s1397_s4 + $0x98] sm:$0xff] %v763_v41  ;;  %v716_v46 = vadd.f32 %v1231_v55, %v677_v42  ;;  %v732_v47 = vadd.f32 %v1231_v55, %v693_v43  ;;  %v895_v48 = vadd.f32 %v894_v44, %v893_v38 }
  0xfa   :  { %v943_v49 = vadd.f32 %v942_v45, %v941_v39  ;;  %v896_v50 = vpop.f32.mrf.mxu0  ;;  %v944_v52 = vpop.f32.mrf.mxu1 }
  0xfb   :  { %v748_v53 = vmax.f32 %v716_v46, 0.0  ;;  %v764_v54 = vmax.f32 %v732_v47, 0.0  ;;  %v678_v56 = vmul.f32 %v895_v48, %v1226_v51 }
  0xfc   :  { %v694_v57 = vmul.f32 %v943_v49, %v1226_v51  ;;  %v897_v58 = vpop.f32.mrf.mxu0  ;;  %v945_v59 = vpop.f32.mrf.mxu1 }
  0xfd   :  { %780 = vst [vmem:[%s1397_s4 + $0x20] sm:$0xff] %v748_v53  ;;  %796 = vst [vmem:[%s1397_s4 + $0xa0] sm:$0xff] %v764_v54  ;;  %v717_v60 = vadd.f32 %v1231_v55, %v678_v56  ;;  %v898_v62 = vadd.f32 %v897_v58, %v896_v50  ;;  %v946_v63 = vadd.f32 %v945_v59, %v944_v52 }
  0xfe   :  { %v733_v61 = vadd.f32 %v1231_v55, %v694_v57  ;;  %v899_v0 = vpop.f32.mrf.mxu0  ;;  %v947_v1 = vpop.f32.mrf.mxu1 }
  0xff   :  { %v749_v2 = vmax.f32 %v717_v60, 0.0  ;;  %v679_v4 = vmul.f32 %v898_v62, %v1226_v51  ;;  %v695_v5 = vmul.f32 %v946_v63, %v1226_v51 }
 0x100   :  { %v765_v3 = vmax.f32 %v733_v61, 0.0  ;;  %v900_v6 = vpop.f32.mrf.mxu0  ;;  %v948_v7 = vpop.f32.mrf.mxu1 }
 0x101   :  { %781 = vst [vmem:[%s1397_s4 + $0x28] sm:$0xff] %v749_v2  ;;  %v718_v8 = vadd.f32 %v1231_v55, %v679_v4  ;;  %v734_v9 = vadd.f32 %v1231_v55, %v695_v5  ;;  %v901_v10 = vadd.f32 %v900_v6, %v899_v0  ;;  %v949_v11 = vadd.f32 %v948_v7, %v947_v1 }
 0x102   :  { %797 = vst [vmem:[%s1397_s4 + $0xa8] sm:$0xff] %v765_v3  ;;  %v902_v12 = vpop.f32.mrf.mxu0  ;;  %v950_v13 = vpop.f32.mrf.mxu1 }
 0x103   :  { %v750_v14 = vmax.f32 %v718_v8, 0.0  ;;  %v766_v15 = vmax.f32 %v734_v9, 0.0  ;;  %v680_v16 = vmul.f32 %v901_v10, %v1226_v51  ;;  %v696_v17 = vmul.f32 %v949_v11, %v1226_v51 }
 0x104   :  { %v903_v18 = vpop.f32.mrf.mxu0  ;;  %v951_v19 = vpop.f32.mrf.mxu1 }
 0x105   :  { %782 = vst [vmem:[%s1397_s4 + $0x30] sm:$0xff] %v750_v14  ;;  %798 = vst [vmem:[%s1397_s4 + $0xb0] sm:$0xff] %v766_v15  ;;  %v719_v20 = vadd.f32 %v1231_v55, %v680_v16  ;;  %v735_v21 = vadd.f32 %v1231_v55, %v696_v17  ;;  %v904_v22 = vadd.f32 %v903_v18, %v902_v12 }
 0x106   :  { %v952_v23 = vadd.f32 %v951_v19, %v950_v13  ;;  %v905_v24 = vpop.f32.mrf.mxu0  ;;  %v953_v25 = vpop.f32.mrf.mxu1 }
 0x107   :  { %v751_v26 = vmax.f32 %v719_v20, 0.0  ;;  %v767_v27 = vmax.f32 %v735_v21, 0.0  ;;  %v681_v28 = vmul.f32 %v904_v22, %v1226_v51 }
 0x108   :  { %v697_v29 = vmul.f32 %v952_v23, %v1226_v51  ;;  %v906_v30 = vpop.f32.mrf.mxu0  ;;  %v954_v31 = vpop.f32.mrf.mxu1 }
 0x109   :  { %783 = vst [vmem:[%s1397_s4 + $0x38] sm:$0xff] %v751_v26  ;;  %799 = vst [vmem:[%s1397_s4 + $0xb8] sm:$0xff] %v767_v27  ;;  %v720_v32 = vadd.f32 %v1231_v55, %v681_v28  ;;  %v907_v34 = vadd.f32 %v906_v30, %v905_v24  ;;  %v955_v35 = vadd.f32 %v954_v31, %v953_v25 }
 0x10a   :  { %v736_v33 = vadd.f32 %v1231_v55, %v697_v29  ;;  %v908_v36 = vpop.f32.mrf.mxu0  ;;  %v956_v37 = vpop.f32.mrf.mxu1 }
 0x10b   :  { %v752_v38 = vmax.f32 %v720_v32, 0.0  ;;  %v682_v40 = vmul.f32 %v907_v34, %v1226_v51  ;;  %v698_v41 = vmul.f32 %v955_v35, %v1226_v51 }
 0x10c   :  { %v768_v39 = vmax.f32 %v736_v33, 0.0  ;;  %v909_v42 = vpop.f32.mrf.mxu0  ;;  %v957_v43 = vpop.f32.mrf.mxu1 }
 0x10d   :  { %784 = vst [vmem:[%s1397_s4 + $0x40] sm:$0xff] %v752_v38  ;;  %v721_v44 = vadd.f32 %v1231_v55, %v682_v40  ;;  %v737_v45 = vadd.f32 %v1231_v55, %v698_v41  ;;  %v910_v46 = vadd.f32 %v909_v42, %v908_v36  ;;  %v958_v47 = vadd.f32 %v957_v43, %v956_v37 }
 0x10e   :  { %800 = vst [vmem:[%s1397_s4 + $0xc0] sm:$0xff] %v768_v39  ;;  %v911_v48 = vpop.f32.mrf.mxu0  ;;  %v959_v49 = vpop.f32.mrf.mxu1 }
 0x10f   :  { %v753_v50 = vmax.f32 %v721_v44, 0.0  ;;  %v769_v52 = vmax.f32 %v737_v45, 0.0  ;;  %v683_v53 = vmul.f32 %v910_v46, %v1226_v51  ;;  %v699_v54 = vmul.f32 %v958_v47, %v1226_v51 }
 0x110   :  { %v912_v56 = vpop.f32.mrf.mxu0  ;;  %v960_v57 = vpop.f32.mrf.mxu1 }
 0x111   :  { %785 = vst [vmem:[%s1397_s4 + $0x48] sm:$0xff] %v753_v50  ;;  %801 = vst [vmem:[%s1397_s4 + $0xc8] sm:$0xff] %v769_v52  ;;  %v722_v58 = vadd.f32 %v1231_v55, %v683_v53  ;;  %v738_v59 = vadd.f32 %v1231_v55, %v699_v54  ;;  %v913_v60 = vadd.f32 %v912_v56, %v911_v48 }
 0x112   :  { %v961_v61 = vadd.f32 %v960_v57, %v959_v49  ;;  %v914_v62 = vpop.f32.mrf.mxu0  ;;  %v962_v63 = vpop.f32.mrf.mxu1 }
 0x113   :  { %v754_v0 = vmax.f32 %v722_v58, 0.0  ;;  %v770_v1 = vmax.f32 %v738_v59, 0.0  ;;  %v684_v2 = vmul.f32 %v913_v60, %v1226_v51 }
 0x114   :  { %v700_v3 = vmul.f32 %v961_v61, %v1226_v51  ;;  %v915_v4 = vpop.f32.mrf.mxu0  ;;  %v963_v5 = vpop.f32.mrf.mxu1 }
 0x115   :  { %786 = vst [vmem:[%s1397_s4 + $0x50] sm:$0xff] %v754_v0  ;;  %802 = vst [vmem:[%s1397_s4 + $0xd0] sm:$0xff] %v770_v1  ;;  %v723_v6 = vadd.f32 %v1231_v55, %v684_v2  ;;  %v916_v8 = vadd.f32 %v915_v4, %v914_v62  ;;  %v964_v9 = vadd.f32 %v963_v5, %v962_v63 }
 0x116   :  { %v739_v7 = vadd.f32 %v1231_v55, %v700_v3  ;;  %v917_v10 = vpop.f32.mrf.mxu0  ;;  %v965_v11 = vpop.f32.mrf.mxu1 }
 0x117   :  { %v755_v12 = vmax.f32 %v723_v6, 0.0  ;;  %v685_v14 = vmul.f32 %v916_v8, %v1226_v51  ;;  %v701_v15 = vmul.f32 %v964_v9, %v1226_v51 }
 0x118   :  { %v771_v13 = vmax.f32 %v739_v7, 0.0  ;;  %v918_v16 = vpop.f32.mrf.mxu0  ;;  %v966_v17 = vpop.f32.mrf.mxu1 }
 0x119   :  { %787 = vst [vmem:[%s1397_s4 + $0x58] sm:$0xff] %v755_v12  ;;  %v724_v18 = vadd.f32 %v1231_v55, %v685_v14  ;;  %v740_v19 = vadd.f32 %v1231_v55, %v701_v15  ;;  %v919_v20 = vadd.f32 %v918_v16, %v917_v10  ;;  %v967_v21 = vadd.f32 %v966_v17, %v965_v11 }
 0x11a   :  { %803 = vst [vmem:[%s1397_s4 + $0xd8] sm:$0xff] %v771_v13  ;;  %v920_v22 = vpop.f32.mrf.mxu0  ;;  %v968_v23 = vpop.f32.mrf.mxu1 }
 0x11b   :  { %v756_v24 = vmax.f32 %v724_v18, 0.0  ;;  %v772_v25 = vmax.f32 %v740_v19, 0.0  ;;  %v686_v26 = vmul.f32 %v919_v20, %v1226_v51  ;;  %v702_v27 = vmul.f32 %v967_v21, %v1226_v51 }
 0x11c   :  { %v921_v28 = vpop.f32.mrf.mxu0  ;;  %v969_v29 = vpop.f32.mrf.mxu1 }
 0x11d   :  { %788 = vst [vmem:[%s1397_s4 + $0x60] sm:$0xff] %v756_v24  ;;  %804 = vst [vmem:[%s1397_s4 + $0xe0] sm:$0xff] %v772_v25  ;;  %v725_v30 = vadd.f32 %v1231_v55, %v686_v26  ;;  %v741_v31 = vadd.f32 %v1231_v55, %v702_v27  ;;  %v922_v32 = vadd.f32 %v921_v28, %v920_v22 }
 0x11e   :  { %v970_v33 = vadd.f32 %v969_v29, %v968_v23  ;;  %v923_v34 = vpop.f32.mrf.mxu0  ;;  %v971_v35 = vpop.f32.mrf.mxu1 }
 0x11f   :  { %v757_v36 = vmax.f32 %v725_v30, 0.0  ;;  %v773_v37 = vmax.f32 %v741_v31, 0.0  ;;  %v687_v38 = vmul.f32 %v922_v32, %v1226_v51 }
 0x120   :  { %v703_v39 = vmul.f32 %v970_v33, %v1226_v51  ;;  %v924_v40 = vpop.f32.mrf.mxu0  ;;  %v972_v41 = vpop.f32.mrf.mxu1 }
 0x121   :  { %789 = vst [vmem:[%s1397_s4 + $0x68] sm:$0xff] %v757_v36  ;;  %805 = vst [vmem:[%s1397_s4 + $0xe8] sm:$0xff] %v773_v37  ;;  %v726_v42 = vadd.f32 %v1231_v55, %v687_v38  ;;  %v925_v44 = vadd.f32 %v924_v40, %v923_v34  ;;  %v973_v45 = vadd.f32 %v972_v41, %v971_v35 }
 0x122   :  { %v742_v43 = vadd.f32 %v1231_v55, %v703_v39 }
 0x123   :  { %v758_v46 = vmax.f32 %v726_v42, 0.0  ;;  %v688_v48 = vmul.f32 %v925_v44, %v1226_v51  ;;  %v704_v49 = vmul.f32 %v973_v45, %v1226_v51 }
 0x124   :  { %v774_v47 = vmax.f32 %v742_v43, 0.0 }
 0x125   :  { %790 = vst [vmem:[%s1397_s4 + $0x70] sm:$0xff] %v758_v46  ;;  %v727_v50 = vadd.f32 %v1231_v55, %v688_v48  ;;  %v743_v52 = vadd.f32 %v1231_v55, %v704_v49 }
 0x126   :  { %806 = vst [vmem:[%s1397_s4 + $0xf0] sm:$0xff] %v774_v47 }
 0x127   :  { %v759_v53 = vmax.f32 %v727_v50, 0.0  ;;  %v775_v54 = vmax.f32 %v743_v52, 0.0 }
 0x129   :  { %791 = vst [vmem:[%s1397_s4 + $0x78] sm:$0xff] %v759_v53  ;;  %807 = vst [vmem:[%s1397_s4 + $0xf8] sm:$0xff] %v775_v54 }

// kernel: vanilla_forward.21
= control target key start
LH: loop header
LB: loop body
LE: loop exit
PB: predicated region body
PF: predicated region fallthrough
CT: control target
= control target key end

     0   :  { %s1057_s1 = inlined_call_operand.vmem [shape: bf16[128,128], index: 1, kind: input, shape index: {}]   ;;  %s1058_s0 = inlined_call_operand.vmem [shape: bf16[256,128], index: 0, kind: input, shape index: {}]   ;;  %s1059_s2 = inlined_call_operand.vmem [shape: f32[1,128], index: 2, kind: input, shape index: {}]   ;;  %s1060_s3 = inlined_call_operand.vmem [shape: f32[1,128], index: 3, kind: input, shape index: {}]   ;;  %s1061_s4 = inlined_call_operand.vmem [shape: f32[256,128], index: 4, kind: output, shape index: {}]  }
   0x1   :  { %v766_v0 = vld [vmem:[%s1057_s1 + $0x38] sm:$0xff]   ;;  %v767_v1 = vld [vmem:[%s1057_s1 + $0x30] sm:$0xff]   ;;  %v768_v2 = vld [vmem:[%s1057_s1 + $0x28] sm:$0xff]  }
   0x2   :  { %702 = vmatprep.subr.bf16.mxu0 %v766_v0  ;;  %750 = vmatprep.subr.bf16.mxu1 %v766_v0  ;;  %v769_v3 = vld [vmem:[%s1057_s1 + $0x20] sm:$0xff]   ;;  %v770_v6 = vld [vmem:[%s1057_s1 + $0x18] sm:$0xff]   ;;  %v771_v7 = vld [vmem:[%s1057_s1 + $0x10] sm:$0xff]  }
   0x3   :  { %703 = vmatpush3.bf16.msra.mxu0 %v766_v0  ;;  %758 = vmatpush3.bf16.msra.mxu1 %v766_v0  ;;  %v774_v4 = vld [vmem:[%s1058_s0] sm:$0xff]   ;;  %v772_v8 = vld [vmem:[%s1057_s1 + $0x8] sm:$0xff]   ;;  %v778_v12 = vld [vmem:[%s1058_s0 + $0x10] sm:$0xff]  }
   0x4   :  { %704 = vmatprep.subr.bf16.mxu0 %v767_v1  ;;  %751 = vmatprep.subr.bf16.mxu1 %v767_v1  ;;  %v775_v5 = vld [vmem:[%s1058_s0 + $0x40] sm:$0xff]   ;;  %v776_v10 = vld [vmem:[%s1058_s0 + $0x8] sm:$0xff]   ;;  %v779_v13 = vld [vmem:[%s1058_s0 + $0x50] sm:$0xff]  }
   0x5   :  { %718 = vmatprep.mubr.bf16.mxu0 %v774_v4  ;;  %734 = vmatprep.mubr.bf16.mxu1 %v775_v5  ;;  %v773_v9 = vld [vmem:[%s1057_s1] sm:$0xff]   ;;  %v777_v11 = vld [vmem:[%s1058_s0 + $0x48] sm:$0xff]   ;;  %v780_v14 = vld [vmem:[%s1058_s0 + $0x18] sm:$0xff]  }
   0x6   :  { %v781_v15 = vld [vmem:[%s1058_s0 + $0x58] sm:$0xff]   ;;  %v782_v16 = vld [vmem:[%s1058_s0 + $0x20] sm:$0xff]   ;;  %v784_v18 = vld [vmem:[%s1058_s0 + $0x28] sm:$0xff]  }
   0x7   :  { %705 = vmatpush3.bf16.msra.mxu0 %v767_v1  ;;  %759 = vmatpush3.bf16.msra.mxu1 %v767_v1  ;;  %v783_v17 = vld [vmem:[%s1058_s0 + $0x60] sm:$0xff]   ;;  %v785_v19 = vld [vmem:[%s1058_s0 + $0x68] sm:$0xff]   ;;  %v786_v20 = vld [vmem:[%s1058_s0 + $0x30] sm:$0xff]  }
   0x8   :  { %706 = vmatprep.subr.bf16.mxu0 %v768_v2  ;;  %752 = vmatprep.subr.bf16.mxu1 %v768_v2  ;;  %v787_v21 = vld [vmem:[%s1058_s0 + $0x70] sm:$0xff]   ;;  %v788_v22 = vld [vmem:[%s1058_s0 + $0x38] sm:$0xff]   ;;  %v890_v24 = vld [vmem:[%s1059_s2] ss:$0 sm:$0xff] }
   0x9   :  { %v789_v23 = vld [vmem:[%s1058_s0 + $0x78] sm:$0xff]   ;;  %v895_v26 = vld [vmem:[%s1060_s3] ss:$0 sm:$0xff] }
   0xb   :  { %707 = vmatpush3.bf16.msra.mxu0 %v768_v2  ;;  %760 = vmatpush3.bf16.msra.mxu1 %v768_v2 }
   0xc   :  { %708 = vmatprep.subr.bf16.mxu0 %v769_v3  ;;  %753 = vmatprep.subr.bf16.mxu1 %v769_v3 }
   0xf   :  { %709 = vmatpush3.bf16.msra.mxu0 %v769_v3  ;;  %761 = vmatpush3.bf16.msra.mxu1 %v769_v3 }
  0x10   :  { %710 = vmatprep.subr.bf16.mxu0 %v770_v6  ;;  %754 = vmatprep.subr.bf16.mxu1 %v770_v6 }
  0x13   :  { %711 = vmatpush3.bf16.msra.mxu0 %v770_v6  ;;  %762 = vmatpush3.bf16.msra.mxu1 %v770_v6 }
  0x14   :  { %712 = vmatprep.subr.bf16.mxu0 %v771_v7  ;;  %755 = vmatprep.subr.bf16.mxu1 %v771_v7 }
  0x17   :  { %713 = vmatpush3.bf16.msra.mxu0 %v771_v7  ;;  %763 = vmatpush3.bf16.msra.mxu1 %v771_v7 }
  0x18   :  { %714 = vmatprep.subr.bf16.mxu0 %v772_v8  ;;  %756 = vmatprep.subr.bf16.mxu1 %v772_v8 }
  0x1b   :  { %715 = vmatpush3.bf16.msra.mxu0 %v772_v8  ;;  %764 = vmatpush3.bf16.msra.mxu1 %v772_v8 }
  0x1c   :  { %716 = vmatprep.subr.bf16.mxu0 %v773_v9  ;;  %757 = vmatprep.subr.bf16.mxu1 %v773_v9 }
  0x1f   :  { %717 = vmatpush3.bf16.msra.mxu0 %v773_v9  ;;  %765 = vmatpush3.bf16.msra.mxu1 %v773_v9 }
  0x22   :  { %719 = vmatmul.mubr.bf16.vlgmr.msra.gmra.mxu0 %v776_v10  ;;  %735 = vmatmul.mubr.bf16.vlgmr.msra.gmra.mxu1 %v777_v11 }
  0x23   :  { %722 = vmatprep.mubr.bf16.mxu0 %v778_v12  ;;  %738 = vmatprep.mubr.bf16.mxu1 %v779_v13 }
  0x2a   :  { %723 = vmatmul.mubr.bf16.gmra.mxu0 %v780_v14  ;;  %739 = vmatmul.mubr.bf16.gmra.mxu1 %v781_v15 }
  0x2b   :  { %726 = vmatprep.mubr.bf16.mxu0 %v782_v16  ;;  %742 = vmatprep.mubr.bf16.mxu1 %v783_v17 }
  0x32   :  { %727 = vmatmul.mubr.bf16.gmra.mxu0 %v784_v18  ;;  %743 = vmatmul.mubr.bf16.gmra.mxu1 %v785_v19 }
  0x33   :  { %730 = vmatprep.mubr.bf16.mxu0 %v786_v20  ;;  %746 = vmatprep.mubr.bf16.mxu1 %v787_v21 }
  0x3a   :  { %731 = vmatmul.mubr.bf16.gmra.mxu0 %v788_v22  ;;  %747 = vmatmul.mubr.bf16.gmra.mxu1 %v789_v23 }
  0xe2   :  { %v720_v25 = vpop.f32.mrf.mxu0  ;;  %v736_v27 = vpop.f32.mrf.mxu1 }
  0xe3   :  { %v547_v28 = vmul.f32 %v720_v25, %v890_v24  ;;  %v563_v29 = vmul.f32 %v736_v27, %v890_v24 }
  0xe4   :  { %v312_v30 = vpop.f32.mrf.mxu0  ;;  %v376_v31 = vpop.f32.mrf.mxu1 }
  0xe5   :  { %v586_v32 = vadd.f32 %v895_v26, %v547_v28  ;;  %v602_v33 = vadd.f32 %v895_v26, %v563_v29  ;;  %v545_v34 = vmul.f32 %v890_v24, %v312_v30  ;;  %v561_v35 = vmul.f32 %v890_v24, %v376_v31 }
  0xe6   :  { %v721_v36 = vpop.f32.mrf.mxu0  ;;  %v737_v37 = vpop.f32.mrf.mxu1 }
  0xe7   :  { %618 = vst [vmem:[%s1061_s4 + $0x10] sm:$0xff] %v586_v32  ;;  %634 = vst [vmem:[%s1061_s4 + $0x90] sm:$0xff] %v602_v33  ;;  %v584_v38 = vadd.f32 %v895_v26, %v545_v34  ;;  %v600_v39 = vadd.f32 %v895_v26, %v561_v35  ;;  %v548_v40 = vmul.f32 %v721_v36, %v890_v24 }
  0xe8   :  { %v564_v41 = vmul.f32 %v737_v37, %v890_v24  ;;  %v315_v42 = vpop.f32.mrf.mxu0  ;;  %v379_v43 = vpop.f32.mrf.mxu1 }
  0xe9   :  { %616 = vst [vmem:[%s1061_s4] sm:$0xff] %v584_v38  ;;  %632 = vst [vmem:[%s1061_s4 + $0x80] sm:$0xff] %v600_v39  ;;  %v587_v44 = vadd.f32 %v895_v26, %v548_v40  ;;  %v546_v46 = vmul.f32 %v890_v24, %v315_v42  ;;  %v562_v47 = vmul.f32 %v890_v24, %v379_v43 }
  0xea   :  { %v603_v45 = vadd.f32 %v895_v26, %v564_v41  ;;  %v724_v48 = vpop.f32.mrf.mxu0  ;;  %v740_v49 = vpop.f32.mrf.mxu1 }
  0xeb   :  { %619 = vst [vmem:[%s1061_s4 + $0x18] sm:$0xff] %v587_v44  ;;  %v585_v50 = vadd.f32 %v895_v26, %v546_v46  ;;  %v601_v51 = vadd.f32 %v895_v26, %v562_v47  ;;  %v551_v52 = vmul.f32 %v724_v48, %v890_v24  ;;  %v567_v53 = vmul.f32 %v740_v49, %v890_v24 }
  0xec   :  { %635 = vst [vmem:[%s1061_s4 + $0x98] sm:$0xff] %v603_v45  ;;  %v328_v54 = vpop.f32.mrf.mxu0  ;;  %v392_v55 = vpop.f32.mrf.mxu1 }
  0xed   :  { %617 = vst [vmem:[%s1061_s4 + $0x8] sm:$0xff] %v585_v50  ;;  %633 = vst [vmem:[%s1061_s4 + $0x88] sm:$0xff] %v601_v51  ;;  %v590_v56 = vadd.f32 %v895_v26, %v551_v52  ;;  %v606_v57 = vadd.f32 %v895_v26, %v567_v53  ;;  %v549_v58 = vmul.f32 %v890_v24, %v328_v54 }
  0xee   :  { %v565_v59 = vmul.f32 %v890_v24, %v392_v55  ;;  %v725_v60 = vpop.f32.mrf.mxu0  ;;  %v741_v61 = vpop.f32.mrf.mxu1 }
  0xef   :  { %622 = vst [vmem:[%s1061_s4 + $0x30] sm:$0xff] %v590_v56  ;;  %638 = vst [vmem:[%s1061_s4 + $0xb0] sm:$0xff] %v606_v57  ;;  %v588_v62 = vadd.f32 %v895_v26, %v549_v58  ;;  %v552_v0 = vmul.f32 %v725_v60, %v890_v24  ;;  %v568_v1 = vmul.f32 %v741_v61, %v890_v24 }
  0xf0   :  { %v604_v63 = vadd.f32 %v895_v26, %v565_v59  ;;  %v331_v2 = vpop.f32.mrf.mxu0  ;;  %v395_v3 = vpop.f32.mrf.mxu1 }
  0xf1   :  { %620 = vst [vmem:[%s1061_s4 + $0x20] sm:$0xff] %v588_v62  ;;  %v591_v4 = vadd.f32 %v895_v26, %v552_v0  ;;  %v607_v5 = vadd.f32 %v895_v26, %v568_v1  ;;  %v550_v6 = vmul.f32 %v890_v24, %v331_v2  ;;  %v566_v7 = vmul.f32 %v890_v24, %v395_v3 }
  0xf2   :  { %636 = vst [vmem:[%s1061_s4 + $0xa0] sm:$0xff] %v604_v63  ;;  %v728_v8 = vpop.f32.mrf.mxu0  ;;  %v744_v9 = vpop.f32.mrf.mxu1 }
  0xf3   :  { %623 = vst [vmem:[%s1061_s4 + $0x38] sm:$0xff] %v591_v4  ;;  %639 = vst [vmem:[%s1061_s4 + $0xb8] sm:$0xff] %v607_v5  ;;  %v589_v10 = vadd.f32 %v895_v26, %v550_v6  ;;  %v605_v11 = vadd.f32 %v895_v26, %v566_v7  ;;  %v555_v12 = vmul.f32 %v728_v8, %v890_v24 }
  0xf4   :  { %v571_v13 = vmul.f32 %v744_v9, %v890_v24  ;;  %v344_v14 = vpop.f32.mrf.mxu0  ;;  %v408_v15 = vpop.f32.mrf.mxu1 }
  0xf5   :  { %621 = vst [vmem:[%s1061_s4 + $0x28] sm:$0xff] %v589_v10  ;;  %637 = vst [vmem:[%s1061_s4 + $0xa8] sm:$0xff] %v605_v11  ;;  %v594_v16 = vadd.f32 %v895_v26, %v555_v12  ;;  %v553_v18 = vmul.f32 %v890_v24, %v344_v14  ;;  %v569_v19 = vmul.f32 %v890_v24, %v408_v15 }
  0xf6   :  { %v610_v17 = vadd.f32 %v895_v26, %v571_v13  ;;  %v729_v20 = vpop.f32.mrf.mxu0  ;;  %v745_v21 = vpop.f32.mrf.mxu1 }
  0xf7   :  { %626 = vst [vmem:[%s1061_s4 + $0x50] sm:$0xff] %v594_v16  ;;  %v592_v22 = vadd.f32 %v895_v26, %v553_v18  ;;  %v608_v23 = vadd.f32 %v895_v26, %v569_v19  ;;  %v556_v25 = vmul.f32 %v729_v20, %v890_v24  ;;  %v572_v27 = vmul.f32 %v745_v21, %v890_v24 }
  0xf8   :  { %642 = vst [vmem:[%s1061_s4 + $0xd0] sm:$0xff] %v610_v17  ;;  %v347_v28 = vpop.f32.mrf.mxu0  ;;  %v411_v29 = vpop.f32.mrf.mxu1 }
  0xf9   :  { %624 = vst [vmem:[%s1061_s4 + $0x40] sm:$0xff] %v592_v22  ;;  %640 = vst [vmem:[%s1061_s4 + $0xc0] sm:$0xff] %v608_v23  ;;  %v595_v30 = vadd.f32 %v895_v26, %v556_v25  ;;  %v611_v31 = vadd.f32 %v895_v26, %v572_v27  ;;  %v554_v32 = vmul.f32 %v890_v24, %v347_v28 }
  0xfa   :  { %v570_v33 = vmul.f32 %v890_v24, %v411_v29  ;;  %v732_v34 = vpop.f32.mrf.mxu0  ;;  %v748_v35 = vpop.f32.mrf.mxu1 }
  0xfb   :  { %627 = vst [vmem:[%s1061_s4 + $0x58] sm:$0xff] %v595_v30  ;;  %643 = vst [vmem:[%s1061_s4 + $0xd8] sm:$0xff] %v611_v31  ;;  %v593_v36 = vadd.f32 %v895_v26, %v554_v32  ;;  %v559_v38 = vmul.f32 %v732_v34, %v890_v24  ;;  %v575_v39 = vmul.f32 %v748_v35, %v890_v24 }
  0xfc   :  { %v609_v37 = vadd.f32 %v895_v26, %v570_v33  ;;  %v360_v40 = vpop.f32.mrf.mxu0  ;;  %v424_v41 = vpop.f32.mrf.mxu1 }
  0xfd   :  { %625 = vst [vmem:[%s1061_s4 + $0x48] sm:$0xff] %v593_v36  ;;  %v598_v42 = vadd.f32 %v895_v26, %v559_v38  ;;  %v614_v43 = vadd.f32 %v895_v26, %v575_v39  ;;  %v557_v44 = vmul.f32 %v890_v24, %v360_v40  ;;  %v573_v45 = vmul.f32 %v890_v24, %v424_v41 }
  0xfe   :  { %641 = vst [vmem:[%s1061_s4 + $0xc8] sm:$0xff] %v609_v37  ;;  %v733_v46 = vpop.f32.mrf.mxu0  ;;  %v749_v47 = vpop.f32.mrf.mxu1 }
  0xff   :  { %630 = vst [vmem:[%s1061_s4 + $0x70] sm:$0xff] %v598_v42  ;;  %646 = vst [vmem:[%s1061_s4 + $0xf0] sm:$0xff] %v614_v43  ;;  %v596_v48 = vadd.f32 %v895_v26, %v557_v44  ;;  %v612_v49 = vadd.f32 %v895_v26, %v573_v45  ;;  %v560_v50 = vmul.f32 %v733_v46, %v890_v24 }
 0x100   :  { %v576_v51 = vmul.f32 %v749_v47, %v890_v24  ;;  %v363_v52 = vpop.f32.mrf.mxu0  ;;  %v427_v53 = vpop.f32.mrf.mxu1 }
 0x101   :  { %628 = vst [vmem:[%s1061_s4 + $0x60] sm:$0xff] %v596_v48  ;;  %644 = vst [vmem:[%s1061_s4 + $0xe0] sm:$0xff] %v612_v49  ;;  %v599_v54 = vadd.f32 %v895_v26, %v560_v50  ;;  %v558_v56 = vmul.f32 %v890_v24, %v363_v52  ;;  %v574_v57 = vmul.f32 %v890_v24, %v427_v53 }
 0x102   :  { %v615_v55 = vadd.f32 %v895_v26, %v576_v51 }
 0x103   :  { %631 = vst [vmem:[%s1061_s4 + $0x78] sm:$0xff] %v599_v54  ;;  %v597_v58 = vadd.f32 %v895_v26, %v558_v56  ;;  %v613_v59 = vadd.f32 %v895_v26, %v574_v57 }
 0x104   :  { %647 = vst [vmem:[%s1061_s4 + $0xf8] sm:$0xff] %v615_v55 }
 0x105   :  { %629 = vst [vmem:[%s1061_s4 + $0x68] sm:$0xff] %v597_v58  ;;  %645 = vst [vmem:[%s1061_s4 + $0xe8] sm:$0xff] %v613_v59 }

// kernel: vanilla_forward.23
= control target key start
LH: loop header
LB: loop body
LE: loop exit
PB: predicated region body
PF: predicated region fallthrough
CT: control target
= control target key end

     0   :  { %s2125_s1 = inlined_call_operand.vmem [shape: bf16[384,128], index: 1, kind: input, shape index: {}]   ;;  %s2126_s0 = inlined_call_operand.vmem [shape: bf16[256,384], index: 0, kind: input, shape index: {}]   ;;  %s2127_s2 = inlined_call_operand.vmem [shape: f32[1,128], index: 2, kind: input, shape index: {}]   ;;  %s2128_s3 = inlined_call_operand.vmem [shape: f32[1,128], index: 3, kind: input, shape index: {}]   ;;  %s2129_s4 = inlined_call_operand.vmem [shape: f32[256,128], index: 4, kind: input, shape index: {}]   ;;  %s2130_s5 = inlined_call_operand.vmem [shape: f32[256,128], index: 5, kind: output, shape index: {}]  }
   0x1   :  { %v1474_v0 = vld [vmem:[%s2125_s1 + $0x78] sm:$0xff]   ;;  %v1476_v2 = vld [vmem:[%s2125_s1 + $0x70] sm:$0xff]   ;;  %v1478_v4 = vld [vmem:[%s2125_s1 + $0x68] sm:$0xff]  }
   0x2   :  { %v1475_v1 = vld [vmem:[%s2125_s1 + $0x38] sm:$0xff]   ;;  %1274 = vmatprep.subr.bf16.mxu0 %v1474_v0  ;;  %1458 = vmatprep.subr.bf16.mxu1 %v1474_v0  ;;  %v1477_v3 = vld [vmem:[%s2125_s1 + $0x30] sm:$0xff]   ;;  %v1479_v5 = vld [vmem:[%s2125_s1 + $0x28] sm:$0xff]  }
   0x3   :  { %1275 = vmatpush3.bf16.msra.mxu0 %v1475_v1  ;;  %1466 = vmatpush3.bf16.msra.mxu1 %v1475_v1  ;;  %v1480_v6 = vld [vmem:[%s2125_s1 + $0x60] sm:$0xff]   ;;  %v1482_v8 = vld [vmem:[%s2125_s1 + $0x58] sm:$0xff]   ;;  %v1484_v10 = vld [vmem:[%s2125_s1 + $0x50] sm:$0xff]  }
   0x4   :  { %1276 = vmatprep.subr.bf16.mxu0 %v1476_v2  ;;  %1459 = vmatprep.subr.bf16.mxu1 %v1476_v2  ;;  %v1481_v7 = vld [vmem:[%s2125_s1 + $0x20] sm:$0xff]   ;;  %v1483_v9 = vld [vmem:[%s2125_s1 + $0x18] sm:$0xff]   ;;  %v1485_v13 = vld [vmem:[%s2125_s1 + $0x10] sm:$0xff]  }
   0x5   :  { %v1492_v11 = vld [vmem:[%s2126_s0 + $0x4] ss:$12 sps:$4 sm:$0xff]   ;;  %v1486_v14 = vld [vmem:[%s2125_s1 + $0x48] sm:$0xff]   ;;  %v1496_v18 = vld [vmem:[%s2125_s1 + $0xb8] sm:$0xff]  }
   0x6   :  { %v1495_v12 = vld [vmem:[%s2126_s0 + $0x124] ss:$12 sps:$4 sm:$0xff]   ;;  %633 = vmatprep.mubr.bf16.mxu0 %v1492_v11  ;;  %v1487_v15 = vld [vmem:[%s2125_s1 + $0x8] sm:$0xff]   ;;  %v1506_v28 = vld [vmem:[%s2126_s0 + $0x34] ss:$12 sps:$4 sm:$0xff]  }
   0x7   :  { %1277 = vmatpush3.bf16.msra.mxu0 %v1477_v3  ;;  %1467 = vmatpush3.bf16.msra.mxu1 %v1477_v3  ;;  %v1488_v16 = vld [vmem:[%s2125_s1 + $0x40] sm:$0xff]   ;;  %v1498_v21 = vld [vmem:[%s2126_s0 + $0x1c] ss:$12 sps:$4 sm:$0xff]   ;;  %v1497_v22 = vld [vmem:[%s2125_s1 + $0xb0] sm:$0xff]  }
   0x8   :  { %1278 = vmatprep.subr.bf16.mxu0 %v1478_v4  ;;  %1460 = vmatprep.subr.bf16.mxu1 %v1478_v4  ;;  %v1489_v17 = vld [vmem:[%s2125_s1] sm:$0xff]   ;;  %v1500_v23 = vld [vmem:[%s2126_s0 + $0x13c] ss:$12 sps:$4 sm:$0xff]   ;;  %v1513_v33 = vld [vmem:[%s2125_s1 + $0x90] sm:$0xff]  }
   0x9   :  { %729 = vmatprep.mubr.bf16.mxu1 %v1495_v12  ;;  %v1490_v19 = vld [vmem:[%s2126_s0] ss:$12 sps:$4 sm:$0xff]   ;;  %v1502_v24 = vld [vmem:[%s2126_s0 + $0x18] ss:$12 sps:$4 sm:$0xff]   ;;  %v1510_v31 = vld [vmem:[%s2126_s0 + $0x30] ss:$12 sps:$4 sm:$0xff]  }
   0xa   :  { %v1493_v20 = vld [vmem:[%s2126_s0 + $0x120] ss:$12 sps:$4 sm:$0xff]   ;;  %v1503_v26 = vld [vmem:[%s2126_s0 + $0x138] ss:$12 sps:$4 sm:$0xff]   ;;  %v1511_v32 = vld [vmem:[%s2126_s0 + $0x150] ss:$12 sps:$4 sm:$0xff]  }
   0xb   :  { %1279 = vmatpush3.bf16.msra.mxu0 %v1479_v5  ;;  %1468 = vmatpush3.bf16.msra.mxu1 %v1479_v5  ;;  %v1504_v25 = vld [vmem:[%s2125_s1 + $0xa8] sm:$0xff]   ;;  %v1505_v27 = vld [vmem:[%s2125_s1 + $0xa0] sm:$0xff]   ;;  %v1512_v30 = vld [vmem:[%s2125_s1 + $0x98] sm:$0xff]  }
   0xc   :  { %1280 = vmatprep.subr.bf16.mxu0 %v1480_v6  ;;  %1461 = vmatprep.subr.bf16.mxu1 %v1480_v6  ;;  %v1508_v29 = vld [vmem:[%s2126_s0 + $0x154] ss:$12 sps:$4 sm:$0xff]   ;;  %v1514_v34 = vld [vmem:[%s2126_s0 + $0x4c] ss:$12 sps:$4 sm:$0xff]   ;;  %v1522_v39 = vld [vmem:[%s2126_s0 + $0x64] ss:$12 sps:$4 sm:$0xff]  }
   0xd   :  { %v1516_v35 = vld [vmem:[%s2126_s0 + $0x16c] ss:$12 sps:$4 sm:$0xff]   ;;  %v1518_v37 = vld [vmem:[%s2126_s0 + $0x48] ss:$12 sps:$4 sm:$0xff]   ;;  %v1521_v40 = vld [vmem:[%s2125_s1 + $0x80] sm:$0xff]  }
   0xe   :  { %v1520_v36 = vld [vmem:[%s2125_s1 + $0x88] sm:$0xff]   ;;  %v1529_v45 = vld [vmem:[%s2126_s0 + $0x38] ss:$12 sps:$4 sm:$0xff]   ;;  %v1531_v47 = vld [vmem:[%s2126_s0 + $0x50] ss:$12 sps:$4 sm:$0xff]  }
   0xf   :  { %1281 = vmatpush3.bf16.msra.mxu0 %v1481_v7  ;;  %1469 = vmatpush3.bf16.msra.mxu1 %v1481_v7  ;;  %v1519_v38 = vld [vmem:[%s2126_s0 + $0x168] ss:$12 sps:$4 sm:$0xff]   ;;  %v1525_v42 = vld [vmem:[%s2126_s0 + $0x60] ss:$12 sps:$4 sm:$0xff]   ;;  %v1530_v46 = vld [vmem:[%s2126_s0 + $0x78] ss:$12 sps:$4 sm:$0xff]  }
  0x10   :  { %1282 = vmatprep.subr.bf16.mxu0 %v1482_v8  ;;  %1462 = vmatprep.subr.bf16.mxu1 %v1482_v8  ;;  %v1524_v41 = vld [vmem:[%s2126_s0 + $0x8] ss:$12 sps:$4 sm:$0xff]   ;;  %v1526_v43 = vld [vmem:[%s2126_s0 + $0x20] ss:$12 sps:$4 sm:$0xff]   ;;  %v1535_v50 = vld [vmem:[%s2126_s0 + $0x90] ss:$12 sps:$4 sm:$0xff]  }
  0x11   :  { %v1527_v44 = vld [vmem:[%s2126_s0 + $0x7c] ss:$12 sps:$4 sm:$0xff]   ;;  %v1532_v48 = vld [vmem:[%s2126_s0 + $0x94] ss:$12 sps:$4 sm:$0xff]   ;;  %v1537_v52 = vld [vmem:[%s2126_s0 + $0xac] ss:$12 sps:$4 sm:$0xff]  }
  0x12   :  { %v1534_v49 = vld [vmem:[%s2126_s0 + $0x68] ss:$12 sps:$4 sm:$0xff]   ;;  %v1536_v51 = vld [vmem:[%s2126_s0 + $0x80] ss:$12 sps:$4 sm:$0xff]   ;;  %v1539_v53 = vld [vmem:[%s2126_s0 + $0x98] ss:$12 sps:$4 sm:$0xff]  }
  0x13   :  { %1283 = vmatpush3.bf16.msra.mxu0 %v1483_v9  ;;  %1470 = vmatpush3.bf16.msra.mxu1 %v1483_v9  ;;  %v1540_v54 = vld [vmem:[%s2126_s0 + $0xa8] ss:$12 sps:$4 sm:$0xff]   ;;  %v1541_v55 = vld [vmem:[%s2126_s0 + $0xb0] ss:$12 sps:$4 sm:$0xff]   ;;  %v1545_v58 = vld [vmem:[%s2126_s0 + $0xc0] ss:$12 sps:$4 sm:$0xff]  }
  0x14   :  { %1284 = vmatprep.subr.bf16.mxu0 %v1484_v10  ;;  %1463 = vmatprep.subr.bf16.mxu1 %v1484_v10  ;;  %v1542_v56 = vld [vmem:[%s2126_s0 + $0xc4] ss:$12 sps:$4 sm:$0xff]   ;;  %v1544_v57 = vld [vmem:[%s2126_s0 + $0xc8] ss:$12 sps:$4 sm:$0xff]   ;;  %v1546_v59 = vld [vmem:[%s2126_s0 + $0xe0] ss:$12 sps:$4 sm:$0xff]  }
  0x15   :  { %v1547_v60 = vld [vmem:[%s2126_s0 + $0xdc] ss:$12 sps:$4 sm:$0xff]   ;;  %v1549_v61 = vld [vmem:[%s2126_s0 + $0xf8] ss:$12 sps:$4 sm:$0xff]   ;;  %v1552_v0 = vld [vmem:[%s2126_s0 + $0xf4] ss:$12 sps:$4 sm:$0xff]  }
  0x16   :  { %v1550_v62 = vld [vmem:[%s2126_s0 + $0xd8] ss:$12 sps:$4 sm:$0xff]   ;;  %v1551_v63 = vld [vmem:[%s2126_s0 + $0x110] ss:$12 sps:$4 sm:$0xff]   ;;  %v1554_v1 = vld [vmem:[%s2126_s0 + $0x128] ss:$12 sps:$4 sm:$0xff]  }
  0x17   :  { %1285 = vmatpush3.bf16.msra.mxu0 %v1485_v13  ;;  %1471 = vmatpush3.bf16.msra.mxu1 %v1485_v13  ;;  %v1555_v2 = vld [vmem:[%s2126_s0 + $0xf0] ss:$12 sps:$4 sm:$0xff]   ;;  %v1556_v3 = vld [vmem:[%s2126_s0 + $0x140] ss:$12 sps:$4 sm:$0xff]   ;;  %v1559_v5 = vld [vmem:[%s2126_s0 + $0x158] ss:$12 sps:$4 sm:$0xff]  }
  0x18   :  { %1286 = vmatprep.subr.bf16.mxu0 %v1486_v14  ;;  %1464 = vmatprep.subr.bf16.mxu1 %v1486_v14  ;;  %v1557_v4 = vld [vmem:[%s2126_s0 + $0x10c] ss:$12 sps:$4 sm:$0xff]   ;;  %v1560_v6 = vld [vmem:[%s2126_s0 + $0x108] ss:$12 sps:$4 sm:$0xff]   ;;  %v1561_v7 = vld [vmem:[%s2126_s0 + $0x170] ss:$12 sps:$4 sm:$0xff]  }
  0x1b   :  { %1287 = vmatpush3.bf16.msra.mxu0 %v1487_v15  ;;  %1472 = vmatpush3.bf16.msra.mxu1 %v1487_v15 }
  0x1c   :  { %1288 = vmatprep.subr.bf16.mxu0 %v1488_v16  ;;  %1465 = vmatprep.subr.bf16.mxu1 %v1488_v16 }
  0x1f   :  { %1289 = vmatpush3.bf16.msra.mxu0 %v1489_v17  ;;  %1473 = vmatpush3.bf16.msra.mxu1 %v1489_v17 }
  0x20   :  { %1410 = vmatprep.subr.bf16.mxu1 %v1496_v18 }
  0x22   :  { %634 = vmatmul.mubr.bf16.vlgmr.msra.gmra.mxu0 %v1490_v19  ;;  %730 = vmatmul.mubr.bf16.vlgmr.msra.gmra.mxu1 %v1493_v20 }
  0x23   :  { %1411 = vmatpush3.bf16.msra.mxu1 %v1496_v18  ;;  %641 = vmatprep.mubr.bf16.mxu0 %v1498_v21 }
  0x24   :  { %1412 = vmatprep.subr.bf16.mxu1 %v1497_v22  ;;  %737 = vmatprep.mubr.bf16.mxu1 %v1500_v23 }
  0x27   :  { %1413 = vmatpush3.bf16.msra.mxu1 %v1497_v22 }
  0x28   :  { %1414 = vmatprep.subr.bf16.mxu1 %v1504_v25 }
  0x2a   :  { %642 = vmatmul.mubr.bf16.gmra.mxu0 %v1502_v24  ;;  %738 = vmatmul.mubr.bf16.gmra.mxu1 %v1503_v26 }
  0x2b   :  { %1415 = vmatpush3.bf16.msra.mxu1 %v1504_v25  ;;  %649 = vmatprep.mubr.bf16.mxu0 %v1506_v28 }
  0x2c   :  { %1416 = vmatprep.subr.bf16.mxu1 %v1505_v27  ;;  %745 = vmatprep.mubr.bf16.mxu1 %v1508_v29 }
  0x2f   :  { %1417 = vmatpush3.bf16.msra.mxu1 %v1505_v27 }
  0x30   :  { %1418 = vmatprep.subr.bf16.mxu1 %v1512_v30 }
  0x32   :  { %650 = vmatmul.mubr.bf16.gmra.mxu0 %v1510_v31  ;;  %746 = vmatmul.mubr.bf16.gmra.mxu1 %v1511_v32 }
  0x33   :  { %1419 = vmatpush3.bf16.msra.mxu1 %v1512_v30  ;;  %657 = vmatprep.mubr.bf16.mxu0 %v1514_v34 }
  0x34   :  { %1420 = vmatprep.subr.bf16.mxu1 %v1513_v33  ;;  %753 = vmatprep.mubr.bf16.mxu1 %v1516_v35 }
  0x37   :  { %1421 = vmatpush3.bf16.msra.mxu1 %v1513_v33 }
  0x38   :  { %1422 = vmatprep.subr.bf16.mxu1 %v1520_v36 }
  0x3a   :  { %658 = vmatmul.mubr.bf16.gmra.mxu0 %v1518_v37  ;;  %754 = vmatmul.mubr.bf16.gmra.mxu1 %v1519_v38 }
  0x3b   :  { %1423 = vmatpush3.bf16.msra.mxu1 %v1520_v36  ;;  %665 = vmatprep.mubr.bf16.mxu0 %v1522_v39 }
  0x3c   :  { %1424 = vmatprep.subr.bf16.mxu1 %v1521_v40  ;;  %1426 = vmatprep.mubr.bf16.mxu1 %v1524_v41 }
  0x3f   :  { %1425 = vmatpush3.bf16.msra.mxu1 %v1521_v40 }
  0x42   :  { %666 = vmatmul.mubr.bf16.gmra.mxu0 %v1525_v42  ;;  %1427 = vmatmul.mubr.bf16.vlgmr.msra.gmra.mxu1 %v1526_v43 }
  0x43   :  { %673 = vmatprep.mubr.bf16.mxu0 %v1527_v44  ;;  %1430 = vmatprep.mubr.bf16.mxu1 %v1529_v45 }
  0x4a   :  { %674 = vmatmul.mubr.bf16.gmra.mxu0 %v1530_v46  ;;  %1431 = vmatmul.mubr.bf16.gmra.mxu1 %v1531_v47 }
  0x4b   :  { %681 = vmatprep.mubr.bf16.mxu0 %v1532_v48  ;;  %1434 = vmatprep.mubr.bf16.mxu1 %v1534_v49  ;;  %v1837_v49 = vld [vmem:[%s2127_s2] ss:$0 sm:$0xff] }
  0x52   :  { %682 = vmatmul.mubr.bf16.gmra.mxu0 %v1535_v50  ;;  %1435 = vmatmul.mubr.bf16.gmra.mxu1 %v1536_v51 }
  0x53   :  { %689 = vmatprep.mubr.bf16.mxu0 %v1537_v52  ;;  %1438 = vmatprep.mubr.bf16.mxu1 %v1539_v53  ;;  %v1842_v52 = vld [vmem:[%s2128_s3] ss:$0 sm:$0xff] }
  0x5a   :  { %690 = vmatmul.mubr.bf16.gmra.mxu0 %v1540_v54  ;;  %1439 = vmatmul.mubr.bf16.gmra.mxu1 %v1541_v55 }
  0x5b   :  { %697 = vmatprep.mubr.bf16.mxu0 %v1542_v56  ;;  %1442 = vmatprep.mubr.bf16.mxu1 %v1544_v57 }
  0x62   :  { %698 = vmatmul.mubr.bf16.gmra.mxu0 %v1545_v58  ;;  %1443 = vmatmul.mubr.bf16.gmra.mxu1 %v1546_v59  ;;  %v1102_v58 = vld [vmem:[%s2129_s4 + $0x10] sm:$0xff] }
  0x63   :  { %705 = vmatprep.mubr.bf16.mxu0 %v1547_v60  ;;  %1446 = vmatprep.mubr.bf16.mxu1 %v1549_v61 }
  0x6a   :  { %706 = vmatmul.mubr.bf16.gmra.mxu0 %v1550_v62  ;;  %1447 = vmatmul.mubr.bf16.gmra.mxu1 %v1551_v63 }
  0x6b   :  { %713 = vmatprep.mubr.bf16.mxu0 %v1552_v0  ;;  %1450 = vmatprep.mubr.bf16.mxu1 %v1554_v1  ;;  %v1100_v1 = vld [vmem:[%s2129_s4] sm:$0xff] }
  0x72   :  { %714 = vmatmul.mubr.bf16.gmra.mxu0 %v1555_v2  ;;  %1451 = vmatmul.mubr.bf16.gmra.mxu1 %v1556_v3 }
  0x73   :  { %721 = vmatprep.mubr.bf16.mxu0 %v1557_v4  ;;  %1454 = vmatprep.mubr.bf16.mxu1 %v1559_v5 }
  0x7a   :  { %722 = vmatmul.mubr.bf16.gmra.mxu0 %v1560_v6  ;;  %1455 = vmatmul.mubr.bf16.gmra.mxu1 %v1561_v7 }
  0xe2   :  { %v1290_v8 = vpop.f32.mrf.mxu0  ;;  %v1362_v9 = vpop.f32.mrf.mxu1 }
  0xe4   :  { %v1291_v10 = vpop.f32.mrf.mxu0  ;;  %v1363_v11 = vpop.f32.mrf.mxu1 }
  0xe5   :  { %v1808_v12 = vadd.f32 %v1363_v11, %v1362_v9  ;;  %v1292_v50 = vadd.f32 %v1291_v10, %v1290_v8  ;;  %v1103_v8 = vld [vmem:[%s2129_s4 + $0x18] sm:$0xff] }
  0xe6   :  { %v1293_v13 = vpop.f32.mrf.mxu0  ;;  %v1365_v14 = vpop.f32.mrf.mxu1 }
  0xe8   :  { %v1294_v15 = vpop.f32.mrf.mxu0  ;;  %v1366_v16 = vpop.f32.mrf.mxu1 }
  0xe9   :  { %v1810_v17 = vadd.f32 %v1366_v16, %v1365_v14  ;;  %v1295_v0 = vadd.f32 %v1294_v15, %v1293_v13 }
  0xea   :  { %v1296_v18 = vpop.f32.mrf.mxu0  ;;  %v1368_v19 = vpop.f32.mrf.mxu1 }
  0xec   :  { %v1297_v20 = vpop.f32.mrf.mxu0  ;;  %v1369_v21 = vpop.f32.mrf.mxu1 }
  0xed   :  { %v1812_v22 = vadd.f32 %v1369_v21, %v1368_v19  ;;  %v1298_v46 = vadd.f32 %v1297_v20, %v1296_v18 }
  0xee   :  { %v1299_v23 = vpop.f32.mrf.mxu0  ;;  %v1371_v24 = vpop.f32.mrf.mxu1 }
  0xf0   :  { %v1300_v25 = vpop.f32.mrf.mxu0  ;;  %v1372_v26 = vpop.f32.mrf.mxu1 }
  0xf1   :  { %v1814_v27 = vadd.f32 %v1372_v26, %v1371_v24  ;;  %v1301_v55 = vadd.f32 %v1300_v25, %v1299_v23  ;;  %v1101_v24 = vld [vmem:[%s2129_s4 + $0x8] sm:$0xff] }
  0xf2   :  { %v1302_v28 = vpop.f32.mrf.mxu0  ;;  %v1374_v29 = vpop.f32.mrf.mxu1 }
  0xf4   :  { %v1303_v30 = vpop.f32.mrf.mxu0  ;;  %v1375_v31 = vpop.f32.mrf.mxu1 }
  0xf5   :  { %v1816_v32 = vadd.f32 %v1375_v31, %v1374_v29  ;;  %v1304_v13 = vadd.f32 %v1303_v30, %v1302_v28  ;;  %v1106_v29 = vld [vmem:[%s2129_s4 + $0x30] sm:$0xff] }
  0xf6   :  { %v1818_v33 = vpop.f32.mrf.mxu0  ;;  %v1377_v34 = vpop.f32.mrf.mxu1 }
  0xf8   :  { %v1820_v35 = vpop.f32.mrf.mxu0  ;;  %v1378_v36 = vpop.f32.mrf.mxu1 }
  0xf9   :  { %v1822_v37 = vadd.f32 %v1378_v36, %v1377_v34 }
  0xfa   :  { %v1308_v38 = vpop.f32.mrf.mxu0  ;;  %v1824_v39 = vpop.f32.mrf.mxu1 }
  0xfc   :  { %v1309_v40 = vpop.f32.mrf.mxu0  ;;  %v1826_v41 = vpop.f32.mrf.mxu1 }
  0xfd   :  { %v1310_v4 = vadd.f32 %v1309_v40, %v1308_v38  ;;  %v1307_v40 = vadd.f32 %v1820_v35, %v1818_v33  ;;  %v1107_v33 = vld [vmem:[%s2129_s4 + $0x38] sm:$0xff] }
  0xfe   :  { %v1311_v42 = vpop.f32.mrf.mxu0  ;;  %v1828_v43 = vpop.f32.mrf.mxu1 }
 0x100   :  { %v1312_v44 = vpop.f32.mrf.mxu0  ;;  %v1830_v45 = vpop.f32.mrf.mxu1 }
 0x101   :  { %v1313_v21 = vadd.f32 %v1312_v44, %v1311_v42  ;;  %v1104_v44 = vld [vmem:[%s2129_s4 + $0x20] sm:$0xff] }
 0x102   :  { %v1832_v47 = vpop.f32.mrf.mxu0  ;;  %v1428_v48 = vpop.f32.mrf.mxu1 }
 0x103   :  { %v805_v51 = vadd.f32 %v1428_v48, %v1298_v46 }
 0x104   :  { %v1315_v53 = vpop.f32.mrf.mxu0  ;;  %v796_v54 = vpop.f32.mrf.mxu1 }
 0x105   :  { %v1031_v56 = vmul.f32 %v1837_v49, %v805_v51  ;;  %v797_v57 = vadd.f32 %v1292_v50, %v796_v54 }
 0x106   :  { %v1848_v59 = vpop.f32.mrf.mxu0  ;;  %v1429_v60 = vpop.f32.mrf.mxu1 }
 0x107   :  { %v1070_v61 = vadd.f32 %v1842_v52, %v1031_v56  ;;  %v1029_v62 = vmul.f32 %v1837_v49, %v797_v57  ;;  %v808_v63 = vadd.f32 %v1429_v60, %v1301_v55 }
 0x108   :  { %v1855_v2 = vpop.f32.mrf.mxu0  ;;  %v799_v3 = vpop.f32.mrf.mxu1 }
 0x109   :  { %v1134_v5 = vadd.f32 %v1102_v58, %v1070_v61  ;;  %v1068_v6 = vadd.f32 %v1842_v52, %v1029_v62  ;;  %v1032_v7 = vmul.f32 %v1837_v49, %v808_v63  ;;  %v800_v9 = vadd.f32 %v1295_v0, %v799_v3 }
 0x10a   :  { %v1320_v10 = vpop.f32.mrf.mxu0  ;;  %v1432_v11 = vpop.f32.mrf.mxu1  ;;  %v1316_v58 = vadd.f32 %v1315_v53, %v1832_v47  ;;  %v1105_v47 = vld [vmem:[%s2129_s4 + $0x28] sm:$0xff] }
 0x10b   :  { %1166 = vst [vmem:[%s2130_s5 + $0x10] sm:$0xff] %v1134_v5  ;;  %v1132_v14 = vadd.f32 %v1100_v1, %v1068_v6  ;;  %v1071_v15 = vadd.f32 %v1842_v52, %v1032_v7  ;;  %v821_v16 = vadd.f32 %v1432_v11, %v1310_v4  ;;  %v1030_v18 = vmul.f32 %v1837_v49, %v800_v9  ;;  %v1110_v7 = vld [vmem:[%s2129_s4 + $0x50] sm:$0xff] }
 0x10c   :  { %v1321_v19 = vpop.f32.mrf.mxu0  ;;  %v812_v20 = vpop.f32.mrf.mxu1 }
 0x10d   :  { %1164 = vst [vmem:[%s2130_s5] sm:$0xff] %v1132_v14  ;;  %v1135_v23 = vadd.f32 %v1103_v8, %v1071_v15  ;;  %v1035_v25 = vmul.f32 %v1837_v49, %v821_v16  ;;  %v813_v26 = vadd.f32 %v1304_v13, %v812_v20  ;;  %v1069_v28 = vadd.f32 %v1842_v52, %v1030_v18  ;;  %v1108_v16 = vld [vmem:[%s2129_s4 + $0x40] sm:$0xff] }
 0x10e   :  { %v1323_v30 = vpop.f32.mrf.mxu0  ;;  %v1433_v31 = vpop.f32.mrf.mxu1  ;;  %v1322_v51 = vadd.f32 %v1321_v19, %v1320_v10  ;;  %v1319_v14 = vadd.f32 %v1855_v2, %v1848_v59  ;;  %v1111_v59 = vld [vmem:[%s2129_s4 + $0x58] sm:$0xff] }
 0x10f   :  { %1167 = vst [vmem:[%s2130_s5 + $0x18] sm:$0xff] %v1135_v23  ;;  %v1074_v34 = vadd.f32 %v1842_v52, %v1035_v25  ;;  %v1033_v36 = vmul.f32 %v1837_v49, %v813_v26  ;;  %v824_v38 = vadd.f32 %v1433_v31, %v1313_v21  ;;  %v1133_v42 = vadd.f32 %v1101_v24, %v1069_v28 }
 0x110   :  { %v1324_v46 = vpop.f32.mrf.mxu0  ;;  %v815_v48 = vpop.f32.mrf.mxu1 }
 0x111   :  { %v1138_v50 = vadd.f32 %v1106_v29, %v1074_v34  ;;  %v1072_v54 = vadd.f32 %v1842_v52, %v1033_v36  ;;  %v1036_v55 = vmul.f32 %v1837_v49, %v824_v38  ;;  %1165 = vst [vmem:[%s2130_s5 + $0x8] sm:$0xff] %v1133_v42  ;;  %v816_v35 = vadd.f32 %v1307_v40, %v815_v48  ;;  %v1109_v38 = vld [vmem:[%s2129_s4 + $0x48] sm:$0xff] }
 0x112   :  { %v1326_v56 = vpop.f32.mrf.mxu0  ;;  %v1436_v57 = vpop.f32.mrf.mxu1  ;;  %v1325_v4 = vadd.f32 %v1324_v46, %v1323_v30 }
 0x113   :  { %1170 = vst [vmem:[%s2130_s5 + $0x30] sm:$0xff] %v1138_v50  ;;  %v1136_v60 = vadd.f32 %v1104_v44, %v1072_v54  ;;  %v1075_v61 = vadd.f32 %v1842_v52, %v1036_v55  ;;  %v837_v62 = vadd.f32 %v1436_v57, %v1322_v51  ;;  %v1034_v63 = vmul.f32 %v1837_v49, %v816_v35 }
 0x114   :  { %v1327_v0 = vpop.f32.mrf.mxu0  ;;  %v828_v1 = vpop.f32.mrf.mxu1 }
 0x115   :  { %1168 = vst [vmem:[%s2130_s5 + $0x20] sm:$0xff] %v1136_v60  ;;  %v1139_v3 = vadd.f32 %v1107_v33, %v1075_v61  ;;  %v1039_v53 = vmul.f32 %v1837_v49, %v837_v62  ;;  %v829_v5 = vadd.f32 %v1316_v58, %v828_v1  ;;  %v1073_v6 = vadd.f32 %v1842_v52, %v1034_v63  ;;  %v1112_v33 = vld [vmem:[%s2129_s4 + $0x60] sm:$0xff]  ;;  %v1114_v62 = vld [vmem:[%s2129_s4 + $0x70] sm:$0xff] }
 0x116   :  { %v1329_v8 = vpop.f32.mrf.mxu0  ;;  %v1437_v9 = vpop.f32.mrf.mxu1  ;;  %v1328_v26 = vadd.f32 %v1327_v0, %v1326_v56 }
 0x117   :  { %1171 = vst [vmem:[%s2130_s5 + $0x38] sm:$0xff] %v1139_v3  ;;  %v1078_v10 = vadd.f32 %v1842_v52, %v1039_v53  ;;  %v1037_v11 = vmul.f32 %v1837_v49, %v829_v5  ;;  %v840_v13 = vadd.f32 %v1437_v9, %v1325_v4  ;;  %v1137_v15 = vadd.f32 %v1105_v47, %v1073_v6  ;;  %v1113_v53 = vld [vmem:[%s2129_s4 + $0x68] sm:$0xff] }
 0x118   :  { %v1330_v18 = vpop.f32.mrf.mxu0  ;;  %v831_v19 = vpop.f32.mrf.mxu1 }
 0x119   :  { %v1142_v20 = vadd.f32 %v1110_v7, %v1078_v10  ;;  %v1076_v21 = vadd.f32 %v1842_v52, %v1037_v11  ;;  %v1040_v23 = vmul.f32 %v1837_v49, %v840_v13  ;;  %1169 = vst [vmem:[%s2130_s5 + $0x28] sm:$0xff] %v1137_v15  ;;  %v832_v2 = vadd.f32 %v1319_v14, %v831_v19  ;;  %v1115_v11 = vld [vmem:[%s2129_s4 + $0x78] sm:$0xff] }
 0x11a   :  { %v1332_v24 = vpop.f32.mrf.mxu0  ;;  %v1440_v25 = vpop.f32.mrf.mxu1  ;;  %v1331_v50 = vadd.f32 %v1330_v18, %v1329_v8 }
 0x11b   :  { %1174 = vst [vmem:[%s2130_s5 + $0x50] sm:$0xff] %v1142_v20  ;;  %v1140_v28 = vadd.f32 %v1108_v16, %v1076_v21  ;;  %v1079_v29 = vadd.f32 %v1842_v52, %v1040_v23  ;;  %v1038_v30 = vmul.f32 %v1837_v49, %v832_v2  ;;  %v1116_v2 = vld [vmem:[%s2129_s4 + $0x80] sm:$0xff] }
 0x11c   :  { %v1333_v31 = vpop.f32.mrf.mxu0  ;;  %v844_v34 = vpop.f32.mrf.mxu1 }
 0x11d   :  { %1172 = vst [vmem:[%s2130_s5 + $0x40] sm:$0xff] %v1140_v28  ;;  %v1143_v36 = vadd.f32 %v1111_v59, %v1079_v29  ;;  %v1334_v40 = vadd.f32 %v1333_v31, %v1332_v24  ;;  %v845_v42 = vadd.f32 %v1328_v26, %v844_v34  ;;  %v1077_v44 = vadd.f32 %v1842_v52, %v1038_v30 }
 0x11e   :  { %v1335_v46 = vpop.f32.mrf.mxu0  ;;  %v1441_v48 = vpop.f32.mrf.mxu1 }
 0x11f   :  { %1175 = vst [vmem:[%s2130_s5 + $0x58] sm:$0xff] %v1143_v36  ;;  %v853_v51 = vadd.f32 %v1440_v25, %v1334_v40  ;;  %v1041_v54 = vmul.f32 %v1837_v49, %v845_v42  ;;  %v1141_v55 = vadd.f32 %v1109_v38, %v1077_v44  ;;  %v1117_v38 = vld [vmem:[%s2129_s4 + $0x88] sm:$0xff] }
 0x120   :  { %v1336_v35 = vpop.f32.mrf.mxu0  ;;  %v847_v56 = vpop.f32.mrf.mxu1 }
 0x121   :  { %v1043_v57 = vmul.f32 %v1837_v49, %v853_v51  ;;  %v1080_v58 = vadd.f32 %v1842_v52, %v1041_v54  ;;  %v1337_v60 = vadd.f32 %v1336_v35, %v1335_v46  ;;  %v848_v61 = vadd.f32 %v1331_v50, %v847_v56  ;;  %1173 = vst [vmem:[%s2130_s5 + $0x48] sm:$0xff] %v1141_v55 }
 0x122   :  { %v1338_v63 = vpop.f32.mrf.mxu0  ;;  %v1444_v0 = vpop.f32.mrf.mxu1 }
 0x123   :  { %v1082_v1 = vadd.f32 %v1842_v52, %v1043_v57  ;;  %v1144_v3 = vadd.f32 %v1112_v33, %v1080_v58  ;;  %v856_v4 = vadd.f32 %v1441_v48, %v1337_v60  ;;  %v1042_v47 = vmul.f32 %v1837_v49, %v848_v61  ;;  %v1118_v33 = vld [vmem:[%s2129_s4 + $0x90] sm:$0xff] }
 0x124   :  { %v1339_v5 = vpop.f32.mrf.mxu0  ;;  %v860_v6 = vpop.f32.mrf.mxu1 }
 0x125   :  { %v1146_v7 = vadd.f32 %v1114_v62, %v1082_v1  ;;  %1176 = vst [vmem:[%s2130_s5 + $0x60] sm:$0xff] %v1144_v3  ;;  %v1044_v8 = vmul.f32 %v1837_v49, %v856_v4  ;;  %v1081_v9 = vadd.f32 %v1842_v52, %v1042_v47  ;;  %v1340_v10 = vadd.f32 %v1339_v5, %v1338_v63  ;;  %v1119_v4 = vld [vmem:[%s2129_s4 + $0x98] sm:$0xff]  ;;  %v1126_v47 = vld [vmem:[%s2129_s4 + $0xd0] sm:$0xff] }
 0x126   :  { %v1341_v13 = vpop.f32.mrf.mxu0  ;;  %v1445_v14 = vpop.f32.mrf.mxu1 }
 0x127   :  { %1178 = vst [vmem:[%s2130_s5 + $0x70] sm:$0xff] %v1146_v7  ;;  %v1083_v15 = vadd.f32 %v1842_v52, %v1044_v8  ;;  %v1145_v16 = vadd.f32 %v1113_v53, %v1081_v9  ;;  %v861_v18 = vadd.f32 %v1340_v10, %v860_v6  ;;  %v1382_v10 = vadd.f32 %v1826_v41, %v1824_v39  ;;  %v1127_v41 = vld [vmem:[%s2129_s4 + $0xd8] sm:$0xff] }
 0x128   :  { %v1342_v19 = vpop.f32.mrf.mxu0  ;;  %v863_v20 = vpop.f32.mrf.mxu1 }
 0x129   :  { %v1147_v21 = vadd.f32 %v1115_v11, %v1083_v15  ;;  %1177 = vst [vmem:[%s2130_s5 + $0x68] sm:$0xff] %v1145_v16  ;;  %v1045_v23 = vmul.f32 %v1837_v49, %v861_v18  ;;  %v1343_v59 = vadd.f32 %v1342_v19, %v1341_v13  ;;  %v1124_v18 = vld [vmem:[%s2129_s4 + $0xc0] sm:$0xff] }
 0x12a   :  { %v1344_v24 = vpop.f32.mrf.mxu0  ;;  %v1982_v25 = vpop.f32.mrf.mxu1 }
 0x12b   :  { %1179 = vst [vmem:[%s2130_s5 + $0x78] sm:$0xff] %v1147_v21  ;;  %v1084_v26 = vadd.f32 %v1842_v52, %v1045_v23  ;;  %v864_v28 = vadd.f32 %v1343_v59, %v863_v20 }
 0x12c   :  { %v1345_v29 = vpop.f32.mrf.mxu0  ;;  %v876_v30 = vpop.f32.mrf.mxu1 }
 0x12d   :  { %v1148_v31 = vadd.f32 %v1116_v2, %v1084_v26  ;;  %v1046_v34 = vmul.f32 %v1837_v49, %v864_v28  ;;  %v1346_v36 = vadd.f32 %v1345_v29, %v1344_v24  ;;  %v1385_v28 = vadd.f32 %v1830_v45, %v1828_v43 }
 0x12e   :  { %v1347_v40 = vpop.f32.mrf.mxu0  ;;  %v1992_v42 = vpop.f32.mrf.mxu1 }
 0x12f   :  { %1180 = vst [vmem:[%s2130_s5 + $0x80] sm:$0xff] %v1148_v31  ;;  %v1085_v44 = vadd.f32 %v1842_v52, %v1046_v34  ;;  %v869_v46 = vadd.f32 %v1444_v0, %v1346_v36 }
 0x130   :  { %v1348_v48 = vpop.f32.mrf.mxu0  ;;  %v879_v50 = vpop.f32.mrf.mxu1 }
 0x131   :  { %v1149_v51 = vadd.f32 %v1117_v38, %v1085_v44  ;;  %v1047_v54 = vmul.f32 %v1837_v49, %v869_v46  ;;  %v1349_v55 = vadd.f32 %v1348_v48, %v1347_v40  ;;  %v1125_v40 = vld [vmem:[%s2129_s4 + $0xc8] sm:$0xff]  ;;  %v1130_v48 = vld [vmem:[%s2129_s4 + $0xf0] sm:$0xff] }
 0x132   :  { %v1350_v35 = vpop.f32.mrf.mxu0  ;;  %v1452_v56 = vpop.f32.mrf.mxu1 }
 0x133   :  { %1181 = vst [vmem:[%s2130_s5 + $0x88] sm:$0xff] %v1149_v51  ;;  %v1086_v57 = vadd.f32 %v1842_v52, %v1047_v54  ;;  %v872_v58 = vadd.f32 %v1445_v14, %v1349_v55  ;;  %v901_v60 = vadd.f32 %v1452_v56, %v1812_v22  ;;  %v1121_v55 = vld [vmem:[%s2129_s4 + $0xa8] sm:$0xff] }
 0x134   :  { %v1351_v61 = vpop.f32.mrf.mxu0  ;;  %v892_v62 = vpop.f32.mrf.mxu1 }
 0x135   :  { %v1150_v63 = vadd.f32 %v1118_v33, %v1086_v57  ;;  %v1048_v0 = vmul.f32 %v1837_v49, %v872_v58  ;;  %v1055_v1 = vmul.f32 %v1837_v49, %v901_v60  ;;  %v1352_v3 = vadd.f32 %v1351_v61, %v1350_v35 }
 0x136   :  { %v893_v53 = vadd.f32 %v1808_v12, %v892_v62  ;;  %v1353_v5 = vpop.f32.mrf.mxu0  ;;  %v1453_v22 = vpop.f32.mrf.mxu1 }
 0x137   :  { %1182 = vst [vmem:[%s2130_s5 + $0x90] sm:$0xff] %v1150_v63  ;;  %v1087_v6 = vadd.f32 %v1842_v52, %v1048_v0  ;;  %v1094_v7 = vadd.f32 %v1842_v52, %v1055_v1  ;;  %v877_v8 = vadd.f32 %v1352_v3, %v876_v30  ;;  %v904_v9 = vadd.f32 %v1453_v22, %v1814_v27  ;;  %v1120_v27 = vld [vmem:[%s2129_s4 + $0xa0] sm:$0xff] }
 0x138   :  { %v1053_v11 = vmul.f32 %v1837_v49, %v893_v53  ;;  %v1354_v13 = vpop.f32.mrf.mxu0  ;;  %v895_v12 = vpop.f32.mrf.mxu1  ;;  %v1128_v0 = vld [vmem:[%s2129_s4 + $0xe0] sm:$0xff]  ;;  %v1131_v53 = vld [vmem:[%s2129_s4 + $0xf8] sm:$0xff] }
 0x139   :  { %v1151_v14 = vadd.f32 %v1119_v4, %v1087_v6  ;;  %v1158_v15 = vadd.f32 %v1126_v47, %v1094_v7  ;;  %v1049_v16 = vmul.f32 %v1837_v49, %v877_v8  ;;  %v1056_v19 = vmul.f32 %v1837_v49, %v904_v9 }
 0x13a   :  { %v1092_v39 = vadd.f32 %v1842_v52, %v1053_v11  ;;  %v1355_v20 = vadd.f32 %v1354_v13, %v1353_v5  ;;  %v896_v21 = vadd.f32 %v1810_v17, %v895_v12  ;;  %v1356_v23 = vpop.f32.mrf.mxu0  ;;  %v1456_v59 = vpop.f32.mrf.mxu1  ;;  %v1129_v13 = vld [vmem:[%s2129_s4 + $0xe8] sm:$0xff] }
 0x13b   :  { %1183 = vst [vmem:[%s2130_s5 + $0x98] sm:$0xff] %v1151_v14  ;;  %1190 = vst [vmem:[%s2130_s5 + $0xd0] sm:$0xff] %v1158_v15  ;;  %v1088_v2 = vadd.f32 %v1842_v52, %v1049_v16  ;;  %v1095_v24 = vadd.f32 %v1842_v52, %v1056_v19  ;;  %v917_v26 = vadd.f32 %v1456_v59, %v1382_v10 }
 0x13c   :  { %v1156_v29 = vadd.f32 %v1124_v18, %v1092_v39  ;;  %v880_v17 = vadd.f32 %v1355_v20, %v879_v50  ;;  %v1054_v30 = vmul.f32 %v1837_v49, %v896_v21  ;;  %v1357_v31 = vpop.f32.mrf.mxu0  ;;  %v908_v34 = vpop.f32.mrf.mxu1 }
 0x13d   :  { %v1152_v36 = vadd.f32 %v1120_v27, %v1088_v2  ;;  %v1159_v38 = vadd.f32 %v1127_v41, %v1095_v24  ;;  %v1059_v44 = vmul.f32 %v1837_v49, %v917_v26  ;;  %v1358_v46 = vadd.f32 %v1357_v31, %v1356_v23 }
 0x13e   :  { %1188 = vst [vmem:[%s2130_s5 + $0xc0] sm:$0xff] %v1156_v29  ;;  %v1050_v43 = vmul.f32 %v1837_v49, %v880_v17  ;;  %v1093_v45 = vadd.f32 %v1842_v52, %v1054_v30  ;;  %v909_v50 = vadd.f32 %v1816_v32, %v908_v34  ;;  %v1359_v51 = vpop.f32.mrf.mxu0  ;;  %v1457_v54 = vpop.f32.mrf.mxu1 }
 0x13f   :  { %1184 = vst [vmem:[%s2130_s5 + $0xa0] sm:$0xff] %v1152_v36  ;;  %1191 = vst [vmem:[%s2130_s5 + $0xd8] sm:$0xff] %v1159_v38  ;;  %v1098_v33 = vadd.f32 %v1842_v52, %v1059_v44  ;;  %v885_v35 = vadd.f32 %v1982_v25, %v1358_v46  ;;  %v920_v56 = vadd.f32 %v1457_v54, %v1385_v28  ;;  %v1122_v25 = vld [vmem:[%s2129_s4 + $0xb0] sm:$0xff] }
 0x140   :  { %v1089_v32 = vadd.f32 %v1842_v52, %v1050_v43  ;;  %v1157_v57 = vadd.f32 %v1125_v40, %v1093_v45  ;;  %v1057_v58 = vmul.f32 %v1837_v49, %v909_v50  ;;  %v1360_v60 = vpop.f32.mrf.mxu0  ;;  %v911_v61 = vpop.f32.mrf.mxu1 }
 0x141   :  { %v1162_v62 = vadd.f32 %v1130_v48, %v1098_v33  ;;  %v1051_v63 = vmul.f32 %v1837_v49, %v885_v35  ;;  %v1060_v1 = vmul.f32 %v1837_v49, %v920_v56  ;;  %v1361_v3 = vadd.f32 %v1360_v60, %v1359_v51 }
 0x142   :  { %v1153_v4 = vadd.f32 %v1121_v55, %v1089_v32  ;;  %1189 = vst [vmem:[%s2130_s5 + $0xc8] sm:$0xff] %v1157_v57  ;;  %v1096_v47 = vadd.f32 %v1842_v52, %v1057_v58  ;;  %v912_v5 = vadd.f32 %v1822_v37, %v911_v61 }
 0x143   :  { %1194 = vst [vmem:[%s2130_s5 + $0xf0] sm:$0xff] %v1162_v62  ;;  %v1090_v22 = vadd.f32 %v1842_v52, %v1051_v63  ;;  %v1099_v6 = vadd.f32 %v1842_v52, %v1060_v1  ;;  %v888_v7 = vadd.f32 %v1992_v42, %v1361_v3  ;;  %v1123_v42 = vld [vmem:[%s2129_s4 + $0xb8] sm:$0xff] }
 0x144   :  { %1185 = vst [vmem:[%s2130_s5 + $0xa8] sm:$0xff] %v1153_v4  ;;  %v1160_v8 = vadd.f32 %v1128_v0, %v1096_v47  ;;  %v1058_v9 = vmul.f32 %v1837_v49, %v912_v5 }
 0x145   :  { %v1154_v10 = vadd.f32 %v1122_v25, %v1090_v22  ;;  %v1163_v11 = vadd.f32 %v1131_v53, %v1099_v6  ;;  %v1052_v37 = vmul.f32 %v1837_v49, %v888_v7 }
 0x146   :  { %1192 = vst [vmem:[%s2130_s5 + $0xe0] sm:$0xff] %v1160_v8  ;;  %v1097_v12 = vadd.f32 %v1842_v52, %v1058_v9 }
 0x147   :  { %1186 = vst [vmem:[%s2130_s5 + $0xb0] sm:$0xff] %v1154_v10  ;;  %1195 = vst [vmem:[%s2130_s5 + $0xf8] sm:$0xff] %v1163_v11  ;;  %v1091_v49 = vadd.f32 %v1842_v52, %v1052_v37 }
 0x148   :  { %v1161_v14 = vadd.f32 %v1129_v13, %v1097_v12 }
 0x149   :  { %v1155_v15 = vadd.f32 %v1123_v42, %v1091_v49 }
 0x14a   :  { %1193 = vst [vmem:[%s2130_s5 + $0xe8] sm:$0xff] %v1161_v14 }
 0x14b   :  { %1187 = vst [vmem:[%s2130_s5 + $0xb8] sm:$0xff] %v1155_v15 }

// kernel: vanilla_forward.24
= control target key start
LH: loop header
LB: loop body
LE: loop exit
PB: predicated region body
PF: predicated region fallthrough
CT: control target
= control target key end

     0   :  { %s1647_s15 = smov 0   ;;  %s1649_s16 = smov 0   ;;  %s1994_s0 = inlined_call_operand.vmem [shape: bf16[64,384], index: 0, kind: input, shape index: {}]   ;;  %s1995_s1 = inlined_call_operand.vmem [shape: bf16[384,512], index: 1, kind: input, shape index: {}]   ;;  %s1996_s2 = inlined_call_operand.vmem [shape: f32[1,512], index: 2, kind: input, shape index: {}]   ;;  %s1997_s3 = inlined_call_operand.vmem [shape: f32[1,512], index: 3, kind: input, shape index: {}]   ;;  %s1998_s4 = inlined_call_operand.vmem [shape: f32[64,512], index: 4, kind: output, shape index: {}]  }
   0x1   :  { %s1651_s17 = smov 0   ;;  %s1653_s18 = smov 0  }
   0x2   :  { %s1655_s19 = smov 0  }
   0x3 LB: > { %s29_s20 = sadd.s32 1, %s1615_s18  ;;  %s1372_s21 = sadd.s32 4294967295, %s1619_s19   ;;  %s1619_s19 = sphi %s1655_s19, %s14_s19   ;;  %s1615_s18 = sphi %s1653_s18, %s2003_s18   ;;  %s1611_s17 = sphi %s1651_s17, %s2002_s17   ;;  %s1607_s16 = sphi %s1649_s16, %s2001_s16   ;;  %s1603_s15 = sphi %s1647_s15, %s2000_s15  }
   0x4   : > { %p31_p0 = scmp.ge.s32.totalorder %s29_s20, 2  ;;  %p77_p1 = scmp.ne.s32.totalorder %s1607_s16, %s1603_s15 }
   0x5   : > { %p78_p2 = scmp.eq.s32.totalorder %s1619_s19, 0  ;;  %p161_p4 = scmp.eq.s32.totalorder %s1372_s21, 1 }
   0x6   : > { %s2005_s20 = smov (%p31_p0, %s29_s20), 0  ;;  %s70_s23 = sadd.s32 1, %s1607_s16 }
   0x7   : > { %p79_p3 = por %p78_p2, %p77_p1  ;;  %s66_s22 = ssub.s32 %s1615_s18, %s2005_s20 }
   0x8   : > { %p68_p5 = scmp.eq.s32.totalorder %s66_s22, 0  ;;  %p1682_p6 = por %p161_p4, %p77_p1 }
   0x9   : > { %p1376_p7 = scmp.ge.s32.totalorder %s1619_s19, 2 }
   0xa   : > { %s1687_s25 = scalar_select %p68_p5, %s1607_s16, %s70_s23  }
   0xb   : > { %198 = sbr.rel (%p1376_p7) target bundleno = 44 (0x2c), region = 20 }
  0x10   : > { %201 = sbr.rel (!%p79_p3) target bundleno = 44 (0x2c), region = 24  ;;  %s203_s26 = sand.u32 (%p79_p3), 1, %s1607_s16  }
  0x11   : > { %s1448_s27 = sshll.u32 (%p79_p3), %s1615_s18, 3  ;;  %s1450_s28 = smul.u32 (%p79_p3), 384, %s203_s26 }
  0x12   : > { %s1695_s5 = scalar_lea.vmem (%p79_p3), %s1995_s1, %s1448_s27 }
  0x13   : > { %v334_v0 = vld [vmem:[%s1695_s5] sm:$0xff] (%p79_p3)  ;;  %v336_v1 = vld [vmem:[%s1695_s5 + $0x10] sm:$0xff] (%p79_p3)  ;;  %s1703_s6 = scalar_lea.vmem (%p79_p3), [#allocation3], %s1450_s28 }
  0x14   : > { %v338_v2 = vld [vmem:[%s1695_s5 + $0x20] sm:$0xff] (%p79_p3)  ;;  %v340_v3 = vld [vmem:[%s1695_s5 + $0x30] sm:$0xff] (%p79_p3)  ;;  %335 = vst [vmem:[%s1703_s6] sm:$0xff] (%p79_p3), %v334_v0  ;;  %337 = vst [vmem:[%s1703_s6 + $0x8] sm:$0xff] (%p79_p3), %v336_v1 }
  0x15   : > { %v342_v4 = vld [vmem:[%s1695_s5 + $0x40] sm:$0xff]  ;;  %v344_v5 = vld [vmem:[%s1695_s5 + $0x50] sm:$0xff]  ;;  %339 = vst [vmem:[%s1703_s6 + $0x10] sm:$0xff] %v338_v2  ;;  %341 = vst [vmem:[%s1703_s6 + $0x18] sm:$0xff] %v340_v3 }
  0x16   : > { %343 = vst [vmem:[%s1703_s6 + $0x20] sm:$0xff] %v342_v4  ;;  %345 = vst [vmem:[%s1703_s6 + $0x28] sm:$0xff] %v344_v5  ;;  %v346_v6 = vld [vmem:[%s1695_s5 + $0x60] sm:$0xff]  ;;  %v348_v7 = vld [vmem:[%s1695_s5 + $0x70] sm:$0xff] }
  0x17   : > { %v350_v8 = vld [vmem:[%s1695_s5 + $0x80] sm:$0xff]  ;;  %347 = vst [vmem:[%s1703_s6 + $0x30] sm:$0xff] %v346_v6  ;;  %349 = vst [vmem:[%s1703_s6 + $0x38] sm:$0xff] %v348_v7  ;;  %v352_v9 = vld [vmem:[%s1695_s5 + $0x90] sm:$0xff] }
  0x18   : > { %351 = vst [vmem:[%s1703_s6 + $0x40] sm:$0xff] %v350_v8  ;;  %v354_v10 = vld [vmem:[%s1695_s5 + $0xa0] sm:$0xff]  ;;  %v356_v11 = vld [vmem:[%s1695_s5 + $0xb0] sm:$0xff]  ;;  %353 = vst [vmem:[%s1703_s6 + $0x48] sm:$0xff] %v352_v9 }
  0x19   : > { %355 = vst [vmem:[%s1703_s6 + $0x50] sm:$0xff] %v354_v10  ;;  %357 = vst [vmem:[%s1703_s6 + $0x58] sm:$0xff] %v356_v11  ;;  %v358_v12 = vld [vmem:[%s1695_s5 + $0xc0] sm:$0xff]  ;;  %v360_v13 = vld [vmem:[%s1695_s5 + $0xd0] sm:$0xff] }
  0x1a   : > { %v362_v14 = vld [vmem:[%s1695_s5 + $0xe0] sm:$0xff]  ;;  %359 = vst [vmem:[%s1703_s6 + $0x60] sm:$0xff] %v358_v12  ;;  %361 = vst [vmem:[%s1703_s6 + $0x68] sm:$0xff] %v360_v13  ;;  %v364_v15 = vld [vmem:[%s1695_s5 + $0xf0] sm:$0xff] }
  0x1b   : > { %363 = vst [vmem:[%s1703_s6 + $0x70] sm:$0xff] %v362_v14  ;;  %v366_v16 = vld [vmem:[%s1695_s5 + $0x100] sm:$0xff]  ;;  %v368_v17 = vld [vmem:[%s1695_s5 + $0x110] sm:$0xff]  ;;  %365 = vst [vmem:[%s1703_s6 + $0x78] sm:$0xff] %v364_v15 }
  0x1c   : > { %367 = vst [vmem:[%s1703_s6 + $0x80] sm:$0xff] %v366_v16  ;;  %369 = vst [vmem:[%s1703_s6 + $0x88] sm:$0xff] %v368_v17  ;;  %v370_v18 = vld [vmem:[%s1695_s5 + $0x120] sm:$0xff]  ;;  %v372_v19 = vld [vmem:[%s1695_s5 + $0x130] sm:$0xff] }
  0x1d   : > { %v374_v20 = vld [vmem:[%s1695_s5 + $0x140] sm:$0xff]  ;;  %371 = vst [vmem:[%s1703_s6 + $0x90] sm:$0xff] %v370_v18  ;;  %373 = vst [vmem:[%s1703_s6 + $0x98] sm:$0xff] %v372_v19  ;;  %v376_v21 = vld [vmem:[%s1695_s5 + $0x150] sm:$0xff] }
  0x1e   : > { %375 = vst [vmem:[%s1703_s6 + $0xa0] sm:$0xff] %v374_v20  ;;  %v378_v22 = vld [vmem:[%s1695_s5 + $0x160] sm:$0xff]  ;;  %v380_v23 = vld [vmem:[%s1695_s5 + $0x170] sm:$0xff]  ;;  %377 = vst [vmem:[%s1703_s6 + $0xa8] sm:$0xff] %v376_v21 }
  0x1f   : > { %379 = vst [vmem:[%s1703_s6 + $0xb0] sm:$0xff] %v378_v22  ;;  %381 = vst [vmem:[%s1703_s6 + $0xb8] sm:$0xff] %v380_v23  ;;  %v382_v24 = vld [vmem:[%s1695_s5 + $0x180] sm:$0xff]  ;;  %v384_v25 = vld [vmem:[%s1695_s5 + $0x190] sm:$0xff] }
  0x20   : > { %v386_v26 = vld [vmem:[%s1695_s5 + $0x1a0] sm:$0xff]  ;;  %383 = vst [vmem:[%s1703_s6 + $0xc0] sm:$0xff] %v382_v24  ;;  %385 = vst [vmem:[%s1703_s6 + $0xc8] sm:$0xff] %v384_v25  ;;  %v388_v27 = vld [vmem:[%s1695_s5 + $0x1b0] sm:$0xff] }
  0x21   : > { %387 = vst [vmem:[%s1703_s6 + $0xd0] sm:$0xff] %v386_v26  ;;  %v390_v28 = vld [vmem:[%s1695_s5 + $0x1c0] sm:$0xff]  ;;  %v392_v29 = vld [vmem:[%s1695_s5 + $0x1d0] sm:$0xff]  ;;  %389 = vst [vmem:[%s1703_s6 + $0xd8] sm:$0xff] %v388_v27 }
  0x22   : > { %391 = vst [vmem:[%s1703_s6 + $0xe0] sm:$0xff] %v390_v28  ;;  %393 = vst [vmem:[%s1703_s6 + $0xe8] sm:$0xff] %v392_v29  ;;  %v394_v30 = vld [vmem:[%s1695_s5 + $0x1e0] sm:$0xff]  ;;  %v396_v31 = vld [vmem:[%s1695_s5 + $0x1f0] sm:$0xff] }
  0x23   : > { %v398_v32 = vld [vmem:[%s1695_s5 + $0x200] sm:$0xff]  ;;  %395 = vst [vmem:[%s1703_s6 + $0xf0] sm:$0xff] %v394_v30  ;;  %397 = vst [vmem:[%s1703_s6 + $0xf8] sm:$0xff] %v396_v31  ;;  %v400_v33 = vld [vmem:[%s1695_s5 + $0x210] sm:$0xff] }
  0x24   : > { %399 = vst [vmem:[%s1703_s6 + $0x100] sm:$0xff] %v398_v32  ;;  %v402_v34 = vld [vmem:[%s1695_s5 + $0x220] sm:$0xff]  ;;  %v404_v35 = vld [vmem:[%s1695_s5 + $0x230] sm:$0xff]  ;;  %401 = vst [vmem:[%s1703_s6 + $0x108] sm:$0xff] %v400_v33 }
  0x25   : > { %403 = vst [vmem:[%s1703_s6 + $0x110] sm:$0xff] %v402_v34  ;;  %405 = vst [vmem:[%s1703_s6 + $0x118] sm:$0xff] %v404_v35  ;;  %v406_v36 = vld [vmem:[%s1695_s5 + $0x240] sm:$0xff]  ;;  %v408_v37 = vld [vmem:[%s1695_s5 + $0x250] sm:$0xff] }
  0x26   : > { %v410_v38 = vld [vmem:[%s1695_s5 + $0x260] sm:$0xff]  ;;  %407 = vst [vmem:[%s1703_s6 + $0x120] sm:$0xff] %v406_v36  ;;  %409 = vst [vmem:[%s1703_s6 + $0x128] sm:$0xff] %v408_v37  ;;  %v412_v39 = vld [vmem:[%s1695_s5 + $0x270] sm:$0xff] }
  0x27   : > { %411 = vst [vmem:[%s1703_s6 + $0x130] sm:$0xff] %v410_v38  ;;  %v414_v40 = vld [vmem:[%s1695_s5 + $0x280] sm:$0xff]  ;;  %v416_v41 = vld [vmem:[%s1695_s5 + $0x290] sm:$0xff]  ;;  %413 = vst [vmem:[%s1703_s6 + $0x138] sm:$0xff] %v412_v39 }
  0x28   : > { %415 = vst [vmem:[%s1703_s6 + $0x140] sm:$0xff] %v414_v40  ;;  %417 = vst [vmem:[%s1703_s6 + $0x148] sm:$0xff] %v416_v41  ;;  %v418_v42 = vld [vmem:[%s1695_s5 + $0x2a0] sm:$0xff]  ;;  %v420_v43 = vld [vmem:[%s1695_s5 + $0x2b0] sm:$0xff] }
  0x29   : > { %v422_v44 = vld [vmem:[%s1695_s5 + $0x2c0] sm:$0xff]  ;;  %419 = vst [vmem:[%s1703_s6 + $0x150] sm:$0xff] %v418_v42  ;;  %421 = vst [vmem:[%s1703_s6 + $0x158] sm:$0xff] %v420_v43  ;;  %v424_v45 = vld [vmem:[%s1695_s5 + $0x2d0] sm:$0xff] }
  0x2a   : > { %423 = vst [vmem:[%s1703_s6 + $0x160] sm:$0xff] %v422_v44  ;;  %v426_v46 = vld [vmem:[%s1695_s5 + $0x2e0] sm:$0xff]  ;;  %v428_v47 = vld [vmem:[%s1695_s5 + $0x2f0] sm:$0xff]  ;;  %425 = vst [vmem:[%s1703_s6 + $0x168] sm:$0xff] %v424_v45 }
  0x2b   : > { %427 = vst [vmem:[%s1703_s6 + $0x170] sm:$0xff] %v426_v46  ;;  %429 = vst [vmem:[%s1703_s6 + $0x178] sm:$0xff] %v428_v47 }
  0x2c PF: > { %p1379_p8 = scmp.ge.s32.totalorder %s1619_s19, 1  ;;  %p450_p9 = scmp.lt.s32.totalorder %s1619_s19, 3 }
  0x2e   : > { %p451_p10 = pnand %p1379_p8, %p450_p9 }
  0x2f   : > { %s457_s7 = sand.u32 (!%p451_p10), 1, %s1603_s15   ;;  %s1381_s23 = sshll.u32 (!%p451_p10), %s1611_s17, 1 }
  0x30   : > { %454 = sbr.rel (%p451_p10) target bundleno = 357 (0x165), region = 70  ;;  %p514_p11 = scmp.lt.s32.totalorder (!%p451_p10), %s1381_s23, 3 }
  0x31   : > { %s1451_s8 = smul.u32 (!%p451_p10), 384, %s457_s7  ;;  %s1380_s6 = sshll.u32 (!%p451_p10), %s457_s7, 7 }
  0x32   : > { %s1910_s15 = scalar_lea.vmem (!%p451_p10), [#allocation4], %s1380_s6 }
  0x33   : > { %s1804_s11 = scalar_lea.vmem (!%p451_p10), [#allocation3], %s1451_s8 }
  0x35   : > { %v1621_v48 = vmov 0   ;;  %v1568_v49 = vld [vmem:[%s1994_s0 + $0x4] ss:$12 sps:$4 sm:$0xff]   ;;  %v1493_v50 = vld [vmem:[%s1804_s11 + $0x74] ss:$8 sps:$4 sm:$0xff]   ;;  %s2007_s23 = smov (!%p514_p11, %s1381_s23), 3 }
  0x36   : > { %1035 = vmatprep.mubr.bf16.mxu1 %v1621_v48  ;;  %962 = vmatprep.mubr.bf16.mxu0 %v1568_v49  ;;  %v1495_v51 = vld [vmem:[%s1804_s11 + $0x70] ss:$8 sps:$4 sm:$0xff]   ;;  %v1496_v52 = vld [vmem:[%s1804_s11 + $0x64] ss:$8 sps:$4 sm:$0xff]   ;;  %v1498_v53 = vld [vmem:[%s1804_s11 + $0x60] ss:$8 sps:$4 sm:$0xff]   ;;  %s516_s28 = scalar_lea.vmem %s1996_s2, %s2007_s23  ;;  %s521_s5 = scalar_lea.vmem %s1997_s3, %s2007_s23 }
  0x37   : > { %930 = vmatprep.subr.bf16.mxu0 %v1493_v50  ;;  %v1499_v54 = vld [vmem:[%s1804_s11 + $0x54] ss:$8 sps:$4 sm:$0xff]   ;;  %v1501_v55 = vld [vmem:[%s1804_s11 + $0x50] ss:$8 sps:$4 sm:$0xff]   ;;  %v1502_v56 = vld [vmem:[%s1804_s11 + $0x44] ss:$8 sps:$4 sm:$0xff]   ;;  %v1129_v50 = vlaneseq }
  0x38   : > { %931 = vmatpush1.bf16.msra.mxu0 %v1495_v51  ;;  %v1514_v57 = vld [vmem:[%s1804_s11 + $0x174] ss:$8 sps:$4 sm:$0xff]   ;;  %v1516_v58 = vld [vmem:[%s1804_s11 + $0x170] ss:$8 sps:$4 sm:$0xff]   ;;  %v1504_v59 = vld [vmem:[%s1804_s11 + $0x40] ss:$8 sps:$4 sm:$0xff]  }
  0x39   : > { %932 = vmatprep.subr.bf16.mxu0 %v1496_v52  ;;  %v1505_v60 = vld [vmem:[%s1804_s11 + $0x34] ss:$8 sps:$4 sm:$0xff]   ;;  %1003 = vmatprep.subr.bf16.mxu1 %v1514_v57  ;;  %v1520_v61 = vld [vmem:[%s1804_s11 + $0x164] ss:$8 sps:$4 sm:$0xff]   ;;  %v1522_v62 = vld [vmem:[%s1804_s11 + $0x160] ss:$8 sps:$4 sm:$0xff]  }
  0x3a   : > { %1004 = vmatpush1.bf16.msra.mxu1 %v1516_v58  ;;  %v1507_v63 = vld [vmem:[%s1804_s11 + $0x30] ss:$8 sps:$4 sm:$0xff]   ;;  %v1526_v0 = vld [vmem:[%s1804_s11 + $0x154] ss:$8 sps:$4 sm:$0xff]   ;;  %v1508_v1 = vld [vmem:[%s1804_s11 + $0x24] ss:$8 sps:$4 sm:$0xff]  }
  0x3b   : > { %1005 = vmatprep.subr.bf16.mxu1 %v1520_v61  ;;  %v1528_v2 = vld [vmem:[%s1804_s11 + $0x150] ss:$8 sps:$4 sm:$0xff]   ;;  %v1532_v3 = vld [vmem:[%s1804_s11 + $0x144] ss:$8 sps:$4 sm:$0xff]   ;;  %v1510_v4 = vld [vmem:[%s1804_s11 + $0x20] ss:$8 sps:$4 sm:$0xff]  }
  0x3c   : > { %933 = vmatpush1.bf16.msra.mxu0 %v1498_v53  ;;  %v1511_v5 = vld [vmem:[%s1804_s11 + $0x14] ss:$8 sps:$4 sm:$0xff]   ;;  %v1534_v6 = vld [vmem:[%s1804_s11 + $0x140] ss:$8 sps:$4 sm:$0xff]   ;;  %v1513_v8 = vld [vmem:[%s1804_s11 + $0x10] ss:$8 sps:$4 sm:$0xff]  }
  0x3d   : > { %934 = vmatprep.subr.bf16.mxu0 %v1499_v54  ;;  %v1538_v7 = vld [vmem:[%s1804_s11 + $0x134] ss:$8 sps:$4 sm:$0xff]   ;;  %v1517_v9 = vld [vmem:[%s1804_s11 + $0x4] ss:$8 sps:$4 sm:$0xff]   ;;  %v1540_v10 = vld [vmem:[%s1804_s11 + $0x130] ss:$8 sps:$4 sm:$0xff]  }
  0x3e   : > { %1006 = vmatpush1.bf16.msra.mxu1 %v1522_v62  ;;  %v1544_v11 = vld [vmem:[%s1804_s11 + $0x124] ss:$8 sps:$4 sm:$0xff]   ;;  %v1519_v12 = vld [vmem:[%s1804_s11] ss:$8 sps:$4 sm:$0xff]   ;;  %v1523_v13 = vld [vmem:[%s1804_s11 + $0xf4] ss:$8 sps:$4 sm:$0xff]  }
  0x3f   : > { %1007 = vmatprep.subr.bf16.mxu1 %v1526_v0  ;;  %v1546_v14 = vld [vmem:[%s1804_s11 + $0x120] ss:$8 sps:$4 sm:$0xff]   ;;  %v1550_v15 = vld [vmem:[%s1804_s11 + $0x114] ss:$8 sps:$4 sm:$0xff]   ;;  %v1525_v16 = vld [vmem:[%s1804_s11 + $0xf0] ss:$8 sps:$4 sm:$0xff]  }
  0x40   : > { %935 = vmatpush1.bf16.msra.mxu0 %v1501_v55  ;;  %v1529_v17 = vld [vmem:[%s1804_s11 + $0xe4] ss:$8 sps:$4 sm:$0xff]   ;;  %v1552_v18 = vld [vmem:[%s1804_s11 + $0x110] ss:$8 sps:$4 sm:$0xff]   ;;  %v1531_v20 = vld [vmem:[%s1804_s11 + $0xe0] ss:$8 sps:$4 sm:$0xff]  }
  0x41   : > { %936 = vmatprep.subr.bf16.mxu0 %v1502_v56  ;;  %v1556_v19 = vld [vmem:[%s1804_s11 + $0x104] ss:$8 sps:$4 sm:$0xff]   ;;  %v1535_v21 = vld [vmem:[%s1804_s11 + $0xd4] ss:$8 sps:$4 sm:$0xff]   ;;  %v1558_v22 = vld [vmem:[%s1804_s11 + $0x100] ss:$8 sps:$4 sm:$0xff]  }
  0x42   : > { %1008 = vmatpush1.bf16.msra.mxu1 %v1528_v2  ;;  %v1537_v23 = vld [vmem:[%s1804_s11 + $0xd0] ss:$8 sps:$4 sm:$0xff]   ;;  %v1541_v24 = vld [vmem:[%s1804_s11 + $0xc4] ss:$8 sps:$4 sm:$0xff]   ;;  %v1562_v25 = vld [vmem:[%s1994_s0 + $0x8] ss:$12 sps:$4 sm:$0xff]  }
  0x43   : > { %1009 = vmatprep.subr.bf16.mxu1 %v1532_v3  ;;  %v1543_v26 = vld [vmem:[%s1804_s11 + $0xc0] ss:$8 sps:$4 sm:$0xff]   ;;  %v1547_v27 = vld [vmem:[%s1804_s11 + $0xb4] ss:$8 sps:$4 sm:$0xff]   ;;  %v1549_v28 = vld [vmem:[%s1804_s11 + $0xb0] ss:$8 sps:$4 sm:$0xff]  }
  0x44   : > { %937 = vmatpush1.bf16.msra.mxu0 %v1504_v59  ;;  %v1553_v29 = vld [vmem:[%s1804_s11 + $0xa4] ss:$8 sps:$4 sm:$0xff]   ;;  %v1555_v31 = vld [vmem:[%s1804_s11 + $0xa0] ss:$8 sps:$4 sm:$0xff]   ;;  %v1559_v32 = vld [vmem:[%s1804_s11 + $0x94] ss:$8 sps:$4 sm:$0xff]  }
  0x45   : > { %938 = vmatprep.subr.bf16.mxu0 %v1505_v60  ;;  %v1569_v30 = vld [vmem:[%s1994_s0 + $0x20] ss:$12 sps:$4 sm:$0xff]   ;;  %v1561_v33 = vld [vmem:[%s1804_s11 + $0x90] ss:$8 sps:$4 sm:$0xff]   ;;  %v1570_v38 = vld [vmem:[%s1994_s0 + $0x1c] ss:$12 sps:$4 sm:$0xff]  }
  0x46   : > { %1010 = vmatpush1.bf16.msra.mxu1 %v1534_v6  ;;  %v1563_v34 = vld [vmem:[%s1804_s11 + $0x84] ss:$8 sps:$4 sm:$0xff]   ;;  %v1565_v36 = vld [vmem:[%s1804_s11 + $0x80] ss:$8 sps:$4 sm:$0xff]   ;;  %v1577_v39 = vld [vmem:[%s1994_s0 + $0x50] ss:$12 sps:$4 sm:$0xff]  }
  0x47   : > { %1011 = vmatprep.subr.bf16.mxu1 %v1538_v7  ;;  %v1573_v35 = vld [vmem:[%s1994_s0 + $0x38] ss:$12 sps:$4 sm:$0xff]   ;;  %v1566_v37 = vld [vmem:[%s1994_s0] ss:$12 sps:$4 sm:$0xff]   ;;  %v1576_v42 = vld [vmem:[%s1994_s0 + $0x30] ss:$12 sps:$4 sm:$0xff]  }
  0x48   : > { %939 = vmatpush1.bf16.msra.mxu0 %v1507_v63  ;;  %v1572_v40 = vld [vmem:[%s1994_s0 + $0x18] ss:$12 sps:$4 sm:$0xff]   ;;  %v1574_v41 = vld [vmem:[%s1994_s0 + $0x34] ss:$12 sps:$4 sm:$0xff]   ;;  %v1130_v52 = vshrl.u32 %v1129_v50, 7  ;;  %s1449_s7 = sshll.u32 (%p1682_p6), %s1611_s17, 4 }
  0x49   : > { %940 = vmatprep.subr.bf16.mxu0 %v1508_v1  ;;  %v1578_v43 = vld [vmem:[%s1994_s0 + $0x4c] ss:$12 sps:$4 sm:$0xff]   ;;  %v1580_v44 = vld [vmem:[%s1994_s0 + $0x48] ss:$12 sps:$4 sm:$0xff]   ;;  %v1127_v55 = vld [vmem:[%s516_s28] sm:$0x3]  ;;  %s1211_s10 = scalar_lea.vmem (%p1682_p6), %s1998_s4, %s1449_s7 }
  0x4a   : > { %1012 = vmatpush1.bf16.msra.mxu1 %v1540_v10  ;;  %v1131_v54 = vsub.s32 0, %v1130_v52  ;;  %v1135_v56 = vsub.s32 1, %v1130_v52  ;;  %v1155_v57 = vld [vmem:[%s521_s5] sm:$0x3] }
  0x4b   : > { %1013 = vmatprep.subr.bf16.mxu1 %v1544_v11 }
  0x4c   : > { %941 = vmatpush1.bf16.msra.mxu0 %v1510_v4  ;;  %v1897_v59 = vrot.slane %v1127_v55, %v1131_v54  ;;  %v1901_v62 = vrot.slane %v1155_v57, %v1131_v54  ;;  %v1903_v63 = vrot.slane %v1127_v55, %v1135_v56  ;;  %v1906_v4 = vrot.slane %v1155_v57, %v1135_v56 }
  0x4d   : > { %942 = vmatprep.subr.bf16.mxu0 %v1511_v5 }
  0x4e   : > { %1014 = vmatpush1.bf16.msra.mxu1 %v1546_v14 }
  0x4f   : > { %1015 = vmatprep.subr.bf16.mxu1 %v1550_v15 }
  0x50   : > { %943 = vmatpush1.bf16.msra.mxu0 %v1513_v8 }
  0x51   : > { %944 = vmatprep.subr.bf16.mxu0 %v1517_v9 }
  0x52   : > { %1016 = vmatpush1.bf16.msra.mxu1 %v1552_v18 }
  0x53   : > { %1017 = vmatprep.subr.bf16.mxu1 %v1556_v19 }
  0x54   : > { %945 = vmatpush1.bf16.msra.mxu0 %v1519_v12 }
  0x55   : > { %946 = vmatprep.subr.bf16.mxu0 %v1523_v13 }
  0x56   : > { %1018 = vmatpush1.bf16.msra.mxu1 %v1558_v22 }
  0x58   : > { %947 = vmatpush2.bf16.msra.mxu0 %v1525_v16 }
  0x59   : > { %948 = vmatprep.subr.bf16.mxu0 %v1529_v17  ;;  %1036 = vmatmul.mubr.bf16.vlgmr.msra.gmra.mxu1 %v1562_v25 }
  0x5a   : > { %1045 = vmatprep.mubr.bf16.mxu1 %v1621_v48 }
  0x5c   : > { %949 = vmatpush2.bf16.msra.mxu0 %v1531_v20 }
  0x5d   : > { %950 = vmatprep.subr.bf16.mxu0 %v1535_v21 }
  0x60   : > { %951 = vmatpush2.bf16.msra.mxu0 %v1537_v23 }
  0x61   : > { %952 = vmatprep.subr.bf16.mxu0 %v1541_v24  ;;  %1046 = vmatmul.mubr.bf16.gmra.mxu1 %v1569_v30 }
  0x62   : > { %1055 = vmatprep.mubr.bf16.mxu1 %v1621_v48 }
  0x64   : > { %953 = vmatpush2.bf16.msra.mxu0 %v1543_v26 }
  0x65   : > { %954 = vmatprep.subr.bf16.mxu0 %v1547_v27 }
  0x68   : > { %955 = vmatpush2.bf16.msra.mxu0 %v1549_v28 }
  0x69   : > { %956 = vmatprep.subr.bf16.mxu0 %v1553_v29  ;;  %1056 = vmatmul.mubr.bf16.gmra.mxu1 %v1573_v35 }
  0x6a   : > { %1065 = vmatprep.mubr.bf16.mxu1 %v1621_v48 }
  0x6c   : > { %957 = vmatpush2.bf16.msra.mxu0 %v1555_v31 }
  0x6d   : > { %958 = vmatprep.subr.bf16.mxu0 %v1559_v32 }
  0x70   : > { %959 = vmatpush2.bf16.msra.mxu0 %v1561_v33 }
  0x71   : > { %960 = vmatprep.subr.bf16.mxu0 %v1563_v34  ;;  %1066 = vmatmul.mubr.bf16.gmra.mxu1 %v1577_v39 }
  0x74   : > { %961 = vmatpush2.bf16.msra.mxu0 %v1565_v36 }
  0x77   : > { %963 = vmatmul.mubr.bf16.vlgmr.msra.gmra.mxu0 %v1566_v37 }
  0x78   : > { %972 = vmatprep.mubr.bf16.mxu0 %v1570_v38 }
  0x7f   : > { %973 = vmatmul.mubr.bf16.gmra.mxu0 %v1572_v40 }
  0x80   : > { %982 = vmatprep.mubr.bf16.mxu0 %v1574_v41 }
  0x87   : > { %983 = vmatmul.mubr.bf16.gmra.mxu0 %v1576_v42 }
  0x88   : > { %992 = vmatprep.mubr.bf16.mxu0 %v1578_v43 }
  0x8f   : > { %993 = vmatmul.mubr.bf16.gmra.mxu0 %v1580_v44 }
 0x119   : > { %v1037_v45 = vpop.f32.mrf.mxu1 }
 0x11b   : > { %v1039_v46 = vpop.f32.mrf.mxu1 }
 0x11d   : > { %v1041_v47 = vpop.f32.mrf.mxu1 }
 0x11f   : > { %v1043_v48 = vpop.f32.mrf.mxu1 }
 0x121   : > { %v1047_v49 = vpop.f32.mrf.mxu1 }
 0x123   : > { %v1049_v51 = vpop.f32.mrf.mxu1 }
 0x125   : > { %v1051_v53 = vpop.f32.mrf.mxu1 }
 0x127   : > { %v1053_v58 = vpop.f32.mrf.mxu1 }
 0x129   : > { %v1057_v1 = vpop.f32.mrf.mxu1 }
 0x12b   : > { %v1059_v10 = vpop.f32.mrf.mxu1 }
 0x12d   : > { %v1061_v19 = vpop.f32.mrf.mxu1 }
 0x12f   : > { %v1063_v28 = vpop.f32.mrf.mxu1 }
 0x131   : > { %v1067_v37 = vpop.f32.mrf.mxu1 }
 0x137   : > { %v964_v60 = vpop.f32.mrf.mxu0 }
 0x138   : > { %v1038_v61 = vadd.f32 %v1037_v45, %v964_v60  ;;  %v1069_v45 = vpop.f32.mrf.mxu1 }
 0x139   : > { %v966_v0 = vpop.f32.mrf.mxu0 }
 0x13a   : > { %v1139_v2 = vmul.f32 %v1897_v59, %v1038_v61  ;;  %v1040_v3 = vadd.f32 %v1039_v46, %v966_v0  ;;  %v1071_v54 = vpop.f32.mrf.mxu1 }
 0x13b   : > { %v968_v5 = vpop.f32.mrf.mxu0 }
 0x13c   : > { %v1167_v6 = vadd.f32 %v1901_v62, %v1139_v2  ;;  %v1140_v7 = vmul.f32 %v1903_v63, %v1040_v3  ;;  %v1042_v8 = vadd.f32 %v1041_v47, %v968_v5  ;;  %v1073_v2 = vpop.f32.mrf.mxu1 }
 0x13d   : > { %v970_v9 = vpop.f32.mrf.mxu0 }
 0x13e   : > { %1183 = vst [vmem:[%s1910_s15] sm:$0xff] %v1167_v6  ;;  %v1168_v11 = vadd.f32 %v1906_v4, %v1140_v7  ;;  %v1141_v12 = vmul.f32 %v1897_v59, %v1042_v8  ;;  %v1044_v13 = vadd.f32 %v1043_v48, %v970_v9 }
 0x13f   : > { %v974_v14 = vpop.f32.mrf.mxu0 }
 0x140   : > { %1184 = vst [vmem:[%s1910_s15 + $0x8] sm:$0xff] %v1168_v11  ;;  %v1169_v15 = vadd.f32 %v1901_v62, %v1141_v12  ;;  %v1142_v16 = vmul.f32 %v1903_v63, %v1044_v13  ;;  %v1048_v17 = vadd.f32 %v1047_v49, %v974_v14 }
 0x141   : > { %v976_v18 = vpop.f32.mrf.mxu0 }
 0x142   : > { %1185 = vst [vmem:[%s1910_s15 + $0x10] sm:$0xff] %v1169_v15  ;;  %v1170_v20 = vadd.f32 %v1906_v4, %v1142_v16  ;;  %v1143_v21 = vmul.f32 %v1897_v59, %v1048_v17  ;;  %v1050_v22 = vadd.f32 %v1049_v51, %v976_v18 }
 0x143   : > { %v978_v23 = vpop.f32.mrf.mxu0 }
 0x144   : > { %1186 = vst [vmem:[%s1910_s15 + $0x18] sm:$0xff] %v1170_v20  ;;  %v1171_v24 = vadd.f32 %v1901_v62, %v1143_v21  ;;  %v1144_v25 = vmul.f32 %v1903_v63, %v1050_v22  ;;  %v1052_v26 = vadd.f32 %v1051_v53, %v978_v23 }
 0x145   : > { %v980_v27 = vpop.f32.mrf.mxu0 }
 0x146   : > { %1187 = vst [vmem:[%s1910_s15 + $0x20] sm:$0xff] %v1171_v24  ;;  %v1172_v29 = vadd.f32 %v1906_v4, %v1144_v25  ;;  %v1145_v30 = vmul.f32 %v1897_v59, %v1052_v26  ;;  %v1054_v31 = vadd.f32 %v1053_v58, %v980_v27 }
 0x147   : > { %v984_v32 = vpop.f32.mrf.mxu0 }
 0x148   : > { %1188 = vst [vmem:[%s1910_s15 + $0x28] sm:$0xff] %v1172_v29  ;;  %v1173_v33 = vadd.f32 %v1901_v62, %v1145_v30  ;;  %v1146_v34 = vmul.f32 %v1903_v63, %v1054_v31  ;;  %v1058_v35 = vadd.f32 %v1057_v1, %v984_v32 }
 0x149   : > { %v986_v36 = vpop.f32.mrf.mxu0 }
 0x14a   : > { %1189 = vst [vmem:[%s1910_s15 + $0x30] sm:$0xff] %v1173_v33  ;;  %v1174_v38 = vadd.f32 %v1906_v4, %v1146_v34  ;;  %v1147_v39 = vmul.f32 %v1897_v59, %v1058_v35  ;;  %v1060_v40 = vadd.f32 %v1059_v10, %v986_v36 }
 0x14b   : > { %v988_v41 = vpop.f32.mrf.mxu0 }
 0x14c   : > { %1190 = vst [vmem:[%s1910_s15 + $0x38] sm:$0xff] %v1174_v38  ;;  %v1175_v42 = vadd.f32 %v1901_v62, %v1147_v39  ;;  %v1148_v43 = vmul.f32 %v1903_v63, %v1060_v40  ;;  %v1062_v44 = vadd.f32 %v1061_v19, %v988_v41 }
 0x14d   : > { %v990_v46 = vpop.f32.mrf.mxu0  ;;  %v1232_v11 = vld [vmem:[%s1910_s15 + $0x20] sm:$0xff] (%p1682_p6) }
 0x14e   : > { %1191 = vst [vmem:[%s1910_s15 + $0x40] sm:$0xff] %v1175_v42  ;;  %v1176_v47 = vadd.f32 %v1906_v4, %v1148_v43  ;;  %v1149_v48 = vmul.f32 %v1897_v59, %v1062_v44  ;;  %v1064_v49 = vadd.f32 %v1063_v28, %v990_v46  ;;  %1233 = vst [vmem:[%s1211_s10 + $0x40] sm:$0xff] (%p1682_p6), %v1232_v11 }
 0x14f   : > { %v994_v50 = vpop.f32.mrf.mxu0  ;;  %v1234_v12 = vld [vmem:[%s1910_s15 + $0x28] sm:$0xff] (%p1682_p6) }
 0x150   : > { %1192 = vst [vmem:[%s1910_s15 + $0x48] sm:$0xff] %v1176_v47  ;;  %v1177_v51 = vadd.f32 %v1901_v62, %v1149_v48  ;;  %v1150_v52 = vmul.f32 %v1903_v63, %v1064_v49  ;;  %v1068_v53 = vadd.f32 %v1067_v37, %v994_v50  ;;  %1235 = vst [vmem:[%s1211_s10 + $0x48] sm:$0xff] (%p1682_p6), %v1234_v12 }
 0x151   : > { %v996_v55 = vpop.f32.mrf.mxu0  ;;  %v1236_v13 = vld [vmem:[%s1910_s15 + $0x30] sm:$0xff] (%p1682_p6) }
 0x152   : > { %1193 = vst [vmem:[%s1910_s15 + $0x50] sm:$0xff] %v1177_v51  ;;  %v1178_v56 = vadd.f32 %v1906_v4, %v1150_v52  ;;  %v1151_v57 = vmul.f32 %v1897_v59, %v1068_v53  ;;  %v1070_v58 = vadd.f32 %v1069_v45, %v996_v55  ;;  %1237 = vst [vmem:[%s1211_s10 + $0x60] sm:$0xff] (%p1682_p6), %v1236_v13 }
 0x153   : > { %v998_v60 = vpop.f32.mrf.mxu0  ;;  %v1238_v14 = vld [vmem:[%s1910_s15 + $0x38] sm:$0xff] (%p1682_p6) }
 0x154   : > { %1194 = vst [vmem:[%s1910_s15 + $0x58] sm:$0xff] %v1178_v56  ;;  %v1179_v61 = vadd.f32 %v1901_v62, %v1151_v57  ;;  %v1152_v0 = vmul.f32 %v1903_v63, %v1070_v58  ;;  %v1072_v1 = vadd.f32 %v1071_v54, %v998_v60  ;;  %1239 = vst [vmem:[%s1211_s10 + $0x68] sm:$0xff] (%p1682_p6), %v1238_v14 }
 0x155   : > { %v1000_v3 = vpop.f32.mrf.mxu0  ;;  %v1240_v15 = vld [vmem:[%s1910_s15 + $0x40] sm:$0xff] (%p1682_p6) }
 0x156   : > { %1195 = vst [vmem:[%s1910_s15 + $0x60] sm:$0xff] %v1179_v61  ;;  %v1180_v5 = vadd.f32 %v1906_v4, %v1152_v0  ;;  %v1153_v6 = vmul.f32 %v1897_v59, %v1072_v1  ;;  %v1074_v7 = vadd.f32 %v1073_v2, %v1000_v3  ;;  %v1224_v59 = vld [vmem:[%s1910_s15] sm:$0xff] (%p1682_p6)  ;;  %1241 = vst [vmem:[%s1211_s10 + $0x80] sm:$0xff] (%p1682_p6), %v1240_v15 }
 0x157   : > { %1225 = vst [vmem:[%s1211_s10] sm:$0xff] (%p1682_p6), %v1224_v59  ;;  %v1242_v16 = vld [vmem:[%s1910_s15 + $0x48] sm:$0xff] (%p1682_p6) }
 0x158   : > { %1196 = vst [vmem:[%s1910_s15 + $0x68] sm:$0xff] %v1180_v5  ;;  %v1181_v8 = vadd.f32 %v1901_v62, %v1153_v6  ;;  %v1154_v9 = vmul.f32 %v1903_v63, %v1074_v7  ;;  %1205 = sbr.rel (!%p1682_p6) target bundleno = 357 (0x165), region = 86  ;;  %v1226_v62 = vld [vmem:[%s1910_s15 + $0x8] sm:$0xff] (%p1682_p6)  ;;  %v1228_v63 = vld [vmem:[%s1910_s15 + $0x10] sm:$0xff] (%p1682_p6)  ;;  %1243 = vst [vmem:[%s1211_s10 + $0x88] sm:$0xff] (%p1682_p6), %v1242_v16 }
 0x159   : > { %1227 = vst [vmem:[%s1211_s10 + $0x8] sm:$0xff] (%p1682_p6), %v1226_v62  ;;  %1229 = vst [vmem:[%s1211_s10 + $0x20] sm:$0xff] (%p1682_p6), %v1228_v63  ;;  %v1244_v17 = vld [vmem:[%s1910_s15 + $0x50] sm:$0xff] (%p1682_p6) }
 0x15a   : > { %1197 = vst [vmem:[%s1910_s15 + $0x70] sm:$0xff] %v1181_v8  ;;  %v1182_v10 = vadd.f32 %v1906_v4, %v1154_v9  ;;  %v1230_v4 = vld [vmem:[%s1910_s15 + $0x18] sm:$0xff] (%p1682_p6)  ;;  %1245 = vst [vmem:[%s1211_s10 + $0xa0] sm:$0xff] (%p1682_p6), %v1244_v17 }
 0x15b   : > { %1231 = vst [vmem:[%s1211_s10 + $0x28] sm:$0xff] (%p1682_p6), %v1230_v4  ;;  %v1246_v18 = vld [vmem:[%s1910_s15 + $0x58] sm:$0xff] (%p1682_p6) }
 0x15c   : > { %1198 = vst [vmem:[%s1910_s15 + $0x78] sm:$0xff] %v1182_v10  ;;  %1247 = vst [vmem:[%s1211_s10 + $0xa8] sm:$0xff] (%p1682_p6), %v1246_v18 }
 0x15d   : > { %v1248_v19 = vld [vmem:[%s1910_s15 + $0x60] sm:$0xff] }
 0x15e   : > { %1249 = vst [vmem:[%s1211_s10 + $0xc0] sm:$0xff] %v1248_v19 }
 0x15f   : > { %v1250_v20 = vld [vmem:[%s1910_s15 + $0x68] sm:$0xff] }
 0x160   : > { %1251 = vst [vmem:[%s1211_s10 + $0xc8] sm:$0xff] %v1250_v20 }
 0x161   : > { %v1252_v21 = vld [vmem:[%s1910_s15 + $0x70] sm:$0xff] }
 0x162   : > { %1253 = vst [vmem:[%s1211_s10 + $0xe0] sm:$0xff] %v1252_v21 }
 0x163   : > { %v1254_v22 = vld [vmem:[%s1910_s15 + $0x78] sm:$0xff] }
 0x164   : > { %1255 = vst [vmem:[%s1211_s10 + $0xe8] sm:$0xff] %v1254_v22 }
 0x165 PF: > { %s14_s19 = sadd.s32 1, %s1619_s19   ;;  %s2000_s15 = smov %s1607_s16 }
 0x166   : > { %p11_p12 = scmp.ge.s32.totalorder %s14_s19, 4   ;;  %s2001_s16 = smov %s1687_s25 }
 0x167   : > { %s2002_s17 = smov %s1615_s18  ;;  %s2003_s18 = smov %s2005_s20 }
 0x168   :  { %13 = sbr.rel (!%p11_p12) target bundleno = 3 (0x3), region = 149 }

// kernel: closed_call.22
= control target key start
LH: loop header
LB: loop body
LE: loop exit
PB: predicated region body
PF: predicated region fallthrough
CT: control target
= control target key end

     0   :  { %s2123_s21 = smov 0   ;;  %s2125_s22 = smov 0   ;;  %s2403_s0 = inlined_call_operand.vmem [shape: bf16[32,1152], index: 0, kind: input, shape index: {}]   ;;  %s2404_s1 = inlined_call_operand.vmem [shape: bf16[1152,512], index: 1, kind: input, shape index: {}]   ;;  %s2405_s2 = inlined_call_operand.vmem [shape: f32[1,512], index: 2, kind: input, shape index: {}]   ;;  %s2406_s3 = inlined_call_operand.vmem [shape: f32[32,512], index: 3, kind: input, shape index: {}]   ;;  %s2407_s4 = inlined_call_operand.vmem [shape: f32[32,128], index: 4, kind: input, shape index: {}]   ;;  %s2408_s5 = inlined_call_operand.vmem [shape: f32[32,128], index: 5, kind: output, shape index: {0}]   ;;  %s2409_s6 = inlined_call_operand.vmem [shape: f32[32,128], index: 6, kind: output, shape index: {1}]  }
   0x1   :  { %s2127_s23 = smov 0   ;;  %s2129_s24 = smov 0  }
   0x2   :  { %s2131_s25 = smov 0  }
   0x3 LB: > { %s26_s26 = sadd.s32 1, %s2080_s24  ;;  %p45_p1 = scmp.ne.s32.totalorder %s2072_s22, %s2068_s21  ;;  %s2084_s25 = sphi %s2131_s25, %s17_s25   ;;  %s2080_s24 = sphi %s2129_s24, %s2413_s24   ;;  %s2076_s23 = sphi %s2127_s23, %s2412_s23   ;;  %s2072_s22 = sphi %s2125_s22, %s2411_s22   ;;  %s2068_s21 = sphi %s2123_s21, %s2410_s21  }
   0x4   : > { %p27_p0 = scmp.ge.s32.totalorder %s26_s26, 3  ;;  %p46_p2 = scmp.eq.s32.totalorder %s2084_s25, 0 }
   0x5   : > { %s38_s28 = sadd.s32 1, %s2072_s22  ;;  %p1649_p5 = scmp.ge.s32.totalorder %s2084_s25, 3 }
   0x6   : > { %s2415_s26 = smov (%p27_p0, %s26_s26), 0  ;;  %p47_p3 = por %p46_p2, %p45_p1 }
   0x7   : > { %s34_s27 = ssub.s32 %s2080_s24, %s2415_s26  ;;  %244 = sbr.rel (%p1649_p5) target bundleno = 21 (0x15), region = 28 }
   0x8   : > { %p36_p4 = scmp.eq.s32.totalorder %s34_s27, 0 }
   0xa   : > { %s2158_s29 = scalar_select %p36_p4, %s2072_s22, %s38_s28  }
   0xc   : > { %247 = sbr.rel (!%p47_p3) target bundleno = 21 (0x15), region = 32  ;;  %s249_s30 = sand.u32 (%p47_p3), 1, %s2072_s22  }
   0xd   : > { %s1784_s7 = smul.u32 (%p47_p3), 12, %s2080_s24 }
   0xe   : > { %s1786_s8 = smul.u32 (%p47_p3), 48, %s249_s30 }
   0xf   : > { %s257_s11 = scalar_lea.vmem (%p47_p3), %s2403_s0, %s1784_s7 }
  0x10   : > { %v272_v0 = vld [vmem:[%s257_s11] sm:$0xff] (%p47_p3)  ;;  %v276_v2 = vld [vmem:[%s257_s11 + $0x48] sm:$0xff] (%p47_p3)  ;;  %s251_s12 = scalar_lea.vmem (%p47_p3), [#allocation3], %s1786_s8  ;;  %v1655_v6 = vld [vmem:[%s257_s11 + $0x50] sm:$0xf] (%p47_p3) }
  0x11   : > { %v274_v1 = vld [vmem:[%s257_s11 + $0x24] sm:$0xff]  ;;  %273 = vst [vmem:[%s251_s12] sm:$0xff] %v272_v0  ;;  %277 = vst [vmem:[%s251_s12 + $0x18] sm:$0xff] %v276_v2  ;;  %v278_v3 = vld [vmem:[%s257_s11 + $0x6c] sm:$0xff] }
  0x12   : > { %275 = vst [vmem:[%s251_s12 + $0xc] sm:$0xff] %v274_v1  ;;  %v1651_v4 = vld [vmem:[%s257_s11 + $0x8] sm:$0xf]  ;;  %v1653_v5 = vld [vmem:[%s257_s11 + $0x2c] sm:$0xf]  ;;  %279 = vst [vmem:[%s251_s12 + $0x24] sm:$0xff] %v278_v3 }
  0x13   : > { %1652 = vst [vmem:[%s251_s12 + $0x8] sm:$0xf] %v1651_v4  ;;  %1654 = vst [vmem:[%s251_s12 + $0x14] sm:$0xf] %v1653_v5  ;;  %v1657_v7 = vld [vmem:[%s257_s11 + $0x74] sm:$0xf] }
  0x14   : > { %1656 = vst [vmem:[%s251_s12 + $0x20] sm:$0xf] %v1655_v6  ;;  %1658 = vst [vmem:[%s251_s12 + $0x2c] sm:$0xf] %v1657_v7 }
  0x15 PF: > { %p1659_p6 = scmp.ge.s32.totalorder %s2084_s25, 1  ;;  %p310_p7 = scmp.lt.s32.totalorder %s2084_s25, 4 }
  0x17   : > { %p311_p8 = pnand %p1659_p6, %p310_p7 }
  0x18   : > { %s317_s13 = sand.u32 (!%p311_p8), 1, %s2068_s21   ;;  %s370_s14 = smul.u32 (!%p311_p8), 48, %s2076_s23 }
  0x19   : > { %314 = sbr.rel (%p311_p8) target bundleno = 427 (0x1ab), region = 62  ;;  %p1662_p10 = scmp.ne.s32.totalorder (!%p311_p8), %s2076_s23, 0 }
  0x1a   : > { %s1787_s15 = smul.u32 (!%p311_p8), 48, %s317_s13  ;;  %p371_p9 = scmp.lt.s32.totalorder (!%p311_p8), %s370_s14, 143 }
  0x1c   : > { %s2175_s20 = scalar_lea.vmem (!%p311_p8), [#allocation3], %s1787_s15 }
  0x1e   : > { %s2417_s14 = smov (!%p371_p9, %s370_s14), 143  ;;  %406 = sbr.rel (%p1662_p10) target bundleno = 44 (0x2c), region = 70 }
  0x1f   : > { %s1785_s16 = sshll.u32 %s2417_s14, 4 }
  0x20   : > { %s2173_s19 = scalar_lea.vmem %s2404_s1, %s1785_s16 }
  0x23   : > { %v2086_v8 = vmov 0.0  }
  0x24   : > { %407 = vst [vmem:[#allocation2 + $0x30] sm:$0xff] %v2086_v8  ;;  %408 = vst [vmem:[#allocation2] sm:$0xff] %v2086_v8 }
  0x25   : > { %409 = vst [vmem:[#allocation2 + $0x58] sm:$0xff] %v2086_v8  ;;  %410 = vst [vmem:[#allocation2 + $0x18] sm:$0xff] %v2086_v8 }
  0x26   : > { %411 = vst [vmem:[#allocation2 + $0x50] sm:$0xff] %v2086_v8  ;;  %412 = vst [vmem:[#allocation2 + $0x68] sm:$0xff] %v2086_v8 }
  0x27   : > { %413 = vst [vmem:[#allocation2 + $0x8] sm:$0xff] %v2086_v8  ;;  %414 = vst [vmem:[#allocation2 + $0x48] sm:$0xff] %v2086_v8 }
  0x28   : > { %415 = vst [vmem:[#allocation2 + $0x40] sm:$0xff] %v2086_v8  ;;  %416 = vst [vmem:[#allocation2 + $0x20] sm:$0xff] %v2086_v8 }
  0x29   : > { %417 = vst [vmem:[#allocation2 + $0x10] sm:$0xff] %v2086_v8  ;;  %418 = vst [vmem:[#allocation2 + $0x38] sm:$0xff] %v2086_v8 }
  0x2a   : > { %419 = vst [vmem:[#allocation2 + $0x60] sm:$0xff] %v2086_v8  ;;  %420 = vst [vmem:[#allocation2 + $0x70] sm:$0xff] %v2086_v8 }
  0x2b   : > { %421 = vst [vmem:[#allocation2 + $0x78] sm:$0xff] %v2086_v8  ;;  %422 = vst [vmem:[#allocation2 + $0x28] sm:$0xff] %v2086_v8 }
  0x2c PF: > { %v1830_v9 = vld [vmem:[%s2173_s19 + $0xe4] ss:$16 sps:$4 sm:$0xff]   ;;  %v2087_v11 = vmov 0   ;;  %v1834_v12 = vld [vmem:[%s2173_s19 + $0xe0] ss:$16 sps:$4 sm:$0xff]   ;;  %p1765_p11 = scmp.ne.s32.totalorder %s2076_s23, 2 }
  0x2d   : > { %v1832_v10 = vld [vmem:[%s2173_s19 + $0x2e4] ss:$16 sps:$4 sm:$0xff]   ;;  %1140 = vmatprep.mubr.bf16.mxu1 %v2087_v11  ;;  %1055 = vmatprep.subr.bf16.mxu0 %v1830_v9  ;;  %v1835_v13 = vld [vmem:[%s2173_s19 + $0x2e0] ss:$16 sps:$4 sm:$0xff]   ;;  %v1883_v43 = vld [vmem:[%s2173_s19 + $0xec] ss:$16 sps:$4 sm:$0xff]  }
  0x2e   : > { %1108 = vmatprep.subr.bf16.mxu1 %v1832_v10  ;;  %v1836_v14 = vld [vmem:[%s2173_s19 + $0xc4] ss:$16 sps:$4 sm:$0xff]   ;;  %1056 = vmatpush1.bf16.msra.mxu0 %v1834_v12  ;;  %v1840_v16 = vld [vmem:[%s2173_s19 + $0xc0] ss:$16 sps:$4 sm:$0xff]   ;;  %v1881_v45 = vld [vmem:[%s2173_s19 + $0xe8] ss:$16 sps:$4 sm:$0xff]  }
  0x2f   : > { %1109 = vmatpush1.bf16.msra.mxu1 %v1835_v13  ;;  %v1838_v15 = vld [vmem:[%s2173_s19 + $0x2c4] ss:$16 sps:$4 sm:$0xff]   ;;  %1057 = vmatprep.subr.bf16.mxu0 %v1836_v14  ;;  %v1841_v17 = vld [vmem:[%s2173_s19 + $0x2c0] ss:$16 sps:$4 sm:$0xff]   ;;  %v1889_v48 = vld [vmem:[%s2173_s19 + $0xcc] ss:$16 sps:$4 sm:$0xff]  }
  0x30   : > { %1110 = vmatprep.subr.bf16.mxu1 %v1838_v15  ;;  %v1842_v18 = vld [vmem:[%s2173_s19 + $0xa4] ss:$16 sps:$4 sm:$0xff]   ;;  %v1846_v20 = vld [vmem:[%s2173_s19 + $0xa0] ss:$16 sps:$4 sm:$0xff]   ;;  %v1887_v49 = vld [vmem:[%s2173_s19 + $0xc8] ss:$16 sps:$4 sm:$0xff]  }
  0x31   : > { %v1844_v19 = vld [vmem:[%s2173_s19 + $0x2a4] ss:$16 sps:$4 sm:$0xff]   ;;  %v1847_v21 = vld [vmem:[%s2173_s19 + $0x2a0] ss:$16 sps:$4 sm:$0xff]   ;;  %v1895_v52 = vld [vmem:[%s2173_s19 + $0xac] ss:$16 sps:$4 sm:$0xff]  }
  0x32   : > { %1058 = vmatpush1.bf16.msra.mxu0 %v1840_v16  ;;  %v1848_v22 = vld [vmem:[%s2173_s19 + $0x84] ss:$16 sps:$4 sm:$0xff]   ;;  %v1852_v24 = vld [vmem:[%s2173_s19 + $0x80] ss:$16 sps:$4 sm:$0xff]   ;;  %v1893_v53 = vld [vmem:[%s2173_s19 + $0xa8] ss:$16 sps:$4 sm:$0xff]  }
  0x33   : > { %1111 = vmatpush1.bf16.msra.mxu1 %v1841_v17  ;;  %1059 = vmatprep.subr.bf16.mxu0 %v1842_v18  ;;  %v1850_v23 = vld [vmem:[%s2173_s19 + $0x284] ss:$16 sps:$4 sm:$0xff]   ;;  %v1853_v25 = vld [vmem:[%s2173_s19 + $0x280] ss:$16 sps:$4 sm:$0xff]   ;;  %v1901_v56 = vld [vmem:[%s2173_s19 + $0x8c] ss:$16 sps:$4 sm:$0xff]  }
  0x34   : > { %1112 = vmatprep.subr.bf16.mxu1 %v1844_v19  ;;  %v1854_v26 = vld [vmem:[%s2173_s19 + $0x64] ss:$16 sps:$4 sm:$0xff]   ;;  %v1858_v28 = vld [vmem:[%s2173_s19 + $0x60] ss:$16 sps:$4 sm:$0xff]   ;;  %v1899_v57 = vld [vmem:[%s2173_s19 + $0x88] ss:$16 sps:$4 sm:$0xff]  }
  0x35   : > { %v1856_v27 = vld [vmem:[%s2173_s19 + $0x264] ss:$16 sps:$4 sm:$0xff]   ;;  %v1859_v29 = vld [vmem:[%s2173_s19 + $0x260] ss:$16 sps:$4 sm:$0xff]   ;;  %v1907_v61 = vld [vmem:[%s2173_s19 + $0x6c] ss:$16 sps:$4 sm:$0xff]  }
  0x36   : > { %1060 = vmatpush1.bf16.msra.mxu0 %v1846_v20  ;;  %v1860_v30 = vld [vmem:[%s2173_s19 + $0x44] ss:$16 sps:$4 sm:$0xff]   ;;  %v1864_v32 = vld [vmem:[%s2173_s19 + $0x40] ss:$16 sps:$4 sm:$0xff]   ;;  %v1905_v62 = vld [vmem:[%s2173_s19 + $0x68] ss:$16 sps:$4 sm:$0xff]  }
  0x37   : > { %1113 = vmatpush1.bf16.msra.mxu1 %v1847_v21  ;;  %1061 = vmatprep.subr.bf16.mxu0 %v1848_v22  ;;  %v1862_v31 = vld [vmem:[%s2173_s19 + $0x244] ss:$16 sps:$4 sm:$0xff]   ;;  %v1865_v33 = vld [vmem:[%s2173_s19 + $0x240] ss:$16 sps:$4 sm:$0xff]   ;;  %v1913_v1 = vld [vmem:[%s2173_s19 + $0x4c] ss:$16 sps:$4 sm:$0xff]  }
  0x38   : > { %1114 = vmatprep.subr.bf16.mxu1 %v1850_v23  ;;  %v1866_v34 = vld [vmem:[%s2173_s19 + $0x24] ss:$16 sps:$4 sm:$0xff]   ;;  %v1870_v36 = vld [vmem:[%s2173_s19 + $0x20] ss:$16 sps:$4 sm:$0xff]   ;;  %v1911_v2 = vld [vmem:[%s2173_s19 + $0x48] ss:$16 sps:$4 sm:$0xff]  }
  0x39   : > { %v1868_v35 = vld [vmem:[%s2173_s19 + $0x224] ss:$16 sps:$4 sm:$0xff]   ;;  %v1871_v37 = vld [vmem:[%s2173_s19 + $0x220] ss:$16 sps:$4 sm:$0xff]   ;;  %v1919_v5 = vld [vmem:[%s2173_s19 + $0x2c] ss:$16 sps:$4 sm:$0xff]  }
  0x3a   : > { %1062 = vmatpush1.bf16.msra.mxu0 %v1852_v24  ;;  %v1872_v38 = vld [vmem:[%s2173_s19 + $0x4] ss:$16 sps:$4 sm:$0xff]   ;;  %v1876_v40 = vld [vmem:[%s2173_s19] ss:$16 sps:$4 sm:$0xff]   ;;  %v1917_v6 = vld [vmem:[%s2173_s19 + $0x28] ss:$16 sps:$4 sm:$0xff]  }
  0x3b   : > { %1115 = vmatpush1.bf16.msra.mxu1 %v1853_v25  ;;  %1063 = vmatprep.subr.bf16.mxu0 %v1854_v26  ;;  %v1874_v39 = vld [vmem:[%s2173_s19 + $0x204] ss:$16 sps:$4 sm:$0xff]   ;;  %v1877_v41 = vld [vmem:[%s2173_s19 + $0x200] ss:$16 sps:$4 sm:$0xff]   ;;  %v1925_v9 = vld [vmem:[%s2173_s19 + $0xc] ss:$16 sps:$4 sm:$0xff]  }
  0x3c   : > { %1116 = vmatprep.subr.bf16.mxu1 %v1856_v27  ;;  %v1878_v42 = vld [vmem:[%s2173_s19 + $0x1e4] ss:$16 sps:$4 sm:$0xff]   ;;  %v1884_v46 = vld [vmem:[%s2173_s19 + $0x1e0] ss:$16 sps:$4 sm:$0xff]   ;;  %v1923_v10 = vld [vmem:[%s2173_s19 + $0x8] ss:$16 sps:$4 sm:$0xff]  }
  0x3d   : > { %v2214_v44 = vld [vmem:[%s2175_s20 + $0x8] ss:$12 sps:$4 sm:$0xff]   ;;  %v1890_v50 = vld [vmem:[%s2173_s19 + $0x1c0] ss:$16 sps:$4 sm:$0xff]   ;;  %v1932_v14 = vld [vmem:[%s2173_s19 + $0x1ec] ss:$16 sps:$4 sm:$0xff]  }
  0x3e   : > { %1064 = vmatpush1.bf16.msra.mxu0 %v1858_v28  ;;  %v1885_v47 = vld [vmem:[%s2173_s19 + $0x1c4] ss:$16 sps:$4 sm:$0xff]   ;;  %v1896_v54 = vld [vmem:[%s2173_s19 + $0x1a0] ss:$16 sps:$4 sm:$0xff]   ;;  %v1935_v15 = vld [vmem:[%s2173_s19 + $0x2ec] ss:$16 sps:$4 sm:$0xff]  }
  0x3f   : > { %1117 = vmatpush1.bf16.msra.mxu1 %v1859_v29  ;;  %1065 = vmatprep.subr.bf16.mxu0 %v1860_v30  ;;  %v1891_v51 = vld [vmem:[%s2173_s19 + $0x1a4] ss:$16 sps:$4 sm:$0xff]   ;;  %v1902_v58 = vld [vmem:[%s2173_s19 + $0x180] ss:$16 sps:$4 sm:$0xff]   ;;  %v1930_v17 = vld [vmem:[%s2173_s19 + $0x1e8] ss:$16 sps:$4 sm:$0xff]  }
  0x40   : > { %1118 = vmatprep.subr.bf16.mxu1 %v1862_v31  ;;  %v1897_v55 = vld [vmem:[%s2173_s19 + $0x184] ss:$16 sps:$4 sm:$0xff]   ;;  %v1908_v63 = vld [vmem:[%s2173_s19 + $0x160] ss:$16 sps:$4 sm:$0xff]   ;;  %v1933_v18 = vld [vmem:[%s2173_s19 + $0x2e8] ss:$16 sps:$4 sm:$0xff]  }
  0x41   : > { %v1903_v59 = vld [vmem:[%s2173_s19 + $0x164] ss:$16 sps:$4 sm:$0xff]   ;;  %v1914_v3 = vld [vmem:[%s2173_s19 + $0x140] ss:$16 sps:$4 sm:$0xff]   ;;  %v1938_v19 = vld [vmem:[%s2173_s19 + $0x1cc] ss:$16 sps:$4 sm:$0xff]  }
  0x42   : > { %1066 = vmatpush1.bf16.msra.mxu0 %v1864_v32  ;;  %v1929_v60 = vld [vmem:[%s2175_s20 + $0x4] ss:$12 sps:$4 sm:$0xff]   ;;  %v2250_v13 = vld [vmem:[%s2175_s20 + $0x20] ss:$12 sps:$4 sm:$0xff]   ;;  %v2263_v21 = vld [vmem:[%s2175_s20 + $0x1c] ss:$12 sps:$4 sm:$0xff]  }
  0x43   : > { %1119 = vmatpush1.bf16.msra.mxu1 %v1865_v33  ;;  %1067 = vmatprep.subr.bf16.mxu0 %v1866_v34  ;;  %v1909_v0 = vld [vmem:[%s2173_s19 + $0x144] ss:$16 sps:$4 sm:$0xff]   ;;  %v1920_v7 = vld [vmem:[%s2173_s19 + $0x120] ss:$16 sps:$4 sm:$0xff]   ;;  %v1941_v20 = vld [vmem:[%s2173_s19 + $0x2cc] ss:$16 sps:$4 sm:$0xff]  }
  0x44   : > { %1120 = vmatprep.subr.bf16.mxu1 %v1868_v35  ;;  %1087 = vmatprep.mubr.bf16.mxu0 %v1929_v60  ;;  %v1915_v4 = vld [vmem:[%s2173_s19 + $0x124] ss:$16 sps:$4 sm:$0xff]   ;;  %v1926_v12 = vld [vmem:[%s2173_s19 + $0x100] ss:$16 sps:$4 sm:$0xff]   ;;  %v1936_v22 = vld [vmem:[%s2173_s19 + $0x1c8] ss:$16 sps:$4 sm:$0xff]  }
  0x45   : > { %v1921_v8 = vld [vmem:[%s2173_s19 + $0x104] ss:$16 sps:$4 sm:$0xff]   ;;  %v2256_v16 = vld [vmem:[%s2175_s20] ss:$12 sps:$4 sm:$0xff]   ;;  %v1939_v23 = vld [vmem:[%s2173_s19 + $0x2c8] ss:$16 sps:$4 sm:$0xff]  }
  0x46   : > { %1068 = vmatpush1.bf16.msra.mxu0 %v1870_v36  ;;  %v1944_v24 = vld [vmem:[%s2173_s19 + $0x1ac] ss:$16 sps:$4 sm:$0xff]   ;;  %v1962_v26 = vld [vmem:[%s2175_s20 + $0x18] ss:$12 sps:$4 sm:$0xff]  }
  0x47   : > { %1121 = vmatpush1.bf16.msra.mxu1 %v1871_v37  ;;  %1069 = vmatprep.subr.bf16.mxu0 %v1872_v38  ;;  %v1947_v25 = vld [vmem:[%s2173_s19 + $0x2ac] ss:$16 sps:$4 sm:$0xff]   ;;  %v1942_v27 = vld [vmem:[%s2173_s19 + $0x1a8] ss:$16 sps:$4 sm:$0xff]  }
  0x48   : > { %1122 = vmatprep.subr.bf16.mxu1 %v1874_v39  ;;  %v1945_v28 = vld [vmem:[%s2173_s19 + $0x2a8] ss:$16 sps:$4 sm:$0xff]   ;;  %v1950_v29 = vld [vmem:[%s2173_s19 + $0x18c] ss:$16 sps:$4 sm:$0xff]  }
  0x49   : > { %v1953_v30 = vld [vmem:[%s2173_s19 + $0x28c] ss:$16 sps:$4 sm:$0xff]   ;;  %v1948_v31 = vld [vmem:[%s2173_s19 + $0x188] ss:$16 sps:$4 sm:$0xff]  }
  0x4a   : > { %1070 = vmatpush1.bf16.msra.mxu0 %v1876_v40  ;;  %v1951_v32 = vld [vmem:[%s2173_s19 + $0x288] ss:$16 sps:$4 sm:$0xff]   ;;  %v1956_v33 = vld [vmem:[%s2173_s19 + $0x16c] ss:$16 sps:$4 sm:$0xff]  }
  0x4b   : > { %1123 = vmatpush1.bf16.msra.mxu1 %v1877_v41  ;;  %1071 = vmatprep.subr.bf16.mxu0 %v1878_v42  ;;  %v1959_v34 = vld [vmem:[%s2173_s19 + $0x26c] ss:$16 sps:$4 sm:$0xff]   ;;  %v1954_v35 = vld [vmem:[%s2173_s19 + $0x168] ss:$16 sps:$4 sm:$0xff]  }
  0x4c   : > { %1161 = vmatprep.subr.bf16.mxu1 %v1883_v43  ;;  %v1957_v36 = vld [vmem:[%s2173_s19 + $0x268] ss:$16 sps:$4 sm:$0xff]   ;;  %v1966_v37 = vld [vmem:[%s2173_s19 + $0x14c] ss:$16 sps:$4 sm:$0xff]  }
  0x4d   : > { %v1969_v38 = vld [vmem:[%s2173_s19 + $0x24c] ss:$16 sps:$4 sm:$0xff]   ;;  %v1964_v39 = vld [vmem:[%s2173_s19 + $0x148] ss:$16 sps:$4 sm:$0xff]  }
  0x4e   : > { %1141 = vmatmul.mubr.bf16.vlgmr.msra.gmra.mxu1 %v2214_v44  ;;  %1072 = vmatpush2.bf16.msra.mxu0 %v1884_v46  ;;  %v1967_v40 = vld [vmem:[%s2173_s19 + $0x248] ss:$16 sps:$4 sm:$0xff]   ;;  %v1972_v41 = vld [vmem:[%s2173_s19 + $0x12c] ss:$16 sps:$4 sm:$0xff]  }
  0x4f   : > { %1162 = vmatpush1.bf16.msra.mxu1 %v1881_v45  ;;  %1073 = vmatprep.subr.bf16.mxu0 %v1885_v47  ;;  %v1975_v42 = vld [vmem:[%s2173_s19 + $0x22c] ss:$16 sps:$4 sm:$0xff]   ;;  %v1970_v43 = vld [vmem:[%s2173_s19 + $0x128] ss:$16 sps:$4 sm:$0xff]  }
  0x50   : > { %1163 = vmatprep.subr.bf16.mxu1 %v1889_v48  ;;  %1150 = vmatprep.mubr.bf16.mxu1 %v2087_v11  ;;  %v1973_v45 = vld [vmem:[%s2173_s19 + $0x228] ss:$16 sps:$4 sm:$0xff]   ;;  %v1978_v46 = vld [vmem:[%s2173_s19 + $0x10c] ss:$16 sps:$4 sm:$0xff]  }
  0x51   : > { %v1981_v47 = vld [vmem:[%s2173_s19 + $0x20c] ss:$16 sps:$4 sm:$0xff]   ;;  %v1976_v48 = vld [vmem:[%s2173_s19 + $0x108] ss:$16 sps:$4 sm:$0xff]  }
  0x52   : > { %1074 = vmatpush2.bf16.msra.mxu0 %v1890_v50 }
  0x53   : > { %1164 = vmatpush1.bf16.msra.mxu1 %v1887_v49  ;;  %1075 = vmatprep.subr.bf16.mxu0 %v1891_v51  ;;  %v1979_v49 = vld [vmem:[%s2173_s19 + $0x208] ss:$16 sps:$4 sm:$0xff]  }
  0x54   : > { %1165 = vmatprep.subr.bf16.mxu1 %v1895_v52 }
  0x56   : > { %1076 = vmatpush2.bf16.msra.mxu0 %v1896_v54  ;;  %1151 = vmatmul.mubr.bf16.gmra.mxu1 %v2250_v13  ;;  %v423_v54 = vld [vmem:[#allocation2 + $0x30] sm:$0xff] }
  0x57   : > { %1166 = vmatpush1.bf16.msra.mxu1 %v1893_v53  ;;  %1077 = vmatprep.subr.bf16.mxu0 %v1897_v55 }
  0x58   : > { %1167 = vmatprep.subr.bf16.mxu1 %v1901_v56  ;;  %1193 = vmatprep.mubr.bf16.mxu1 %v1929_v60 }
  0x5a   : > { %1078 = vmatpush2.bf16.msra.mxu0 %v1902_v58  ;;  %v424_v58 = vld [vmem:[#allocation2] sm:$0xff] }
  0x5b   : > { %1168 = vmatpush1.bf16.msra.mxu1 %v1899_v57  ;;  %1079 = vmatprep.subr.bf16.mxu0 %v1903_v59 }
  0x5c   : > { %1169 = vmatprep.subr.bf16.mxu1 %v1907_v61 }
  0x5e   : > { %1080 = vmatpush2.bf16.msra.mxu0 %v1908_v63 }
  0x5f   : > { %1170 = vmatpush1.bf16.msra.mxu1 %v1905_v62  ;;  %1081 = vmatprep.subr.bf16.mxu0 %v1909_v0 }
  0x60   : > { %1171 = vmatprep.subr.bf16.mxu1 %v1913_v1  ;;  %v428_v1 = vld [vmem:[#allocation2 + $0x68] sm:$0xff] }
  0x62   : > { %1082 = vmatpush2.bf16.msra.mxu0 %v1914_v3 }
  0x63   : > { %1172 = vmatpush1.bf16.msra.mxu1 %v1911_v2  ;;  %1083 = vmatprep.subr.bf16.mxu0 %v1915_v4 }
  0x64   : > { %1173 = vmatprep.subr.bf16.mxu1 %v1919_v5 }
  0x66   : > { %1084 = vmatpush2.bf16.msra.mxu0 %v1920_v7 }
  0x67   : > { %1174 = vmatpush1.bf16.msra.mxu1 %v1917_v6  ;;  %1085 = vmatprep.subr.bf16.mxu0 %v1921_v8  ;;  %v431_v6 = vld [vmem:[#allocation2 + $0x40] sm:$0xff] }
  0x68   : > { %1175 = vmatprep.subr.bf16.mxu1 %v1925_v9 }
  0x6a   : > { %1086 = vmatpush2.bf16.msra.mxu0 %v1926_v12  ;;  %v432_v12 = vld [vmem:[#allocation2 + $0x20] sm:$0xff] }
  0x6b   : > { %1176 = vmatpush1.bf16.msra.mxu1 %v1923_v10  ;;  %1214 = vmatprep.subr.bf16.mxu0 %v1935_v15 }
  0x6c   : > { %1177 = vmatprep.subr.bf16.mxu1 %v1932_v14 }
  0x6d   : > { %1088 = vmatmul.mubr.bf16.vlgmr.msra.gmra.mxu0 %v2256_v16 }
  0x6e   : > { %1215 = vmatpush1.bf16.msra.mxu0 %v1933_v18  ;;  %1097 = vmatprep.mubr.bf16.mxu0 %v2263_v21 }
  0x6f   : > { %1178 = vmatpush2.bf16.msra.mxu1 %v1930_v17  ;;  %1216 = vmatprep.subr.bf16.mxu0 %v1941_v20 }
  0x70   : > { %1179 = vmatprep.subr.bf16.mxu1 %v1938_v19 }
  0x72   : > { %1217 = vmatpush1.bf16.msra.mxu0 %v1939_v23 }
  0x73   : > { %1180 = vmatpush2.bf16.msra.mxu1 %v1936_v22  ;;  %1218 = vmatprep.subr.bf16.mxu0 %v1947_v25 }
  0x74   : > { %1181 = vmatprep.subr.bf16.mxu1 %v1944_v24 }
  0x75   : > { %1098 = vmatmul.mubr.bf16.gmra.mxu0 %v1962_v26 }
  0x76   : > { %1219 = vmatpush1.bf16.msra.mxu0 %v1945_v28  ;;  %1246 = vmatprep.mubr.bf16.mxu0 %v2087_v11 }
  0x77   : > { %1182 = vmatpush2.bf16.msra.mxu1 %v1942_v27  ;;  %1220 = vmatprep.subr.bf16.mxu0 %v1953_v30  ;;  %v426_v30 = vld [vmem:[#allocation2 + $0x18] sm:$0xff] }
  0x78   : > { %1183 = vmatprep.subr.bf16.mxu1 %v1950_v29 }
  0x7a   : > { %1221 = vmatpush1.bf16.msra.mxu0 %v1951_v32 }
  0x7b   : > { %1184 = vmatpush2.bf16.msra.mxu1 %v1948_v31  ;;  %1222 = vmatprep.subr.bf16.mxu0 %v1959_v34 }
  0x7c   : > { %1185 = vmatprep.subr.bf16.mxu1 %v1956_v33 }
  0x7e   : > { %1223 = vmatpush1.bf16.msra.mxu0 %v1957_v36 }
  0x7f   : > { %1186 = vmatpush2.bf16.msra.mxu1 %v1954_v35  ;;  %1224 = vmatprep.subr.bf16.mxu0 %v1969_v38  ;;  %v429_v35 = vld [vmem:[#allocation2 + $0x8] sm:$0xff] }
  0x80   : > { %1187 = vmatprep.subr.bf16.mxu1 %v1966_v37 }
  0x82   : > { %1225 = vmatpush1.bf16.msra.mxu0 %v1967_v40  ;;  %v430_v40 = vld [vmem:[#allocation2 + $0x48] sm:$0xff] }
  0x83   : > { %1188 = vmatpush2.bf16.msra.mxu1 %v1964_v39  ;;  %1226 = vmatprep.subr.bf16.mxu0 %v1975_v42 }
  0x84   : > { %1189 = vmatprep.subr.bf16.mxu1 %v1972_v41 }
  0x86   : > { %1227 = vmatpush1.bf16.msra.mxu0 %v1973_v45 }
  0x87   : > { %1190 = vmatpush2.bf16.msra.mxu1 %v1970_v43  ;;  %1228 = vmatprep.subr.bf16.mxu0 %v1981_v47 }
  0x88   : > { %1191 = vmatprep.subr.bf16.mxu1 %v1978_v46  ;;  %v433_v46 = vld [vmem:[#allocation2 + $0x10] sm:$0xff] }
  0x8a   : > { %1229 = vmatpush1.bf16.msra.mxu0 %v1979_v49 }
  0x8b   : > { %1192 = vmatpush2.bf16.msra.mxu1 %v1976_v48 }
  0x8d   : > { %1247 = vmatmul.mubr.bf16.vlgmr.msra.gmra.mxu0 %v2214_v44  ;;  %v427_v44 = vld [vmem:[#allocation2 + $0x50] sm:$0xff] }
  0x8e   : > { %1194 = vmatmul.mubr.bf16.vlgmr.msra.gmra.mxu1 %v2256_v16  ;;  %1256 = vmatprep.mubr.bf16.mxu0 %v2087_v11  ;;  %v435_v16 = vld [vmem:[#allocation2 + $0x60] sm:$0xff] }
  0x8f   : > { %1203 = vmatprep.mubr.bf16.mxu1 %v2263_v21  ;;  %v436_v21 = vld [vmem:[#allocation2 + $0x70] sm:$0xff] }
  0x95   : > { %1257 = vmatmul.mubr.bf16.gmra.mxu0 %v2250_v13 }
  0x96   : > { %1204 = vmatmul.mubr.bf16.gmra.mxu1 %v1962_v26  ;;  %v425_v26 = vld [vmem:[#allocation2 + $0x58] sm:$0xff] }
 0x10e   : > { %v1142_v50 = vpop.f32.mrf.mxu1 }
 0x110   : > { %v1144_v51 = vpop.f32.mrf.mxu1 }
 0x112   : > { %v1146_v52 = vpop.f32.mrf.mxu1 }
 0x114   : > { %v1148_v53 = vpop.f32.mrf.mxu1 }
 0x116   : > { %v1152_v56 = vpop.f32.mrf.mxu1 }
 0x118   : > { %v1154_v63 = vpop.f32.mrf.mxu1 }
 0x11a   : > { %v1156_v7 = vpop.f32.mrf.mxu1 }
 0x11c   : > { %v1158_v17 = vpop.f32.mrf.mxu1 }
 0x12d   : > { %v1089_v55 = vpop.f32.mrf.mxu0 }
 0x12e   : > { %v1143_v57 = vadd.f32 %v1142_v50, %v1089_v55 }
 0x12f   : > { %v1091_v59 = vpop.f32.mrf.mxu0 }
 0x130   : > { %v1267_v60 = vadd.f32 %v1143_v57, %v423_v54  ;;  %v1145_v61 = vadd.f32 %v1144_v51, %v1091_v59  ;;  %v434_v51 = vld [vmem:[#allocation2 + $0x38] sm:$0xff] }
 0x131   : > { %v1093_v62 = vpop.f32.mrf.mxu0 }
 0x132   : > { %1283 = vst [vmem:[#allocation2 + $0x30] sm:$0xff] %v1267_v60  ;;  %v1268_v11 = vadd.f32 %v1145_v61, %v424_v58  ;;  %v1147_v0 = vadd.f32 %v1146_v52, %v1093_v62  ;;  %v438_v61 = vld [vmem:[#allocation2 + $0x28] sm:$0xff] }
 0x133   : > { %v1095_v2 = vpop.f32.mrf.mxu0 }
 0x134   : > { %1284 = vst [vmem:[#allocation2] sm:$0xff] %v1268_v11  ;;  %v1271_v3 = vadd.f32 %v1147_v0, %v427_v44  ;;  %v1149_v4 = vadd.f32 %v1148_v53, %v1095_v2 }
 0x135   : > { %v1099_v5 = vpop.f32.mrf.mxu0 }
 0x136   : > { %1287 = vst [vmem:[#allocation2 + $0x50] sm:$0xff] %v1271_v3  ;;  %v1272_v8 = vadd.f32 %v1149_v4, %v428_v1  ;;  %v1153_v9 = vadd.f32 %v1152_v56, %v1099_v5  ;;  %v437_v56 = vld [vmem:[#allocation2 + $0x78] sm:$0xff] }
 0x137   : > { %v1101_v10 = vpop.f32.mrf.mxu0 }
 0x138   : > { %1288 = vst [vmem:[#allocation2 + $0x68] sm:$0xff] %v1272_v8  ;;  %v1275_v13 = vadd.f32 %v1153_v9, %v431_v6  ;;  %v1155_v14 = vadd.f32 %v1154_v63, %v1101_v10 }
 0x139   : > { %v1103_v15 = vpop.f32.mrf.mxu0 }
 0x13a   : > { %1291 = vst [vmem:[#allocation2 + $0x40] sm:$0xff] %v1275_v13  ;;  %v1276_v18 = vadd.f32 %v1155_v14, %v432_v12  ;;  %v1157_v19 = vadd.f32 %v1156_v7, %v1103_v15 }
 0x13b   : > { %v1105_v20 = vpop.f32.mrf.mxu0 }
 0x13c   : > { %1292 = vst [vmem:[#allocation2 + $0x20] sm:$0xff] %v1276_v18  ;;  %v1279_v22 = vadd.f32 %v1157_v19, %v435_v16  ;;  %v1159_v23 = vadd.f32 %v1158_v17, %v1105_v20 }
 0x13e   : > { %1295 = vst [vmem:[#allocation2 + $0x60] sm:$0xff] %v1279_v22  ;;  %v1280_v24 = vadd.f32 %v1159_v23, %v436_v21 }
 0x140   : > { %1296 = vst [vmem:[#allocation2 + $0x70] sm:$0xff] %v1280_v24 }
 0x14d   : > { %v1248_v27 = vpop.f32.mrf.mxu0 }
 0x14e   : > { %v1195_v25 = vpop.f32.mrf.mxu1 }
 0x14f   : > { %v1249_v28 = vadd.f32 %v1248_v27, %v1195_v25  ;;  %v1250_v31 = vpop.f32.mrf.mxu0 }
 0x150   : > { %v1197_v29 = vpop.f32.mrf.mxu1 }
 0x151   : > { %v1269_v32 = vadd.f32 %v1249_v28, %v425_v26  ;;  %v1251_v33 = vadd.f32 %v1250_v31, %v1197_v29  ;;  %v1252_v36 = vpop.f32.mrf.mxu0 }
 0x152   : > { %v1199_v34 = vpop.f32.mrf.mxu1 }
 0x153   : > { %1285 = vst [vmem:[#allocation2 + $0x58] sm:$0xff] %v1269_v32  ;;  %v1270_v37 = vadd.f32 %v1251_v33, %v426_v30  ;;  %v1253_v38 = vadd.f32 %v1252_v36, %v1199_v34  ;;  %v1254_v41 = vpop.f32.mrf.mxu0 }
 0x154   : > { %v1201_v39 = vpop.f32.mrf.mxu1 }
 0x155   : > { %1286 = vst [vmem:[#allocation2 + $0x18] sm:$0xff] %v1270_v37  ;;  %v1273_v42 = vadd.f32 %v1253_v38, %v429_v35  ;;  %v1255_v43 = vadd.f32 %v1254_v41, %v1201_v39  ;;  %v1258_v47 = vpop.f32.mrf.mxu0 }
 0x156   : > { %v1205_v45 = vpop.f32.mrf.mxu1 }
 0x157   : > { %1289 = vst [vmem:[#allocation2 + $0x8] sm:$0xff] %v1273_v42  ;;  %v1274_v48 = vadd.f32 %v1255_v43, %v430_v40  ;;  %v1259_v49 = vadd.f32 %v1258_v47, %v1205_v45  ;;  %v1260_v52 = vpop.f32.mrf.mxu0 }
 0x158   : > { %v1207_v50 = vpop.f32.mrf.mxu1 }
 0x159   : > { %1290 = vst [vmem:[#allocation2 + $0x48] sm:$0xff] %v1274_v48  ;;  %v1277_v53 = vadd.f32 %v1259_v49, %v433_v46  ;;  %v1261_v54 = vadd.f32 %v1260_v52, %v1207_v50  ;;  %v1262_v57 = vpop.f32.mrf.mxu0 }
 0x15a   : > { %v1209_v55 = vpop.f32.mrf.mxu1 }
 0x15b   : > { %1293 = vst [vmem:[#allocation2 + $0x10] sm:$0xff] %v1277_v53  ;;  %v1278_v58 = vadd.f32 %v1261_v54, %v434_v51  ;;  %v1263_v59 = vadd.f32 %v1262_v57, %v1209_v55  ;;  %v1264_v44 = vpop.f32.mrf.mxu0 }
 0x15c   : > { %v1211_v60 = vpop.f32.mrf.mxu1 }
 0x15d   : > { %1294 = vst [vmem:[#allocation2 + $0x38] sm:$0xff] %v1278_v58  ;;  %v1281_v62 = vadd.f32 %v1263_v59, %v437_v56  ;;  %v1265_v63 = vadd.f32 %v1264_v44, %v1211_v60  ;;  %1302 = sbr.rel (%p1765_p11) target bundleno = 427 (0x1ab), region = 74 }
 0x15f   : > { %1297 = vst [vmem:[#allocation2 + $0x78] sm:$0xff] %v1281_v62  ;;  %v1282_v11 = vadd.f32 %v1265_v63, %v438_v61 }
 0x161   : > { %1298 = vst [vmem:[#allocation2 + $0x28] sm:$0xff] %v1282_v11 }
 0x162   : > { %v1321_v0 = vlaneseq  ;;  %v1319_v2 = vld [vmem:[%s2405_s2] sm:$0xf]  ;;  %v1303_v3 = vld [vmem:[#allocation2 + $0x30] sm:$0xff]  ;;  %v1306_v8 = vld [vmem:[#allocation2 + $0x18] sm:$0xff] }
 0x163   : > { %v1304_v7 = vld [vmem:[#allocation2] sm:$0xff]  ;;  %v1307_v9 = vld [vmem:[#allocation2 + $0x50] sm:$0xff]  ;;  %v1308_v14 = vld [vmem:[#allocation2 + $0x68] sm:$0xff] }
 0x164   : > { %v1322_v1 = vshrl.u32 %v1321_v0, 7  ;;  %v1311_v15 = vld [vmem:[#allocation2 + $0x40] sm:$0xff]  ;;  %v1358_v18 = vld [vmem:[%s2406_s3 + $0x8] sm:$0xff]  ;;  %v1360_v27 = vld [vmem:[%s2406_s3 + $0x18] sm:$0xff] }
 0x165   : > { %v1312_v16 = vld [vmem:[#allocation2 + $0x20] sm:$0xff]  ;;  %v1362_v24 = vld [vmem:[%s2406_s3 + $0x28] sm:$0xff]  ;;  %v1314_v35 = vld [vmem:[#allocation2 + $0x38] sm:$0xff] }
 0x166   : > { %v1323_v4 = vsub.s32 0, %v1322_v1  ;;  %v1327_v5 = vsub.s32 1, %v1322_v1  ;;  %v1335_v6 = vsub.s32 3, %v1322_v1  ;;  %v1357_v17 = vld [vmem:[%s2406_s3] sm:$0xff]  ;;  %v1331_v20 = vsub.s32 2, %v1322_v1  ;;  %v1310_v33 = vld [vmem:[#allocation2 + $0x48] sm:$0xff] }
 0x167   : > { %v1361_v19 = vld [vmem:[%s2406_s3 + $0x20] sm:$0xff]  ;;  %v1366_v36 = vld [vmem:[%s2406_s3 + $0x48] sm:$0xff]  ;;  %v1316_v40 = vld [vmem:[#allocation2 + $0x70] sm:$0xff] }
 0x168   : > { %v1324_v10 = vrot.slane %v1319_v2, %v1323_v4  ;;  %v1328_v12 = vrot.slane %v1319_v2, %v1327_v5  ;;  %v1336_v13 = vrot.slane %v1319_v2, %v1335_v6  ;;  %v1365_v25 = vld [vmem:[%s2406_s3 + $0x40] sm:$0xff]  ;;  %v1305_v41 = vld [vmem:[#allocation2 + $0x58] sm:$0xff]  ;;  %v1332_v42 = vrot.slane %v1319_v2, %v1331_v20  ;;  %v1370_v52 = vld [vmem:[%s2406_s3 + $0x68] sm:$0xff] }
 0x169   : > { %v1315_v39 = vld [vmem:[#allocation2 + $0x60] sm:$0xff]  ;;  %v1309_v53 = vld [vmem:[#allocation2 + $0x8] sm:$0xff]  ;;  %v1313_v58 = vld [vmem:[#allocation2 + $0x10] sm:$0xff] }
 0x16a   : > { %v1341_v21 = vadd.f32 %v1324_v10, %v1303_v3  ;;  %v1342_v22 = vadd.f32 %v1328_v12, %v1304_v7  ;;  %v1345_v23 = vadd.f32 %v1324_v10, %v1307_v9  ;;  %v1344_v26 = vadd.f32 %v1336_v13, %v1306_v8  ;;  %v1369_v51 = vld [vmem:[%s2406_s3 + $0x60] sm:$0xff]  ;;  %v1318_v55 = vld [vmem:[#allocation2 + $0x28] sm:$0xff]  ;;  %v1359_v44 = vld [vmem:[%s2406_s3 + $0x10] sm:$0xff] }
 0x16b   : > { %v1346_v28 = vadd.f32 %v1328_v12, %v1308_v14  ;;  %v1349_v29 = vadd.f32 %v1324_v10, %v1311_v15  ;;  %v1350_v30 = vadd.f32 %v1328_v12, %v1312_v16  ;;  %v1348_v48 = vadd.f32 %v1336_v13, %v1310_v33  ;;  %v1364_v62 = vld [vmem:[%s2406_s3 + $0x38] sm:$0xff]  ;;  %v1363_v1 = vld [vmem:[%s2406_s3 + $0x30] sm:$0xff] }
 0x16c   : > { %v1373_v31 = vadd.f32 %v1357_v17, %v1341_v21  ;;  %v1374_v32 = vadd.f32 %v1358_v18, %v1342_v22  ;;  %v1377_v34 = vadd.f32 %v1361_v19, %v1345_v23  ;;  %v1376_v47 = vadd.f32 %v1360_v27, %v1344_v26  ;;  %v1317_v2 = vld [vmem:[#allocation2 + $0x78] sm:$0xff]  ;;  %v1367_v6 = vld [vmem:[%s2406_s3 + $0x50] sm:$0xff] }
 0x16d   : > { %v1378_v37 = vadd.f32 %v1362_v24, %v1346_v28  ;;  %v1381_v38 = vadd.f32 %v1365_v25, %v1349_v29  ;;  %v1382_v50 = vadd.f32 %v1366_v36, %v1350_v30  ;;  %v1353_v56 = vadd.f32 %v1324_v10, %v1315_v39  ;;  %v1368_v3 = vld [vmem:[%s2406_s3 + $0x58] sm:$0xff] }
 0x16e   : > { %v1766_v43 = vmul.f32 -1.442695, %v1373_v31  ;;  %v1770_v45 = vmul.f32 -1.442695, %v1374_v32  ;;  %v1767_v46 = vmul.f32 -1.442695, %v1377_v34  ;;  %v1354_v57 = vadd.f32 %v1328_v12, %v1316_v40 }
 0x16f   : > { %v1771_v49 = vmul.f32 -1.442695, %v1378_v37  ;;  %v1768_v54 = vmul.f32 -1.442695, %v1381_v38  ;;  %v1352_v59 = vadd.f32 %v1336_v13, %v1314_v35  ;;  %v1772_v60 = vmul.f32 -1.442695, %v1382_v50 }
 0x170   : > { %1982 = vpow2.f32 %v1766_v43  ;;  %v1343_v61 = vadd.f32 %v1332_v42, %v1305_v41  ;;  %v1385_v63 = vadd.f32 %v1369_v51, %v1353_v56  ;;  %v1386_v11 = vadd.f32 %v1370_v52, %v1354_v57  ;;  %v1372_v7 = vld [vmem:[%s2406_s3 + $0x78] sm:$0xff]  ;;  %v1371_v12 = vld [vmem:[%s2406_s3 + $0x70] sm:$0xff] }
 0x171   : > { %1984 = vpow2.f32 %v1770_v45  ;;  %v1347_v0 = vadd.f32 %v1332_v42, %v1309_v53  ;;  %v1356_v4 = vadd.f32 %v1336_v13, %v1318_v55  ;;  %v1351_v5 = vadd.f32 %v1332_v42, %v1313_v58 }
 0x172   : > { %1986 = vpow2.f32 %v1767_v46  ;;  %v1769_v8 = vmul.f32 -1.442695, %v1385_v63  ;;  %v1773_v9 = vmul.f32 -1.442695, %v1386_v11  ;;  %v1375_v10 = vadd.f32 %v1359_v44, %v1343_v61 }
 0x173   : > { %1988 = vpow2.f32 %v1771_v49  ;;  %v1380_v14 = vadd.f32 %v1364_v62, %v1348_v48  ;;  %v1379_v13 = vadd.f32 %v1363_v1, %v1347_v0  ;;  %v1355_v15 = vadd.f32 %v1332_v42, %v1317_v2  ;;  %v1465_v49 = vld [vmem:[%s2407_s4] sm:$0xff] }
 0x174   : > { %1990 = vpow2.f32 %v1768_v54  ;;  %v1384_v16 = vadd.f32 %v1368_v3, %v1352_v59  ;;  %v1383_v17 = vadd.f32 %v1367_v6, %v1351_v5  ;;  %v1388_v18 = vadd.f32 %v1372_v7, %v1356_v4  ;;  %v1466_v54 = vld [vmem:[%s2407_s4 + $0x8] sm:$0xff]  ;;  %v1468_v3 = vld [vmem:[%s2407_s4 + $0x18] sm:$0xff] }
 0x175   : > { %1992 = vpow2.f32 %v1772_v60  ;;  %v1387_v19 = vadd.f32 %v1371_v12, %v1355_v15  ;;  %v1774_v20 = vmul.f32 -1.442695, %v1375_v10  ;;  %v1775_v21 = vmul.f32 -1.442695, %v1379_v13  ;;  %v1467_v60 = vld [vmem:[%s2407_s4 + $0x10] sm:$0xff] }
 0x176   : > { %1994 = vtanh.f32 %v1376_v47  ;;  %v1776_v22 = vmul.f32 -1.442695, %v1383_v17 }
 0x177   : > { %1996 = vpow2.f32 %v1769_v8  ;;  %v1777_v23 = vmul.f32 -1.442695, %v1387_v19 }
 0x178   : > { %1998 = vpow2.f32 %v1773_v9 }
 0x179   : > { %2000 = vtanh.f32 %v1380_v14 }
 0x17a   : > { %2002 = vtanh.f32 %v1384_v16 }
 0x17b   : > { %2004 = vtanh.f32 %v1388_v18 }
 0x17c   : > { %2006 = vpow2.f32 %v1774_v20 }
 0x17d   : > { %v1983_v24 = vpop.eup %1982  ;;  %2008 = vpow2.f32 %v1775_v21 }
 0x17e   : > { %v1985_v25 = vpop.eup %1984  ;;  %v1401_v26 = vadd.f32 1.0, %v1983_v24  ;;  %2010 = vpow2.f32 %v1776_v22 }
 0x17f   : > { %v1987_v27 = vpop.eup %1986  ;;  %v1425_v28 = vadd.f32 1.0, %v1985_v25  ;;  %2012 = vpow2.f32 %v1777_v23 }
 0x180   : > { %v1989_v29 = vpop.eup %1988  ;;  %2014 = vrcp.f32 %v1401_v26  ;;  %v1402_v30 = vadd.f32 1.0, %v1987_v27 }
 0x181   : > { %v1991_v31 = vpop.eup %1990  ;;  %2016 = vrcp.f32 %v1425_v28  ;;  %v1426_v32 = vadd.f32 1.0, %v1989_v29 }
 0x182   : > { %v1993_v33 = vpop.eup %1992  ;;  %2018 = vrcp.f32 %v1402_v30  ;;  %v1403_v34 = vadd.f32 1.0, %v1991_v31 }
 0x183   : > { %v1995_v35 = vpop.eup %1994  ;;  %2020 = vrcp.f32 %v1426_v32  ;;  %v1427_v36 = vadd.f32 1.0, %v1993_v33 }
 0x184   : > { %v1997_v37 = vpop.eup %1996  ;;  %2022 = vrcp.f32 %v1403_v34 }
 0x185   : > { %v1999_v38 = vpop.eup %1998  ;;  %2024 = vrcp.f32 %v1427_v36  ;;  %v1404_v39 = vadd.f32 1.0, %v1997_v37 }
 0x186   : > { %v2001_v40 = vpop.eup %2000  ;;  %v1428_v41 = vadd.f32 1.0, %v1999_v38 }
 0x187   : > { %v2003_v42 = vpop.eup %2002  ;;  %2026 = vrcp.f32 %v1404_v39 }
 0x188   : > { %v2005_v43 = vpop.eup %2004  ;;  %2028 = vrcp.f32 %v1428_v41 }
 0x189   : > { %v2007_v45 = vpop.eup %2006 }
 0x18a   : > { %v2009_v46 = vpop.eup %2008  ;;  %v1449_v51 = vadd.f32 1.0, %v2007_v45 }
 0x18b   : > { %v2011_v47 = vpop.eup %2010  ;;  %v1450_v55 = vadd.f32 1.0, %v2009_v46 }
 0x18c   : > { %v2013_v48 = vpop.eup %2012  ;;  %v1451_v61 = vadd.f32 1.0, %v2011_v47  ;;  %2030 = vrcp.f32 %v1449_v51 }
 0x18d   : > { %v2015_v50 = vpop.eup %2014  ;;  %2032 = vrcp.f32 %v1450_v55  ;;  %v1452_v5 = vadd.f32 1.0, %v2013_v48 }
 0x18e   : > { %v2017_v52 = vpop.eup %2016  ;;  %v1473_v53 = vmul.f32 %v2015_v50, %v1995_v35 }
 0x18f   : > { %v2019_v56 = vpop.eup %2018  ;;  %v1469_v57 = vmul.f32 %v2017_v52, %v1465_v49 }
 0x190   : > { %v2021_v58 = vpop.eup %2020  ;;  %v1474_v59 = vmul.f32 %v2019_v56, %v2001_v40 }
 0x191   : > { %v2023_v44 = vpop.eup %2022  ;;  %v1477_v62 = vadd.f32 %v1473_v53, %v1469_v57  ;;  %v1470_v63 = vmul.f32 %v2021_v58, %v1466_v54 }
 0x192   : > { %v2025_v11 = vpop.eup %2024  ;;  %v1475_v0 = vmul.f32 %v2023_v44, %v2003_v42 }
 0x193   : > { %1481 = vst [vmem:[%s2409_s6] sm:$0xff] %v1477_v62  ;;  %2034 = vtanh.f32 %v1477_v62  ;;  %v1478_v1 = vadd.f32 %v1474_v59, %v1470_v63  ;;  %v1471_v2 = vmul.f32 %v2025_v11, %v1467_v60 }
 0x194   : > { %v2027_v4 = vpop.eup %2026  ;;  %2036 = vrcp.f32 %v1451_v61 }
 0x195   : > { %v2029_v6 = vpop.eup %2028  ;;  %1482 = vst [vmem:[%s2409_s6 + $0x8] sm:$0xff] %v1478_v1  ;;  %2038 = vtanh.f32 %v1478_v1  ;;  %v1479_v7 = vadd.f32 %v1475_v0, %v1471_v2  ;;  %v1476_v8 = vmul.f32 %v2027_v4, %v2005_v43 }
 0x196   : > { %v1472_v9 = vmul.f32 %v2029_v6, %v1468_v3 }
 0x197   : > { %1483 = vst [vmem:[%s2409_s6 + $0x10] sm:$0xff] %v1479_v7  ;;  %2040 = vtanh.f32 %v1479_v7 }
 0x198   : > { %v1480_v10 = vadd.f32 %v1476_v8, %v1472_v9  ;;  %2042 = vrcp.f32 %v1452_v5 }
 0x199   : > { %v2031_v12 = vpop.eup %2030 }
 0x19a   : > { %1484 = vst [vmem:[%s2409_s6 + $0x18] sm:$0xff] %v1480_v10  ;;  %2044 = vtanh.f32 %v1480_v10  ;;  %v2033_v14 = vpop.eup %2032 }
 0x1a0   : > { %v2035_v13 = vpop.eup %2034 }
 0x1a1   : > { %v2037_v15 = vpop.eup %2036  ;;  %v1489_v16 = vmul.f32 %v2035_v13, %v2031_v12 }
 0x1a2   : > { %v2039_v17 = vpop.eup %2038 }
 0x1a3   : > { %1493 = vst [vmem:[%s2408_s5] sm:$0xff] %v1489_v16  ;;  %v1490_v18 = vmul.f32 %v2039_v17, %v2033_v14 }
 0x1a4   : > { %v2041_v19 = vpop.eup %2040 }
 0x1a5   : > { %v2043_v20 = vpop.eup %2042  ;;  %1494 = vst [vmem:[%s2408_s5 + $0x8] sm:$0xff] %v1490_v18  ;;  %v1491_v21 = vmul.f32 %v2041_v19, %v2037_v15 }
 0x1a7   : > { %v2045_v22 = vpop.eup %2044  ;;  %1495 = vst [vmem:[%s2408_s5 + $0x10] sm:$0xff] %v1491_v21 }
 0x1a8   : > { %v1492_v23 = vmul.f32 %v2045_v22, %v2043_v20 }
 0x1aa   : > { %1496 = vst [vmem:[%s2408_s5 + $0x18] sm:$0xff] %v1492_v23 }
 0x1ab PF: > { %s17_s25 = sadd.s32 1, %s2084_s25   ;;  %s2410_s21 = smov %s2072_s22 }
 0x1ac   : > { %p14_p12 = scmp.ge.s32.totalorder %s17_s25, 5   ;;  %s2411_s22 = smov %s2158_s29 }
 0x1ad   : > { %s2412_s23 = smov %s2080_s24  ;;  %s2413_s24 = smov %s2415_s26 }
 0x1ae   :  { %16 = sbr.rel (!%p14_p12) target bundleno = 3 (0x3), region = 136 }

// kernel: vanilla_forward.25
= control target key start
LH: loop header
LB: loop body
LE: loop exit
PB: predicated region body
PF: predicated region fallthrough
CT: control target
= control target key end

     0   :  { %s2222_s0 = inlined_call_operand.vmem [shape: bf16[64,1152], index: 0, kind: input, shape index: {}]   ;;  %s2223_s1 = inlined_call_operand.vmem [shape: bf16[1152,512], index: 1, kind: input, shape index: {}]   ;;  %s2224_s2 = inlined_call_operand.vmem [shape: f32[1,512], index: 2, kind: input, shape index: {}]   ;;  %s2225_s3 = inlined_call_operand.vmem [shape: f32[1,512], index: 3, kind: input, shape index: {}]   ;;  %s2226_s4 = inlined_call_operand.vmem [shape: f32[64,512], index: 4, kind: output, shape index: {}]  }
   0x1   :  { %2229 = sst [smem:[#allocation8_spill]] %s2222_s0 }
   0x2   :  { %2230 = sst [smem:[#allocation9_spill]] %s2223_s1 }
   0x3   :  { %s1821_s15 = smov 0   ;;  %s1823_s16 = smov 0  }
   0x4   :  { %s1825_s17 = smov 0   ;;  %s1827_s18 = smov 0  }
   0x5   :  { %s1829_s19 = smov 0   ;;  %s1831_s20 = smov 0  }
   0x6   :  { %s1833_s21 = smov 0   ;;  %s1835_s22 = smov 0  }
   0x7   :  { %s1837_s23 = smov 0   ;;  %s1839_s24 = smov 0  }
   0x8   :  { %s1841_s25 = smov 0  }
   0x9 LB: > { %s1426_s26 = sadd.s32 4294967295, %s1792_s25   ;;  %s26_s27 = sadd.s32 1, %s1784_s23  ;;  %s1792_s25 = sphi %s1841_s25, %s14_s25   ;;  %s1788_s24 = sphi %s1839_s24, %s2249_s24   ;;  %s1784_s23 = sphi %s1837_s23, %s2248_s23   ;;  %s1780_s22 = sphi %s1835_s22, %s2247_s22   ;;  %s1776_s21 = sphi %s1833_s21, %s2246_s21   ;;  %s1772_s20 = sphi %s1831_s20, %s2245_s20   ;;  %s1768_s19 = sphi %s1829_s19, %s2244_s19   ;;  %s1764_s18 = sphi %s1827_s18, %s2243_s18   ;;  %s1760_s17 = sphi %s1825_s17, %s2242_s17   ;;  %s1756_s16 = sphi %s1823_s16, %s2241_s16   ;;  %s1752_s15 = sphi %s1821_s15, %s2240_s15  }
   0xa   : > { %p27_p0 = scmp.ge.s32.totalorder %s26_s27, 3  ;;  %s29_s28 = sadd.s32 1, %s1788_s24 }
   0xb   : > { %s42_s29 = sadd.s32 1, %s1772_s20  ;;  %p49_p1 = scmp.ne.s32.totalorder %s1772_s20, %s1768_s19 }
   0xc   : > { %s2251_s27 = smov (%p27_p0, %s26_s27), 0  ;;  %s2253_s28 = smov (!%p27_p0, %s29_s28), %s1788_s24 }
   0xd   : > { %2231 = sst [smem:[#allocation6_spill]] %s2251_s27  ;;  %s38_s30 = ssub.s32 %s1784_s23, %s2251_s27 }
   0xe   : > { %p50_p2 = scmp.eq.s32.totalorder %s1792_s25, 0  ;;  %p31_p3 = scmp.ge.s32.totalorder %s2253_s28, 2 }
   0xf   : > { %p40_p4 = scmp.eq.s32.totalorder %s38_s30, 0  ;;  %s70_s6 = sadd.s32 1, %s1764_s18 }
  0x10   : > { %p1888_p5 = por %p50_p2, %p49_p1  ;;  %s2255_s28 = smov (%p31_p3, %s2253_s28), 0 }
  0x11   : > { %2233 = sst [smem:[#allocation7_spill]] %s2255_s28  ;;  %s66_s8 = ssub.s32 %s1788_s24, %s2255_s28 }
  0x12   : > { %s1896_s7 = scalar_select %p40_p4, %s1772_s20, %s42_s29  }
  0x13   : > { %p77_p6 = scmp.ne.s32.totalorder %s1764_s18, %s1760_s17  ;;  %s67_s9 = sor.u32 %s66_s8, %s38_s30 }
  0x14   : > { %p148_p7 = scmp.eq.s32.totalorder %s66_s8, 0  ;;  %p68_p8 = scmp.eq.s32.totalorder %s67_s9, 0 }
  0x15   : > { %p1902_p9 = por %p77_p6, %p50_p2  ;;  %s150_s11 = sadd.s32 1, %s1756_s16 }
  0x16   : > { %p160_p10 = scmp.ne.s32.totalorder %s1756_s16, %s1752_s15  ;;  %p161_p11 = scmp.eq.s32.totalorder %s1426_s26, 5 }
  0x17   : > { %s1910_s12 = scalar_select %p68_p8, %s1764_s18, %s70_s6  }
  0x18   : > { %s1913_s13 = scalar_select %p148_p7, %s1756_s16, %s150_s11  }
  0x19   : > { %p1915_p12 = por %p161_p11, %p160_p10  ;;  %p1429_p13 = scmp.ge.s32.totalorder %s1792_s25, 6 }
  0x1b   : > { %183 = sbr.rel (%p1429_p13) target bundleno = 84 (0x54), region = 16 }
  0x20   : > { %186 = sbr.rel (!%p1888_p5) target bundleno = 50 (0x32), region = 20  ;;  %s188_s29 = sand.u32 (%p1888_p5), 1, %s1772_s20  }
  0x21   : > { %s1521_s30 = smul.u32 (%p1888_p5), 12, %s1784_s23  ;;  %s2236_s0 = sld [smem:[#allocation8_spill]] (%p1888_p5) }
  0x22   : > { %s1524_s8 = smul.u32 (%p1888_p5), 96, %s188_s29 }
  0x24   : > { %s190_s26 = scalar_lea.vmem (%p1888_p5), [#allocation3], %s1524_s8 }
  0x27   : > { %s1927_s11 = scalar_lea.vmem %s2236_s0, %s1521_s30 }
  0x28   : > { %v211_v0 = vld [vmem:[%s1927_s11] sm:$0xff]  ;;  %v215_v2 = vld [vmem:[%s1927_s11 + $0x48] sm:$0xff]  ;;  %v219_v4 = vld [vmem:[%s1927_s11 + $0x90] sm:$0xff] }
  0x29   : > { %v213_v1 = vld [vmem:[%s1927_s11 + $0x24] sm:$0xff]  ;;  %212 = vst [vmem:[%s190_s26] sm:$0xff] %v211_v0  ;;  %216 = vst [vmem:[%s190_s26 + $0x18] sm:$0xff] %v215_v2  ;;  %v217_v3 = vld [vmem:[%s1927_s11 + $0x6c] sm:$0xff] }
  0x2a   : > { %214 = vst [vmem:[%s190_s26 + $0xc] sm:$0xff] %v213_v1  ;;  %v221_v5 = vld [vmem:[%s1927_s11 + $0xb4] sm:$0xff]  ;;  %218 = vst [vmem:[%s190_s26 + $0x24] sm:$0xff] %v217_v3  ;;  %v225_v7 = vld [vmem:[%s1927_s11 + $0xfc] sm:$0xff] }
  0x2b   : > { %220 = vst [vmem:[%s190_s26 + $0x30] sm:$0xff] %v219_v4  ;;  %222 = vst [vmem:[%s190_s26 + $0x3c] sm:$0xff] %v221_v5  ;;  %v223_v6 = vld [vmem:[%s1927_s11 + $0xd8] sm:$0xff]  ;;  %v1431_v8 = vld [vmem:[%s1927_s11 + $0x8] sm:$0xf] }
  0x2c   : > { %224 = vst [vmem:[%s190_s26 + $0x48] sm:$0xff] %v223_v6  ;;  %226 = vst [vmem:[%s190_s26 + $0x54] sm:$0xff] %v225_v7  ;;  %v1433_v9 = vld [vmem:[%s1927_s11 + $0x2c] sm:$0xf]  ;;  %v1435_v10 = vld [vmem:[%s1927_s11 + $0x50] sm:$0xf] }
  0x2d   : > { %1432 = vst [vmem:[%s190_s26 + $0x8] sm:$0xf] %v1431_v8  ;;  %v1437_v11 = vld [vmem:[%s1927_s11 + $0x74] sm:$0xf]  ;;  %1434 = vst [vmem:[%s190_s26 + $0x14] sm:$0xf] %v1433_v9 }
  0x2e   : > { %1436 = vst [vmem:[%s190_s26 + $0x20] sm:$0xf] %v1435_v10  ;;  %1438 = vst [vmem:[%s190_s26 + $0x2c] sm:$0xf] %v1437_v11  ;;  %v1439_v12 = vld [vmem:[%s1927_s11 + $0x98] sm:$0xf] }
  0x2f   : > { %v1441_v13 = vld [vmem:[%s1927_s11 + $0xbc] sm:$0xf]  ;;  %v1443_v14 = vld [vmem:[%s1927_s11 + $0xe0] sm:$0xf]  ;;  %1440 = vst [vmem:[%s190_s26 + $0x38] sm:$0xf] %v1439_v12 }
  0x30   : > { %1442 = vst [vmem:[%s190_s26 + $0x44] sm:$0xf] %v1441_v13  ;;  %1444 = vst [vmem:[%s190_s26 + $0x50] sm:$0xf] %v1443_v14  ;;  %v1445_v15 = vld [vmem:[%s1927_s11 + $0x104] sm:$0xf] }
  0x31   : > { %1446 = vst [vmem:[%s190_s26 + $0x5c] sm:$0xf] %v1445_v15 }
  0x32 PF: > { %256 = sbr.rel (!%p1902_p9) target bundleno = 84 (0x54), region = 46  ;;  %s258_s5 = sand.u32 (%p1902_p9), 1, %s1764_s18  }
  0x33   : > { %s1525_s29 = smul.u32 (%p1902_p9), 384, %s258_s5  ;;  %s1447_s30 = sshll.u32 (%p1902_p9), %s1788_s24, 1 }
  0x34   : > { %s1522_s8 = smul.u32 (%p1902_p9), 192, %s1784_s23  ;;  %s2237_s1 = sld [smem:[#allocation9_spill]] (%p1902_p9) }
  0x35   : > { %s1958_s10 = scalar_lea.vmem (%p1902_p9), [#allocation4], %s1525_s29 }
  0x36   : > { %s264_s6 = sadd.s32 (%p1902_p9), %s1522_s8, %s1447_s30 }
  0x37   : > { %s1449_s9 = sshll.u32 %s264_s6, 2 }
  0x3a   : > { %s1953_s27 = scalar_lea.vmem %s2237_s1, %s1449_s9 }
  0x3b   : > { %v389_v16 = vld [vmem:[%s1953_s27] sm:$0xff]  ;;  %v391_v17 = vld [vmem:[%s1953_s27 + $0x10] sm:$0xff] }
  0x3c   : > { %v393_v18 = vld [vmem:[%s1953_s27 + $0x20] sm:$0xff]  ;;  %390 = vst [vmem:[%s1958_s10] sm:$0xff] %v389_v16  ;;  %392 = vst [vmem:[%s1958_s10 + $0x8] sm:$0xff] %v391_v17  ;;  %v395_v19 = vld [vmem:[%s1953_s27 + $0x30] sm:$0xff] }
  0x3d   : > { %394 = vst [vmem:[%s1958_s10 + $0x10] sm:$0xff] %v393_v18  ;;  %v397_v20 = vld [vmem:[%s1953_s27 + $0x40] sm:$0xff]  ;;  %v399_v21 = vld [vmem:[%s1953_s27 + $0x50] sm:$0xff]  ;;  %396 = vst [vmem:[%s1958_s10 + $0x18] sm:$0xff] %v395_v19 }
  0x3e   : > { %398 = vst [vmem:[%s1958_s10 + $0x20] sm:$0xff] %v397_v20  ;;  %400 = vst [vmem:[%s1958_s10 + $0x28] sm:$0xff] %v399_v21  ;;  %v401_v22 = vld [vmem:[%s1953_s27 + $0x60] sm:$0xff]  ;;  %v403_v23 = vld [vmem:[%s1953_s27 + $0x70] sm:$0xff] }
  0x3f   : > { %v405_v24 = vld [vmem:[%s1953_s27 + $0x80] sm:$0xff]  ;;  %402 = vst [vmem:[%s1958_s10 + $0x30] sm:$0xff] %v401_v22  ;;  %404 = vst [vmem:[%s1958_s10 + $0x38] sm:$0xff] %v403_v23  ;;  %v407_v25 = vld [vmem:[%s1953_s27 + $0x90] sm:$0xff] }
  0x40   : > { %406 = vst [vmem:[%s1958_s10 + $0x40] sm:$0xff] %v405_v24  ;;  %v409_v26 = vld [vmem:[%s1953_s27 + $0xa0] sm:$0xff]  ;;  %v411_v27 = vld [vmem:[%s1953_s27 + $0xb0] sm:$0xff]  ;;  %408 = vst [vmem:[%s1958_s10 + $0x48] sm:$0xff] %v407_v25 }
  0x41   : > { %410 = vst [vmem:[%s1958_s10 + $0x50] sm:$0xff] %v409_v26  ;;  %412 = vst [vmem:[%s1958_s10 + $0x58] sm:$0xff] %v411_v27  ;;  %v413_v28 = vld [vmem:[%s1953_s27 + $0xc0] sm:$0xff]  ;;  %v415_v29 = vld [vmem:[%s1953_s27 + $0xd0] sm:$0xff] }
  0x42   : > { %v417_v30 = vld [vmem:[%s1953_s27 + $0xe0] sm:$0xff]  ;;  %414 = vst [vmem:[%s1958_s10 + $0x60] sm:$0xff] %v413_v28  ;;  %416 = vst [vmem:[%s1958_s10 + $0x68] sm:$0xff] %v415_v29  ;;  %v419_v31 = vld [vmem:[%s1953_s27 + $0xf0] sm:$0xff] }
  0x43   : > { %418 = vst [vmem:[%s1958_s10 + $0x70] sm:$0xff] %v417_v30  ;;  %v421_v32 = vld [vmem:[%s1953_s27 + $0x100] sm:$0xff]  ;;  %v423_v33 = vld [vmem:[%s1953_s27 + $0x110] sm:$0xff]  ;;  %420 = vst [vmem:[%s1958_s10 + $0x78] sm:$0xff] %v419_v31 }
  0x44   : > { %422 = vst [vmem:[%s1958_s10 + $0x80] sm:$0xff] %v421_v32  ;;  %424 = vst [vmem:[%s1958_s10 + $0x88] sm:$0xff] %v423_v33  ;;  %v425_v34 = vld [vmem:[%s1953_s27 + $0x120] sm:$0xff]  ;;  %v427_v35 = vld [vmem:[%s1953_s27 + $0x130] sm:$0xff] }
  0x45   : > { %v429_v36 = vld [vmem:[%s1953_s27 + $0x140] sm:$0xff]  ;;  %426 = vst [vmem:[%s1958_s10 + $0x90] sm:$0xff] %v425_v34  ;;  %428 = vst [vmem:[%s1958_s10 + $0x98] sm:$0xff] %v427_v35  ;;  %v431_v37 = vld [vmem:[%s1953_s27 + $0x150] sm:$0xff] }
  0x46   : > { %430 = vst [vmem:[%s1958_s10 + $0xa0] sm:$0xff] %v429_v36  ;;  %v433_v38 = vld [vmem:[%s1953_s27 + $0x160] sm:$0xff]  ;;  %v435_v39 = vld [vmem:[%s1953_s27 + $0x170] sm:$0xff]  ;;  %432 = vst [vmem:[%s1958_s10 + $0xa8] sm:$0xff] %v431_v37 }
  0x47   : > { %434 = vst [vmem:[%s1958_s10 + $0xb0] sm:$0xff] %v433_v38  ;;  %436 = vst [vmem:[%s1958_s10 + $0xb8] sm:$0xff] %v435_v39  ;;  %v437_v40 = vld [vmem:[%s1953_s27 + $0x180] sm:$0xff]  ;;  %v439_v41 = vld [vmem:[%s1953_s27 + $0x190] sm:$0xff] }
  0x48   : > { %v441_v42 = vld [vmem:[%s1953_s27 + $0x1a0] sm:$0xff]  ;;  %438 = vst [vmem:[%s1958_s10 + $0xc0] sm:$0xff] %v437_v40  ;;  %440 = vst [vmem:[%s1958_s10 + $0xc8] sm:$0xff] %v439_v41  ;;  %v443_v43 = vld [vmem:[%s1953_s27 + $0x1b0] sm:$0xff] }
  0x49   : > { %442 = vst [vmem:[%s1958_s10 + $0xd0] sm:$0xff] %v441_v42  ;;  %v445_v44 = vld [vmem:[%s1953_s27 + $0x1c0] sm:$0xff]  ;;  %v447_v45 = vld [vmem:[%s1953_s27 + $0x1d0] sm:$0xff]  ;;  %444 = vst [vmem:[%s1958_s10 + $0xd8] sm:$0xff] %v443_v43 }
  0x4a   : > { %446 = vst [vmem:[%s1958_s10 + $0xe0] sm:$0xff] %v445_v44  ;;  %448 = vst [vmem:[%s1958_s10 + $0xe8] sm:$0xff] %v447_v45  ;;  %v449_v46 = vld [vmem:[%s1953_s27 + $0x1e0] sm:$0xff]  ;;  %v451_v47 = vld [vmem:[%s1953_s27 + $0x1f0] sm:$0xff] }
  0x4b   : > { %v453_v48 = vld [vmem:[%s1953_s27 + $0x200] sm:$0xff]  ;;  %450 = vst [vmem:[%s1958_s10 + $0xf0] sm:$0xff] %v449_v46  ;;  %452 = vst [vmem:[%s1958_s10 + $0xf8] sm:$0xff] %v451_v47  ;;  %v455_v49 = vld [vmem:[%s1953_s27 + $0x210] sm:$0xff] }
  0x4c   : > { %454 = vst [vmem:[%s1958_s10 + $0x100] sm:$0xff] %v453_v48  ;;  %v457_v50 = vld [vmem:[%s1953_s27 + $0x220] sm:$0xff]  ;;  %v459_v51 = vld [vmem:[%s1953_s27 + $0x230] sm:$0xff]  ;;  %456 = vst [vmem:[%s1958_s10 + $0x108] sm:$0xff] %v455_v49 }
  0x4d   : > { %458 = vst [vmem:[%s1958_s10 + $0x110] sm:$0xff] %v457_v50  ;;  %460 = vst [vmem:[%s1958_s10 + $0x118] sm:$0xff] %v459_v51  ;;  %v461_v52 = vld [vmem:[%s1953_s27 + $0x240] sm:$0xff]  ;;  %v463_v53 = vld [vmem:[%s1953_s27 + $0x250] sm:$0xff] }
  0x4e   : > { %v465_v54 = vld [vmem:[%s1953_s27 + $0x260] sm:$0xff]  ;;  %462 = vst [vmem:[%s1958_s10 + $0x120] sm:$0xff] %v461_v52  ;;  %464 = vst [vmem:[%s1958_s10 + $0x128] sm:$0xff] %v463_v53  ;;  %v467_v55 = vld [vmem:[%s1953_s27 + $0x270] sm:$0xff] }
  0x4f   : > { %466 = vst [vmem:[%s1958_s10 + $0x130] sm:$0xff] %v465_v54  ;;  %v469_v56 = vld [vmem:[%s1953_s27 + $0x280] sm:$0xff]  ;;  %v471_v57 = vld [vmem:[%s1953_s27 + $0x290] sm:$0xff]  ;;  %468 = vst [vmem:[%s1958_s10 + $0x138] sm:$0xff] %v467_v55 }
  0x50   : > { %470 = vst [vmem:[%s1958_s10 + $0x140] sm:$0xff] %v469_v56  ;;  %472 = vst [vmem:[%s1958_s10 + $0x148] sm:$0xff] %v471_v57  ;;  %v473_v58 = vld [vmem:[%s1953_s27 + $0x2a0] sm:$0xff]  ;;  %v475_v59 = vld [vmem:[%s1953_s27 + $0x2b0] sm:$0xff] }
  0x51   : > { %v477_v60 = vld [vmem:[%s1953_s27 + $0x2c0] sm:$0xff]  ;;  %474 = vst [vmem:[%s1958_s10 + $0x150] sm:$0xff] %v473_v58  ;;  %476 = vst [vmem:[%s1958_s10 + $0x158] sm:$0xff] %v475_v59  ;;  %v479_v61 = vld [vmem:[%s1953_s27 + $0x2d0] sm:$0xff] }
  0x52   : > { %478 = vst [vmem:[%s1958_s10 + $0x160] sm:$0xff] %v477_v60  ;;  %v481_v62 = vld [vmem:[%s1953_s27 + $0x2e0] sm:$0xff]  ;;  %v483_v63 = vld [vmem:[%s1953_s27 + $0x2f0] sm:$0xff]  ;;  %480 = vst [vmem:[%s1958_s10 + $0x168] sm:$0xff] %v479_v61 }
  0x53   : > { %482 = vst [vmem:[%s1958_s10 + $0x170] sm:$0xff] %v481_v62  ;;  %484 = vst [vmem:[%s1958_s10 + $0x178] sm:$0xff] %v483_v63 }
  0x54 PF: > { %p1450_p0 = scmp.ge.s32.totalorder %s1792_s25, 1  ;;  %p505_p1 = scmp.lt.s32.totalorder %s1792_s25, 7 }
  0x56   : > { %p506_p2 = pnand %p1450_p0, %p505_p1 }
  0x57   : > { %s512_s0 = sand.u32 (!%p506_p2), 1, %s1768_s19   ;;  %s519_s28 = sand.u32 (!%p506_p2), 1, %s1760_s17  }
  0x58   : > { %509 = sbr.rel (%p506_p2) target bundleno = 433 (0x1b1), region = 92  ;;  %s552_s26 = sand.u32 (!%p506_p2), 1, %s1752_s15  }
  0x59   : > { %s1526_s11 = smul.u32 (!%p506_p2), 96, %s512_s0  ;;  %s1451_s5 = sshll.u32 (!%p506_p2), %s552_s26, 7 }
  0x5a   : > { %s1527_s27 = smul.u32 (!%p506_p2), 384, %s519_s28  ;;  %s1452_s29 = sshll.u32 (!%p506_p2), %s1780_s22, 1 }
  0x5b   : > { %p560_p3 = scmp.lt.s32.totalorder (!%p506_p2), %s1452_s29, 3  ;;  %s2069_s19 = scalar_lea.vmem (!%p506_p2), [#allocation3], %s1526_s11 }
  0x5c   : > { %s2071_s17 = scalar_lea.vmem (!%p506_p2), [#allocation4], %s1527_s27  ;;  %s2073_s15 = scalar_lea.vmem (!%p506_p2), [#allocation5], %s1451_s5 }
  0x5d   : > { %s2257_s29 = smov (!%p560_p3, %s1452_s29), 3  ;;  %p1454_p4 = scmp.ne.s32.totalorder %s1776_s21, 0 }
  0x5e   : > { %s562_s6 = scalar_lea.vmem %s2224_s2, %s2257_s29  ;;  %s567_s1 = scalar_lea.vmem %s2225_s3, %s2257_s29 }
  0x5f   : > { %575 = sbr.rel (%p1454_p4) target bundleno = 109 (0x6d), region = 104 }
  0x64   : > { %v1794_v0 = vmov 0.0  }
  0x65   : > { %576 = vst [vmem:[#allocation2 + $0x30] sm:$0xff] %v1794_v0  ;;  %577 = vst [vmem:[#allocation2] sm:$0xff] %v1794_v0 }
  0x66   : > { %578 = vst [vmem:[#allocation2 + $0x58] sm:$0xff] %v1794_v0  ;;  %579 = vst [vmem:[#allocation2 + $0x18] sm:$0xff] %v1794_v0 }
  0x67   : > { %580 = vst [vmem:[#allocation2 + $0x50] sm:$0xff] %v1794_v0  ;;  %581 = vst [vmem:[#allocation2 + $0x68] sm:$0xff] %v1794_v0 }
  0x68   : > { %582 = vst [vmem:[#allocation2 + $0x8] sm:$0xff] %v1794_v0  ;;  %583 = vst [vmem:[#allocation2 + $0x48] sm:$0xff] %v1794_v0 }
  0x69   : > { %584 = vst [vmem:[#allocation2 + $0x40] sm:$0xff] %v1794_v0  ;;  %585 = vst [vmem:[#allocation2 + $0x20] sm:$0xff] %v1794_v0 }
  0x6a   : > { %586 = vst [vmem:[#allocation2 + $0x10] sm:$0xff] %v1794_v0  ;;  %587 = vst [vmem:[#allocation2 + $0x38] sm:$0xff] %v1794_v0 }
  0x6b   : > { %588 = vst [vmem:[#allocation2 + $0x60] sm:$0xff] %v1794_v0  ;;  %589 = vst [vmem:[#allocation2 + $0x70] sm:$0xff] %v1794_v0 }
  0x6c   : > { %590 = vst [vmem:[#allocation2 + $0x78] sm:$0xff] %v1794_v0  ;;  %591 = vst [vmem:[#allocation2 + $0x28] sm:$0xff] %v1794_v0 }
  0x6d PF: > { %v1618_v1 = vld [vmem:[%s2071_s17 + $0x74] ss:$8 sps:$4 sm:$0xff]   ;;  %v1620_v2 = vld [vmem:[%s2071_s17 + $0x70] ss:$8 sps:$4 sm:$0xff]   ;;  %v1795_v3 = vmov 0   ;;  %p1515_p5 = scmp.ne.s32.totalorder %s1776_s21, 2 }
  0x6e   : > { %1081 = vmatprep.mubr.bf16.mxu1 %v1795_v3  ;;  %976 = vmatprep.subr.bf16.mxu0 %v1618_v1  ;;  %v1621_v4 = vld [vmem:[%s2071_s17 + $0x64] ss:$8 sps:$4 sm:$0xff]   ;;  %v1623_v5 = vld [vmem:[%s2071_s17 + $0x60] ss:$8 sps:$4 sm:$0xff]   ;;  %v1624_v6 = vld [vmem:[%s2071_s17 + $0x54] ss:$8 sps:$4 sm:$0xff]  }
  0x6f   : > { %977 = vmatpush1.bf16.msra.mxu0 %v1620_v2  ;;  %v1626_v7 = vld [vmem:[%s2071_s17 + $0x50] ss:$8 sps:$4 sm:$0xff]   ;;  %v1627_v8 = vld [vmem:[%s2071_s17 + $0x44] ss:$8 sps:$4 sm:$0xff]   ;;  %v1639_v9 = vld [vmem:[%s2071_s17 + $0x174] ss:$8 sps:$4 sm:$0xff]  }
  0x70   : > { %978 = vmatprep.subr.bf16.mxu0 %v1621_v4  ;;  %v1641_v10 = vld [vmem:[%s2071_s17 + $0x170] ss:$8 sps:$4 sm:$0xff]   ;;  %v1629_v11 = vld [vmem:[%s2071_s17 + $0x40] ss:$8 sps:$4 sm:$0xff]   ;;  %v1630_v12 = vld [vmem:[%s2071_s17 + $0x34] ss:$8 sps:$4 sm:$0xff]   ;;  %1049 = vmatprep.subr.bf16.mxu1 %v1639_v9 }
  0x71   : > { %v1645_v13 = vld [vmem:[%s2071_s17 + $0x164] ss:$8 sps:$4 sm:$0xff]   ;;  %1050 = vmatpush1.bf16.msra.mxu1 %v1641_v10  ;;  %v1647_v14 = vld [vmem:[%s2071_s17 + $0x160] ss:$8 sps:$4 sm:$0xff]   ;;  %v1632_v15 = vld [vmem:[%s2071_s17 + $0x30] ss:$8 sps:$4 sm:$0xff]  }
  0x72   : > { %1051 = vmatprep.subr.bf16.mxu1 %v1645_v13  ;;  %v1651_v16 = vld [vmem:[%s2071_s17 + $0x154] ss:$8 sps:$4 sm:$0xff]   ;;  %v1633_v17 = vld [vmem:[%s2071_s17 + $0x24] ss:$8 sps:$4 sm:$0xff]   ;;  %v1653_v18 = vld [vmem:[%s2071_s17 + $0x150] ss:$8 sps:$4 sm:$0xff]  }
  0x73   : > { %979 = vmatpush1.bf16.msra.mxu0 %v1623_v5  ;;  %v1657_v19 = vld [vmem:[%s2071_s17 + $0x144] ss:$8 sps:$4 sm:$0xff]   ;;  %v1635_v20 = vld [vmem:[%s2071_s17 + $0x20] ss:$8 sps:$4 sm:$0xff]   ;;  %v1636_v21 = vld [vmem:[%s2071_s17 + $0x14] ss:$8 sps:$4 sm:$0xff]  }
  0x74   : > { %980 = vmatprep.subr.bf16.mxu0 %v1624_v6  ;;  %v1659_v22 = vld [vmem:[%s2071_s17 + $0x140] ss:$8 sps:$4 sm:$0xff]   ;;  %v1663_v23 = vld [vmem:[%s2071_s17 + $0x134] ss:$8 sps:$4 sm:$0xff]   ;;  %v1638_v24 = vld [vmem:[%s2071_s17 + $0x10] ss:$8 sps:$4 sm:$0xff]  }
  0x75   : > { %1052 = vmatpush1.bf16.msra.mxu1 %v1647_v14  ;;  %v1642_v25 = vld [vmem:[%s2071_s17 + $0x4] ss:$8 sps:$4 sm:$0xff]   ;;  %v1665_v26 = vld [vmem:[%s2071_s17 + $0x130] ss:$8 sps:$4 sm:$0xff]   ;;  %v1644_v28 = vld [vmem:[%s2071_s17] ss:$8 sps:$4 sm:$0xff]  }
  0x76   : > { %1053 = vmatprep.subr.bf16.mxu1 %v1651_v16  ;;  %v1669_v27 = vld [vmem:[%s2071_s17 + $0x124] ss:$8 sps:$4 sm:$0xff]   ;;  %v1648_v29 = vld [vmem:[%s2071_s17 + $0xf4] ss:$8 sps:$4 sm:$0xff]   ;;  %v1671_v30 = vld [vmem:[%s2071_s17 + $0x120] ss:$8 sps:$4 sm:$0xff]  }
  0x77   : > { %981 = vmatpush1.bf16.msra.mxu0 %v1626_v7  ;;  %v1675_v31 = vld [vmem:[%s2071_s17 + $0x114] ss:$8 sps:$4 sm:$0xff]   ;;  %v1650_v32 = vld [vmem:[%s2071_s17 + $0xf0] ss:$8 sps:$4 sm:$0xff]   ;;  %v1654_v33 = vld [vmem:[%s2071_s17 + $0xe4] ss:$8 sps:$4 sm:$0xff]  }
  0x78   : > { %982 = vmatprep.subr.bf16.mxu0 %v1627_v8  ;;  %v1677_v34 = vld [vmem:[%s2071_s17 + $0x110] ss:$8 sps:$4 sm:$0xff]   ;;  %v1681_v35 = vld [vmem:[%s2071_s17 + $0x104] ss:$8 sps:$4 sm:$0xff]   ;;  %v1656_v37 = vld [vmem:[%s2071_s17 + $0xe0] ss:$8 sps:$4 sm:$0xff]  }
  0x79   : > { %1054 = vmatpush1.bf16.msra.mxu1 %v1653_v18  ;;  %v1693_v36 = vld [vmem:[%s2069_s19 + $0x4] ss:$12 sps:$4 sm:$0xff]   ;;  %v1660_v38 = vld [vmem:[%s2071_s17 + $0xd4] ss:$8 sps:$4 sm:$0xff]   ;;  %v1683_v39 = vld [vmem:[%s2071_s17 + $0x100] ss:$8 sps:$4 sm:$0xff]  }
  0x7a   : > { %1055 = vmatprep.subr.bf16.mxu1 %v1657_v19  ;;  %1008 = vmatprep.mubr.bf16.mxu0 %v1693_v36  ;;  %v1662_v40 = vld [vmem:[%s2071_s17 + $0xd0] ss:$8 sps:$4 sm:$0xff]   ;;  %v1666_v41 = vld [vmem:[%s2071_s17 + $0xc4] ss:$8 sps:$4 sm:$0xff]   ;;  %v1687_v42 = vld [vmem:[%s2069_s19 + $0x8] ss:$12 sps:$4 sm:$0xff]  }
  0x7b   : > { %983 = vmatpush1.bf16.msra.mxu0 %v1629_v11  ;;  %v1668_v43 = vld [vmem:[%s2071_s17 + $0xc0] ss:$8 sps:$4 sm:$0xff]   ;;  %v1672_v44 = vld [vmem:[%s2071_s17 + $0xb4] ss:$8 sps:$4 sm:$0xff]   ;;  %v1674_v45 = vld [vmem:[%s2071_s17 + $0xb0] ss:$8 sps:$4 sm:$0xff]  }
  0x7c   : > { %984 = vmatprep.subr.bf16.mxu0 %v1630_v12  ;;  %v1678_v46 = vld [vmem:[%s2071_s17 + $0xa4] ss:$8 sps:$4 sm:$0xff]   ;;  %v1680_v48 = vld [vmem:[%s2071_s17 + $0xa0] ss:$8 sps:$4 sm:$0xff]   ;;  %v1684_v49 = vld [vmem:[%s2071_s17 + $0x94] ss:$8 sps:$4 sm:$0xff]  }
  0x7d   : > { %1056 = vmatpush1.bf16.msra.mxu1 %v1659_v22  ;;  %v1694_v47 = vld [vmem:[%s2069_s19 + $0x20] ss:$12 sps:$4 sm:$0xff]   ;;  %v1686_v50 = vld [vmem:[%s2071_s17 + $0x90] ss:$8 sps:$4 sm:$0xff]   ;;  %v1695_v55 = vld [vmem:[%s2069_s19 + $0x1c] ss:$12 sps:$4 sm:$0xff]  }
  0x7e   : > { %1057 = vmatprep.subr.bf16.mxu1 %v1663_v23  ;;  %v1688_v51 = vld [vmem:[%s2071_s17 + $0x84] ss:$8 sps:$4 sm:$0xff]   ;;  %v1690_v53 = vld [vmem:[%s2071_s17 + $0x80] ss:$8 sps:$4 sm:$0xff]   ;;  %v1702_v56 = vld [vmem:[%s2069_s19 + $0x50] ss:$12 sps:$4 sm:$0xff]  }
  0x7f   : > { %985 = vmatpush1.bf16.msra.mxu0 %v1632_v15  ;;  %v1698_v52 = vld [vmem:[%s2069_s19 + $0x38] ss:$12 sps:$4 sm:$0xff]   ;;  %v1691_v54 = vld [vmem:[%s2069_s19] ss:$12 sps:$4 sm:$0xff]   ;;  %v1701_v59 = vld [vmem:[%s2069_s19 + $0x30] ss:$12 sps:$4 sm:$0xff]  }
  0x80   : > { %986 = vmatprep.subr.bf16.mxu0 %v1633_v17  ;;  %v1697_v57 = vld [vmem:[%s2069_s19 + $0x18] ss:$12 sps:$4 sm:$0xff]   ;;  %v1699_v58 = vld [vmem:[%s2069_s19 + $0x34] ss:$12 sps:$4 sm:$0xff]   ;;  %v599_v36 = vld [vmem:[#allocation2 + $0x48] sm:$0xff] }
  0x81   : > { %1058 = vmatpush1.bf16.msra.mxu1 %v1665_v26  ;;  %v1703_v60 = vld [vmem:[%s2069_s19 + $0x4c] ss:$12 sps:$4 sm:$0xff]   ;;  %v1705_v61 = vld [vmem:[%s2069_s19 + $0x48] ss:$12 sps:$4 sm:$0xff]   ;;  %v593_v9 = vld [vmem:[#allocation2] sm:$0xff] }
  0x82   : > { %1059 = vmatprep.subr.bf16.mxu1 %v1669_v27  ;;  %v592_v6 = vld [vmem:[#allocation2 + $0x30] sm:$0xff]  ;;  %v594_v14 = vld [vmem:[#allocation2 + $0x58] sm:$0xff]  ;;  %v597_v27 = vld [vmem:[#allocation2 + $0x68] sm:$0xff] }
  0x83   : > { %987 = vmatpush1.bf16.msra.mxu0 %v1635_v20  ;;  %v595_v18 = vld [vmem:[#allocation2 + $0x18] sm:$0xff]  ;;  %v596_v23 = vld [vmem:[#allocation2 + $0x50] sm:$0xff] }
  0x84   : > { %988 = vmatprep.subr.bf16.mxu0 %v1636_v21 }
  0x85   : > { %1060 = vmatpush1.bf16.msra.mxu1 %v1671_v30 }
  0x86   : > { %1061 = vmatprep.subr.bf16.mxu1 %v1675_v31 }
  0x87   : > { %989 = vmatpush1.bf16.msra.mxu0 %v1638_v24 }
  0x88   : > { %990 = vmatprep.subr.bf16.mxu0 %v1642_v25 }
  0x89   : > { %1062 = vmatpush1.bf16.msra.mxu1 %v1677_v34 }
  0x8a   : > { %1063 = vmatprep.subr.bf16.mxu1 %v1681_v35 }
  0x8b   : > { %991 = vmatpush1.bf16.msra.mxu0 %v1644_v28 }
  0x8c   : > { %992 = vmatprep.subr.bf16.mxu0 %v1648_v29 }
  0x8d   : > { %1064 = vmatpush1.bf16.msra.mxu1 %v1683_v39 }
  0x8f   : > { %993 = vmatpush2.bf16.msra.mxu0 %v1650_v32  ;;  %v598_v32 = vld [vmem:[#allocation2 + $0x8] sm:$0xff] }
  0x90   : > { %994 = vmatprep.subr.bf16.mxu0 %v1654_v33  ;;  %1082 = vmatmul.mubr.bf16.vlgmr.msra.gmra.mxu1 %v1687_v42 }
  0x91   : > { %1091 = vmatprep.mubr.bf16.mxu1 %v1795_v3 }
  0x93   : > { %995 = vmatpush2.bf16.msra.mxu0 %v1656_v37 }
  0x94   : > { %996 = vmatprep.subr.bf16.mxu0 %v1660_v38 }
  0x97   : > { %997 = vmatpush2.bf16.msra.mxu0 %v1662_v40 }
  0x98   : > { %998 = vmatprep.subr.bf16.mxu0 %v1666_v41  ;;  %1092 = vmatmul.mubr.bf16.gmra.mxu1 %v1694_v47  ;;  %v600_v41 = vld [vmem:[#allocation2 + $0x40] sm:$0xff] }
  0x99   : > { %1101 = vmatprep.mubr.bf16.mxu1 %v1795_v3 }
  0x9b   : > { %999 = vmatpush2.bf16.msra.mxu0 %v1668_v43 }
  0x9c   : > { %1000 = vmatprep.subr.bf16.mxu0 %v1672_v44 }
  0x9f   : > { %1001 = vmatpush2.bf16.msra.mxu0 %v1674_v45  ;;  %v601_v45 = vld [vmem:[#allocation2 + $0x20] sm:$0xff] }
  0xa0   : > { %1002 = vmatprep.subr.bf16.mxu0 %v1678_v46  ;;  %1102 = vmatmul.mubr.bf16.gmra.mxu1 %v1698_v52 }
  0xa1   : > { %1111 = vmatprep.mubr.bf16.mxu1 %v1795_v3 }
  0xa3   : > { %1003 = vmatpush2.bf16.msra.mxu0 %v1680_v48 }
  0xa4   : > { %1004 = vmatprep.subr.bf16.mxu0 %v1684_v49 }
  0xa7   : > { %1005 = vmatpush2.bf16.msra.mxu0 %v1686_v50  ;;  %v602_v50 = vld [vmem:[#allocation2 + $0x10] sm:$0xff] }
  0xa8   : > { %1006 = vmatprep.subr.bf16.mxu0 %v1688_v51  ;;  %1112 = vmatmul.mubr.bf16.gmra.mxu1 %v1702_v56 }
  0xab   : > { %1007 = vmatpush2.bf16.msra.mxu0 %v1690_v53 }
  0xae   : > { %1009 = vmatmul.mubr.bf16.vlgmr.msra.gmra.mxu0 %v1691_v54 }
  0xaf   : > { %1018 = vmatprep.mubr.bf16.mxu0 %v1695_v55  ;;  %v603_v55 = vld [vmem:[#allocation2 + $0x38] sm:$0xff] }
  0xb6   : > { %1019 = vmatmul.mubr.bf16.gmra.mxu0 %v1697_v57 }
  0xb7   : > { %1028 = vmatprep.mubr.bf16.mxu0 %v1699_v58 }
  0xbe   : > { %1029 = vmatmul.mubr.bf16.gmra.mxu0 %v1701_v59  ;;  %v604_v59 = vld [vmem:[#allocation2 + $0x60] sm:$0xff] }
  0xbf   : > { %1038 = vmatprep.mubr.bf16.mxu0 %v1703_v60 }
  0xc6   : > { %1039 = vmatmul.mubr.bf16.gmra.mxu0 %v1705_v61 }
 0x150   : > { %v1083_v62 = vpop.f32.mrf.mxu1 }
 0x152   : > { %v1085_v63 = vpop.f32.mrf.mxu1 }
 0x154   : > { %v1087_v0 = vpop.f32.mrf.mxu1 }
 0x156   : > { %v1089_v1 = vpop.f32.mrf.mxu1 }
 0x158   : > { %v1093_v2 = vpop.f32.mrf.mxu1 }
 0x15a   : > { %v1095_v3 = vpop.f32.mrf.mxu1 }
 0x15c   : > { %v1097_v4 = vpop.f32.mrf.mxu1 }
 0x15e   : > { %v1099_v5 = vpop.f32.mrf.mxu1 }
 0x160   : > { %v1103_v11 = vpop.f32.mrf.mxu1 }
 0x162   : > { %v1105_v20 = vpop.f32.mrf.mxu1 }
 0x164   : > { %v1107_v29 = vpop.f32.mrf.mxu1 }
 0x166   : > { %v1109_v38 = vpop.f32.mrf.mxu1 }
 0x168   : > { %v1113_v47 = vpop.f32.mrf.mxu1 }
 0x16a   : > { %v1115_v54 = vpop.f32.mrf.mxu1 }
 0x16e   : > { %v1010_v7 = vpop.f32.mrf.mxu0 }
 0x16f   : > { %v1084_v8 = vadd.f32 %v1083_v62, %v1010_v7 }
 0x170   : > { %v1012_v10 = vpop.f32.mrf.mxu0 }
 0x171   : > { %v1122_v12 = vadd.f32 %v1084_v8, %v592_v6  ;;  %v1086_v13 = vadd.f32 %v1085_v63, %v1012_v10  ;;  %v1117_v63 = vpop.f32.mrf.mxu1 }
 0x172   : > { %v1014_v15 = vpop.f32.mrf.mxu0 }
 0x173   : > { %1138 = vst [vmem:[#allocation2 + $0x30] sm:$0xff] %v1122_v12  ;;  %v1123_v16 = vadd.f32 %v1086_v13, %v593_v9  ;;  %v1088_v17 = vadd.f32 %v1087_v0, %v1014_v15  ;;  %v605_v0 = vld [vmem:[#allocation2 + $0x70] sm:$0xff]  ;;  %v1119_v8 = vpop.f32.mrf.mxu1  ;;  %v607_v9 = vld [vmem:[#allocation2 + $0x28] sm:$0xff] }
 0x174   : > { %v1016_v19 = vpop.f32.mrf.mxu0 }
 0x175   : > { %1139 = vst [vmem:[#allocation2] sm:$0xff] %v1123_v16  ;;  %v1124_v21 = vadd.f32 %v1088_v17, %v594_v14  ;;  %v1090_v22 = vadd.f32 %v1089_v1, %v1016_v19 }
 0x176   : > { %v1020_v24 = vpop.f32.mrf.mxu0 }
 0x177   : > { %1140 = vst [vmem:[#allocation2 + $0x58] sm:$0xff] %v1124_v21  ;;  %v1125_v25 = vadd.f32 %v1090_v22, %v595_v18  ;;  %v1094_v26 = vadd.f32 %v1093_v2, %v1020_v24 }
 0x178   : > { %v1022_v28 = vpop.f32.mrf.mxu0 }
 0x179   : > { %1141 = vst [vmem:[#allocation2 + $0x18] sm:$0xff] %v1125_v25  ;;  %v1126_v30 = vadd.f32 %v1094_v26, %v596_v23  ;;  %v1096_v31 = vadd.f32 %v1095_v3, %v1022_v28 }
 0x17a   : > { %v1024_v33 = vpop.f32.mrf.mxu0 }
 0x17b   : > { %1142 = vst [vmem:[#allocation2 + $0x50] sm:$0xff] %v1126_v30  ;;  %v1127_v34 = vadd.f32 %v1096_v31, %v597_v27  ;;  %v1098_v35 = vadd.f32 %v1097_v4, %v1024_v33  ;;  %v606_v4 = vld [vmem:[#allocation2 + $0x78] sm:$0xff] }
 0x17c   : > { %v1026_v37 = vpop.f32.mrf.mxu0 }
 0x17d   : > { %1143 = vst [vmem:[#allocation2 + $0x68] sm:$0xff] %v1127_v34  ;;  %v1128_v39 = vadd.f32 %v1098_v35, %v598_v32  ;;  %v1100_v40 = vadd.f32 %v1099_v5, %v1026_v37 }
 0x17e   : > { %v1030_v42 = vpop.f32.mrf.mxu0 }
 0x17f   : > { %1144 = vst [vmem:[#allocation2 + $0x8] sm:$0xff] %v1128_v39  ;;  %v1129_v43 = vadd.f32 %v1100_v40, %v599_v36  ;;  %v1104_v44 = vadd.f32 %v1103_v11, %v1030_v42 }
 0x180   : > { %v1032_v46 = vpop.f32.mrf.mxu0 }
 0x181   : > { %1145 = vst [vmem:[#allocation2 + $0x48] sm:$0xff] %v1129_v43  ;;  %v1130_v48 = vadd.f32 %v1104_v44, %v600_v41  ;;  %v1106_v49 = vadd.f32 %v1105_v20, %v1032_v46 }
 0x182   : > { %v1034_v51 = vpop.f32.mrf.mxu0 }
 0x183   : > { %1146 = vst [vmem:[#allocation2 + $0x40] sm:$0xff] %v1130_v48  ;;  %v1131_v52 = vadd.f32 %v1106_v49, %v601_v45  ;;  %v1108_v53 = vadd.f32 %v1107_v29, %v1034_v51 }
 0x184   : > { %v1036_v56 = vpop.f32.mrf.mxu0 }
 0x185   : > { %1147 = vst [vmem:[#allocation2 + $0x20] sm:$0xff] %v1131_v52  ;;  %v1132_v57 = vadd.f32 %v1108_v53, %v602_v50  ;;  %v1110_v58 = vadd.f32 %v1109_v38, %v1036_v56 }
 0x186   : > { %v1040_v60 = vpop.f32.mrf.mxu0 }
 0x187   : > { %1148 = vst [vmem:[#allocation2 + $0x10] sm:$0xff] %v1132_v57  ;;  %v1133_v61 = vadd.f32 %v1110_v58, %v603_v55  ;;  %v1114_v62 = vadd.f32 %v1113_v47, %v1040_v60 }
 0x188   : > { %v1042_v1 = vpop.f32.mrf.mxu0 }
 0x189   : > { %1149 = vst [vmem:[#allocation2 + $0x38] sm:$0xff] %v1133_v61  ;;  %v1134_v2 = vadd.f32 %v1114_v62, %v604_v59  ;;  %v1116_v3 = vadd.f32 %v1115_v54, %v1042_v1 }
 0x18a   : > { %v1044_v5 = vpop.f32.mrf.mxu0 }
 0x18b   : > { %1150 = vst [vmem:[#allocation2 + $0x60] sm:$0xff] %v1134_v2  ;;  %v1135_v6 = vadd.f32 %v1116_v3, %v605_v0  ;;  %v1118_v7 = vadd.f32 %v1117_v63, %v1044_v5 }
 0x18c   : > { %v1046_v10 = vpop.f32.mrf.mxu0 }
 0x18d   : > { %1151 = vst [vmem:[#allocation2 + $0x70] sm:$0xff] %v1135_v6  ;;  %v1136_v11 = vadd.f32 %v1118_v7, %v606_v4  ;;  %v1120_v12 = vadd.f32 %v1119_v8, %v1046_v10  ;;  %1157 = sbr.rel (%p1515_p5) target bundleno = 423 (0x1a7), region = 108 }
 0x18f   : > { %1152 = vst [vmem:[#allocation2 + $0x78] sm:$0xff] %v1136_v11  ;;  %v1137_v13 = vadd.f32 %v1120_v12, %v607_v9 }
 0x191   : > { %1153 = vst [vmem:[#allocation2 + $0x28] sm:$0xff] %v1137_v13 }
 0x192   : > { %v1176_v14 = vlaneseq  ;;  %v1174_v16 = vld [vmem:[%s562_s6] sm:$0x3]  ;;  %v1158_v18 = vld [vmem:[#allocation2 + $0x30] sm:$0xff]  ;;  %v1160_v22 = vld [vmem:[#allocation2 + $0x58] sm:$0xff] }
 0x193   : > { %v1202_v17 = vld [vmem:[%s567_s1] sm:$0x3]  ;;  %v1161_v23 = vld [vmem:[#allocation2 + $0x18] sm:$0xff]  ;;  %v1162_v24 = vld [vmem:[#allocation2 + $0x50] sm:$0xff] }
 0x194   : > { %v1177_v15 = vshrl.u32 %v1176_v14, 7  ;;  %v1159_v20 = vld [vmem:[#allocation2] sm:$0xff]  ;;  %v1163_v29 = vld [vmem:[#allocation2 + $0x68] sm:$0xff]  ;;  %v1168_v42 = vld [vmem:[#allocation2 + $0x10] sm:$0xff] }
 0x195   : > { %v1164_v30 = vld [vmem:[#allocation2 + $0x8] sm:$0xff]  ;;  %v1166_v36 = vld [vmem:[#allocation2 + $0x40] sm:$0xff]  ;;  %v1169_v43 = vld [vmem:[#allocation2 + $0x38] sm:$0xff] }
 0x196   : > { %v1178_v19 = vsub.s32 0, %v1177_v15  ;;  %v1182_v21 = vsub.s32 1, %v1177_v15  ;;  %v1165_v31 = vld [vmem:[#allocation2 + $0x48] sm:$0xff]  ;;  %v1167_v37 = vld [vmem:[#allocation2 + $0x20] sm:$0xff]  ;;  %v1171_v49 = vld [vmem:[#allocation2 + $0x70] sm:$0xff] }
 0x197   : > { %v1170_v44 = vld [vmem:[#allocation2 + $0x60] sm:$0xff]  ;;  %v1172_v50 = vld [vmem:[#allocation2 + $0x78] sm:$0xff] }
 0x198   : > { %v1179_v25 = vrot.slane %v1174_v16, %v1178_v19  ;;  %v1207_v26 = vrot.slane %v1202_v17, %v1178_v19  ;;  %v1183_v27 = vrot.slane %v1174_v16, %v1182_v21  ;;  %v1211_v28 = vrot.slane %v1202_v17, %v1182_v21  ;;  %v1173_v51 = vld [vmem:[#allocation2 + $0x28] sm:$0xff] }
 0x19a   : > { %v1186_v32 = vmul.f32 %v1179_v25, %v1158_v18  ;;  %v1187_v33 = vmul.f32 %v1183_v27, %v1159_v20  ;;  %v1188_v34 = vmul.f32 %v1179_v25, %v1160_v22  ;;  %v1189_v35 = vmul.f32 %v1183_v27, %v1161_v23 }
 0x19b   : > { %v1190_v38 = vmul.f32 %v1179_v25, %v1162_v24  ;;  %v1191_v39 = vmul.f32 %v1183_v27, %v1163_v29  ;;  %v1192_v40 = vmul.f32 %v1179_v25, %v1164_v30  ;;  %v1193_v41 = vmul.f32 %v1183_v27, %v1165_v31 }
 0x19c   : > { %v1214_v45 = vadd.f32 %v1207_v26, %v1186_v32  ;;  %v1215_v46 = vadd.f32 %v1211_v28, %v1187_v33  ;;  %v1216_v47 = vadd.f32 %v1207_v26, %v1188_v34  ;;  %v1217_v48 = vadd.f32 %v1211_v28, %v1189_v35 }
 0x19d   : > { %v1218_v52 = vadd.f32 %v1207_v26, %v1190_v38  ;;  %v1219_v53 = vadd.f32 %v1211_v28, %v1191_v39  ;;  %v1220_v54 = vadd.f32 %v1207_v26, %v1192_v40  ;;  %v1221_v55 = vadd.f32 %v1211_v28, %v1193_v41 }
 0x19e   : > { %1230 = vst [vmem:[%s2073_s15] sm:$0xff] %v1214_v45  ;;  %1231 = vst [vmem:[%s2073_s15 + $0x8] sm:$0xff] %v1215_v46  ;;  %v1194_v56 = vmul.f32 %v1179_v25, %v1166_v36  ;;  %v1195_v57 = vmul.f32 %v1183_v27, %v1167_v37  ;;  %v1196_v58 = vmul.f32 %v1179_v25, %v1168_v42 }
 0x19f   : > { %1232 = vst [vmem:[%s2073_s15 + $0x10] sm:$0xff] %v1216_v47  ;;  %1233 = vst [vmem:[%s2073_s15 + $0x18] sm:$0xff] %v1217_v48  ;;  %v1197_v59 = vmul.f32 %v1183_v27, %v1169_v43  ;;  %v1198_v60 = vmul.f32 %v1179_v25, %v1170_v44  ;;  %v1199_v61 = vmul.f32 %v1183_v27, %v1171_v49 }
 0x1a0   : > { %1234 = vst [vmem:[%s2073_s15 + $0x20] sm:$0xff] %v1218_v52  ;;  %1235 = vst [vmem:[%s2073_s15 + $0x28] sm:$0xff] %v1219_v53  ;;  %v1200_v62 = vmul.f32 %v1179_v25, %v1172_v50  ;;  %v1201_v63 = vmul.f32 %v1183_v27, %v1173_v51  ;;  %v1222_v0 = vadd.f32 %v1207_v26, %v1194_v56 }
 0x1a1   : > { %1236 = vst [vmem:[%s2073_s15 + $0x30] sm:$0xff] %v1220_v54  ;;  %1237 = vst [vmem:[%s2073_s15 + $0x38] sm:$0xff] %v1221_v55  ;;  %v1223_v1 = vadd.f32 %v1211_v28, %v1195_v57  ;;  %v1224_v2 = vadd.f32 %v1207_v26, %v1196_v58  ;;  %v1225_v3 = vadd.f32 %v1211_v28, %v1197_v59 }
 0x1a2   : > { %v1226_v4 = vadd.f32 %v1207_v26, %v1198_v60  ;;  %v1227_v5 = vadd.f32 %v1211_v28, %v1199_v61  ;;  %v1228_v6 = vadd.f32 %v1207_v26, %v1200_v62  ;;  %v1229_v7 = vadd.f32 %v1211_v28, %v1201_v63  ;;  %1238 = vst [vmem:[%s2073_s15 + $0x40] sm:$0xff] %v1222_v0 }
 0x1a3   : > { %1239 = vst [vmem:[%s2073_s15 + $0x48] sm:$0xff] %v1223_v1  ;;  %1240 = vst [vmem:[%s2073_s15 + $0x50] sm:$0xff] %v1224_v2 }
 0x1a4   : > { %1241 = vst [vmem:[%s2073_s15 + $0x58] sm:$0xff] %v1225_v3  ;;  %1242 = vst [vmem:[%s2073_s15 + $0x60] sm:$0xff] %v1226_v4 }
 0x1a5   : > { %1243 = vst [vmem:[%s2073_s15 + $0x68] sm:$0xff] %v1227_v5  ;;  %1244 = vst [vmem:[%s2073_s15 + $0x70] sm:$0xff] %v1228_v6 }
 0x1a6   : > { %1245 = vst [vmem:[%s2073_s15 + $0x78] sm:$0xff] %v1229_v7 }
 0x1a7 PF: > { %1252 = sbr.rel (!%p1915_p12) target bundleno = 433 (0x1b1), region = 112  ;;  %s1523_s1 = sshll.u32 (%p1915_p12), %s1780_s22, 4  ;;  %v1271_v8 = vld [vmem:[%s2073_s15] sm:$0xff] (%p1915_p12)  ;;  %v1273_v9 = vld [vmem:[%s2073_s15 + $0x8] sm:$0xff] (%p1915_p12)  ;;  %v1275_v10 = vld [vmem:[%s2073_s15 + $0x10] sm:$0xff] (%p1915_p12) }
 0x1a8   : > { %s1258_s5 = scalar_lea.vmem (%p1915_p12), %s2226_s4, %s1523_s1  ;;  %v1277_v11 = vld [vmem:[%s2073_s15 + $0x18] sm:$0xff] (%p1915_p12)  ;;  %v1279_v12 = vld [vmem:[%s2073_s15 + $0x20] sm:$0xff] (%p1915_p12)  ;;  %v1281_v13 = vld [vmem:[%s2073_s15 + $0x28] sm:$0xff] (%p1915_p12) }
 0x1a9   : > { %1272 = vst [vmem:[%s1258_s5] sm:$0xff] (%p1915_p12), %v1271_v8  ;;  %1274 = vst [vmem:[%s1258_s5 + $0x8] sm:$0xff] (%p1915_p12), %v1273_v9  ;;  %v1283_v14 = vld [vmem:[%s2073_s15 + $0x30] sm:$0xff] (%p1915_p12)  ;;  %v1285_v15 = vld [vmem:[%s2073_s15 + $0x38] sm:$0xff] (%p1915_p12) }
 0x1aa   : > { %1276 = vst [vmem:[%s1258_s5 + $0x20] sm:$0xff] (%p1915_p12), %v1275_v10  ;;  %1278 = vst [vmem:[%s1258_s5 + $0x28] sm:$0xff] (%p1915_p12), %v1277_v11  ;;  %v1287_v16 = vld [vmem:[%s2073_s15 + $0x40] sm:$0xff] (%p1915_p12)  ;;  %v1289_v17 = vld [vmem:[%s2073_s15 + $0x48] sm:$0xff] (%p1915_p12) }
 0x1ab   : > { %1280 = vst [vmem:[%s1258_s5 + $0x40] sm:$0xff] (%p1915_p12), %v1279_v12  ;;  %1282 = vst [vmem:[%s1258_s5 + $0x48] sm:$0xff] (%p1915_p12), %v1281_v13  ;;  %v1291_v18 = vld [vmem:[%s2073_s15 + $0x50] sm:$0xff] (%p1915_p12)  ;;  %v1293_v19 = vld [vmem:[%s2073_s15 + $0x58] sm:$0xff] (%p1915_p12) }
 0x1ac   : > { %1284 = vst [vmem:[%s1258_s5 + $0x60] sm:$0xff] %v1283_v14  ;;  %1286 = vst [vmem:[%s1258_s5 + $0x68] sm:$0xff] %v1285_v15  ;;  %v1295_v20 = vld [vmem:[%s2073_s15 + $0x60] sm:$0xff]  ;;  %v1297_v21 = vld [vmem:[%s2073_s15 + $0x68] sm:$0xff] }
 0x1ad   : > { %1288 = vst [vmem:[%s1258_s5 + $0x80] sm:$0xff] %v1287_v16  ;;  %1290 = vst [vmem:[%s1258_s5 + $0x88] sm:$0xff] %v1289_v17  ;;  %v1299_v22 = vld [vmem:[%s2073_s15 + $0x70] sm:$0xff]  ;;  %v1301_v23 = vld [vmem:[%s2073_s15 + $0x78] sm:$0xff] }
 0x1ae   : > { %1292 = vst [vmem:[%s1258_s5 + $0xa0] sm:$0xff] %v1291_v18  ;;  %1294 = vst [vmem:[%s1258_s5 + $0xa8] sm:$0xff] %v1293_v19 }
 0x1af   : > { %1296 = vst [vmem:[%s1258_s5 + $0xc0] sm:$0xff] %v1295_v20  ;;  %1298 = vst [vmem:[%s1258_s5 + $0xc8] sm:$0xff] %v1297_v21 }
 0x1b0   : > { %1300 = vst [vmem:[%s1258_s5 + $0xe0] sm:$0xff] %v1299_v22  ;;  %1302 = vst [vmem:[%s1258_s5 + $0xe8] sm:$0xff] %v1301_v23 }
 0x1b1 PF: > { %s14_s25 = sadd.s32 1, %s1792_s25   ;;  %s2238_s14 = sld [smem:[#allocation6_spill]] }
 0x1b2   : > { %p11_p6 = scmp.ge.s32.totalorder %s14_s25, 8   ;;  %s2239_s29 = sld [smem:[#allocation7_spill]] }
 0x1b3   : > { %s2240_s15 = smov %s1756_s16  ;;  %s2241_s16 = smov %s1913_s13 }
 0x1b4   : > { %s2242_s17 = smov %s1764_s18  ;;  %s2243_s18 = smov %s1910_s12 }
 0x1b5   : > { %s2244_s19 = smov %s1772_s20  ;;  %s2245_s20 = smov %s1896_s7 }
 0x1b6   : > { %s2246_s21 = smov %s1784_s23  ;;  %s2247_s22 = smov %s1788_s24 }
 0x1b7   : > { %s2248_s23 = smov %s2238_s14  ;;  %13 = sbr.rel (!%p11_p6) target bundleno = 9 (0x9), region = 186 }
 0x1b8   : > { %s2249_s24 = smov %s2239_s29 }

// kernel: vanilla_forward.26
= control target key start
LH: loop header
LB: loop body
LE: loop exit
PB: predicated region body
PF: predicated region fallthrough
CT: control target
= control target key end

     0   :  { %s148_s0 = inlined_call_operand.vmem [shape: f32[64,128], index: 0, kind: input, shape index: {}]   ;;  %s149_s1 = inlined_call_operand.vmem [shape: f32[1,128], index: 1, kind: input, shape index: {}]   ;;  %s150_s2 = inlined_call_operand.vmem [shape: f32[1,128], index: 2, kind: input, shape index: {}]   ;;  %s151_s3 = inlined_call_operand.vmem [shape: f32[64,128], index: 3, kind: output, shape index: {}]  }
   0x1   :  { %v14_v0 = vld [vmem:[%s148_s0] sm:$0xff]  ;;  %v15_v4 = vld [vmem:[%s148_s0 + $0x8] sm:$0xff]  ;;  %v16_v5 = vld [vmem:[%s148_s0 + $0x10] sm:$0xff] }
   0x2   :  { %v72_v1 = vld [vmem:[%s149_s1] ss:$0 sm:$0xff]  ;;  %v17_v6 = vld [vmem:[%s148_s0 + $0x18] sm:$0xff]  ;;  %v19_v11 = vld [vmem:[%s148_s0 + $0x28] sm:$0xff] }
   0x3   :  { %v73_v2 = vld [vmem:[%s150_s2] ss:$0 sm:$0xff]  ;;  %v29_v3 = vmul.f32 %v72_v1, %v14_v0  ;;  %v30_v7 = vmul.f32 %v72_v1, %v15_v4  ;;  %v31_v8 = vmul.f32 %v72_v1, %v16_v5  ;;  %v32_v9 = vmul.f32 %v72_v1, %v17_v6  ;;  %v20_v12 = vld [vmem:[%s148_s0 + $0x30] sm:$0xff]  ;;  %v21_v17 = vld [vmem:[%s148_s0 + $0x38] sm:$0xff] }
   0x4   :  { %v18_v10 = vld [vmem:[%s148_s0 + $0x20] sm:$0xff]  ;;  %v34_v15 = vmul.f32 %v72_v1, %v19_v11  ;;  %v35_v16 = vmul.f32 %v72_v1, %v20_v12  ;;  %v36_v21 = vmul.f32 %v72_v1, %v21_v17 }
   0x5   :  { %v44_v13 = vadd.f32 %v73_v2, %v29_v3  ;;  %v33_v14 = vmul.f32 %v72_v1, %v18_v10  ;;  %v45_v18 = vadd.f32 %v73_v2, %v30_v7  ;;  %v46_v19 = vadd.f32 %v73_v2, %v31_v8 }
   0x6   :  { %v47_v20 = vadd.f32 %v73_v2, %v32_v9  ;;  %v49_v24 = vadd.f32 %v73_v2, %v34_v15  ;;  %v50_v25 = vadd.f32 %v73_v2, %v35_v16  ;;  %v51_v29 = vadd.f32 %v73_v2, %v36_v21 }
   0x7   :  { %v52_v22 = vmax.f32 %v44_v13, 0.0  ;;  %v48_v23 = vadd.f32 %v73_v2, %v33_v14  ;;  %v53_v26 = vmax.f32 %v45_v18, 0.0  ;;  %v54_v27 = vmax.f32 %v46_v19, 0.0 }
   0x8   :  { %v55_v28 = vmax.f32 %v47_v20, 0.0  ;;  %v57_v31 = vmax.f32 %v49_v24, 0.0  ;;  %v58_v32 = vmax.f32 %v50_v25, 0.0  ;;  %v59_v33 = vmax.f32 %v51_v29, 0.0 }
   0x9   :  { %60 = vst [vmem:[%s151_s3] sm:$0xff] %v52_v22  ;;  %v56_v30 = vmax.f32 %v48_v23, 0.0  ;;  %61 = vst [vmem:[%s151_s3 + $0x8] sm:$0xff] %v53_v26 }
   0xa   :  { %62 = vst [vmem:[%s151_s3 + $0x10] sm:$0xff] %v54_v27  ;;  %63 = vst [vmem:[%s151_s3 + $0x18] sm:$0xff] %v55_v28 }
   0xb   :  { %64 = vst [vmem:[%s151_s3 + $0x20] sm:$0xff] %v56_v30  ;;  %65 = vst [vmem:[%s151_s3 + $0x28] sm:$0xff] %v57_v31 }
   0xc   :  { %66 = vst [vmem:[%s151_s3 + $0x30] sm:$0xff] %v58_v32  ;;  %67 = vst [vmem:[%s151_s3 + $0x38] sm:$0xff] %v59_v33 }

// kernel: vanilla_forward.28
= control target key start
LH: loop header
LB: loop body
LE: loop exit
PB: predicated region body
PF: predicated region fallthrough
CT: control target
= control target key end

     0   :  { %s1032_s15 = smov 0   ;;  %s1034_s16 = smov 0   ;;  %s1142_s0 = inlined_call_operand.vmem [shape: bf16[16,1152], index: 0, kind: input, shape index: {}]   ;;  %s1143_s1 = inlined_call_operand.vmem [shape: bf16[1152,128], index: 1, kind: input, shape index: {}]   ;;  %s1144_s2 = inlined_call_operand.vmem [shape: f32[1,128], index: 2, kind: input, shape index: {}]   ;;  %s1145_s3 = inlined_call_operand.vmem [shape: f32[1,128], index: 3, kind: input, shape index: {}]   ;;  %s1146_s4 = inlined_call_operand.vmem [shape: f32[16,128], index: 4, kind: output, shape index: {}]  }
   0x1   :  { %s1036_s17 = smov 0   ;;  %s1038_s18 = smov 0  }
   0x2   :  { %s1040_s19 = smov 0  }
   0x3 LB: > { %s26_s20 = sadd.s32 1, %s998_s18  ;;  %p49_p1 = scmp.ne.s32.totalorder %s990_s16, %s986_s15  ;;  %s1002_s19 = sphi %s1040_s19, %s14_s19   ;;  %s998_s18 = sphi %s1038_s18, %s1150_s18   ;;  %s994_s17 = sphi %s1036_s17, %s1149_s17   ;;  %s990_s16 = sphi %s1034_s16, %s1148_s16   ;;  %s986_s15 = sphi %s1032_s15, %s1147_s15  }
   0x4   : > { %p27_p0 = scmp.ge.s32.totalorder %s26_s20, 3  ;;  %p50_p2 = scmp.eq.s32.totalorder %s1002_s19, 0 }
   0x5   : > { %s42_s22 = sadd.s32 1, %s990_s16  ;;  %p796_p5 = scmp.ge.s32.totalorder %s1002_s19, 3 }
   0x6   : > { %s1152_s20 = smov (%p27_p0, %s26_s20), 0  ;;  %p51_p3 = por %p50_p2, %p49_p1 }
   0x7   : > { %s38_s21 = ssub.s32 %s998_s18, %s1152_s20  ;;  %195 = sbr.rel (%p796_p5) target bundleno = 19 (0x13), region = 24 }
   0x8   : > { %p40_p4 = scmp.eq.s32.totalorder %s38_s21, 0 }
   0xa   : > { %s1067_s23 = scalar_select %p40_p4, %s990_s16, %s42_s22  }
   0xc   : > { %198 = sbr.rel (!%p51_p3) target bundleno = 19 (0x13), region = 28  ;;  %s200_s24 = sand.u32 (%p51_p3), 1, %s990_s16  }
   0xd   : > { %s839_s25 = smul.u32 (%p51_p3), 12, %s998_s18 }
   0xe   : > { %s891_s26 = smul.u32 (%p51_p3), 24, %s200_s24 }
   0xf   : > { %s208_s29 = scalar_lea.vmem (%p51_p3), %s1142_s0, %s839_s25 }
  0x10   : > { %v223_v0 = vld [vmem:[%s208_s29] sm:$0xff] (%p51_p3)  ;;  %v798_v2 = vld [vmem:[%s208_s29 + $0x8] sm:$0xf] (%p51_p3)  ;;  %s202_s30 = scalar_lea.vmem (%p51_p3), [#allocation3], %s891_s26  ;;  %v800_v3 = vld [vmem:[%s208_s29 + $0x2c] sm:$0xf] (%p51_p3) }
  0x11   : > { %v225_v1 = vld [vmem:[%s208_s29 + $0x24] sm:$0xff]  ;;  %224 = vst [vmem:[%s202_s30] sm:$0xff] %v223_v0  ;;  %799 = vst [vmem:[%s202_s30 + $0x8] sm:$0xf] %v798_v2 }
  0x12   : > { %226 = vst [vmem:[%s202_s30 + $0xc] sm:$0xff] %v225_v1  ;;  %801 = vst [vmem:[%s202_s30 + $0x14] sm:$0xf] %v800_v3 }
  0x13 PF: > { %p802_p6 = scmp.ge.s32.totalorder %s1002_s19, 1  ;;  %p255_p7 = scmp.lt.s32.totalorder %s1002_s19, 4 }
  0x15   : > { %p256_p8 = pnand %p802_p6, %p255_p7 }
  0x16   : > { %s262_s5 = sand.u32 (!%p256_p8), 1, %s986_s15   ;;  %s306_s6 = smul.u32 (!%p256_p8), 48, %s994_s17 }
  0x17   : > { %259 = sbr.rel (%p256_p8) target bundleno = 289 (0x121), region = 58  ;;  %p804_p10 = scmp.ne.s32.totalorder (!%p256_p8), %s994_s17, 0 }
  0x18   : > { %s892_s7 = smul.u32 (!%p256_p8), 24, %s262_s5  ;;  %p307_p9 = scmp.lt.s32.totalorder (!%p256_p8), %s306_s6, 143 }
  0x1a   : > { %s1084_s12 = scalar_lea.vmem (!%p256_p8), [#allocation3], %s892_s7 }
  0x1c   : > { %s1154_s6 = smov (!%p307_p9, %s306_s6), 143  ;;  %334 = sbr.rel (%p804_p10) target bundleno = 35 (0x23), region = 66 }
  0x1d   : > { %s803_s8 = sshll.u32 %s1154_s6, 2 }
  0x1e   : > { %s1082_s11 = scalar_lea.vmem %s1143_s1, %s803_s8 }
  0x21   : > { %v1004_v4 = vmov 0.0  }
  0x22   : > { %335 = vst [vmem:[#allocation2] sm:$0xff] %v1004_v4  ;;  %336 = vst [vmem:[#allocation2 + $0x8] sm:$0xff] %v1004_v4 }
  0x23 PF: > { %v936_v5 = vld [vmem:[%s1082_s11 + $0x78] sm:$0xff]   ;;  %v1005_v6 = vmov 0.0   ;;  %vm1006_vm0 = vmmov 0   ;;  %v939_v9 = vld [vmem:[%s1082_s11 + $0x70] sm:$0xff]   ;;  %v942_v12 = vld [vmem:[%s1082_s11 + $0x68] sm:$0xff]   ;;  %p832_p11 = scmp.ne.s32.totalorder %s994_s17, 2 }
  0x24   : > { %871 = vmatprep.subr.bf16.mxu1 %v1005_v6  ;;  %v937_v7 = vld [vmem:[%s1082_s11 + $0xb8] sm:$0xff]   ;;  %840 = vmatprep.subr.bf16.mxu0 %v936_v5  ;;  %v940_v10 = vld [vmem:[%s1082_s11 + $0xb0] sm:$0xff]   ;;  %v943_v13 = vld [vmem:[%s1082_s11 + $0xa8] sm:$0xff]  }
  0x25   : > { %v938_v8 = vld [vmem:[%s1082_s11 + $0x38] sm:$0xff]   ;;  %887 = vmatprep.mubr.msk.bf16.mxu1 %vm1006_vm0, %v1005_v6  ;;  %872 = vmatpush3.bf16.msra.mxu1 %v937_v7  ;;  %v941_v11 = vld [vmem:[%s1082_s11 + $0x30] sm:$0xff]   ;;  %v944_v14 = vld [vmem:[%s1082_s11 + $0x28] sm:$0xff]  }
  0x26   : > { %841 = vmatpush3.bf16.msra.mxu0 %v938_v8  ;;  %873 = vmatprep.subr.bf16.mxu1 %v1005_v6  ;;  %v945_v15 = vld [vmem:[%s1082_s11 + $0x60] sm:$0xff]   ;;  %v948_v18 = vld [vmem:[%s1082_s11 + $0x58] sm:$0xff]   ;;  %v951_v21 = vld [vmem:[%s1082_s11 + $0x50] sm:$0xff]  }
  0x27   : > { %842 = vmatprep.subr.bf16.mxu0 %v939_v9  ;;  %v946_v16 = vld [vmem:[%s1082_s11 + $0xa0] sm:$0xff]   ;;  %v949_v19 = vld [vmem:[%s1082_s11 + $0x98] sm:$0xff]   ;;  %v952_v22 = vld [vmem:[%s1082_s11 + $0x90] sm:$0xff]  }
  0x28   : > { %v947_v17 = vld [vmem:[%s1082_s11 + $0x20] sm:$0xff]   ;;  %v950_v20 = vld [vmem:[%s1082_s11 + $0x18] sm:$0xff]   ;;  %v953_v23 = vld [vmem:[%s1082_s11 + $0x10] sm:$0xff]  }
  0x29   : > { %874 = vmatpush3.bf16.msra.mxu1 %v940_v10  ;;  %v954_v24 = vld [vmem:[%s1082_s11 + $0x48] sm:$0xff]   ;;  %v957_v27 = vld [vmem:[%s1082_s11 + $0x40] sm:$0xff]  }
  0x2a   : > { %843 = vmatpush3.bf16.msra.mxu0 %v941_v11  ;;  %875 = vmatprep.subr.bf16.mxu1 %v1005_v6  ;;  %v955_v25 = vld [vmem:[%s1082_s11 + $0x88] sm:$0xff]   ;;  %v958_v29 = vld [vmem:[%s1082_s11 + $0x80] sm:$0xff]  }
  0x2b   : > { %844 = vmatprep.subr.bf16.mxu0 %v942_v12  ;;  %v956_v26 = vld [vmem:[%s1082_s11 + $0x8] sm:$0xff]   ;;  %v959_v30 = vld [vmem:[%s1082_s11] sm:$0xff]  }
  0x2c   : > { %v962_v28 = vld [vmem:[%s1084_s12 + $0x4] ss:$12 sps:$4 sm:$0xff]   ;;  %v963_v31 = vld [vmem:[%s1084_s12 + $0x8] ss:$12 sps:$4 sm:$0xff]   ;;  %v960_v32 = vld [vmem:[%s1084_s12] ss:$12 sps:$4 sm:$0xff]  }
  0x2d   : > { %876 = vmatpush3.bf16.msra.mxu1 %v943_v13  ;;  %583 = vmatprep.mubr.bf16.mxu0 %v962_v28  ;;  %v337_v39 = vld [vmem:[#allocation2] sm:$0xff]  ;;  %v338_v46 = vld [vmem:[#allocation2 + $0x8] sm:$0xff] }
  0x2e   : > { %845 = vmatpush3.bf16.msra.mxu0 %v944_v14  ;;  %877 = vmatprep.subr.bf16.mxu1 %v1005_v6 }
  0x2f   : > { %846 = vmatprep.subr.bf16.mxu0 %v945_v15 }
  0x31   : > { %878 = vmatpush3.bf16.msra.mxu1 %v946_v16 }
  0x32   : > { %847 = vmatpush3.bf16.msra.mxu0 %v947_v17  ;;  %879 = vmatprep.subr.bf16.mxu1 %v1005_v6 }
  0x33   : > { %848 = vmatprep.subr.bf16.mxu0 %v948_v18 }
  0x35   : > { %880 = vmatpush3.bf16.msra.mxu1 %v949_v19 }
  0x36   : > { %849 = vmatpush3.bf16.msra.mxu0 %v950_v20  ;;  %881 = vmatprep.subr.bf16.mxu1 %v1005_v6 }
  0x37   : > { %850 = vmatprep.subr.bf16.mxu0 %v951_v21 }
  0x39   : > { %882 = vmatpush3.bf16.msra.mxu1 %v952_v22 }
  0x3a   : > { %851 = vmatpush3.bf16.msra.mxu0 %v953_v23  ;;  %883 = vmatprep.subr.bf16.mxu1 %v1005_v6 }
  0x3b   : > { %852 = vmatprep.subr.bf16.mxu0 %v954_v24 }
  0x3d   : > { %884 = vmatpush3.bf16.msra.mxu1 %v955_v25 }
  0x3e   : > { %853 = vmatpush3.bf16.msra.mxu0 %v956_v26  ;;  %885 = vmatprep.subr.bf16.mxu1 %v1005_v6 }
  0x3f   : > { %854 = vmatprep.subr.bf16.mxu0 %v957_v27 }
  0x41   : > { %886 = vmatpush3.bf16.msra.mxu1 %v958_v29 }
  0x42   : > { %855 = vmatpush3.bf16.msra.mxu0 %v959_v30 }
  0x44   : > { %888 = vmatmul.mubr.bf16.vlgmr.msra.gmra.mxu1 %v963_v31 }
  0x45   : > { %584 = vmatmul.mubr.bf16.vlgmr.msra.gmra.mxu0 %v960_v32 }
 0x104   : > { %v626_v33 = vpop.f32.mrf.mxu1 }
 0x105   : > { %v856_v34 = vpop.f32.mrf.mxu0 }
 0x106   : > { %v889_v35 = vpop.f32.mrf.mxu1 }
 0x107   : > { %v857_v36 = vpop.f32.mrf.mxu0 }
 0x108   : > { %v858_v37 = vadd.f32 %v857_v36, %v856_v34  ;;  %v629_v38 = vpop.f32.mrf.mxu1 }
 0x109   : > { %v859_v40 = vpop.f32.mrf.mxu0 }
 0x10a   : > { %v627_v41 = vadd.f32 %v858_v37, %v626_v33  ;;  %v890_v42 = vpop.f32.mrf.mxu1 }
 0x10b   : > { %v860_v43 = vpop.f32.mrf.mxu0 }
 0x10c   : > { %v633_v44 = vadd.f32 %v627_v41, %v337_v39  ;;  %v861_v45 = vadd.f32 %v860_v43, %v859_v40 }
 0x10e   : > { %635 = vst [vmem:[#allocation2] sm:$0xff] %v633_v44  ;;  %v630_v47 = vadd.f32 %v861_v45, %v629_v38  ;;  %640 = sbr.rel (%p832_p11) target bundleno = 289 (0x121), region = 70 }
 0x110   : > { %v634_v48 = vadd.f32 %v630_v47, %v338_v46 }
 0x112   : > { %636 = vst [vmem:[#allocation2 + $0x8] sm:$0xff] %v634_v48 }
 0x113   : > { %v833_v50 = vld [vmem:[%s1144_s2] ss:$0 sm:$0xff] }
 0x114   : > { %v834_v51 = vld [vmem:[%s1145_s3] ss:$0 sm:$0xff] }
 0x115   : > { %v641_v49 = vld [vmem:[#allocation2] sm:$0xff] }
 0x116   : > { %v650_v52 = vmul.f32 %v833_v50, %v641_v49 }
 0x118   : > { %v659_v55 = vadd.f32 %v834_v51, %v650_v52 }
 0x119   : > { %v642_v53 = vld [vmem:[#allocation2 + $0x8] sm:$0xff] }
 0x11a   : > { %v651_v54 = vmul.f32 %v833_v50, %v642_v53  ;;  %v661_v57 = vmax.f32 %v659_v55, 0.0 }
 0x11c   : > { %v660_v56 = vadd.f32 %v834_v51, %v651_v54  ;;  %663 = vst [vmem:[%s1146_s4] sm:$0xff] %v661_v57 }
 0x11e   : > { %v662_v58 = vmax.f32 %v660_v56, 0.0 }
 0x120   : > { %664 = vst [vmem:[%s1146_s4 + $0x8] sm:$0xff] %v662_v58 }
 0x121 PF: > { %s14_s19 = sadd.s32 1, %s1002_s19   ;;  %s1147_s15 = smov %s990_s16 }
 0x122   : > { %p11_p12 = scmp.ge.s32.totalorder %s14_s19, 5   ;;  %s1148_s16 = smov %s1067_s23 }
 0x123   : > { %s1149_s17 = smov %s998_s18  ;;  %s1150_s18 = smov %s1152_s20 }
 0x124   :  { %13 = sbr.rel (!%p11_p12) target bundleno = 3 (0x3), region = 120 }

// kernel: vanilla_forward.27
= control target key start
LH: loop header
LB: loop body
LE: loop exit
PB: predicated region body
PF: predicated region fallthrough
CT: control target
= control target key end

     0   :  { %v223_v0 = vmov 0.0   ;;  %vm224_vm0 = vmmov 0   ;;  %s289_s1 = inlined_call_operand.vmem [shape: bf16[128,128], index: 1, kind: input, shape index: {}]   ;;  %s290_s0 = inlined_call_operand.vmem [shape: bf16[16,128], index: 0, kind: input, shape index: {}]   ;;  %s291_s2 = inlined_call_operand.vmem [shape: f32[1,128], index: 2, kind: input, shape index: {}]   ;;  %s292_s3 = inlined_call_operand.vmem [shape: f32[1,128], index: 3, kind: input, shape index: {}]   ;;  %s293_s4 = inlined_call_operand.vmem [shape: f32[16,128], index: 4, kind: output, shape index: {}]  }
   0x1   :  { %192 = vmatprep.subr.bf16.mxu0 %v223_v0  ;;  %v214_v1 = vld [vmem:[%s289_s1 + $0x38] sm:$0xff]   ;;  %208 = vmatprep.mubr.msk.bf16.mxu0 %vm224_vm0, %v223_v0  ;;  %v215_v2 = vld [vmem:[%s289_s1 + $0x30] sm:$0xff]   ;;  %v216_v3 = vld [vmem:[%s289_s1 + $0x28] sm:$0xff]  }
   0x2   :  { %193 = vmatpush3.bf16.msra.mxu0 %v214_v1  ;;  %v217_v4 = vld [vmem:[%s289_s1 + $0x20] sm:$0xff]   ;;  %v218_v5 = vld [vmem:[%s289_s1 + $0x18] sm:$0xff]   ;;  %v219_v6 = vld [vmem:[%s289_s1 + $0x10] sm:$0xff]  }
   0x3   :  { %194 = vmatprep.subr.bf16.mxu0 %v223_v0  ;;  %v220_v7 = vld [vmem:[%s289_s1 + $0x8] sm:$0xff]   ;;  %v221_v8 = vld [vmem:[%s289_s1] sm:$0xff]  }
   0x4   :  { %v222_v9 = vld [vmem:[%s290_s0] sm:$0xff]  }
   0x5   :  { %v181_v10 = vld [vmem:[%s291_s2] ss:$0 sm:$0xff] }
   0x6   :  { %195 = vmatpush3.bf16.msra.mxu0 %v215_v2  ;;  %v182_v12 = vld [vmem:[%s292_s3] ss:$0 sm:$0xff] }
   0x7   :  { %196 = vmatprep.subr.bf16.mxu0 %v223_v0 }
   0xa   :  { %197 = vmatpush3.bf16.msra.mxu0 %v216_v3 }
   0xb   :  { %198 = vmatprep.subr.bf16.mxu0 %v223_v0 }
   0xe   :  { %199 = vmatpush3.bf16.msra.mxu0 %v217_v4 }
   0xf   :  { %200 = vmatprep.subr.bf16.mxu0 %v223_v0 }
  0x12   :  { %201 = vmatpush3.bf16.msra.mxu0 %v218_v5 }
  0x13   :  { %202 = vmatprep.subr.bf16.mxu0 %v223_v0 }
  0x16   :  { %203 = vmatpush3.bf16.msra.mxu0 %v219_v6 }
  0x17   :  { %204 = vmatprep.subr.bf16.mxu0 %v223_v0 }
  0x1a   :  { %205 = vmatpush3.bf16.msra.mxu0 %v220_v7 }
  0x1b   :  { %206 = vmatprep.subr.bf16.mxu0 %v223_v0 }
  0x1e   :  { %207 = vmatpush3.bf16.msra.mxu0 %v221_v8 }
  0x21   :  { %209 = vmatmul.mubr.bf16.vlgmr.msra.gmra.mxu0 %v222_v9 }
  0xe1   :  { %v132_v11 = vpop.f32.mrf.mxu0 }
  0xe2   :  { %v155_v13 = vmul.f32 %v181_v10, %v132_v11 }
  0xe3   :  { %v210_v14 = vpop.f32.mrf.mxu0 }
  0xe4   :  { %v164_v15 = vadd.f32 %v182_v12, %v155_v13 }
  0xe5   :  { %v135_v16 = vpop.f32.mrf.mxu0 }
  0xe6   :  { %166 = vst [vmem:[%s293_s4] sm:$0xff] %v164_v15  ;;  %v156_v17 = vmul.f32 %v181_v10, %v135_v16 }
  0xe7   :  { %v211_v18 = vpop.f32.mrf.mxu0 }
  0xe8   :  { %v165_v19 = vadd.f32 %v182_v12, %v156_v17 }
  0xea   :  { %167 = vst [vmem:[%s293_s4 + $0x8] sm:$0xff] %v165_v19 }

// kernel: vanilla_forward.29
= control target key start
LH: loop header
LB: loop body
LE: loop exit
PB: predicated region body
PF: predicated region fallthrough
CT: control target
= control target key end

     0   :  { %10 = vsyncpa [#allocation5], 0  ;;  %s1136_s18 = smov 0   ;;  %s1138_s19 = smov 0   ;;  %s1264_s0 = inlined_call_operand.vmem [shape: bf16[16,1152], index: 0, kind: input, shape index: {}]   ;;  %s1265_s1 = inlined_call_operand.vmem [shape: bf16[1152,128], index: 1, kind: input, shape index: {}]   ;;  %s1266_s2 = inlined_call_operand.vmem [shape: f32[1,128], index: 2, kind: input, shape index: {}]   ;;  %s1267_s3 = inlined_call_operand.vmem [shape: f32[1,128], index: 3, kind: input, shape index: {}]   ;;  %s1268_s4 = inlined_call_operand.vmem [shape: f32[16,128], index: 4, kind: input, shape index: {}]   ;;  %s1269_s5 = inlined_call_operand.hbm [shape: f32[16,128], index: 5, kind: output, shape index: {}]  }
   0x1   :  { %s1140_s20 = smov 0   ;;  %s1142_s21 = smov 0  }
   0x2   :  { %s1144_s22 = smov 0  }
   0x3 LB: > { %s850_s23 = sadd.s32 4294967295, %s1098_s22   ;;  %s28_s24 = sadd.s32 1, %s1094_s21  ;;  %s1098_s22 = sphi %s1144_s22, %s16_s22   ;;  %s1094_s21 = sphi %s1142_s21, %s1274_s21   ;;  %s1090_s20 = sphi %s1140_s20, %s1273_s20   ;;  %s1086_s19 = sphi %s1138_s19, %s1272_s19   ;;  %s1082_s18 = sphi %s1136_s18, %s1271_s18  }
   0x4   : > { %p29_p0 = scmp.ge.s32.totalorder %s28_s24, 3  ;;  %p51_p1 = scmp.ne.s32.totalorder %s1086_s19, %s1082_s18 }
   0x5   : > { %p52_p2 = scmp.eq.s32.totalorder %s1098_s22, 0  ;;  %s44_s26 = sadd.s32 1, %s1086_s19 }
   0x6   : > { %s1276_s24 = smov (%p29_p0, %s28_s24), 0  ;;  %p855_p5 = scmp.ge.s32.totalorder %s1098_s22, 3 }
   0x7   : > { %p53_p3 = por %p52_p2, %p51_p1  ;;  %s40_s25 = ssub.s32 %s1094_s21, %s1276_s24 }
   0x8   : > { %p42_p4 = scmp.eq.s32.totalorder %s40_s25, 0  ;;  %237 = sbr.rel (%p855_p5) target bundleno = 20 (0x14), region = 28 }
   0xa   : > { %s1172_s27 = scalar_select %p42_p4, %s1086_s19, %s44_s26  }
   0xd   : > { %240 = sbr.rel (!%p53_p3) target bundleno = 20 (0x14), region = 32  ;;  %s242_s28 = sand.u32 (%p53_p3), 1, %s1086_s19  }
   0xe   : > { %s898_s29 = smul.u32 (%p53_p3), 12, %s1094_s21 }
   0xf   : > { %s950_s30 = smul.u32 (%p53_p3), 24, %s242_s28 }
  0x10   : > { %s250_s8 = scalar_lea.vmem (%p53_p3), %s1264_s0, %s898_s29 }
  0x11   : > { %v265_v0 = vld [vmem:[%s250_s8] sm:$0xff] (%p53_p3)  ;;  %v857_v2 = vld [vmem:[%s250_s8 + $0x8] sm:$0xf] (%p53_p3)  ;;  %s244_s9 = scalar_lea.vmem (%p53_p3), [#allocation3], %s950_s30  ;;  %v859_v3 = vld [vmem:[%s250_s8 + $0x2c] sm:$0xf] (%p53_p3) }
  0x12   : > { %v267_v1 = vld [vmem:[%s250_s8 + $0x24] sm:$0xff]  ;;  %266 = vst [vmem:[%s244_s9] sm:$0xff] %v265_v0  ;;  %858 = vst [vmem:[%s244_s9 + $0x8] sm:$0xf] %v857_v2 }
  0x13   : > { %268 = vst [vmem:[%s244_s9 + $0xc] sm:$0xff] %v267_v1  ;;  %860 = vst [vmem:[%s244_s9 + $0x14] sm:$0xf] %v859_v3 }
  0x14 PF: > { %p861_p6 = scmp.ge.s32.totalorder %s1098_s22, 1  ;;  %p297_p7 = scmp.lt.s32.totalorder %s1098_s22, 4 }
  0x16   : > { %p298_p8 = pnand %p861_p6, %p297_p7 }
  0x17   : > { %s304_s10 = sand.u32 (!%p298_p8), 1, %s1082_s18   ;;  %s350_s11 = smul.u32 (!%p298_p8), 48, %s1090_s20 }
  0x18   : > { %301 = sbr.rel (%p298_p8) target bundleno = 306 (0x132), region = 62  ;;  %p863_p10 = scmp.ne.s32.totalorder (!%p298_p8), %s1090_s20, 0 }
  0x19   : > { %s951_s12 = smul.u32 (!%p298_p8), 24, %s304_s10  ;;  %p351_p9 = scmp.lt.s32.totalorder (!%p298_p8), %s350_s11, 143 }
  0x1b   : > { %s1189_s17 = scalar_lea.vmem (!%p298_p8), [#allocation3], %s951_s12 }
  0x1d   : > { %s1278_s11 = smov (!%p351_p9, %s350_s11), 143  ;;  %379 = sbr.rel (%p863_p10) target bundleno = 36 (0x24), region = 70 }
  0x1e   : > { %s862_s13 = sshll.u32 %s1278_s11, 2 }
  0x1f   : > { %s1187_s16 = scalar_lea.vmem %s1265_s1, %s862_s13 }
  0x22   : > { %v1100_v4 = vmov 0.0  }
  0x23   : > { %380 = vst [vmem:[#allocation2] sm:$0xff] %v1100_v4  ;;  %381 = vst [vmem:[#allocation2 + $0x8] sm:$0xff] %v1100_v4 }
  0x24 PF: > { %v1004_v5 = vld [vmem:[%s1187_s16 + $0x78] sm:$0xff]   ;;  %v1101_v6 = vmov 0.0   ;;  %vm1102_vm0 = vmmov 0   ;;  %v1007_v9 = vld [vmem:[%s1187_s16 + $0x70] sm:$0xff]   ;;  %v1010_v12 = vld [vmem:[%s1187_s16 + $0x68] sm:$0xff]   ;;  %p891_p11 = scmp.ne.s32.totalorder %s1090_s20, 2 }
  0x25   : > { %930 = vmatprep.subr.bf16.mxu1 %v1101_v6  ;;  %v1005_v7 = vld [vmem:[%s1187_s16 + $0xb8] sm:$0xff]   ;;  %899 = vmatprep.subr.bf16.mxu0 %v1004_v5  ;;  %v1008_v10 = vld [vmem:[%s1187_s16 + $0xb0] sm:$0xff]   ;;  %v1011_v13 = vld [vmem:[%s1187_s16 + $0xa8] sm:$0xff]  }
  0x26   : > { %v1006_v8 = vld [vmem:[%s1187_s16 + $0x38] sm:$0xff]   ;;  %946 = vmatprep.mubr.msk.bf16.mxu1 %vm1102_vm0, %v1101_v6  ;;  %931 = vmatpush3.bf16.msra.mxu1 %v1005_v7  ;;  %v1009_v11 = vld [vmem:[%s1187_s16 + $0x30] sm:$0xff]   ;;  %v1012_v14 = vld [vmem:[%s1187_s16 + $0x28] sm:$0xff]  }
  0x27   : > { %900 = vmatpush3.bf16.msra.mxu0 %v1006_v8  ;;  %932 = vmatprep.subr.bf16.mxu1 %v1101_v6  ;;  %v1013_v15 = vld [vmem:[%s1187_s16 + $0x60] sm:$0xff]   ;;  %v1016_v18 = vld [vmem:[%s1187_s16 + $0x58] sm:$0xff]   ;;  %v1019_v21 = vld [vmem:[%s1187_s16 + $0x50] sm:$0xff]  }
  0x28   : > { %901 = vmatprep.subr.bf16.mxu0 %v1007_v9  ;;  %v1014_v16 = vld [vmem:[%s1187_s16 + $0xa0] sm:$0xff]   ;;  %v1017_v19 = vld [vmem:[%s1187_s16 + $0x98] sm:$0xff]   ;;  %v1020_v22 = vld [vmem:[%s1187_s16 + $0x90] sm:$0xff]  }
  0x29   : > { %v1015_v17 = vld [vmem:[%s1187_s16 + $0x20] sm:$0xff]   ;;  %v1018_v20 = vld [vmem:[%s1187_s16 + $0x18] sm:$0xff]   ;;  %v1021_v23 = vld [vmem:[%s1187_s16 + $0x10] sm:$0xff]  }
  0x2a   : > { %933 = vmatpush3.bf16.msra.mxu1 %v1008_v10  ;;  %v1022_v24 = vld [vmem:[%s1187_s16 + $0x48] sm:$0xff]   ;;  %v1025_v27 = vld [vmem:[%s1187_s16 + $0x40] sm:$0xff]  }
  0x2b   : > { %902 = vmatpush3.bf16.msra.mxu0 %v1009_v11  ;;  %934 = vmatprep.subr.bf16.mxu1 %v1101_v6  ;;  %v1023_v25 = vld [vmem:[%s1187_s16 + $0x88] sm:$0xff]   ;;  %v1026_v29 = vld [vmem:[%s1187_s16 + $0x80] sm:$0xff]  }
  0x2c   : > { %903 = vmatprep.subr.bf16.mxu0 %v1010_v12  ;;  %v1024_v26 = vld [vmem:[%s1187_s16 + $0x8] sm:$0xff]   ;;  %v1027_v30 = vld [vmem:[%s1187_s16] sm:$0xff]  }
  0x2d   : > { %v1030_v28 = vld [vmem:[%s1189_s17 + $0x4] ss:$12 sps:$4 sm:$0xff]   ;;  %v1031_v31 = vld [vmem:[%s1189_s17 + $0x8] ss:$12 sps:$4 sm:$0xff]   ;;  %v1028_v32 = vld [vmem:[%s1189_s17] ss:$12 sps:$4 sm:$0xff]  }
  0x2e   : > { %935 = vmatpush3.bf16.msra.mxu1 %v1011_v13  ;;  %628 = vmatprep.mubr.bf16.mxu0 %v1030_v28  ;;  %v382_v39 = vld [vmem:[#allocation2] sm:$0xff]  ;;  %v383_v46 = vld [vmem:[#allocation2 + $0x8] sm:$0xff] }
  0x2f   : > { %904 = vmatpush3.bf16.msra.mxu0 %v1012_v14  ;;  %936 = vmatprep.subr.bf16.mxu1 %v1101_v6 }
  0x30   : > { %905 = vmatprep.subr.bf16.mxu0 %v1013_v15 }
  0x32   : > { %937 = vmatpush3.bf16.msra.mxu1 %v1014_v16 }
  0x33   : > { %906 = vmatpush3.bf16.msra.mxu0 %v1015_v17  ;;  %938 = vmatprep.subr.bf16.mxu1 %v1101_v6 }
  0x34   : > { %907 = vmatprep.subr.bf16.mxu0 %v1016_v18 }
  0x36   : > { %939 = vmatpush3.bf16.msra.mxu1 %v1017_v19 }
  0x37   : > { %908 = vmatpush3.bf16.msra.mxu0 %v1018_v20  ;;  %940 = vmatprep.subr.bf16.mxu1 %v1101_v6 }
  0x38   : > { %909 = vmatprep.subr.bf16.mxu0 %v1019_v21 }
  0x3a   : > { %941 = vmatpush3.bf16.msra.mxu1 %v1020_v22 }
  0x3b   : > { %910 = vmatpush3.bf16.msra.mxu0 %v1021_v23  ;;  %942 = vmatprep.subr.bf16.mxu1 %v1101_v6 }
  0x3c   : > { %911 = vmatprep.subr.bf16.mxu0 %v1022_v24 }
  0x3e   : > { %943 = vmatpush3.bf16.msra.mxu1 %v1023_v25 }
  0x3f   : > { %912 = vmatpush3.bf16.msra.mxu0 %v1024_v26  ;;  %944 = vmatprep.subr.bf16.mxu1 %v1101_v6 }
  0x40   : > { %913 = vmatprep.subr.bf16.mxu0 %v1025_v27 }
  0x42   : > { %945 = vmatpush3.bf16.msra.mxu1 %v1026_v29 }
  0x43   : > { %914 = vmatpush3.bf16.msra.mxu0 %v1027_v30 }
  0x45   : > { %947 = vmatmul.mubr.bf16.vlgmr.msra.gmra.mxu1 %v1031_v31 }
  0x46   : > { %629 = vmatmul.mubr.bf16.vlgmr.msra.gmra.mxu0 %v1028_v32 }
 0x105   : > { %v671_v33 = vpop.f32.mrf.mxu1 }
 0x106   : > { %v915_v34 = vpop.f32.mrf.mxu0 }
 0x107   : > { %v948_v35 = vpop.f32.mrf.mxu1 }
 0x108   : > { %v916_v36 = vpop.f32.mrf.mxu0 }
 0x109   : > { %v917_v37 = vadd.f32 %v916_v36, %v915_v34  ;;  %v674_v38 = vpop.f32.mrf.mxu1 }
 0x10a   : > { %v918_v40 = vpop.f32.mrf.mxu0 }
 0x10b   : > { %v672_v41 = vadd.f32 %v917_v37, %v671_v33  ;;  %v949_v42 = vpop.f32.mrf.mxu1 }
 0x10c   : > { %v919_v43 = vpop.f32.mrf.mxu0 }
 0x10d   : > { %v678_v44 = vadd.f32 %v672_v41, %v382_v39  ;;  %v920_v45 = vadd.f32 %v919_v43, %v918_v40 }
 0x10f   : > { %680 = vst [vmem:[#allocation2] sm:$0xff] %v678_v44  ;;  %v675_v47 = vadd.f32 %v920_v45, %v674_v38  ;;  %685 = sbr.rel (%p891_p11) target bundleno = 290 (0x122), region = 74 }
 0x111   : > { %v679_v48 = vadd.f32 %v675_v47, %v383_v46 }
 0x113   : > { %681 = vst [vmem:[#allocation2 + $0x8] sm:$0xff] %v679_v48 }
 0x114   : > { %v892_v50 = vld [vmem:[%s1266_s2] ss:$0 sm:$0xff]  ;;  %v707_v57 = vld [vmem:[%s1268_s4 + $0x8] sm:$0xff] }
 0x115   : > { %v893_v51 = vld [vmem:[%s1267_s3] ss:$0 sm:$0xff] }
 0x116   : > { %v686_v49 = vld [vmem:[#allocation2] sm:$0xff] }
 0x117   : > { %v695_v52 = vmul.f32 %v892_v50, %v686_v49  ;;  %v706_v54 = vld [vmem:[%s1268_s4] sm:$0xff] }
 0x119   : > { %v704_v56 = vadd.f32 %v893_v51, %v695_v52 }
 0x11a   : > { %v687_v53 = vld [vmem:[#allocation2 + $0x8] sm:$0xff] }
 0x11b   : > { %v696_v55 = vmul.f32 %v892_v50, %v687_v53  ;;  %v708_v59 = vadd.f32 %v706_v54, %v704_v56 }
 0x11d   : > { %v705_v58 = vadd.f32 %v893_v51, %v696_v55  ;;  %710 = vst [vmem:[#allocation4] sm:$0xff] %v708_v59 }
 0x11f   : > { %v709_v60 = vadd.f32 %v707_v57, %v705_v58 }
 0x121   : > { %711 = vst [vmem:[#allocation4 + $0x8] sm:$0xff] %v709_v60 }
 0x122 PF: > { %p1234_p12 = scmp.eq.s32.totalorder %s850_s23, 2  ;;  %s1103_s8 = smov [#allocation4]  }
 0x123   : > { %s722_s9 = sshll.u32 %s1103_s8, 4  ;;  %s723_s9 = int_to_ptr.vmem [resolvable:$true] %s722_s9 }
 0x124   : > { %s1032_s10 = scalar_lea.vmem %s723_s9, 256  ;;  %p1039_p2 = scmp.lt.s32.totalorder %s723_s9, %s723_s9 }
 0x125   : > { %p1033_p13 = scmp.ne.s32.totalorder %s723_s9, %s1032_s10  ;;  %p1040_p3 = scmp.lt.s32.totalorder %s1032_s10, %s1032_s10 }
 0x127   : > { %p1034_p0 = pnand %p1033_p13, %p1234_p12  ;;  %p1041_p4 = por %p1040_p3, %p1039_p2 }
 0x129   : > { %p1035_p1 = pneg %p1034_p0 }
 0x12b   : > { %p1042_p5 = pnand %p1041_p4, %p1035_p1 }
 0x12d   : > { %1045 = shalt.err (!%p1042_p5)
}
 0x12e   : > { %s1104_s11 = smov 128   ;;  %s1105_s23 = smov 8  }
 0x12f   : > { %953 = dma.vmem_to_hbm [thread:$0]  (%p1234_p12), %s723_s9, 256, %s1269_s5, [#allocation5], %s1104_s11, %s1104_s11, %s1105_s23  }
 0x130   : > { %1077 = dma.done.wait (%p1234_p12), [#allocation5], 256  }
 0x131   : > { %1079 = vsyncadd (%p1234_p12), [#allocation5], 4294967040 }
 0x132 PF: > { %s16_s22 = sadd.s32 1, %s1098_s22   ;;  %s1271_s18 = smov %s1086_s19 }
 0x133   : > { %p13_p6 = scmp.ge.s32.totalorder %s16_s22, 5   ;;  %s1272_s19 = smov %s1172_s27 }
 0x134   : > { %s1273_s20 = smov %s1094_s21  ;;  %s1274_s21 = smov %s1276_s24 }
 0x135   :  { %15 = sbr.rel (!%p13_p6) target bundleno = 3 (0x3), region = 125 }
 0x13a   :  { %738 = vsyncpa [#allocation5], 1 }
 0x13b   :  { %740 = vsyncpa [#allocation5 + $0x1], 1 }

</bundles_post_ra>
